<compile_context>
chip_gen: v7x
topology: tpu7x:2x2x1
jax: 0.10.0
libtpu: 0.0.40
codegen_flags: <defaults>
</compile_context>

<pallas_src>
import jax
import jax.numpy as jnp
from jax.experimental import pallas as pl
from jax.experimental.pallas import tpu as pltpu

COMPUTE_DTYPE = jnp.bfloat16   # MXU operand dtype; accumulation is f32
NEG_INF = -1e30                # masks padded fc2 logits inside log_softmax


# =========================================================== parameter packing
def pack_params(params, dtype=COMPUTE_DTYPE):
    """Fold im2col, pool-column parity, kernel-row windows and all layout
    permutations into lane-aligned packed weight matrices (done once)."""
    c1_w, c1_b, c2_w, c2_b, f1_w, f1_b, f2_w, f2_b = params

    # conv1 -> A1 [640, 512]:
    #   row r = ki*128 + w           (w = input column, 0..27 used)
    #   col n = cp*256 + q*20 + co   (output column j = 2q+cp; lanes 240..255
    #                                 of each 256-lane half are zero pad)
    #   A1[ki*128+w, cp*256+q*20+co] = c1_w[co, 0, ki, w-(2q+cp)]
    kblocks = []
    for ki in range(5):
        halves = []
        for cp in range(2):
            cols = []
            for q in range(12):
                j = 2 * q + cp
                col = jnp.zeros((128, 20), jnp.float32)
                col = col.at[j:j + 5, :].set(jnp.transpose(c1_w[:, 0, ki, :]))
                cols.append(col)
            half = jnp.pad(jnp.concatenate(cols, axis=1), ((0, 0), (0, 16)))
            halves.append(half)                                # [128, 256]
        kblocks.append(jnp.concatenate(halves, axis=1))        # [128, 512]
    a1 = jnp.concatenate(kblocks, axis=0).astype(dtype)        # [640, 512]
    h1 = jnp.pad(jnp.tile(c1_b, 12), (0, 16))
    b1 = jnp.tile(h1, 2).reshape(1, 512).astype(jnp.float32)

    # conv2 -> A2 [1280, 512]:
    #   row r = ki*256 + v*20 + ci   (v = pool1 column, ci = conv1 channel)
    #   col n = cp*256 + q2*50 + co  (output column j2 = 2*q2+cp)
    #   A2[ki*256+v*20+ci, cp*256+q2*50+co] = c2_w[co, ci, ki, v-(2q2+cp)]
    wt2 = jnp.transpose(c2_w, (2, 3, 1, 0))                    # [ki, kw, ci, co]
    kblocks = []
    for ki in range(5):
        halves = []
        for cp in range(2):
            cols = []
            for q2 in range(4):
                j2 = 2 * q2 + cp
                blk = jnp.zeros((12, 20, 50), jnp.float32)     # [v, ci, co]
                blk = blk.at[j2:j2 + 5, :, :].set(wt2[ki])
                cols.append(blk.reshape(240, 50))
            half = jnp.pad(jnp.concatenate(cols, axis=1), ((0, 16), (0, 56)))
            halves.append(half)                                # [256, 256]
        kblocks.append(jnp.concatenate(halves, axis=1))        # [256, 512]
    a2 = jnp.concatenate(kblocks, axis=0).astype(dtype)        # [1280, 512]
    h2 = jnp.pad(jnp.tile(c2_b, 4), (0, 56))
    b2 = jnp.tile(h2, 2).reshape(1, 512).astype(jnp.float32)

    # fc1: kernel feature index m = p2*256 + q2*50 + co; PyTorch flatten index
    # is co*16 + p2*4 + q2.  Pad K 800->1024 (zero rows), N 500->512.
    w = f1_w.reshape(500, 50, 4, 4)                            # [j, co, p2, q2]
    w = jnp.transpose(w, (2, 3, 1, 0)).reshape(4, 200, 500)    # [p2, q2*50+co, j]
    w = jnp.pad(w, ((0, 0), (0, 56), (0, 12)))                 # [4, 256, 512]
    wf1 = w.reshape(1024, 512).astype(dtype)
    bf1 = jnp.pad(f1_b, (0, 12)).reshape(1, 512).astype(jnp.float32)

    # fc2: pad K 500->512 (zero rows), N 10->128 (zero cols, -1e30 bias).
    wf2 = (jnp.zeros((512, 128), jnp.float32)
           .at[:500, :10].set(jnp.transpose(f2_w))).astype(dtype)
    bf2 = jnp.full((1, 128), NEG_INF, jnp.float32).at[0, :10].set(f2_b)

    return (a1, b1, a2, b2, wf1, bf1, wf2, bf2)


# ===================================================================== kernel
def _net_kernel(x_ref, a1_ref, b1_ref, a2_ref, b2_ref,
                wf1_ref, bf1_ref, wf2_ref, bf2_ref, o_ref):
    """Fused conv1+pool1+conv2+pool2+fc1+fc2+log_softmax for one batch tile.

    x_ref : [BT, 32, 128] f32 (28x28 image, zero padded)  o_ref: [BT, 128] f32
    a1_ref: [640, 512]  bf16   b1_ref: [1, 512] f32
    a2_ref: [1280, 512] bf16   b2_ref: [1, 512] f32
    wf1_ref:[1024, 512] bf16   bf1_ref:[1, 512] f32
    wf2_ref:[512, 128]  bf16   bf2_ref:[1, 128] f32 (-1e30 on padded lanes)
    """
    bt = x_ref.shape[0]
    x = x_ref[...]                                             # [BT, 32, 128]

    # ---- conv1 + relu: row-window LHS -> ONE MXU matmul (K = 5*128, N = 512)
    lhs1 = jnp.concatenate([x[:, ki:ki + 24, :] for ki in range(5)], axis=2)
    y1 = jnp.dot(lhs1.reshape(bt * 24, 640).astype(a1_ref.dtype), a1_ref[...],
                 preferred_element_type=jnp.float32)           # [BT*24, 512]
    c1 = jnp.maximum(y1.reshape(bt, 24, 512) + b1_ref[...], 0.0)
    # pool1: column parity lives in 256-lane halves; rows via shifted max.
    cc = jnp.maximum(c1[:, :, 0:256], c1[:, :, 256:512])       # [BT, 24, 256]
    mm = jnp.maximum(cc[:, 0:23, :], cc[:, 1:24, :])           # roll(-1) + max
    p1 = jnp.concatenate([mm[:, 2 * p:2 * p + 1, :] for p in range(12)],
                         axis=1)                               # [BT, 12, 256]

    # ---- conv2 + relu: row-window LHS -> ONE MXU matmul (K = 5*256, N = 512)
    lhs2 = jnp.concatenate([p1[:, ki:ki + 8, :] for ki in range(5)], axis=2)
    y2 = jnp.dot(lhs2.reshape(bt * 8, 1280).astype(a2_ref.dtype), a2_ref[...],
                 preferred_element_type=jnp.float32)           # [BT*8, 512]
    c2 = jnp.maximum(y2.reshape(bt, 8, 512) + b2_ref[...], 0.0)
    # pool2 + flatten: lane-aligned 1024-wide fc1 feature row per sample.
    c2c = jnp.maximum(c2[:, :, 0:256], c2[:, :, 256:512])      # [BT, 8, 256]
    mm2 = jnp.maximum(c2c[:, 0:7, :], c2c[:, 1:8, :])          # [BT, 7, 256]
    feat = jnp.concatenate([mm2[:, 2 * p:2 * p + 1, :] for p in range(4)],
                           axis=2)                             # [BT, 1, 1024]
    feat = feat.reshape(bt, 1024).astype(wf1_ref.dtype)

    # ---- fc1 + relu -> fc2 + log_softmax (batched over the tile, 128 lanes)
    h = jnp.dot(feat, wf1_ref[...], preferred_element_type=jnp.float32)
    h = jnp.maximum(h + bf1_ref[...], 0.0)                     # [BT, 512]
    logits = jnp.dot(h.astype(wf2_ref.dtype), wf2_ref[...],
                     preferred_element_type=jnp.float32) + bf2_ref[...]
    m = jnp.max(logits, axis=-1, keepdims=True)
    lse = jnp.log(jnp.sum(jnp.exp(logits - m), axis=-1, keepdims=True)) + m
    o_ref[...] = (logits - lse).astype(o_ref.dtype)


# ==================================================================== forward
def net_forward(x, packed):
    a1, b1, a2, b2, wf1, bf1, wf2, bf2 = packed
    B, C, H, W = x.shape
    assert C == 1 and H == 28 and W == 28, "Net requires 1x28x28 inputs"

    # Batch tile: >=8 samples per grid step amortizes per-step overhead and
    # fills MXU rows; prefer >=2 grid steps when possible (v7x has 2 TCs).
    if B >= 32:
        bt = 16
    elif B >= 8:
        bt = 8
    else:
        bt = B
    b_pad = ((B + bt - 1) // bt) * bt

    # One-time zero pad: batch -> b_pad, rows 28->32, cols 28->128, so every
    # in-kernel reshape sits on (8,128) tile boundaries and blocks are lane-dense.
    x3 = jnp.pad(x.reshape(B, 28, 28),
                 ((0, b_pad - B), (0, 4), (0, 100))).astype(jnp.float32)

    out = pl.pallas_call(
        _net_kernel,
        out_shape=jax.ShapeDtypeStruct((b_pad, 128), jnp.float32),
        grid=(b_pad // bt,),
        in_specs=[
            pl.BlockSpec((bt, 32, 128), lambda i: (i, 0, 0)),   # x tile
            pl.BlockSpec((640, 512), lambda i: (0, 0)),         # a1 (VMEM-resident)
            pl.BlockSpec((1, 512), lambda i: (0, 0)),           # b1
            pl.BlockSpec((1280, 512), lambda i: (0, 0)),        # a2
            pl.BlockSpec((1, 512), lambda i: (0, 0)),           # b2
            pl.BlockSpec((1024, 512), lambda i: (0, 0)),        # wf1
            pl.BlockSpec((1, 512), lambda i: (0, 0)),           # bf1
            pl.BlockSpec((512, 128), lambda i: (0, 0)),         # wf2
            pl.BlockSpec((1, 128), lambda i: (0, 0)),           # bf2
        ],
        out_specs=pl.BlockSpec((bt, 128), lambda i: (i, 0)),
        compiler_params=pltpu.CompilerParams(
            dimension_semantics=("parallel",)),
    )(x3, a1, b1, a2, b2, wf1, bf1, wf2, bf2)

    return out[:B, :10]


# ========================================================== pure-JAX reference
def reference_forward(x, params):
    c1_w, c1_b, c2_w, c2_b, f1_w, f1_b, f2_w, f2_b = params
    dn = ("NCHW", "OIHW", "NCHW")
    y = jax.lax.conv_general_dilated(x, c1_w, (1, 1), "VALID", dimension_numbers=dn)
    y = jax.nn.relu(y + c1_b.reshape(1, 20, 1, 1))
    y = jax.lax.reduce_window(y, -jnp.inf, jax.lax.max, (1, 1, 2, 2), (1, 1, 2, 2), "VALID")
    y = jax.lax.conv_general_dilated(y, c2_w, (1, 1), "VALID", dimension_numbers=dn)
    y = jax.nn.relu(y + c2_b.reshape(1, 50, 1, 1))
    y = jax.lax.reduce_window(y, -jnp.inf, jax.lax.max, (1, 1, 2, 2), (1, 1, 2, 2), "VALID")
    y = y.reshape(x.shape[0], 800)
    h = jax.nn.relu(y @ f1_w.T + f1_b)
    return jax.nn.log_softmax(h @ f2_w.T + f2_b, axis=-1)


# ======================================================================== main
if __name__ == "__main__":
    key = jax.random.PRNGKey(0)
    ks = jax.random.split(key, 9)
    B = 16  # two batch tiles of 8 -> exercises the grid (and both v7x TCs)

    x = jax.random.normal(ks[0], (B, 1, 28, 28), jnp.float32)
    params = (
        0.10 * jax.random.normal(ks[1], (20, 1, 5, 5), jnp.float32),   # conv1.weight
        0.10 * jax.random.normal(ks[2], (20,), jnp.float32),           # conv1.bias
        0.05 * jax.random.normal(ks[3], (50, 20, 5, 5), jnp.float32),  # conv2.weight
        0.05 * jax.random.normal(ks[4], (50,), jnp.float32),           # conv2.bias
        0.05 * jax.random.normal(ks[5], (500, 800), jnp.float32),      # fc1.weight
        0.05 * jax.random.normal(ks[6], (500,), jnp.float32),          # fc1.bias
        0.10 * jax.random.normal(ks[7], (10, 500), jnp.float32),       # fc2.weight
        0.10 * jax.random.normal(ks[8], (10,), jnp.float32),           # fc2.bias
    )

    packed = pack_params(params, COMPUTE_DTYPE)
    fwd = jax.jit(net_forward)
    out = jax.block_until_ready(fwd(x, packed))

    assert out.shape == (B, 10) and out.dtype == jnp.float32
    # log_softmax rows must exp-sum to ~1
    assert bool(jnp.allclose(jnp.sum(jnp.exp(out), axis=1), 1.0, atol=1e-3))
    # compare against a pure-JAX f32 reference (loose tol: bf16 matmul operands)
    ref = reference_forward(x, params)
    max_diff = float(jnp.max(jnp.abs(out - ref)))
    assert max_diff < 0.5, f"mismatch vs reference: {max_diff}"
    print("KERNEL_OK")
</pallas_src>

<mosaic_0001>
module attributes {stable_mosaic.version = 11 : i64} {
  func.func @_net_kernel(%arg0: i32, %arg1: memref<8x32x128xf32, #tpu.memory_space<vmem>>, %arg2: memref<640x512xbf16, #tpu.memory_space<vmem>>, %arg3: memref<1x512xf32, #tpu.memory_space<vmem>>, %arg4: memref<1280x512xbf16, #tpu.memory_space<vmem>>, %arg5: memref<1x512xf32, #tpu.memory_space<vmem>>, %arg6: memref<1024x512xbf16, #tpu.memory_space<vmem>>, %arg7: memref<1x512xf32, #tpu.memory_space<vmem>>, %arg8: memref<512x128xbf16, #tpu.memory_space<vmem>>, %arg9: memref<1x128xf32, #tpu.memory_space<vmem>>, %arg10: memref<8x128xf32, #tpu.memory_space<vmem>>) attributes {dimension_semantics = [#tpu.dimension_semantics<parallel>], iteration_bounds = array<i64: 2>, scalar_prefetch = 0 : i64, scratch_operands = 0 : i64, tpu.core_type = #tpu.core_type<tc>, window_params = [{transform_indices = @transform_0, window_bounds = array<i64: 8, 32, 128>}, {pipeline_mode = #tpu.pipeline_mode<synchronous>, transform_indices = @transform_1, window_bounds = array<i64: 640, 512>}, {pipeline_mode = #tpu.pipeline_mode<synchronous>, transform_indices = @transform_2, window_bounds = array<i64: 1, 512>}, {pipeline_mode = #tpu.pipeline_mode<synchronous>, transform_indices = @transform_3, window_bounds = array<i64: 1280, 512>}, {pipeline_mode = #tpu.pipeline_mode<synchronous>, transform_indices = @transform_4, window_bounds = array<i64: 1, 512>}, {pipeline_mode = #tpu.pipeline_mode<synchronous>, transform_indices = @transform_5, window_bounds = array<i64: 1024, 512>}, {pipeline_mode = #tpu.pipeline_mode<synchronous>, transform_indices = @transform_6, window_bounds = array<i64: 1, 512>}, {pipeline_mode = #tpu.pipeline_mode<synchronous>, transform_indices = @transform_7, window_bounds = array<i64: 512, 128>}, {pipeline_mode = #tpu.pipeline_mode<synchronous>, transform_indices = @transform_8, window_bounds = array<i64: 1, 128>}, {transform_indices = @transform_9, window_bounds = array<i64: 8, 128>}]} {
    %c0 = arith.constant 0 : index
    %c0_0 = arith.constant 0 : index
    %c0_1 = arith.constant 0 : index
    %0 = vector.load %arg1[%c0, %c0_0, %c0_1] : memref<8x32x128xf32, #tpu.memory_space<vmem>>, vector<8x32x128xf32>
    %1 = vector.extract_strided_slice %0 {offsets = [0, 0, 0], sizes = [8, 24, 128], strides = [1, 1, 1]} : vector<8x32x128xf32> to vector<8x24x128xf32>
    %2 = vector.extract_strided_slice %0 {offsets = [0, 1, 0], sizes = [8, 24, 128], strides = [1, 1, 1]} : vector<8x32x128xf32> to vector<8x24x128xf32>
    %3 = vector.extract_strided_slice %0 {offsets = [0, 2, 0], sizes = [8, 24, 128], strides = [1, 1, 1]} : vector<8x32x128xf32> to vector<8x24x128xf32>
    %4 = vector.extract_strided_slice %0 {offsets = [0, 3, 0], sizes = [8, 24, 128], strides = [1, 1, 1]} : vector<8x32x128xf32> to vector<8x24x128xf32>
    %5 = vector.extract_strided_slice %0 {offsets = [0, 4, 0], sizes = [8, 24, 128], strides = [1, 1, 1]} : vector<8x32x128xf32> to vector<8x24x128xf32>
    %6 = tpu.concatenate %1, %2, %3, %4, %5 in 2 : vector<8x24x128xf32>, vector<8x24x128xf32>, vector<8x24x128xf32>, vector<8x24x128xf32>, vector<8x24x128xf32> -> vector<8x24x640xf32>
    %7 = vector.shape_cast %6 : vector<8x24x640xf32> to vector<192x640xf32>
    %8 = arith.truncf %7 : vector<192x640xf32> to vector<192x640xbf16>
    %c0_2 = arith.constant 0 : index
    %c0_3 = arith.constant 0 : index
    %9 = vector.load %arg2[%c0_2, %c0_3] : memref<640x512xbf16, #tpu.memory_space<vmem>>, vector<640x512xbf16>
    %cst = arith.constant dense<0.000000e+00> : vector<192x512xf32>
    %10 = tpu.matmul %8, %9, %cst {dimension_numbers = #tpu.dot_dimension_numbers<[1], [0], [0], [1], [0, 0, 1, 1], [], []>} : vector<192x640xbf16>, vector<640x512xbf16>, vector<192x512xf32> -> vector<192x512xf32>
    %11 = vector.shape_cast %10 : vector<192x512xf32> to vector<8x24x512xf32>
    %c0_4 = arith.constant 0 : index
    %c0_5 = arith.constant 0 : index
    %12 = vector.load %arg3[%c0_4, %c0_5] : memref<1x512xf32, #tpu.memory_space<vmem>>, vector<1x512xf32>
    %13 = vector.shape_cast %12 : vector<1x512xf32> to vector<1x1x512xf32>
    %14 = vector.broadcast %13 : vector<1x1x512xf32> to vector<8x24x512xf32>
    %15 = arith.addf %11, %14 : vector<8x24x512xf32>
    %cst_6 = arith.constant 0.000000e+00 : f32
    %16 = vector.broadcast %cst_6 : f32 to vector<8x24x512xf32>
    %17 = arith.maximumf %15, %16 : vector<8x24x512xf32>
    %18 = vector.extract_strided_slice %17 {offsets = [0, 0, 0], sizes = [8, 24, 256], strides = [1, 1, 1]} : vector<8x24x512xf32> to vector<8x24x256xf32>
    %19 = vector.extract_strided_slice %17 {offsets = [0, 0, 256], sizes = [8, 24, 256], strides = [1, 1, 1]} : vector<8x24x512xf32> to vector<8x24x256xf32>
    %20 = arith.maximumf %18, %19 : vector<8x24x256xf32>
    %21 = vector.extract_strided_slice %20 {offsets = [0, 0, 0], sizes = [8, 23, 256], strides = [1, 1, 1]} : vector<8x24x256xf32> to vector<8x23x256xf32>
    %22 = vector.extract_strided_slice %20 {offsets = [0, 1, 0], sizes = [8, 23, 256], strides = [1, 1, 1]} : vector<8x24x256xf32> to vector<8x23x256xf32>
    %23 = arith.maximumf %21, %22 : vector<8x23x256xf32>
    %24 = vector.extract_strided_slice %23 {offsets = [0, 0, 0], sizes = [8, 1, 256], strides = [1, 1, 1]} : vector<8x23x256xf32> to vector<8x1x256xf32>
    %25 = vector.extract_strided_slice %23 {offsets = [0, 2, 0], sizes = [8, 1, 256], strides = [1, 1, 1]} : vector<8x23x256xf32> to vector<8x1x256xf32>
    %26 = vector.extract_strided_slice %23 {offsets = [0, 4, 0], sizes = [8, 1, 256], strides = [1, 1, 1]} : vector<8x23x256xf32> to vector<8x1x256xf32>
    %27 = vector.extract_strided_slice %23 {offsets = [0, 6, 0], sizes = [8, 1, 256], strides = [1, 1, 1]} : vector<8x23x256xf32> to vector<8x1x256xf32>
    %28 = vector.extract_strided_slice %23 {offsets = [0, 8, 0], sizes = [8, 1, 256], strides = [1, 1, 1]} : vector<8x23x256xf32> to vector<8x1x256xf32>
    %29 = vector.extract_strided_slice %23 {offsets = [0, 10, 0], sizes = [8, 1, 256], strides = [1, 1, 1]} : vector<8x23x256xf32> to vector<8x1x256xf32>
    %30 = vector.extract_strided_slice %23 {offsets = [0, 12, 0], sizes = [8, 1, 256], strides = [1, 1, 1]} : vector<8x23x256xf32> to vector<8x1x256xf32>
    %31 = vector.extract_strided_slice %23 {offsets = [0, 14, 0], sizes = [8, 1, 256], strides = [1, 1, 1]} : vector<8x23x256xf32> to vector<8x1x256xf32>
    %32 = vector.extract_strided_slice %23 {offsets = [0, 16, 0], sizes = [8, 1, 256], strides = [1, 1, 1]} : vector<8x23x256xf32> to vector<8x1x256xf32>
    %33 = vector.extract_strided_slice %23 {offsets = [0, 18, 0], sizes = [8, 1, 256], strides = [1, 1, 1]} : vector<8x23x256xf32> to vector<8x1x256xf32>
    %34 = vector.extract_strided_slice %23 {offsets = [0, 20, 0], sizes = [8, 1, 256], strides = [1, 1, 1]} : vector<8x23x256xf32> to vector<8x1x256xf32>
    %35 = vector.extract_strided_slice %23 {offsets = [0, 22, 0], sizes = [8, 1, 256], strides = [1, 1, 1]} : vector<8x23x256xf32> to vector<8x1x256xf32>
    %36 = tpu.concatenate %24, %25, %26, %27, %28, %29, %30, %31, %32, %33, %34, %35 in 1 : vector<8x1x256xf32>, vector<8x1x256xf32>, vector<8x1x256xf32>, vector<8x1x256xf32>, vector<8x1x256xf32>, vector<8x1x256xf32>, vector<8x1x256xf32>, vector<8x1x256xf32>, vector<8x1x256xf32>, vector<8x1x256xf32>, vector<8x1x256xf32>, vector<8x1x256xf32> -> vector<8x12x256xf32>
    %37 = vector.extract_strided_slice %36 {offsets = [0, 0, 0], sizes = [8, 8, 256], strides = [1, 1, 1]} : vector<8x12x256xf32> to vector<8x8x256xf32>
    %38 = vector.extract_strided_slice %36 {offsets = [0, 1, 0], sizes = [8, 8, 256], strides = [1, 1, 1]} : vector<8x12x256xf32> to vector<8x8x256xf32>
    %39 = vector.extract_strided_slice %36 {offsets = [0, 2, 0], sizes = [8, 8, 256], strides = [1, 1, 1]} : vector<8x12x256xf32> to vector<8x8x256xf32>
    %40 = vector.extract_strided_slice %36 {offsets = [0, 3, 0], sizes = [8, 8, 256], strides = [1, 1, 1]} : vector<8x12x256xf32> to vector<8x8x256xf32>
    %41 = vector.extract_strided_slice %36 {offsets = [0, 4, 0], sizes = [8, 8, 256], strides = [1, 1, 1]} : vector<8x12x256xf32> to vector<8x8x256xf32>
    %42 = tpu.concatenate %37, %38, %39, %40, %41 in 2 : vector<8x8x256xf32>, vector<8x8x256xf32>, vector<8x8x256xf32>, vector<8x8x256xf32>, vector<8x8x256xf32> -> vector<8x8x1280xf32>
    %43 = vector.shape_cast %42 : vector<8x8x1280xf32> to vector<64x1280xf32>
    %44 = arith.truncf %43 : vector<64x1280xf32> to vector<64x1280xbf16>
    %c0_7 = arith.constant 0 : index
    %c0_8 = arith.constant 0 : index
    %45 = vector.load %arg4[%c0_7, %c0_8] : memref<1280x512xbf16, #tpu.memory_space<vmem>>, vector<1280x512xbf16>
    %cst_9 = arith.constant dense<0.000000e+00> : vector<64x512xf32>
    %46 = tpu.matmul %44, %45, %cst_9 {dimension_numbers = #tpu.dot_dimension_numbers<[1], [0], [0], [1], [0, 0, 1, 1], [], []>} : vector<64x1280xbf16>, vector<1280x512xbf16>, vector<64x512xf32> -> vector<64x512xf32>
    %47 = vector.shape_cast %46 : vector<64x512xf32> to vector<8x8x512xf32>
    %c0_10 = arith.constant 0 : index
    %c0_11 = arith.constant 0 : index
    %48 = vector.load %arg5[%c0_10, %c0_11] : memref<1x512xf32, #tpu.memory_space<vmem>>, vector<1x512xf32>
    %49 = vector.shape_cast %48 : vector<1x512xf32> to vector<1x1x512xf32>
    %50 = vector.broadcast %49 : vector<1x1x512xf32> to vector<8x8x512xf32>
    %51 = arith.addf %47, %50 : vector<8x8x512xf32>
    %cst_12 = arith.constant 0.000000e+00 : f32
    %52 = vector.broadcast %cst_12 : f32 to vector<8x8x512xf32>
    %53 = arith.maximumf %51, %52 : vector<8x8x512xf32>
    %54 = vector.extract_strided_slice %53 {offsets = [0, 0, 0], sizes = [8, 8, 256], strides = [1, 1, 1]} : vector<8x8x512xf32> to vector<8x8x256xf32>
    %55 = vector.extract_strided_slice %53 {offsets = [0, 0, 256], sizes = [8, 8, 256], strides = [1, 1, 1]} : vector<8x8x512xf32> to vector<8x8x256xf32>
    %56 = arith.maximumf %54, %55 : vector<8x8x256xf32>
    %57 = vector.extract_strided_slice %56 {offsets = [0, 0, 0], sizes = [8, 7, 256], strides = [1, 1, 1]} : vector<8x8x256xf32> to vector<8x7x256xf32>
    %58 = vector.extract_strided_slice %56 {offsets = [0, 1, 0], sizes = [8, 7, 256], strides = [1, 1, 1]} : vector<8x8x256xf32> to vector<8x7x256xf32>
    %59 = arith.maximumf %57, %58 : vector<8x7x256xf32>
    %60 = vector.extract_strided_slice %59 {offsets = [0, 0, 0], sizes = [8, 1, 256], strides = [1, 1, 1]} : vector<8x7x256xf32> to vector<8x1x256xf32>
    %61 = vector.extract_strided_slice %59 {offsets = [0, 2, 0], sizes = [8, 1, 256], strides = [1, 1, 1]} : vector<8x7x256xf32> to vector<8x1x256xf32>
    %62 = vector.extract_strided_slice %59 {offsets = [0, 4, 0], sizes = [8, 1, 256], strides = [1, 1, 1]} : vector<8x7x256xf32> to vector<8x1x256xf32>
    %63 = vector.extract_strided_slice %59 {offsets = [0, 6, 0], sizes = [8, 1, 256], strides = [1, 1, 1]} : vector<8x7x256xf32> to vector<8x1x256xf32>
    %64 = tpu.concatenate %60, %61, %62, %63 in 2 : vector<8x1x256xf32>, vector<8x1x256xf32>, vector<8x1x256xf32>, vector<8x1x256xf32> -> vector<8x1x1024xf32>
    %65 = vector.shape_cast %64 : vector<8x1x1024xf32> to vector<8x1024xf32>
    %66 = arith.truncf %65 : vector<8x1024xf32> to vector<8x1024xbf16>
    %c0_13 = arith.constant 0 : index
    %c0_14 = arith.constant 0 : index
    %67 = vector.load %arg6[%c0_13, %c0_14] : memref<1024x512xbf16, #tpu.memory_space<vmem>>, vector<1024x512xbf16>
    %cst_15 = arith.constant dense<0.000000e+00> : vector<8x512xf32>
    %68 = tpu.matmul %66, %67, %cst_15 {dimension_numbers = #tpu.dot_dimension_numbers<[1], [0], [0], [1], [0, 0, 1, 1], [], []>} : vector<8x1024xbf16>, vector<1024x512xbf16>, vector<8x512xf32> -> vector<8x512xf32>
    %c0_16 = arith.constant 0 : index
    %c0_17 = arith.constant 0 : index
    %69 = vector.load %arg7[%c0_16, %c0_17] : memref<1x512xf32, #tpu.memory_space<vmem>>, vector<1x512xf32>
    %70 = vector.broadcast %69 : vector<1x512xf32> to vector<8x512xf32>
    %71 = arith.addf %68, %70 : vector<8x512xf32>
    %cst_18 = arith.constant 0.000000e+00 : f32
    %72 = vector.broadcast %cst_18 : f32 to vector<8x512xf32>
    %73 = arith.maximumf %71, %72 : vector<8x512xf32>
    %74 = arith.truncf %73 : vector<8x512xf32> to vector<8x512xbf16>
    %c0_19 = arith.constant 0 : index
    %c0_20 = arith.constant 0 : index
    %75 = vector.load %arg8[%c0_19, %c0_20] : memref<512x128xbf16, #tpu.memory_space<vmem>>, vector<512x128xbf16>
    %cst_21 = arith.constant dense<0.000000e+00> : vector<8x128xf32>
    %76 = tpu.matmul %74, %75, %cst_21 {dimension_numbers = #tpu.dot_dimension_numbers<[1], [0], [0], [1], [0, 0, 1, 1], [], []>} : vector<8x512xbf16>, vector<512x128xbf16>, vector<8x128xf32> -> vector<8x128xf32>
    %c0_22 = arith.constant 0 : index
    %c0_23 = arith.constant 0 : index
    %77 = vector.load %arg9[%c0_22, %c0_23] : memref<1x128xf32, #tpu.memory_space<vmem>>, vector<1x128xf32>
    %78 = vector.broadcast %77 : vector<1x128xf32> to vector<8x128xf32>
    %79 = arith.addf %76, %78 : vector<8x128xf32>
    %cst_24 = arith.constant dense<0xFF800000> : vector<8xf32>
    %80 = vector.multi_reduction <maximumf>, %79, %cst_24 [1] : vector<8x128xf32> to vector<8xf32>
    %81 = vector.shape_cast %80 : vector<8xf32> to vector<8x1xf32>
    %82 = vector.broadcast %81 : vector<8x1xf32> to vector<8x128xf32>
    %83 = arith.subf %79, %82 : vector<8x128xf32>
    %84 = math.exp %83 : vector<8x128xf32>
    %cst_25 = arith.constant dense<0.000000e+00> : vector<8xf32>
    %85 = vector.multi_reduction <add>, %84, %cst_25 [1] : vector<8x128xf32> to vector<8xf32>
    %86 = vector.shape_cast %85 : vector<8xf32> to vector<8x1xf32>
    %87 = math.log %86 : vector<8x1xf32>
    %88 = arith.addf %87, %81 : vector<8x1xf32>
    %89 = vector.broadcast %88 : vector<8x1xf32> to vector<8x128xf32>
    %90 = arith.subf %79, %89 : vector<8x128xf32>
    %c0_26 = arith.constant 0 : index
    %c0_27 = arith.constant 0 : index
    %91 = vector.load %arg10[%c0_26, %c0_27] : memref<8x128xf32, #tpu.memory_space<vmem>>, vector<8x128xf32>
    tpu.vector_store %arg10[%c0_26, %c0_27], %90 {strides = array<i32>} : memref<8x128xf32, #tpu.memory_space<vmem>>, vector<8x128xf32>,
    return
  }
  func.func @transform_0(%arg0: i32) -> (i32, i32, i32) {
    %c0_i32 = arith.constant 0 : i32
    %c0_i32_0 = arith.constant 0 : i32
    %c0_i32_1 = arith.constant 0 : i32
    return %arg0, %c0_i32, %c0_i32_0 : i32, i32, i32
  }
  func.func @transform_1(%arg0: i32) -> (i32, i32) {
    %c0_i32 = arith.constant 0 : i32
    %c0_i32_0 = arith.constant 0 : i32
    %c0_i32_1 = arith.constant 0 : i32
    return %c0_i32, %c0_i32_0 : i32, i32
  }
  func.func @transform_2(%arg0: i32) -> (i32, i32) {
    %c0_i32 = arith.constant 0 : i32
    %c0_i32_0 = arith.constant 0 : i32
    %c0_i32_1 = arith.constant 0 : i32
    return %c0_i32, %c0_i32_0 : i32, i32
  }
  func.func @transform_3(%arg0: i32) -> (i32, i32) {
    %c0_i32 = arith.constant 0 : i32
    %c0_i32_0 = arith.constant 0 : i32
    %c0_i32_1 = arith.constant 0 : i32
    return %c0_i32, %c0_i32_0 : i32, i32
  }
  func.func @transform_4(%arg0: i32) -> (i32, i32) {
    %c0_i32 = arith.constant 0 : i32
    %c0_i32_0 = arith.constant 0 : i32
    %c0_i32_1 = arith.constant 0 : i32
    return %c0_i32, %c0_i32_0 : i32, i32
  }
  func.func @transform_5(%arg0: i32) -> (i32, i32) {
    %c0_i32 = arith.constant 0 : i32
    %c0_i32_0 = arith.constant 0 : i32
    %c0_i32_1 = arith.constant 0 : i32
    return %c0_i32, %c0_i32_0 : i32, i32
  }
  func.func @transform_6(%arg0: i32) -> (i32, i32) {
    %c0_i32 = arith.constant 0 : i32
    %c0_i32_0 = arith.constant 0 : i32
    %c0_i32_1 = arith.constant 0 : i32
    return %c0_i32, %c0_i32_0 : i32, i32
  }
  func.func @transform_7(%arg0: i32) -> (i32, i32) {
    %c0_i32 = arith.constant 0 : i32
    %c0_i32_0 = arith.constant 0 : i32
    %c0_i32_1 = arith.constant 0 : i32
    return %c0_i32, %c0_i32_0 : i32, i32
  }
  func.func @transform_8(%arg0: i32) -> (i32, i32) {
    %c0_i32 = arith.constant 0 : i32
    %c0_i32_0 = arith.constant 0 : i32
    %c0_i32_1 = arith.constant 0 : i32
    return %c0_i32, %c0_i32_0 : i32, i32
  }
  func.func @transform_9(%arg0: i32) -> (i32, i32) {
    %c0_i32 = arith.constant 0 : i32
    %c0_i32_0 = arith.constant 0 : i32
    return %arg0, %c0_i32 : i32, i32
  }
}

</mosaic_0001>

<bundles_post_ra>
// kernel: net_forward.1
= control target key start
LH: loop header
LB: loop body
LE: loop exit
PB: predicated region body
PF: predicated region fallthrough
CT: control target
= control target key end

     0   :  { %s15552_s0 = inlined_call_operand.vmem [shape: f32[16,32,128], index: 0, kind: input, shape index: {}]   ;;  %s15553_s1 = inlined_call_operand.vmem [shape: bf16[640,512], index: 1, kind: input, shape index: {}]   ;;  %s15554_s2 = inlined_call_operand.hbm [shape: f32[1,512], index: 2, kind: input, shape index: {}]   ;;  %s15555_s3 = inlined_call_operand.hbm [shape: bf16[1280,512], index: 3, kind: input, shape index: {}]   ;;  %s15556_s4 = inlined_call_operand.hbm [shape: f32[1,512], index: 4, kind: input, shape index: {}]   ;;  %s15557_s5 = inlined_call_operand.hbm [shape: bf16[1024,512], index: 5, kind: input, shape index: {}]   ;;  %s15558_s6 = inlined_call_operand.hbm [shape: f32[1,512], index: 6, kind: input, shape index: {}]   ;;  %s15559_s7 = inlined_call_operand.hbm [shape: bf16[512,128], index: 7, kind: input, shape index: {}]   ;;  %s15560_s8 = inlined_call_operand.hbm [shape: f32[1,128], index: 8, kind: input, shape index: {}]   ;;  %s15561_s9 = inlined_call_operand.hbm [shape: f32[16,128], index: 9, kind: output, shape index: {}]  }
   0x1   :  { %15597 = sst [smem:[#allocation61_spill]] %s15555_s3 }
   0x2   :  { %15598 = sst [smem:[#allocation62_spill]] %s15557_s5 }
   0x3   :  { %14 = vsyncpa [#allocation3], 0 }
   0x4   :  { %15 = vsyncpa [#allocation6], 0 }
   0x5   :  { %16 = vsyncpa [#allocation9], 0 }
   0x6   :  { %17 = vsyncpa [#allocation12], 0 }
   0x7   :  { %18 = vsyncpa [#allocation4], 0 }
   0x8   :  { %20 = vsyncpa [#allocation4 + $0x1], 0  ;;  %s12570_s30 = smov 0   ;;  %s12572_s10 = smov 0  }
   0x9   :  { %s12574_s11 = smov 0   ;;  %s12576_s12 = smov 0  }
   0xa LB: > { %15599 = sst [smem:[#allocation20_spill]] %s12493_s30  ;;  %s12591_s13 = sadd.s32 4294967295, %s12505_s12   ;;  %s12505_s12 = sphi %s12576_s12, %s15773_s12   ;;  %s12501_s11 = sphi %s12574_s11, %s15775_s11   ;;  %s12497_s10 = sphi %s12572_s10, %s15777_s10   ;;  %s12493_s30 = sphi %s12570_s30, %s15776_s30  }
   0xb   : > { %15600 = sst [smem:[#allocation21_spill]] %s12501_s11  ;;  %s9748_s14 = sadd.s32 4294967294, %s12505_s12  }
   0xc   : > { %s12595_s15 = sadd.s32 1, %s12505_s12   ;;  %s227_s16 = sadd.s32 1, %s12501_s11 }
   0xd   : > { %15601 = sst [smem:[#allocation22_spill]] %s12595_s15  ;;  %s224_s17 = ssub.s32 %s12505_s12, %s12595_s15 }
   0xe   : > { %p237_p0 = scmp.ne.s32.totalorder %s12501_s11, %s12497_s10  ;;  %p225_p1 = scmp.eq.s32.totalorder %s224_s17, 0 }
   0xf   : > { %p238_p2 = scmp.eq.s32.totalorder %s12591_s13, 1  ;;  %p243_p3 = scmp.ne.s32.totalorder %s12497_s10, %s12493_s30 }
  0x10   : > { %p244_p4 = scmp.eq.s32.totalorder %s9748_s14, 1  ;;  %p9749_p7 = scmp.ge.s32.totalorder %s12505_s12, 1 }
  0x11   : > { %s12606_s18 = scalar_select %p225_p1, %s12501_s11, %s227_s16  }
  0x12   : > { %p12608_p5 = por %p238_p2, %p237_p0  ;;  %p12612_p6 = por %p244_p4, %p243_p3 }
  0x13   : > { %15602 = sst [smem:[#allocation23_spill]] %s12606_s18  ;;  %p251_p8 = scmp.lt.s32.totalorder %s12505_s12, 3 }
  0x14   : > { %s15603_s19 = scalar_select %p12608_p5, 1, 0 }
  0x15   : > { %s15604_s20 = scalar_select %p12612_p6, 1, 0 }
  0x16   : > { %p15562_p9 = scmp.eq.s32.totalorder %s12591_s13, 0  ;;  %p12619_p10 = pnand %p9749_p7, %p251_p8 }
  0x17   : > { %15605 = sst [smem:[#allocation24_spill]] %s15604_s20  ;;  %s12507_s22 = smov [#allocation5]  }
  0x18   : > { %s15606_s21 = scalar_select %p12619_p10, 1, 0 }
  0x19   : > { %s277_s23 = sshll.u32 %s12507_s22, 4  ;;  %p10966_p11 = pneg %p12619_p10  ;;  %s12625_s23 = int_to_ptr.vmem [resolvable:$true] %s277_s23 }
  0x1a   : > { %s12508_s25 = smov [#allocation8]   ;;  %s12509_s27 = smov [#allocation11]  }
  0x1b   : > { %p12629_p12 = pnand %p15562_p9, %p10966_p11  ;;  %s301_s26 = sshll.u32 %s12508_s25, 4  ;;  %s12633_s26 = int_to_ptr.vmem [resolvable:$true] %s301_s26 }
  0x1c   : > { %s12635_s28 = sshll.u32 %s12509_s27, 4  ;;  %s15608_s3 = sld [smem:[#allocation61_spill]]  ;;  %s326_s28 = int_to_ptr.vmem [resolvable:$true] %s12635_s28 }
  0x1d   : > { %p12645_p0 = pneg %p12629_p12 }
  0x22   : > { %s12231_s16 = scalar_lea.hbm %s15608_s3, 40960 }
  0x23   : > { %p12232_p13 = scmp.ne.s32.totalorder %s15608_s3, %s12231_s16  ;;  %p12238_p3 = scmp.lt.u32.totalorder %s12231_s16, %s15608_s3 }
  0x25   : > { %p12234_p1 = pnand %p12645_p0, %p12232_p13 }
  0x27   : > { %p12235_p2 = pneg %p12234_p1 }
  0x29   : > { %p12240_p4 = pnand %p12238_p3, %p12235_p2 }
  0x2b   : > { %12243 = shalt.err (!%p12240_p4)
}
  0x2c   : > { %s12244_s29 = scalar_lea.vmem %s12625_s23, 40960  ;;  %p12252_p9 = scmp.lt.s32.totalorder %s12625_s23, %s12625_s23 }
  0x2d   : > { %p12245_p7 = scmp.ne.s32.totalorder %s12625_s23, %s12244_s29  ;;  %p12253_p6 = scmp.lt.s32.totalorder %s12244_s29, %s12244_s29 }
  0x2f   : > { %p12247_p8 = pnand %p12245_p7, %p12645_p0  ;;  %p12254_p13 = por %p12253_p6, %p12252_p9 }
  0x31   : > { %p12248_p11 = pneg %p12247_p8 }
  0x33   : > { %p12255_p1 = pnand %p12254_p13, %p12248_p11 }
  0x35   : > { %12258 = shalt.err (!%p12255_p1)
}
  0x36   : > { %s12510_s14 = smov 256   ;;  %s12511_s16 = smov 16  }
  0x37   : > { %10972 = dma.hbm_to_vmem [thread:$0]  (!%p12629_p12), %s15608_s3, 40960, %s12625_s23, [#allocation6], %s12510_s14, %s12510_s14, %s12511_s16  }
  0x38   : > { %s15610_s5 = sld [smem:[#allocation62_spill]] }
  0x3e   : > { %s12259_s11 = scalar_lea.hbm %s15610_s5, 32768 }
  0x3f   : > { %p12260_p6 = scmp.ne.s32.totalorder %s15610_s5, %s12259_s11  ;;  %p12266_p3 = scmp.lt.u32.totalorder %s12259_s11, %s15610_s5 }
  0x41   : > { %p12262_p9 = pnand %p12260_p6, %p12645_p0 }
  0x43   : > { %p12263_p2 = pneg %p12262_p9 }
  0x45   : > { %p12268_p4 = pnand %p12266_p3, %p12263_p2 }
  0x47   : > { %12271 = shalt.err (!%p12268_p4)
}
  0x48   : > { %s12272_s23 = scalar_lea.vmem %s12633_s26, 32768  ;;  %p12280_p13 = scmp.lt.s32.totalorder %s12633_s26, %s12633_s26 }
  0x49   : > { %p12273_p7 = scmp.ne.s32.totalorder %s12633_s26, %s12272_s23  ;;  %p12281_p1 = scmp.lt.s32.totalorder %s12272_s23, %s12272_s23 }
  0x4b   : > { %p12275_p8 = pnand %p12273_p7, %p12645_p0  ;;  %p12282_p6 = por %p12281_p1, %p12280_p13 }
  0x4d   : > { %p12276_p11 = pneg %p12275_p8 }
  0x4f   : > { %p12283_p9 = pnand %p12282_p6, %p12276_p11 }
  0x51   : > { %12286 = shalt.err (!%p12283_p9)
}
  0x52   : > { %10978 = dma.hbm_to_vmem [thread:$0]  (!%p12629_p12), %s15610_s5, 32768, %s12633_s26, [#allocation9], %s12510_s14, %s12510_s14, %s12511_s16  }
  0x53   : > { %s12287_s17 = scalar_lea.hbm %s15559_s7, 4096 }
  0x54   : > { %p12288_p2 = scmp.ne.s32.totalorder %s15559_s7, %s12287_s17  ;;  %p12294_p7 = scmp.lt.u32.totalorder %s12287_s17, %s15559_s7 }
  0x56   : > { %p12290_p3 = pnand %p12288_p2, %p12645_p0 }
  0x58   : > { %p12291_p4 = pneg %p12290_p3 }
  0x5a   : > { %p12296_p8 = pnand %p12294_p7, %p12291_p4 }
  0x5c   : > { %12299 = shalt.err (!%p12296_p8)
}
  0x5d   : > { %s12300_s23 = scalar_lea.vmem %s326_s28, 4096  ;;  %p12308_p6 = scmp.lt.s32.totalorder %s326_s28, %s326_s28 }
  0x5e   : > { %p12301_p11 = scmp.ne.s32.totalorder %s326_s28, %s12300_s23  ;;  %p12309_p9 = scmp.lt.s32.totalorder %s12300_s23, %s12300_s23 }
  0x60   : > { %p12303_p13 = pnand %p12301_p11, %p12645_p0  ;;  %p12310_p5 = por %p12309_p9, %p12308_p6 }
  0x62   : > { %p12304_p1 = pneg %p12303_p13 }
  0x64   : > { %p12311_p10 = pnand %p12310_p5, %p12304_p1 }
  0x66   : > { %12314 = shalt.err (!%p12311_p10)
}
  0x67   : > { %s12512_s26 = smov 64   ;;  %s12513_s14 = smov 4  }
  0x68   : > { %10984 = dma.hbm_to_vmem [thread:$0]  (!%p12629_p12), %s15559_s7, 4096, %s326_s28, [#allocation12], %s12512_s26, %s12512_s26, %s12513_s14  }
  0x69   : > { %s12514_s11 = smov [#allocation2]   ;;  %s12515_s20 = smov [#allocation7]  }
  0x6a   : > { %s267_s15 = sshll.u32 %s12514_s11, 4  ;;  %s291_s17 = sshll.u32 %s12515_s20, 4  ;;  %s268_s15 = int_to_ptr.vmem [resolvable:$true] %s267_s15  ;;  %s292_s17 = int_to_ptr.vmem [resolvable:$true] %s291_s17 }
  0x6b   : > { %s12315_s27 = scalar_lea.hbm %s15554_s2, 64 }
  0x6c   : > { %p12316_p5 = scmp.ne.s32.totalorder %s15554_s2, %s12315_s27  ;;  %p12322_p3 = scmp.lt.u32.totalorder %s12315_s27, %s15554_s2 }
  0x6e   : > { %p12318_p10 = pnand %p12316_p5, %p12645_p0 }
  0x70   : > { %p12319_p2 = pneg %p12318_p10 }
  0x72   : > { %p12324_p4 = pnand %p12322_p3, %p12319_p2 }
  0x74   : > { %12327 = shalt.err (!%p12324_p4)
}
  0x75   : > { %s12328_s28 = scalar_lea.vmem %s268_s15, 64  ;;  %p12336_p13 = scmp.lt.s32.totalorder %s268_s15, %s268_s15 }
  0x76   : > { %p12329_p7 = scmp.ne.s32.totalorder %s268_s15, %s12328_s28  ;;  %p12337_p1 = scmp.lt.s32.totalorder %s12328_s28, %s12328_s28 }
  0x78   : > { %p12331_p8 = pnand %p12329_p7, %p12645_p0  ;;  %p12338_p6 = por %p12337_p1, %p12336_p13 }
  0x7a   : > { %p12332_p11 = pneg %p12331_p8 }
  0x7c   : > { %p12339_p9 = pnand %p12338_p6, %p12332_p11 }
  0x7e   : > { %12342 = shalt.err (!%p12339_p9)
}
  0x7f   : > { %10969 = dma.hbm_to_vmem [thread:$0]  (!%p12629_p12), %s15554_s2, 64, %s268_s15, [#allocation3]  }
  0x80   : > { %s12343_s16 = scalar_lea.hbm %s15556_s4, 64 }
  0x81   : > { %p12344_p5 = scmp.ne.s32.totalorder %s15556_s4, %s12343_s16  ;;  %p12350_p3 = scmp.lt.u32.totalorder %s12343_s16, %s15556_s4 }
  0x83   : > { %p12346_p10 = pnand %p12344_p5, %p12645_p0 }
  0x85   : > { %p12347_p2 = pneg %p12346_p10 }
  0x87   : > { %p12352_p4 = pnand %p12350_p3, %p12347_p2 }
  0x89   : > { %12355 = shalt.err (!%p12352_p4)
}
  0x8a   : > { %s12356_s25 = scalar_lea.vmem %s292_s17, 64  ;;  %p12364_p13 = scmp.lt.s32.totalorder %s292_s17, %s292_s17 }
  0x8b   : > { %p12357_p7 = scmp.ne.s32.totalorder %s292_s17, %s12356_s25  ;;  %p12365_p1 = scmp.lt.s32.totalorder %s12356_s25, %s12356_s25 }
  0x8d   : > { %p12359_p8 = pnand %p12357_p7, %p12645_p0  ;;  %p12366_p6 = por %p12365_p1, %p12364_p13 }
  0x8f   : > { %p12360_p11 = pneg %p12359_p8 }
  0x91   : > { %p12367_p9 = pnand %p12366_p6, %p12360_p11 }
  0x93   : > { %12370 = shalt.err (!%p12367_p9)
}
  0x94   : > { %10975 = dma.hbm_to_vmem [thread:$0]  (!%p12629_p12), %s15556_s4, 64, %s292_s17, [#allocation6]  }
  0x95   : > { %s12516_s29 = smov [#allocation10]   ;;  %s12517_s28 = smov [#allocation13]  }
  0x96   : > { %s315_s23 = sshll.u32 %s12516_s29, 4  ;;  %s339_s26 = sshll.u32 %s12517_s28, 4  ;;  %s316_s23 = int_to_ptr.vmem [resolvable:$true] %s315_s23  ;;  %s340_s26 = int_to_ptr.vmem [resolvable:$true] %s339_s26 }
  0x97   : > { %s12371_s5 = scalar_lea.hbm %s15558_s6, 64 }
  0x98   : > { %p12372_p5 = scmp.ne.s32.totalorder %s15558_s6, %s12371_s5  ;;  %p12378_p3 = scmp.lt.u32.totalorder %s12371_s5, %s15558_s6 }
  0x9a   : > { %p12374_p10 = pnand %p12372_p5, %p12645_p0 }
  0x9c   : > { %p12375_p2 = pneg %p12374_p10 }
  0x9e   : > { %p12380_p4 = pnand %p12378_p3, %p12375_p2 }
  0xa0   : > { %12383 = shalt.err (!%p12380_p4)
}
  0xa1   : > { %s12384_s17 = scalar_lea.vmem %s316_s23, 64  ;;  %p12392_p13 = scmp.lt.s32.totalorder %s316_s23, %s316_s23 }
  0xa2   : > { %p12385_p7 = scmp.ne.s32.totalorder %s316_s23, %s12384_s17  ;;  %p12393_p1 = scmp.lt.s32.totalorder %s12384_s17, %s12384_s17 }
  0xa4   : > { %p12387_p8 = pnand %p12385_p7, %p12645_p0  ;;  %p12394_p6 = por %p12393_p1, %p12392_p13 }
  0xa6   : > { %p12388_p11 = pneg %p12387_p8 }
  0xa8   : > { %p12395_p9 = pnand %p12394_p6, %p12388_p11 }
  0xaa   : > { %12398 = shalt.err (!%p12395_p9)
}
  0xab   : > { %10981 = dma.hbm_to_vmem [thread:$0]  (!%p12629_p12), %s15558_s6, 64, %s316_s23, [#allocation9]  }
  0xac   : > { %s12399_s29 = scalar_lea.hbm %s15560_s8, 16 }
  0xad   : > { %p12400_p5 = scmp.ne.s32.totalorder %s15560_s8, %s12399_s29  ;;  %p12406_p3 = scmp.lt.u32.totalorder %s12399_s29, %s15560_s8 }
  0xaf   : > { %p12402_p10 = pnand %p12400_p5, %p12645_p0 }
  0xb1   : > { %p12403_p2 = pneg %p12402_p10 }
  0xb3   : > { %p12408_p4 = pnand %p12406_p3, %p12403_p2 }
  0xb5   : > { %12411 = shalt.err (!%p12408_p4)
}
  0xb6   : > { %s12412_s16 = scalar_lea.vmem %s340_s26, 16  ;;  %s12419_s23 = scalar_lea.vmem %s340_s26, 32 }
  0xb7   : > { %p12413_p7 = scmp.ne.s32.totalorder %s340_s26, %s12412_s16  ;;  %p12420_p13 = scmp.lt.s32.totalorder %s340_s26, %s340_s26 }
  0xb8   : > { %p12421_p1 = scmp.lt.s32.totalorder %s12419_s23, %s12412_s16 }
  0xb9   : > { %p12415_p8 = pnand %p12413_p7, %p12645_p0 }
  0xba   : > { %p12422_p6 = por %p12421_p1, %p12420_p13 }
  0xbb   : > { %p12416_p11 = pneg %p12415_p8 }
  0xbd   : > { %p12423_p9 = pnand %p12422_p6, %p12416_p11 }
  0xbf   : > { %12426 = shalt.err (!%p12423_p9)
}
  0xc0   : > { %10987 = dma.hbm_to_vmem [thread:$0]  (!%p12629_p12), %s15560_s8, 16, %s340_s26, [#allocation12]  }
  0xc1   : > { %p15611_p5 = scmp.ne.s32.totalorder %s15606_s21, 0 }
  0xc3   : > { %362 = sbr.rel (%p15611_p5) target bundleno = 2329 (0x919), region = 56 }
  0xca   : > { %p15612_p10 = scmp.eq.s32.totalorder %s12591_s13, 0 }
  0xcc   : > { %12472 = dma.done.wait (%p15612_p10), [#allocation3], 64   ;;  %p15613_p0 = pmov %p15612_p10 }
  0xce   : > { %12474 = vsyncadd (%p15613_p0), [#allocation3], 4294967232  ;;  %p15614_p2 = pmov %p15613_p0 }
  0xcf   : > { %p15615_p3 = pmov %p15613_p0 }
  0xd0   : > { %12476 = dma.done.wait (%p15614_p2), [#allocation6], 41024  }
  0xd1   : > { %12478 = vsyncadd (%p15615_p3), [#allocation6], 4294926272  ;;  %p15616_p4 = pmov %p15613_p0 }
  0xd2   : > { %p15617_p12 = pmov %p15613_p0 }
  0xd3   : > { %12480 = dma.done.wait (%p15616_p4), [#allocation9], 32832  }
  0xd4   : > { %12482 = vsyncadd (%p15617_p12), [#allocation9], 4294934464  ;;  %p15618_p7 = pmov %p15613_p0 }
  0xd5   : > { %p15619_p8 = pmov %p15613_p0 }
  0xd6   : > { %12484 = dma.done.wait (%p15618_p7), [#allocation12], 4112  }
  0xd7   : > { %12486 = vsyncadd (%p15619_p8), [#allocation12], 4294963184  ;;  %v11051_v0 = vld [vmem:[%s15553_s1 + $0x4] ss:$16 sps:$4 sm:$0xff]   ;;  %v11053_v1 = vld [vmem:[%s15553_s1 + $0xc] ss:$16 sps:$4 sm:$0xff]  }
  0xd8   : > { %1839 = vmatprep.subr.bf16.mxu0 %v11051_v0  ;;  %v11055_v2 = vld [vmem:[%s15553_s1] ss:$16 sps:$4 sm:$0xff]   ;;  %v11056_v3 = vld [vmem:[%s15553_s1 + $0x8] ss:$16 sps:$4 sm:$0xff]   ;;  %2298 = vmatprep.subr.bf16.mxu1 %v11053_v1  ;;  %v11057_v4 = vld [vmem:[%s15553_s1 + $0x24] ss:$16 sps:$4 sm:$0xff]  }
  0xd9   : > { %1840 = vmatpush1.bf16.msra.mxu0 %v11055_v2  ;;  %2299 = vmatpush1.bf16.msra.mxu1 %v11056_v3  ;;  %v11059_v5 = vld [vmem:[%s15553_s1 + $0x2c] ss:$16 sps:$4 sm:$0xff]   ;;  %v11061_v6 = vld [vmem:[%s15553_s1 + $0x20] ss:$16 sps:$4 sm:$0xff]   ;;  %v11062_v7 = vld [vmem:[%s15553_s1 + $0x28] ss:$16 sps:$4 sm:$0xff]  }
  0xda   : > { %1841 = vmatprep.subr.bf16.mxu0 %v11057_v4  ;;  %2300 = vmatprep.subr.bf16.mxu1 %v11059_v5  ;;  %v11063_v8 = vld [vmem:[%s15553_s1 + $0x44] ss:$16 sps:$4 sm:$0xff]   ;;  %v11065_v9 = vld [vmem:[%s15553_s1 + $0x4c] ss:$16 sps:$4 sm:$0xff]   ;;  %v11067_v10 = vld [vmem:[%s15553_s1 + $0x40] ss:$16 sps:$4 sm:$0xff]  }
  0xdb   : > { %v11068_v11 = vld [vmem:[%s15553_s1 + $0x48] ss:$16 sps:$4 sm:$0xff]   ;;  %v11069_v12 = vld [vmem:[%s15553_s1 + $0x64] ss:$16 sps:$4 sm:$0xff]   ;;  %v11071_v13 = vld [vmem:[%s15553_s1 + $0x6c] ss:$16 sps:$4 sm:$0xff]  }
  0xdc   : > { %v11073_v14 = vld [vmem:[%s15553_s1 + $0x60] ss:$16 sps:$4 sm:$0xff]   ;;  %v11074_v15 = vld [vmem:[%s15553_s1 + $0x68] ss:$16 sps:$4 sm:$0xff]   ;;  %v11075_v16 = vld [vmem:[%s15553_s1 + $0x84] ss:$16 sps:$4 sm:$0xff]  }
  0xdd   : > { %1842 = vmatpush1.bf16.msra.mxu0 %v11061_v6  ;;  %2301 = vmatpush1.bf16.msra.mxu1 %v11062_v7  ;;  %v11077_v17 = vld [vmem:[%s15553_s1 + $0x8c] ss:$16 sps:$4 sm:$0xff]   ;;  %v11079_v18 = vld [vmem:[%s15553_s1 + $0x80] ss:$16 sps:$4 sm:$0xff]   ;;  %v11080_v19 = vld [vmem:[%s15553_s1 + $0x88] ss:$16 sps:$4 sm:$0xff]  }
  0xde   : > { %1843 = vmatprep.subr.bf16.mxu0 %v11063_v8  ;;  %2302 = vmatprep.subr.bf16.mxu1 %v11065_v9  ;;  %v11081_v20 = vld [vmem:[%s15553_s1 + $0xa4] ss:$16 sps:$4 sm:$0xff]   ;;  %v11083_v21 = vld [vmem:[%s15553_s1 + $0xac] ss:$16 sps:$4 sm:$0xff]   ;;  %v11085_v22 = vld [vmem:[%s15553_s1 + $0xa0] ss:$16 sps:$4 sm:$0xff]  }
  0xdf   : > { %v11086_v23 = vld [vmem:[%s15553_s1 + $0xa8] ss:$16 sps:$4 sm:$0xff]   ;;  %v11087_v24 = vld [vmem:[%s15553_s1 + $0xc4] ss:$16 sps:$4 sm:$0xff]   ;;  %v11089_v25 = vld [vmem:[%s15553_s1 + $0xcc] ss:$16 sps:$4 sm:$0xff]  }
  0xe0   : > { %v11091_v26 = vld [vmem:[%s15553_s1 + $0xc0] ss:$16 sps:$4 sm:$0xff]   ;;  %v11092_v27 = vld [vmem:[%s15553_s1 + $0xc8] ss:$16 sps:$4 sm:$0xff]   ;;  %v11093_v28 = vld [vmem:[%s15553_s1 + $0xe4] ss:$16 sps:$4 sm:$0xff]  }
  0xe1   : > { %1844 = vmatpush1.bf16.msra.mxu0 %v11067_v10  ;;  %2303 = vmatpush1.bf16.msra.mxu1 %v11068_v11  ;;  %v11095_v29 = vld [vmem:[%s15553_s1 + $0xec] ss:$16 sps:$4 sm:$0xff]   ;;  %s9767_s26 = sshll.u32 %s12591_s13, 3  ;;  %v11097_v30 = vld [vmem:[%s15553_s1 + $0xe0] ss:$16 sps:$4 sm:$0xff]   ;;  %vm495_vm0 = vcmask 1046528  }
  0xe2   : > { %1845 = vmatprep.subr.bf16.mxu0 %v11069_v12  ;;  %2304 = vmatprep.subr.bf16.mxu1 %v11071_v13  ;;  %v11098_v31 = vld [vmem:[%s15553_s1 + $0xe8] ss:$16 sps:$4 sm:$0xff]   ;;  %v11099_v32 = vld [vmem:[%s15553_s1 + $0x104] ss:$16 sps:$4 sm:$0xff]   ;;  %p424_p11 = scmp.lt.s32.totalorder %s9767_s26, 15  ;;  %vm657_vm1 = vcmask 1044480  }
  0xe3   : > { %v11101_v33 = vld [vmem:[%s15553_s1 + $0x10c] ss:$16 sps:$4 sm:$0xff]   ;;  %v11103_v34 = vld [vmem:[%s15553_s1 + $0x100] ss:$16 sps:$4 sm:$0xff]   ;;  %v11104_v35 = vld [vmem:[%s15553_s1 + $0x108] ss:$16 sps:$4 sm:$0xff]  }
  0xe4   : > { %v11105_v36 = vld [vmem:[%s15553_s1 + $0x124] ss:$16 sps:$4 sm:$0xff]   ;;  %s15779_s26 = smov (!%p424_p11, %s9767_s26), 15  ;;  %v11107_v37 = vld [vmem:[%s15553_s1 + $0x12c] ss:$16 sps:$4 sm:$0xff]   ;;  %vm576_vm2 = vcmask 1045504  }
  0xe5   : > { %1846 = vmatpush1.bf16.msra.mxu0 %v11073_v14  ;;  %2305 = vmatpush1.bf16.msra.mxu1 %v11074_v15  ;;  %v11109_v38 = vld [vmem:[%s15553_s1 + $0x120] ss:$16 sps:$4 sm:$0xff]   ;;  %v11110_v39 = vld [vmem:[%s15553_s1 + $0x128] ss:$16 sps:$4 sm:$0xff]   ;;  %v11111_v40 = vld [vmem:[%s15553_s1 + $0x144] ss:$16 sps:$4 sm:$0xff]  }
  0xe6   : > { %1847 = vmatprep.subr.bf16.mxu0 %v11075_v16  ;;  %2306 = vmatprep.subr.bf16.mxu1 %v11077_v17  ;;  %s10543_s15 = sshll.u32 %s15779_s26, 5  ;;  %v11113_v41 = vld [vmem:[%s15553_s1 + $0x14c] ss:$16 sps:$4 sm:$0xff]   ;;  %v11115_v42 = vld [vmem:[%s15553_s1 + $0x140] ss:$16 sps:$4 sm:$0xff]   ;;  %vm738_vm3 = vcmask 1043456  }
  0xe7   : > { %v11116_v43 = vld [vmem:[%s15553_s1 + $0x148] ss:$16 sps:$4 sm:$0xff]   ;;  %s12934_s30 = scalar_lea.vmem %s15552_s0, %s10543_s15  ;;  %v11117_v44 = vld [vmem:[%s15553_s1 + $0x164] ss:$16 sps:$4 sm:$0xff]   ;;  %v11119_v45 = vld [vmem:[%s15553_s1 + $0x16c] ss:$16 sps:$4 sm:$0xff]  }
  0xe8   : > { %v11121_v46 = vld [vmem:[%s15553_s1 + $0x160] ss:$16 sps:$4 sm:$0xff]   ;;  %v12949_v48 = vld [vmem:[%s12934_s30 + $0x8] sm:$0xff]  ;;  %v11123_v54 = vld [vmem:[%s15553_s1 + $0x184] ss:$16 sps:$4 sm:$0xff]   ;;  %vm3611_vm4 = vcmask 1040384  }
  0xe9   : > { %1848 = vmatpush1.bf16.msra.mxu0 %v11079_v18  ;;  %2307 = vmatpush1.bf16.msra.mxu1 %v11080_v19  ;;  %v12946_v47 = vld [vmem:[%s12934_s30] sm:$0xff]  ;;  %v12952_v49 = vld [vmem:[%s12934_s30 + $0x10] sm:$0xff]  ;;  %v11122_v51 = vld [vmem:[%s15553_s1 + $0x168] ss:$16 sps:$4 sm:$0xff]   ;;  %v497_v52 = vrot.slane %v12949_v48, 1  ;;  %vm3628_vm5 = vcmask 1041408  }
  0xea   : > { %1849 = vmatprep.subr.bf16.mxu0 %v11081_v20  ;;  %2308 = vmatprep.subr.bf16.mxu1 %v11083_v21  ;;  %v496_v50 = vrot.slane %v12946_v47, 1  ;;  %v499_v53 = vrot.slane %v12952_v49, 1  ;;  %v11125_v55 = vld [vmem:[%s15553_s1 + $0x18c] ss:$16 sps:$4 sm:$0xff]   ;;  %v11127_v59 = vld [vmem:[%s15553_s1 + $0x180] ss:$16 sps:$4 sm:$0xff]   ;;  %v819_v18 = vpack.c.bf16 %v12949_v48, %v12946_v47 }
  0xeb   : > { %v11128_v60 = vld [vmem:[%s15553_s1 + $0x188] ss:$16 sps:$4 sm:$0xff]   ;;  %v11129_v61 = vld [vmem:[%s15553_s1 + $0x1a4] ss:$16 sps:$4 sm:$0xff]   ;;  %v11131_v62 = vld [vmem:[%s15553_s1 + $0x1ac] ss:$16 sps:$4 sm:$0xff]  }
  0xec   : > { %v498_v56 = vsel %vm495_vm0, %v496_v50, %v497_v52  ;;  %v500_v57 = vsel %vm495_vm0, %v497_v52, %v499_v53  ;;  %v11133_v63 = vld [vmem:[%s15553_s1 + $0x1a0] ss:$16 sps:$4 sm:$0xff]   ;;  %v11134_v0 = vld [vmem:[%s15553_s1 + $0x1a8] ss:$16 sps:$4 sm:$0xff]   ;;  %v11135_v1 = vld [vmem:[%s15553_s1 + $0x1c4] ss:$16 sps:$4 sm:$0xff]  }
  0xed   : > { %1850 = vmatpush1.bf16.msra.mxu0 %v11085_v22  ;;  %2309 = vmatpush1.bf16.msra.mxu1 %v11086_v23  ;;  %v820_v58 = vpack.c.bf16 %v500_v57, %v498_v56  ;;  %v11137_v2 = vld [vmem:[%s15553_s1 + $0x1cc] ss:$16 sps:$4 sm:$0xff]   ;;  %v11139_v3 = vld [vmem:[%s15553_s1 + $0x1c0] ss:$16 sps:$4 sm:$0xff]   ;;  %v11140_v4 = vld [vmem:[%s15553_s1 + $0x1c8] ss:$16 sps:$4 sm:$0xff]  }
  0xee   : > { %1851 = vmatprep.subr.bf16.mxu0 %v11087_v24  ;;  %2310 = vmatprep.subr.bf16.mxu1 %v11089_v25  ;;  %v11141_v5 = vld [vmem:[%s15553_s1 + $0x1e4] ss:$16 sps:$4 sm:$0xff]   ;;  %v11143_v6 = vld [vmem:[%s15553_s1 + $0x1ec] ss:$16 sps:$4 sm:$0xff]   ;;  %v11145_v10 = vld [vmem:[%s15553_s1 + $0x1e0] ss:$16 sps:$4 sm:$0xff]  }
  0xef   : > { %1871 = vmatprep.mubr.bf16.mxu0 %v820_v58  ;;  %2330 = vmatprep.mubr.bf16.mxu1 %v820_v58  ;;  %v13005_v7 = vld [vmem:[%s12934_s30 + $0x18] sm:$0xff]  ;;  %v13008_v8 = vld [vmem:[%s12934_s30 + $0x20] sm:$0xff]  ;;  %v13011_v9 = vld [vmem:[%s12934_s30 + $0x28] sm:$0xff]  ;;  %vm3645_vm6 = vcmask 1042432   ;;  %vm7501_vm7 = vcmask 1041409   ;;  %vm7504_vm8 = vcmask 1042434  }
  0xf0   : > { %v501_v11 = vrot.slane %v13005_v7, 1  ;;  %v503_v12 = vrot.slane %v13008_v8, 1  ;;  %v504_v13 = vrot.slane %v13011_v9, 1  ;;  %v11146_v14 = vld [vmem:[%s15553_s1 + $0x1e8] ss:$16 sps:$4 sm:$0xff]   ;;  %v13029_v17 = vld [vmem:[%s12934_s30 + $0x30] sm:$0xff] }
  0xf1   : > { %1852 = vmatpush1.bf16.msra.mxu0 %v11091_v26  ;;  %2311 = vmatpush1.bf16.msra.mxu1 %v11092_v27  ;;  %v11149_v15 = vld [vmem:[%s15553_s1 + $0x204] ss:$16 sps:$4 sm:$0xff]   ;;  %v11152_v16 = vld [vmem:[%s15553_s1 + $0x20c] ss:$16 sps:$4 sm:$0xff]   ;;  %v11147_v22 = vld [vmem:[%s15553_s1 + $0x200] ss:$16 sps:$4 sm:$0xff]  }
  0xf2   : > { %1853 = vmatprep.subr.bf16.mxu0 %v11093_v28  ;;  %2312 = vmatprep.subr.bf16.mxu1 %v11095_v29  ;;  %v502_v19 = vsel %vm495_vm0, %v499_v53, %v501_v11  ;;  %v505_v20 = vsel %vm495_vm0, %v503_v12, %v504_v13  ;;  %v13036_v21 = vld [vmem:[%s12934_s30 + $0x38] sm:$0xff]  ;;  %v11155_v24 = vld [vmem:[%s15553_s1 + $0x224] ss:$16 sps:$4 sm:$0xff]   ;;  %v506_v27 = vrot.slane %v13029_v17, 1  ;;  %v11153_v29 = vld [vmem:[%s15553_s1 + $0x220] ss:$16 sps:$4 sm:$0xff]  }
  0xf3   : > { %v11150_v23 = vld [vmem:[%s15553_s1 + $0x208] ss:$16 sps:$4 sm:$0xff]   ;;  %v11158_v25 = vld [vmem:[%s15553_s1 + $0x22c] ss:$16 sps:$4 sm:$0xff]   ;;  %v825_v26 = vpack.c.bf16 %v505_v20, %v502_v19  ;;  %v508_v28 = vrot.slane %v13036_v21, 1  ;;  %v443_v57 = vld [vmem:[%s12934_s30 + $0x60] sm:$0xff] }
  0xf4   : > { %v11165_v50 = vld [vmem:[%s15553_s1 + $0x260] ss:$16 sps:$4 sm:$0xff]   ;;  %v11173_v52 = vld [vmem:[%s15553_s1 + $0x284] ss:$16 sps:$4 sm:$0xff]   ;;  %v11176_v53 = vld [vmem:[%s15553_s1 + $0x28c] ss:$16 sps:$4 sm:$0xff]  }
  0xf5   : > { %1854 = vmatpush1.bf16.msra.mxu0 %v11097_v30  ;;  %2313 = vmatpush1.bf16.msra.mxu1 %v11098_v31  ;;  %v11156_v30 = vld [vmem:[%s15553_s1 + $0x228] ss:$16 sps:$4 sm:$0xff]   ;;  %v11161_v31 = vld [vmem:[%s15553_s1 + $0x244] ss:$16 sps:$4 sm:$0xff]   ;;  %v11188_v12 = vld [vmem:[%s15553_s1 + $0x2cc] ss:$16 sps:$4 sm:$0xff]  }
  0xf6   : > { %1855 = vmatprep.subr.bf16.mxu0 %v11099_v32  ;;  %2314 = vmatprep.subr.bf16.mxu1 %v11101_v33  ;;  %v11164_v32 = vld [vmem:[%s15553_s1 + $0x24c] ss:$16 sps:$4 sm:$0xff]   ;;  %v13065_v33 = vld [vmem:[%s12934_s30 + $0x40] sm:$0xff]  ;;  %v11186_v19 = vld [vmem:[%s15553_s1 + $0x2c8] ss:$16 sps:$4 sm:$0xff]   ;;  %vm7507_vm9 = vcmask 1043459  }
  0xf7   : > { %v442_v56 = vld [vmem:[%s12934_s30 + $0x58] sm:$0xff]  ;;  %v13109_v58 = vld [vmem:[%s12934_s30 + $0x68] sm:$0xff]  ;;  %vm7510_vm10 = vcmask 1044484   ;;  %vm7513_vm11 = vcmask 1045509   ;;  %vm7516_vm12 = vcmask 1046534   ;;  %vm7519_vm13 = vcmask 1047559  }
  0xf8   : > { %s10540_s23 = sshll.u32 %s12591_s13, 7  ;;  %p15769_p1 = scmp.ne.s32.totalorder %s15603_s19, 0 }
  0xf9   : > { %1856 = vmatpush1.bf16.msra.mxu0 %v11103_v34  ;;  %2315 = vmatpush1.bf16.msra.mxu1 %v11104_v35  ;;  %v13068_v34 = vld [vmem:[%s12934_s30 + $0x48] sm:$0xff]  ;;  %v507_v35 = vsel %vm495_vm0, %v504_v13, %v506_v27  ;;  %v13141_v13 = vld [vmem:[%s12934_s30 + $0x70] sm:$0xff]  ;;  %s15510_s24 = scalar_lea.hbm %s15561_s9, %s10540_s23  ;;  %s12519_s13 = smov [#allocation14]  }
  0xfa   : > { %1857 = vmatprep.subr.bf16.mxu0 %v11105_v36  ;;  %2316 = vmatprep.subr.bf16.mxu1 %v11107_v37  ;;  %v509_v36 = vsel %vm495_vm0, %v506_v27, %v508_v28  ;;  %v13073_v37 = vld [vmem:[%s12934_s30 + $0x50] sm:$0xff]  ;;  %v520_v20 = vrot.slane %v13141_v13, 1  ;;  %v13166_v27 = vld [vmem:[%s12934_s30 + $0x80] sm:$0xff]  ;;  %v13169_v28 = vld [vmem:[%s12934_s30 + $0x88] sm:$0xff]  ;;  %s12431_s22 = sshll.u32 %s12519_s13, 4  ;;  %s12432_s22 = int_to_ptr.vmem [resolvable:$false] %s12431_s22 }
  0xfb   : > { %s12433_s25 = scalar_lea.vmem %s12432_s22, 256 }
  0xfd   : > { %1858 = vmatpush1.bf16.msra.mxu0 %v11109_v38  ;;  %2317 = vmatpush1.bf16.msra.mxu1 %v11110_v39  ;;  %v824_v38 = vpack.c.bf16 %v13008_v8, %v12952_v49  ;;  %v11159_v39 = vld [vmem:[%s15553_s1 + $0x240] ss:$16 sps:$4 sm:$0xff]  }
  0xfe   : > { %1859 = vmatprep.subr.bf16.mxu0 %v11111_v40  ;;  %2318 = vmatprep.subr.bf16.mxu1 %v11113_v41  ;;  %v11162_v40 = vld [vmem:[%s15553_s1 + $0x248] ss:$16 sps:$4 sm:$0xff]   ;;  %v11167_v41 = vld [vmem:[%s15553_s1 + $0x264] ss:$16 sps:$4 sm:$0xff]  }
 0x101   : > { %1860 = vmatpush1.bf16.msra.mxu0 %v11115_v42  ;;  %2319 = vmatpush1.bf16.msra.mxu1 %v11116_v43  ;;  %v830_v42 = vpack.c.bf16 %v509_v36, %v507_v35  ;;  %v510_v43 = vrot.slane %v13065_v33, 1  ;;  %v524_v36 = vrot.slane %v13166_v27, 1 }
 0x102   : > { %1861 = vmatprep.subr.bf16.mxu0 %v11117_v44  ;;  %2320 = vmatprep.subr.bf16.mxu1 %v11119_v45  ;;  %v511_v44 = vrot.slane %v13068_v34, 1  ;;  %v513_v45 = vrot.slane %v13073_v37, 1 }
 0x105   : > { %1862 = vmatpush1.bf16.msra.mxu0 %v11121_v46  ;;  %2321 = vmatpush1.bf16.msra.mxu1 %v11122_v51  ;;  %v11170_v46 = vld [vmem:[%s15553_s1 + $0x26c] ss:$16 sps:$4 sm:$0xff]   ;;  %v11168_v51 = vld [vmem:[%s15553_s1 + $0x268] ss:$16 sps:$4 sm:$0xff]  }
 0x106   : > { %1863 = vmatprep.subr.bf16.mxu0 %v11123_v54  ;;  %2322 = vmatprep.subr.bf16.mxu1 %v11125_v55  ;;  %v512_v54 = vsel %vm495_vm0, %v510_v43, %v511_v44  ;;  %v514_v55 = vsel %vm495_vm0, %v511_v44, %v513_v45  ;;  %v11201_v43 = vld [vmem:[%s15553_s1 + $0x320] ss:$16 sps:$4 sm:$0xff]   ;;  %v11204_v44 = vld [vmem:[%s15553_s1 + $0x328] ss:$16 sps:$4 sm:$0xff]  }
 0x109   : > { %1864 = vmatpush1.bf16.msra.mxu0 %v11127_v59  ;;  %2323 = vmatpush1.bf16.msra.mxu1 %v11128_v60  ;;  %v829_v59 = vpack.c.bf16 %v13029_v17, %v13011_v9  ;;  %v11171_v60 = vld [vmem:[%s15553_s1 + $0x280] ss:$16 sps:$4 sm:$0xff]  }
 0x10a   : > { %1865 = vmatprep.subr.bf16.mxu0 %v11129_v61  ;;  %2324 = vmatprep.subr.bf16.mxu1 %v11131_v62  ;;  %v835_v61 = vpack.c.bf16 %v514_v55, %v512_v54  ;;  %v11174_v62 = vld [vmem:[%s15553_s1 + $0x288] ss:$16 sps:$4 sm:$0xff]   ;;  %v11212_v54 = vld [vmem:[%s15553_s1 + $0x34c] ss:$16 sps:$4 sm:$0xff]   ;;  %v844_v55 = vpack.c.bf16 %v13141_v13, %v13109_v58  ;;  %v11219_v13 = vld [vmem:[%s15553_s1 + $0x380] ss:$16 sps:$4 sm:$0xff]  }
 0x10d   : > { %1866 = vmatpush1.bf16.msra.mxu0 %v11133_v63  ;;  %2325 = vmatpush1.bf16.msra.mxu1 %v11134_v0  ;;  %v515_v63 = vrot.slane %v442_v56, 1  ;;  %v517_v0 = vrot.slane %v443_v57, 1 }
 0x10e   : > { %1867 = vmatprep.subr.bf16.mxu0 %v11135_v1  ;;  %2326 = vmatprep.subr.bf16.mxu1 %v11137_v2  ;;  %v518_v1 = vrot.slane %v13109_v58, 1  ;;  %v11179_v2 = vld [vmem:[%s15553_s1 + $0x2a4] ss:$16 sps:$4 sm:$0xff]  }
 0x10f   : > { %v11215_v58 = vld [vmem:[%s15553_s1 + $0x364] ss:$16 sps:$4 sm:$0xff]  }
 0x110   : > { %v519_v11 = vsel %vm495_vm0, %v517_v0, %v518_v1  ;;  %v13236_v0 = vld [vmem:[%s12934_s30 + $0xb0] sm:$0xff] }
 0x111   : > { %1868 = vmatpush1.bf16.msra.mxu0 %v11139_v3  ;;  %2327 = vmatpush1.bf16.msra.mxu1 %v11140_v4  ;;  %v11182_v3 = vld [vmem:[%s15553_s1 + $0x2ac] ss:$16 sps:$4 sm:$0xff]   ;;  %v11177_v4 = vld [vmem:[%s15553_s1 + $0x2a0] ss:$16 sps:$4 sm:$0xff]  }
 0x112   : > { %1869 = vmatprep.subr.bf16.mxu0 %v11141_v5  ;;  %2328 = vmatprep.subr.bf16.mxu1 %v11143_v6  ;;  %v11180_v5 = vld [vmem:[%s15553_s1 + $0x2a8] ss:$16 sps:$4 sm:$0xff]   ;;  %v11185_v6 = vld [vmem:[%s15553_s1 + $0x2c4] ss:$16 sps:$4 sm:$0xff]  }
 0x115   : > { %1870 = vmatpush1.bf16.msra.mxu0 %v11145_v10  ;;  %2329 = vmatpush1.bf16.msra.mxu1 %v11146_v14  ;;  %v516_v10 = vsel %vm495_vm0, %v513_v45, %v515_v63  ;;  %v446_v14 = vld [vmem:[%s12934_s30 + $0x78] sm:$0xff] }
 0x116   : > { %1992 = vmatprep.subr.bf16.mxu0 %v11149_v15  ;;  %2451 = vmatprep.subr.bf16.mxu1 %v11152_v16  ;;  %v834_v15 = vpack.c.bf16 %v13068_v34, %v13065_v33  ;;  %v840_v16 = vpack.c.bf16 %v519_v11, %v516_v10  ;;  %v11200_v33 = vld [vmem:[%s15553_s1 + $0x30c] ss:$16 sps:$4 sm:$0xff]   ;;  %v839_v34 = vpack.c.bf16 %v443_v57, %v13073_v37  ;;  %v11203_v37 = vld [vmem:[%s15553_s1 + $0x324] ss:$16 sps:$4 sm:$0xff]  }
 0x117   : > { %v450_v45 = vld [vmem:[%s12934_s30 + $0x98] sm:$0xff]  ;;  %v849_v11 = vpack.c.bf16 %v13169_v28, %v13166_v27 }
 0x118   : > { %1872 = vmatmul.mubr.bf16.vlgmr.msra.gmra.mrb[0].mxu0 %v819_v18  ;;  %2331 = vmatmul.mubr.bf16.vlgmr.msra.gmra.mrb[0].mxu1 %v819_v18  ;;  %v11183_v18 = vld [vmem:[%s15553_s1 + $0x2c0] ss:$16 sps:$4 sm:$0xff]   ;;  %v529_v57 = vrot.slane %v450_v45, 1  ;;  %v11218_v63 = vld [vmem:[%s15553_s1 + $0x36c] ss:$16 sps:$4 sm:$0xff]  }
 0x119   : > { %1993 = vmatpush1.bf16.msra.mxu0 %v11147_v22  ;;  %2452 = vmatpush1.bf16.msra.mxu1 %v11150_v23  ;;  %v522_v22 = vrot.slane %v446_v14, 1  ;;  %v11191_v23 = vld [vmem:[%s15553_s1 + $0x2e4] ss:$16 sps:$4 sm:$0xff]   ;;  %v11224_v10 = vld [vmem:[%s15553_s1 + $0x38c] ss:$16 sps:$4 sm:$0xff]   ;;  %v534_v14 = vrot.slane %v13236_v0, 1 }
 0x11a   : > { %1994 = vmatprep.subr.bf16.mxu0 %v11155_v24  ;;  %2453 = vmatprep.subr.bf16.mxu1 %v11158_v25  ;;  %v11194_v24 = vld [vmem:[%s15553_s1 + $0x2ec] ss:$16 sps:$4 sm:$0xff]   ;;  %v11189_v25 = vld [vmem:[%s15553_s1 + $0x2e0] ss:$16 sps:$4 sm:$0xff]  }
 0x11b   : > { %1881 = vmatprep.mubr.bf16.mxu0 %v825_v26  ;;  %2340 = vmatprep.mubr.bf16.mxu1 %v825_v26  ;;  %v11192_v26 = vld [vmem:[%s15553_s1 + $0x2e8] ss:$16 sps:$4 sm:$0xff]   ;;  %v11248_v45 = vld [vmem:[%s15553_s1 + $0x40c] ss:$16 sps:$4 sm:$0xff]  }
 0x11d   : > { %1995 = vmatpush1.bf16.msra.mxu0 %v11153_v29  ;;  %2454 = vmatpush1.bf16.msra.mxu1 %v11156_v30  ;;  %v521_v29 = vsel %vm495_vm0, %v518_v1, %v520_v20  ;;  %v523_v30 = vsel %vm495_vm0, %v520_v20, %v522_v22  ;;  %v454_v1 = vld [vmem:[%s12934_s30 + $0xb8] sm:$0xff]  ;;  %v11225_v20 = vld [vmem:[%s15553_s1 + $0x3a0] ss:$16 sps:$4 sm:$0xff]  }
 0x11e   : > { %1996 = vmatprep.subr.bf16.mxu0 %v11161_v31  ;;  %2455 = vmatprep.subr.bf16.mxu1 %v11164_v32  ;;  %v13174_v31 = vld [vmem:[%s12934_s30 + $0x90] sm:$0xff]  ;;  %v845_v35 = vpack.c.bf16 %v523_v30, %v521_v29  ;;  %v11228_v22 = vld [vmem:[%s15553_s1 + $0x3a8] ss:$16 sps:$4 sm:$0xff]   ;;  %v11236_v29 = vld [vmem:[%s15553_s1 + $0x3cc] ss:$16 sps:$4 sm:$0xff]  }
 0x11f   : > { %v11197_v32 = vld [vmem:[%s15553_s1 + $0x304] ss:$16 sps:$4 sm:$0xff]  }
 0x120   : > { %1882 = vmatmul.mubr.bf16.gmra.mrb[4].mxu0 %v824_v38  ;;  %2341 = vmatmul.mubr.bf16.gmra.mrb[4].mxu1 %v824_v38  ;;  %v11195_v38 = vld [vmem:[%s15553_s1 + $0x300] ss:$16 sps:$4 sm:$0xff]  }
 0x121   : > { %1997 = vmatpush1.bf16.msra.mxu0 %v11159_v39  ;;  %2456 = vmatpush1.bf16.msra.mxu1 %v11162_v40  ;;  %v525_v39 = vrot.slane %v13169_v28, 1  ;;  %v527_v40 = vrot.slane %v13174_v31, 1 }
 0x122   : > { %1891 = vmatprep.mubr.bf16.mxu0 %v830_v42  ;;  %2350 = vmatprep.mubr.bf16.mxu1 %v830_v42  ;;  %v11206_v42 = vld [vmem:[%s15553_s1 + $0x32c] ss:$16 sps:$4 sm:$0xff]  }
 0x123   : > { %1998 = vmatprep.subr.bf16.mxu0 %v11167_v41  ;;  %2457 = vmatprep.subr.bf16.mxu1 %v11170_v46  ;;  %v11198_v41 = vld [vmem:[%s15553_s1 + $0x308] ss:$16 sps:$4 sm:$0xff]   ;;  %v13206_v46 = vld [vmem:[%s12934_s30 + $0xa0] sm:$0xff] }
 0x124   : > { %v854_v30 = vpack.c.bf16 %v13206_v46, %v13174_v31 }
 0x125   : > { %1999 = vmatpush1.bf16.msra.mxu0 %v11165_v50  ;;  %2458 = vmatpush1.bf16.msra.mxu1 %v11168_v51  ;;  %v526_v50 = vsel %vm495_vm0, %v524_v36, %v525_v39  ;;  %v528_v51 = vsel %vm495_vm0, %v525_v39, %v527_v40  ;;  %v11242_v36 = vld [vmem:[%s15553_s1 + $0x3ec] ss:$16 sps:$4 sm:$0xff]  }
 0x126   : > { %2000 = vmatprep.subr.bf16.mxu0 %v11173_v52  ;;  %2459 = vmatprep.subr.bf16.mxu1 %v11176_v53  ;;  %v13211_v52 = vld [vmem:[%s12934_s30 + $0xa8] sm:$0xff]  ;;  %v11209_v53 = vld [vmem:[%s15553_s1 + $0x344] ss:$16 sps:$4 sm:$0xff]   ;;  %v850_v56 = vpack.c.bf16 %v528_v51, %v526_v50 }
 0x127   : > { %v859_v51 = vpack.c.bf16 %v13236_v0, %v13211_v52 }
 0x128   : > { %1892 = vmatmul.mubr.bf16.gmra.mrb[8].mxu0 %v829_v59  ;;  %2351 = vmatmul.mubr.bf16.gmra.mrb[8].mxu1 %v829_v59  ;;  %v11207_v59 = vld [vmem:[%s15553_s1 + $0x340] ss:$16 sps:$4 sm:$0xff]  }
 0x129   : > { %1901 = vmatprep.mubr.bf16.mxu0 %v835_v61  ;;  %2360 = vmatprep.mubr.bf16.mxu1 %v835_v61  ;;  %v532_v61 = vrot.slane %v13211_v52, 1 }
 0x12a   : > { %2001 = vmatpush1.bf16.msra.mxu0 %v11171_v60  ;;  %2460 = vmatpush1.bf16.msra.mxu1 %v11174_v62  ;;  %v531_v60 = vrot.slane %v13206_v46, 1  ;;  %v11210_v62 = vld [vmem:[%s15553_s1 + $0x348] ss:$16 sps:$4 sm:$0xff]  }
 0x12b   : > { %2002 = vmatprep.subr.bf16.mxu0 %v11179_v2  ;;  %2461 = vmatprep.subr.bf16.mxu1 %v11182_v3  ;;  %v11213_v2 = vld [vmem:[%s15553_s1 + $0x360] ss:$16 sps:$4 sm:$0xff]   ;;  %v530_v3 = vsel %vm495_vm0, %v527_v40, %v529_v57  ;;  %v535_v27 = vsel %vm495_vm0, %v532_v61, %v534_v14 }
 0x12c   : > { %v11237_v40 = vld [vmem:[%s15553_s1 + $0x3e0] ss:$16 sps:$4 sm:$0xff]  }
 0x12d   : > { %v461_v57 = vld [vmem:[%s12934_s30 + $0xf0] sm:$0xff] }
 0x12e   : > { %2003 = vmatpush1.bf16.msra.mxu0 %v11177_v4  ;;  %2462 = vmatpush1.bf16.msra.mxu1 %v11180_v5  ;;  %v533_v4 = vsel %vm495_vm0, %v531_v60, %v532_v61  ;;  %v11216_v5 = vld [vmem:[%s15553_s1 + $0x368] ss:$16 sps:$4 sm:$0xff]  }
 0x12f   : > { %2004 = vmatprep.subr.bf16.mxu0 %v11185_v6  ;;  %2463 = vmatprep.subr.bf16.mxu1 %v11188_v12  ;;  %v11221_v6 = vld [vmem:[%s15553_s1 + $0x384] ss:$16 sps:$4 sm:$0xff]   ;;  %v855_v12 = vpack.c.bf16 %v533_v4, %v530_v3  ;;  %v658_v4 = vrot.slane %v12946_v47, 3 }
 0x130   : > { %1902 = vmatmul.mubr.bf16.gmra.mrb[12].mxu0 %v834_v15  ;;  %2361 = vmatmul.mubr.bf16.gmra.mrb[12].mxu1 %v834_v15  ;;  %v536_v15 = vrot.slane %v454_v1, 1 }
 0x131   : > { %1911 = vmatprep.mubr.bf16.mxu0 %v840_v16  ;;  %2370 = vmatprep.mubr.bf16.mxu1 %v840_v16  ;;  %v11222_v16 = vld [vmem:[%s15553_s1 + $0x388] ss:$16 sps:$4 sm:$0xff]  }
 0x132   : > { %2005 = vmatpush1.bf16.msra.mxu0 %v11183_v18  ;;  %2464 = vmatpush1.bf16.msra.mxu1 %v11186_v19  ;;  %v11227_v18 = vld [vmem:[%s15553_s1 + $0x3a4] ss:$16 sps:$4 sm:$0xff]   ;;  %v11230_v19 = vld [vmem:[%s15553_s1 + $0x3ac] ss:$16 sps:$4 sm:$0xff]   ;;  %v537_v28 = vsel %vm495_vm0, %v534_v14, %v536_v15 }
 0x133   : > { %2006 = vmatprep.subr.bf16.mxu0 %v11191_v23  ;;  %2465 = vmatprep.subr.bf16.mxu1 %v11194_v24  ;;  %v455_v23 = vld [vmem:[%s12934_s30 + $0xc0] sm:$0xff]  ;;  %v456_v24 = vld [vmem:[%s12934_s30 + $0xc8] sm:$0xff] }
 0x134   : > { %v538_v31 = vrot.slane %v455_v23, 1  ;;  %v13334_v14 = vld [vmem:[%s12934_s30] sm:$0xff]  ;;  %v13338_v15 = vld [vmem:[%s12934_s30 + $0x8] sm:$0xff] }
 0x135   : > { %v577_v47 = vrot.slane %v13334_v14, 2 }
 0x136   : > { %2007 = vmatpush1.bf16.msra.mxu0 %v11189_v25  ;;  %2466 = vmatpush1.bf16.msra.mxu1 %v11192_v26  ;;  %v13277_v25 = vld [vmem:[%s12934_s30 + $0xd0] sm:$0xff] }
 0x137   : > { %2008 = vmatprep.subr.bf16.mxu0 %v11197_v32  ;;  %2467 = vmatprep.subr.bf16.mxu1 %v11200_v33  ;;  %v11233_v26 = vld [vmem:[%s15553_s1 + $0x3c4] ss:$16 sps:$4 sm:$0xff]   ;;  %v11231_v32 = vld [vmem:[%s15553_s1 + $0x3c0] ss:$16 sps:$4 sm:$0xff]   ;;  %v11234_v33 = vld [vmem:[%s15553_s1 + $0x3c8] ss:$16 sps:$4 sm:$0xff]  }
 0x138   : > { %1912 = vmatmul.mubr.bf16.gmra.mrb[16].mxu0 %v839_v34  ;;  %2371 = vmatmul.mubr.bf16.gmra.mrb[16].mxu1 %v839_v34  ;;  %v860_v34 = vpack.c.bf16 %v537_v28, %v535_v27  ;;  %v541_v39 = vrot.slane %v13277_v25, 1  ;;  %v13363_v28 = vld [vmem:[%s12934_s30 + $0x20] sm:$0xff] }
 0x139   : > { %1921 = vmatprep.mubr.bf16.mxu0 %v845_v35  ;;  %2380 = vmatprep.mubr.bf16.mxu1 %v845_v35  ;;  %v11239_v35 = vld [vmem:[%s15553_s1 + $0x3e4] ss:$16 sps:$4 sm:$0xff]  }
 0x13a   : > { %2009 = vmatpush1.bf16.msra.mxu0 %v11195_v38  ;;  %2468 = vmatpush1.bf16.msra.mxu1 %v11198_v41  ;;  %v539_v38 = vrot.slane %v456_v24, 1  ;;  %v11240_v41 = vld [vmem:[%s15553_s1 + $0x3e8] ss:$16 sps:$4 sm:$0xff]  }
 0x13b   : > { %2010 = vmatprep.subr.bf16.mxu0 %v11203_v37  ;;  %2469 = vmatprep.subr.bf16.mxu1 %v11206_v42  ;;  %v458_v37 = vld [vmem:[%s12934_s30 + $0xd8] sm:$0xff]  ;;  %v459_v42 = vld [vmem:[%s12934_s30 + $0xe0] sm:$0xff] }
 0x13c   : > { %v540_v46 = vsel %vm495_vm0, %v538_v31, %v539_v38  ;;  %v542_v50 = vsel %vm495_vm0, %v539_v38, %v541_v39  ;;  %v670_v31 = vrot.slane %v13036_v21, 3  ;;  %v11249_v38 = vld [vmem:[%s15553_s1 + $0x420] ss:$16 sps:$4 sm:$0xff]  }
 0x13e   : > { %2011 = vmatpush1.bf16.msra.mxu0 %v11201_v43  ;;  %2470 = vmatpush1.bf16.msra.mxu1 %v11204_v44  ;;  %v460_v43 = vld [vmem:[%s12934_s30 + $0xe8] sm:$0xff]  ;;  %v11245_v44 = vld [vmem:[%s15553_s1 + $0x404] ss:$16 sps:$4 sm:$0xff]  }
 0x13f   : > { %2012 = vmatprep.subr.bf16.mxu0 %v11209_v53  ;;  %2471 = vmatprep.subr.bf16.mxu1 %v11212_v54  ;;  %v865_v53 = vpack.c.bf16 %v542_v50, %v540_v46  ;;  %v543_v54 = vrot.slane %v458_v37, 1  ;;  %v13401_v50 = vld [vmem:[%s12934_s30 + $0x30] sm:$0xff] }
 0x140   : > { %1922 = vmatmul.mubr.bf16.gmra.mrb[20].mxu0 %v844_v55  ;;  %2381 = vmatmul.mubr.bf16.gmra.mrb[20].mxu1 %v844_v55  ;;  %v545_v55 = vrot.slane %v459_v42, 1 }
 0x141   : > { %1931 = vmatprep.mubr.bf16.mxu0 %v850_v56  ;;  %2390 = vmatprep.mubr.bf16.mxu1 %v850_v56  ;;  %v546_v56 = vrot.slane %v460_v43, 1  ;;  %v544_v60 = vsel %vm495_vm0, %v541_v39, %v543_v54  ;;  %v11252_v39 = vld [vmem:[%s15553_s1 + $0x428] ss:$16 sps:$4 sm:$0xff]  }
 0x142   : > { %2013 = vmatpush1.bf16.msra.mxu0 %v11207_v59  ;;  %2472 = vmatpush1.bf16.msra.mxu1 %v11210_v62  ;;  %v462_v59 = vld [vmem:[%s12934_s30 + $0xf8] sm:$0xff]  ;;  %v864_v62 = vpack.c.bf16 %v456_v24, %v455_v23  ;;  %v11243_v24 = vld [vmem:[%s15553_s1 + $0x400] ss:$16 sps:$4 sm:$0xff]  }
 0x143   : > { %2014 = vmatprep.subr.bf16.mxu0 %v11215_v58  ;;  %2473 = vmatprep.subr.bf16.mxu1 %v11218_v63  ;;  %v547_v61 = vsel %vm495_vm0, %v545_v55, %v546_v56  ;;  %v548_v58 = vrot.slane %v461_v57, 1  ;;  %v550_v63 = vrot.slane %v462_v59, 1  ;;  %v11263_v55 = vld [vmem:[%s15553_s1 + $0x464] ss:$16 sps:$4 sm:$0xff]  }
 0x144   : > { %v870_v52 = vpack.c.bf16 %v547_v61, %v544_v60  ;;  %v12200_v60 = vld [vmem:[%s12934_s30 + $0x48] sm:$0xff] }
 0x145   : > { %v549_v0 = vsel %vm495_vm0, %v546_v56, %v548_v58  ;;  %v551_v1 = vsel %vm495_vm0, %v548_v58, %v550_v63  ;;  %v11266_v56 = vld [vmem:[%s15553_s1 + $0x46c] ss:$16 sps:$4 sm:$0xff]   ;;  %v673_v61 = vrot.slane %v12200_v60, 3  ;;  %v11261_v58 = vld [vmem:[%s15553_s1 + $0x460] ss:$16 sps:$4 sm:$0xff]  }
 0x146   : > { %2015 = vmatpush1.bf16.msra.mxu0 %v11213_v2  ;;  %2474 = vmatpush1.bf16.msra.mxu1 %v11216_v5  ;;  %v869_v2 = vpack.c.bf16 %v459_v42, %v13277_v25  ;;  %v875_v3 = vpack.c.bf16 %v551_v1, %v549_v0  ;;  %v659_v5 = vrot.slane %v12949_v48, 3  ;;  %v578_v48 = vrot.slane %v13338_v15, 2  ;;  %v11264_v63 = vld [vmem:[%s15553_s1 + $0x468] ss:$16 sps:$4 sm:$0xff]  }
 0x147   : > { %2016 = vmatprep.subr.bf16.mxu0 %v11221_v6  ;;  %2475 = vmatprep.subr.bf16.mxu1 %v11224_v10  ;;  %v661_v6 = vrot.slane %v12952_v49, 3  ;;  %v13342_v49 = vld [vmem:[%s12934_s30 + $0x10] sm:$0xff] }
 0x148   : > { %1932 = vmatmul.mubr.bf16.gmra.mrb[24].mxu0 %v849_v11  ;;  %2391 = vmatmul.mubr.bf16.gmra.mrb[24].mxu1 %v849_v11  ;;  %v660_v10 = vsel %vm657_vm1, %v658_v4, %v659_v5 }
 0x149   : > { %1941 = vmatprep.mubr.bf16.mxu0 %v855_v12  ;;  %2400 = vmatprep.mubr.bf16.mxu1 %v855_v12  ;;  %v662_v11 = vsel %vm657_vm1, %v659_v5, %v661_v6  ;;  %v874_v12 = vpack.c.bf16 %v461_v57, %v460_v43  ;;  %v12199_v57 = vld [vmem:[%s12934_s30 + $0x40] sm:$0xff] }
 0x14a   : > { %2017 = vmatpush1.bf16.msra.mxu0 %v11219_v13  ;;  %2476 = vmatpush1.bf16.msra.mxu1 %v11222_v16  ;;  %v822_v13 = vpack.c.bf16 %v662_v11, %v660_v10  ;;  %v580_v16 = vrot.slane %v13342_v49, 2  ;;  %v672_v59 = vrot.slane %v12199_v57, 3  ;;  %v11267_v10 = vld [vmem:[%s15553_s1 + $0x480] ss:$16 sps:$4 sm:$0xff]   ;;  %v11270_v11 = vld [vmem:[%s15553_s1 + $0x488] ss:$16 sps:$4 sm:$0xff]  }
 0x14b   : > { %2018 = vmatprep.subr.bf16.mxu0 %v11227_v18  ;;  %2477 = vmatprep.subr.bf16.mxu1 %v11230_v19  ;;  %v663_v18 = vrot.slane %v13005_v7, 3  ;;  %v665_v19 = vrot.slane %v13008_v8, 3  ;;  %v11246_v7 = vld [vmem:[%s15553_s1 + $0x408] ss:$16 sps:$4 sm:$0xff]  }
 0x14c   : > { %v581_v23 = vsel %vm576_vm2, %v578_v48, %v580_v16  ;;  %v674_v4 = vsel %vm657_vm1, %v672_v59, %v673_v61 }
 0x14d   : > { %v664_v8 = vsel %vm657_vm1, %v661_v6, %v663_v18  ;;  %v11278_v18 = vld [vmem:[%s15553_s1 + $0x4ac] ss:$16 sps:$4 sm:$0xff]  }
 0x14e   : > { %2019 = vmatpush1.bf16.msra.mxu0 %v11225_v20  ;;  %2478 = vmatpush1.bf16.msra.mxu1 %v11228_v22  ;;  %v666_v20 = vrot.slane %v13011_v9, 3  ;;  %v579_v22 = vsel %vm576_vm2, %v577_v47, %v578_v48  ;;  %v592_v47 = vrot.slane %v12200_v60, 2 }
 0x14f   : > { %2020 = vmatprep.subr.bf16.mxu0 %v11233_v26  ;;  %2479 = vmatprep.subr.bf16.mxu1 %v11236_v29  ;;  %v821_v25 = vpack.c.bf16 %v581_v23, %v579_v22  ;;  %v13359_v26 = vld [vmem:[%s12934_s30 + $0x18] sm:$0xff]  ;;  %v584_v29 = vrot.slane %v13363_v28, 2  ;;  %v12203_v22 = vld [vmem:[%s12934_s30 + $0x60] sm:$0xff] }
 0x150   : > { %1942 = vmatmul.mubr.bf16.gmra.mrb[28].mxu0 %v854_v30  ;;  %2401 = vmatmul.mubr.bf16.gmra.mrb[28].mxu1 %v854_v30  ;;  %v667_v9 = vsel %vm657_vm1, %v665_v19, %v666_v20  ;;  %v582_v27 = vrot.slane %v13359_v26, 2  ;;  %v13367_v30 = vld [vmem:[%s12934_s30 + $0x28] sm:$0xff]  ;;  %v12202_v19 = vld [vmem:[%s12934_s30 + $0x58] sm:$0xff]  ;;  %v679_v23 = vrot.slane %v12203_v22, 3 }
 0x151   : > { %1951 = vmatprep.mubr.bf16.mxu0 %v860_v34  ;;  %2410 = vmatprep.mubr.bf16.mxu1 %v860_v34  ;;  %v11254_v34 = vld [vmem:[%s15553_s1 + $0x42c] ss:$16 sps:$4 sm:$0xff]  }
 0x152   : > { %2021 = vmatpush1.bf16.msra.mxu0 %v11231_v32  ;;  %2480 = vmatpush1.bf16.msra.mxu1 %v11234_v33  ;;  %v585_v32 = vrot.slane %v13367_v30, 2  ;;  %v11251_v33 = vld [vmem:[%s15553_s1 + $0x424] ss:$16 sps:$4 sm:$0xff]   ;;  %v583_v21 = vsel %vm576_vm2, %v580_v16, %v582_v27 }
 0x153   : > { %2022 = vmatprep.subr.bf16.mxu0 %v11239_v35  ;;  %2481 = vmatprep.subr.bf16.mxu1 %v11242_v36  ;;  %v827_v35 = vpack.c.bf16 %v667_v9, %v664_v8  ;;  %v668_v36 = vrot.slane %v13029_v17, 3  ;;  %v11260_v17 = vld [vmem:[%s15553_s1 + $0x44c] ss:$16 sps:$4 sm:$0xff]   ;;  %v11275_v16 = vld [vmem:[%s15553_s1 + $0x4a4] ss:$16 sps:$4 sm:$0xff]  }
 0x154   : > { %v11273_v8 = vld [vmem:[%s15553_s1 + $0x4a0] ss:$16 sps:$4 sm:$0xff]   ;;  %v11276_v9 = vld [vmem:[%s15553_s1 + $0x4a8] ss:$16 sps:$4 sm:$0xff]  }
 0x155   : > { %v669_v37 = vsel %vm657_vm1, %v666_v20, %v668_v36  ;;  %v671_v42 = vsel %vm657_vm1, %v668_v36, %v670_v31  ;;  %v677_v20 = vrot.slane %v12202_v19, 3  ;;  %v11279_v36 = vld [vmem:[%s15553_s1 + $0x4c0] ss:$16 sps:$4 sm:$0xff]   ;;  %v11282_v31 = vld [vmem:[%s15553_s1 + $0x4c8] ss:$16 sps:$4 sm:$0xff]  }
 0x156   : > { %2023 = vmatpush1.bf16.msra.mxu0 %v11237_v40  ;;  %2482 = vmatpush1.bf16.msra.mxu1 %v11240_v41  ;;  %v11257_v40 = vld [vmem:[%s15553_s1 + $0x444] ss:$16 sps:$4 sm:$0xff]   ;;  %v586_v41 = vsel %vm576_vm2, %v584_v29, %v585_v32  ;;  %v832_v46 = vpack.c.bf16 %v671_v42, %v669_v37 }
 0x157   : > { %2145 = vmatprep.subr.bf16.mxu0 %v11245_v44  ;;  %2604 = vmatprep.subr.bf16.mxu1 %v11248_v45  ;;  %v826_v43 = vpack.c.bf16 %v586_v41, %v583_v21  ;;  %v11255_v44 = vld [vmem:[%s15553_s1 + $0x440] ss:$16 sps:$4 sm:$0xff]   ;;  %v11258_v45 = vld [vmem:[%s15553_s1 + $0x448] ss:$16 sps:$4 sm:$0xff]   ;;  %v11281_v29 = vld [vmem:[%s15553_s1 + $0x4c4] ss:$16 sps:$4 sm:$0xff]  }
 0x158   : > { %1952 = vmatmul.mubr.bf16.gmra.mrb[32].mxu0 %v859_v51  ;;  %2411 = vmatmul.mubr.bf16.gmra.mrb[32].mxu1 %v859_v51  ;;  %v587_v51 = vrot.slane %v13401_v50, 2  ;;  %v11287_v21 = vld [vmem:[%s15553_s1 + $0x4e4] ss:$16 sps:$4 sm:$0xff]   ;;  %v11290_v41 = vld [vmem:[%s15553_s1 + $0x4ec] ss:$16 sps:$4 sm:$0xff]  }
 0x159   : > { %1961 = vmatprep.mubr.bf16.mxu0 %v865_v53  ;;  %2420 = vmatprep.mubr.bf16.mxu1 %v865_v53  ;;  %v13405_v53 = vld [vmem:[%s12934_s30 + $0x38] sm:$0xff]  ;;  %v12205_v37 = vld [vmem:[%s12934_s30 + $0x70] sm:$0xff] }
 0x15a   : > { %v589_v54 = vrot.slane %v13405_v53, 2  ;;  %v588_v0 = vsel %vm576_vm2, %v585_v32, %v587_v51  ;;  %v11284_v32 = vld [vmem:[%s15553_s1 + $0x4cc] ss:$16 sps:$4 sm:$0xff]   ;;  %v682_v42 = vrot.slane %v12205_v37, 3  ;;  %v601_v60 = vrot.slane %v12205_v37, 2  ;;  %v13549_v37 = vld [vmem:[%s12934_s30 + $0xc0] sm:$0xff] }
 0x15c   : > { %v590_v1 = vsel %vm576_vm2, %v587_v51, %v589_v54 }
 0x15d   : > { %v831_v6 = vpack.c.bf16 %v590_v1, %v588_v0  ;;  %v13505_v0 = vld [vmem:[%s12934_s30 + $0x90] sm:$0xff] }
 0x15e   : > { %v689_v1 = vrot.slane %v13505_v0, 3 }
 0x160   : > { %1962 = vmatmul.mubr.bf16.gmra.mrb[36].mxu0 %v864_v62  ;;  %2421 = vmatmul.mubr.bf16.gmra.mrb[36].mxu1 %v864_v62  ;;  %v13417_v62 = vld [vmem:[%s12934_s30 + $0x50] sm:$0xff] }
 0x161   : > { %1971 = vmatprep.mubr.bf16.mxu0 %v870_v52  ;;  %2430 = vmatprep.mubr.bf16.mxu1 %v870_v52  ;;  %v675_v52 = vrot.slane %v13417_v62, 3  ;;  %v594_v48 = vrot.slane %v13417_v62, 2  ;;  %v13497_v62 = vld [vmem:[%s12934_s30 + $0x80] sm:$0xff] }
 0x163   : > { %v676_v5 = vsel %vm657_vm1, %v673_v61, %v675_v52  ;;  %v595_v27 = vsel %vm576_vm2, %v592_v47, %v594_v48 }
 0x168   : > { %1972 = vmatmul.mubr.bf16.gmra.mrb[40].mxu0 %v869_v2  ;;  %2431 = vmatmul.mubr.bf16.gmra.mrb[40].mxu1 %v869_v2  ;;  %v11269_v2 = vld [vmem:[%s15553_s1 + $0x484] ss:$16 sps:$4 sm:$0xff]  }
 0x169   : > { %1981 = vmatprep.mubr.bf16.mxu0 %v875_v3  ;;  %2440 = vmatprep.mubr.bf16.mxu1 %v875_v3  ;;  %v11272_v3 = vld [vmem:[%s15553_s1 + $0x48c] ss:$16 sps:$4 sm:$0xff]  }
 0x170   : > { %1982 = vmatmul.mubr.bf16.gmra.mrb[44].mxu0 %v874_v12  ;;  %2441 = vmatmul.mubr.bf16.gmra.mrb[44].mxu1 %v874_v12  ;;  %v837_v12 = vpack.c.bf16 %v676_v5, %v674_v4 }
 0x171   : > { %2024 = vmatprep.mubr.bf16.mxu0 %v822_v13  ;;  %2483 = vmatprep.mubr.bf16.mxu1 %v822_v13  ;;  %v591_v13 = vrot.slane %v12199_v57, 2 }
 0x178   : > { %2025 = vmatmul.mubr.bf16.vlgmr.msra.gmra.mrb[0].mxu0 %v821_v25  ;;  %2484 = vmatmul.mubr.bf16.vlgmr.msra.gmra.mrb[0].mxu1 %v821_v25  ;;  %v593_v25 = vsel %vm576_vm2, %v591_v13, %v592_v47  ;;  %v608_v13 = vrot.slane %v13505_v0, 2  ;;  %v13516_v47 = vld [vmem:[%s12934_s30 + $0x98] sm:$0xff] }
 0x179   : > { %2146 = vmatpush1.bf16.msra.mxu0 %v11243_v24  ;;  %2605 = vmatpush1.bf16.msra.mxu1 %v11246_v7  ;;  %v13452_v24 = vld [vmem:[%s12934_s30 + $0x68] sm:$0xff] }
 0x17a   : > { %2034 = vmatprep.mubr.bf16.mxu0 %v827_v35  ;;  %2493 = vmatprep.mubr.bf16.mxu1 %v827_v35  ;;  %v680_v7 = vrot.slane %v13452_v24, 3  ;;  %v836_v35 = vpack.c.bf16 %v595_v27, %v593_v25  ;;  %v610_v25 = vrot.slane %v13516_v47, 2 }
 0x17b   : > { %2147 = vmatprep.subr.bf16.mxu0 %v11251_v33  ;;  %2606 = vmatprep.subr.bf16.mxu1 %v11254_v34  ;;  %v678_v33 = vsel %vm657_vm1, %v675_v52, %v677_v20  ;;  %v686_v52 = vrot.slane %v13497_v62, 3 }
 0x17c   : > { %v681_v34 = vsel %vm657_vm1, %v679_v23, %v680_v7 }
 0x17d   : > { %2148 = vmatpush1.bf16.msra.mxu0 %v11249_v38  ;;  %2607 = vmatpush1.bf16.msra.mxu1 %v11252_v39  ;;  %v842_v38 = vpack.c.bf16 %v681_v34, %v678_v33  ;;  %v596_v39 = vrot.slane %v12202_v19, 2  ;;  %v13524_v19 = vld [vmem:[%s12934_s30 + $0xa8] sm:$0xff]  ;;  %v13539_v34 = vld [vmem:[%s12934_s30 + $0xb8] sm:$0xff] }
 0x17e   : > { %2149 = vmatprep.subr.bf16.mxu0 %v11257_v40  ;;  %2608 = vmatprep.subr.bf16.mxu1 %v11260_v17  ;;  %v598_v40 = vrot.slane %v12203_v22, 2  ;;  %v599_v17 = vrot.slane %v13452_v24, 2  ;;  %v694_v20 = vrot.slane %v13524_v19, 3 }
 0x17f   : > { %v597_v51 = vsel %vm576_vm2, %v594_v48, %v596_v39  ;;  %v691_v48 = vrot.slane %v13516_v47, 3 }
 0x180   : > { %2035 = vmatmul.mubr.bf16.gmra.mrb[4].mxu0 %v826_v43  ;;  %2494 = vmatmul.mubr.bf16.gmra.mrb[4].mxu1 %v826_v43  ;;  %v12206_v43 = vld [vmem:[%s12934_s30 + $0x78] sm:$0xff]  ;;  %v600_v54 = vsel %vm576_vm2, %v598_v40, %v599_v17 }
 0x181   : > { %2044 = vmatprep.mubr.bf16.mxu0 %v832_v46  ;;  %2503 = vmatprep.mubr.bf16.mxu1 %v832_v46  ;;  %v11288_v46 = vld [vmem:[%s15553_s1 + $0x4e8] ss:$16 sps:$4 sm:$0xff]   ;;  %v841_v57 = vpack.c.bf16 %v600_v54, %v597_v51  ;;  %v603_v61 = vrot.slane %v12206_v43, 2  ;;  %v692_v24 = vsel %vm657_vm1, %v689_v1, %v691_v48 }
 0x182   : > { %2150 = vmatpush1.bf16.msra.mxu0 %v11255_v44  ;;  %2609 = vmatpush1.bf16.msra.mxu1 %v11258_v45  ;;  %v684_v44 = vrot.slane %v12206_v43, 3  ;;  %v11285_v45 = vld [vmem:[%s15553_s1 + $0x4e0] ss:$16 sps:$4 sm:$0xff]   ;;  %v13553_v43 = vld [vmem:[%s12934_s30 + $0xc8] sm:$0xff] }
 0x183   : > { %2151 = vmatprep.subr.bf16.mxu0 %v11263_v55  ;;  %2610 = vmatprep.subr.bf16.mxu1 %v11266_v56  ;;  %v683_v55 = vsel %vm657_vm1, %v680_v7, %v682_v42  ;;  %v11293_v51 = vld [vmem:[#allocation5 + $0x4] ss:$16 sps:$4 sm:$0xff]  }
 0x184   : > { %v685_v56 = vsel %vm657_vm1, %v682_v42, %v684_v44  ;;  %v700_v42 = vrot.slane %v13549_v37, 3  ;;  %v701_v44 = vrot.slane %v13553_v43, 3 }
 0x185   : > { %v847_v59 = vpack.c.bf16 %v685_v56, %v683_v55  ;;  %v11296_v56 = vld [vmem:[#allocation5 + $0xc] ss:$16 sps:$4 sm:$0xff]  }
 0x186   : > { %2152 = vmatpush1.bf16.msra.mxu0 %v11261_v58  ;;  %2611 = vmatpush1.bf16.msra.mxu1 %v11264_v63  ;;  %v13501_v58 = vld [vmem:[%s12934_s30 + $0x88] sm:$0xff] }
 0x187   : > { %2153 = vmatprep.subr.bf16.mxu0 %v11269_v2  ;;  %2612 = vmatprep.subr.bf16.mxu1 %v11272_v3  ;;  %v687_v63 = vrot.slane %v13501_v58, 3  ;;  %v602_v2 = vsel %vm576_vm2, %v599_v17, %v601_v60  ;;  %v604_v3 = vsel %vm576_vm2, %v601_v60, %v603_v61 }
 0x188   : > { %2045 = vmatmul.mubr.bf16.gmra.mrb[8].mxu0 %v831_v6  ;;  %2504 = vmatmul.mubr.bf16.gmra.mrb[8].mxu1 %v831_v6  ;;  %v846_v6 = vpack.c.bf16 %v604_v3, %v602_v2  ;;  %v13568_v2 = vld [vmem:[%s12934_s30 + $0xd8] sm:$0xff] }
 0x189   : > { %2054 = vmatprep.mubr.bf16.mxu0 %v837_v12  ;;  %2513 = vmatprep.mubr.bf16.mxu1 %v837_v12  ;;  %v688_v4 = vsel %vm657_vm1, %v686_v52, %v687_v63  ;;  %v690_v5 = vsel %vm657_vm1, %v687_v63, %v689_v1  ;;  %v606_v12 = vrot.slane %v13501_v58, 2  ;;  %v619_v52 = vrot.slane %v13549_v37, 2 }
 0x18a   : > { %2154 = vmatpush1.bf16.msra.mxu0 %v11267_v10  ;;  %2613 = vmatpush1.bf16.msra.mxu1 %v11270_v11  ;;  %v852_v10 = vpack.c.bf16 %v690_v5, %v688_v4  ;;  %v605_v11 = vrot.slane %v13497_v62, 2  ;;  %v620_v63 = vrot.slane %v13553_v43, 2  ;;  %v705_v3 = vrot.slane %v13568_v2, 3  ;;  %v13572_v4 = vld [vmem:[%s12934_s30 + $0xe0] sm:$0xff] }
 0x18b   : > { %2155 = vmatprep.subr.bf16.mxu0 %v11275_v16  ;;  %2614 = vmatprep.subr.bf16.mxu1 %v11278_v18  ;;  %v13520_v16 = vld [vmem:[%s12934_s30 + $0xa0] sm:$0xff]  ;;  %v609_v23 = vsel %vm576_vm2, %v606_v12, %v608_v13  ;;  %v707_v5 = vrot.slane %v13572_v4, 3 }
 0x18c   : > { %v693_v18 = vrot.slane %v13520_v16, 3  ;;  %v607_v22 = vsel %vm576_vm2, %v605_v11, %v606_v12  ;;  %v612_v27 = vrot.slane %v13520_v16, 2  ;;  %v621_v11 = vsel %vm576_vm2, %v619_v52, %v620_v63  ;;  %v11300_v52 = vld [vmem:[#allocation5 + $0x28] ss:$16 sps:$4 sm:$0xff]  }
 0x18e   : > { %2156 = vmatpush1.bf16.msra.mxu0 %v11273_v8  ;;  %2615 = vmatpush1.bf16.msra.mxu1 %v11276_v9  ;;  %v695_v7 = vsel %vm657_vm1, %v693_v18, %v694_v20  ;;  %v851_v8 = vpack.c.bf16 %v609_v23, %v607_v22  ;;  %v624_v22 = vrot.slane %v13568_v2, 2  ;;  %v626_v23 = vrot.slane %v13572_v4, 2 }
 0x18f   : > { %2157 = vmatprep.subr.bf16.mxu0 %v11281_v29  ;;  %2616 = vmatprep.subr.bf16.mxu1 %v11284_v32  ;;  %v857_v9 = vpack.c.bf16 %v695_v7, %v692_v24  ;;  %v613_v29 = vrot.slane %v13524_v19, 2  ;;  %v13535_v32 = vld [vmem:[%s12934_s30 + $0xb0] sm:$0xff] }
 0x190   : > { %2055 = vmatmul.mubr.bf16.gmra.mrb[12].mxu0 %v836_v35  ;;  %2514 = vmatmul.mubr.bf16.gmra.mrb[12].mxu1 %v836_v35  ;;  %v696_v33 = vrot.slane %v13535_v32, 3  ;;  %v698_v35 = vrot.slane %v13539_v34, 3  ;;  %v13587_v7 = vld [vmem:[%s12934_s30 + $0xf0] sm:$0xff] }
 0x191   : > { %2064 = vmatprep.mubr.bf16.mxu0 %v842_v38  ;;  %2523 = vmatprep.mubr.bf16.mxu1 %v842_v38 }
 0x192   : > { %2158 = vmatpush1.bf16.msra.mxu0 %v11279_v36  ;;  %2617 = vmatpush1.bf16.msra.mxu1 %v11282_v31  ;;  %v611_v36 = vsel %vm576_vm2, %v608_v13, %v610_v25  ;;  %v614_v31 = vsel %vm576_vm2, %v612_v27, %v613_v29  ;;  %v697_v38 = vsel %vm657_vm1, %v694_v20, %v696_v33 }
 0x193   : > { %2159 = vmatprep.subr.bf16.mxu0 %v11287_v21  ;;  %2618 = vmatprep.subr.bf16.mxu1 %v11290_v41  ;;  %v699_v39 = vsel %vm657_vm1, %v696_v33, %v698_v35  ;;  %v856_v40 = vpack.c.bf16 %v614_v31, %v611_v36  ;;  %v615_v21 = vrot.slane %v13535_v32, 2  ;;  %v617_v41 = vrot.slane %v13539_v34, 2 }
 0x194   : > { %v862_v17 = vpack.c.bf16 %v699_v39, %v697_v38  ;;  %v629_v38 = vrot.slane %v13587_v7, 2 }
 0x195   : > { %v616_v54 = vsel %vm576_vm2, %v613_v29, %v615_v21  ;;  %v618_v55 = vsel %vm576_vm2, %v615_v21, %v617_v41  ;;  %v739_v41 = vrot.slane %v13334_v14, 4  ;;  %v744_v14 = vrot.slane %v13359_v26, 4  ;;  %v11308_v26 = vld [vmem:[#allocation5 + $0x4c] ss:$16 sps:$4 sm:$0xff]  }
 0x196   : > { %2160 = vmatpush1.bf16.msra.mxu0 %v11285_v45  ;;  %2619 = vmatpush1.bf16.msra.mxu1 %v11288_v46  ;;  %v13557_v45 = vld [vmem:[%s12934_s30 + $0xd0] sm:$0xff]  ;;  %v861_v60 = vpack.c.bf16 %v618_v55, %v616_v54 }
 0x197   : > { %v703_v46 = vrot.slane %v13557_v45, 3  ;;  %6022 = vmatprep.subr.bf16.mxu0 %v11293_v51  ;;  %6387 = vmatprep.subr.bf16.mxu1 %v11296_v56  ;;  %v622_v1 = vrot.slane %v13557_v45, 2  ;;  %v11291_v56 = vld [vmem:[#allocation5] ss:$16 sps:$4 sm:$0xff]  }
 0x198   : > { %2065 = vmatmul.mubr.bf16.gmra.mrb[16].mxu0 %v841_v57  ;;  %2524 = vmatmul.mubr.bf16.gmra.mrb[16].mxu1 %v841_v57  ;;  %v702_v57 = vsel %vm657_vm1, %v700_v42, %v701_v44  ;;  %v740_v42 = vrot.slane %v13338_v15, 4  ;;  %v746_v15 = vrot.slane %v13363_v28, 4 }
 0x199   : > { %2074 = vmatprep.mubr.bf16.mxu0 %v847_v59  ;;  %2533 = vmatprep.mubr.bf16.mxu1 %v847_v59  ;;  %v704_v59 = vsel %vm657_vm1, %v701_v44, %v703_v46  ;;  %v623_v12 = vsel %vm576_vm2, %v620_v63, %v622_v1  ;;  %v706_v13 = vsel %vm657_vm1, %v703_v46, %v705_v3  ;;  %v742_v44 = vrot.slane %v13342_v49, 4  ;;  %v11305_v3 = vld [vmem:[#allocation5 + $0x44] ss:$16 sps:$4 sm:$0xff]  }
 0x19a   : > { %v867_v61 = vpack.c.bf16 %v704_v59, %v702_v57  ;;  %v866_v18 = vpack.c.bf16 %v623_v12, %v621_v11  ;;  %v625_v27 = vsel %vm576_vm2, %v622_v1, %v624_v22  ;;  %v12518_v46 = vmov 0   ;;  %v11294_v57 = vld [vmem:[#allocation5 + $0x8] ss:$16 sps:$4 sm:$0xff]   ;;  %v11299_v59 = vld [vmem:[#allocation5 + $0x24] ss:$16 sps:$4 sm:$0xff]  }
 0x19b   : > { %v741_v51 = vsel %vm738_vm3, %v739_v41, %v740_v42  ;;  %v743_v54 = vsel %vm738_vm3, %v740_v42, %v742_v44  ;;  %v747_v49 = vrot.slane %v13367_v30, 4  ;;  %v745_v63 = vsel %vm738_vm3, %v742_v44, %v744_v14  ;;  %v11303_v30 = vld [vmem:[#allocation5 + $0x40] ss:$16 sps:$4 sm:$0xff]   ;;  %v11311_v12 = vld [vmem:[#allocation5 + $0x64] ss:$16 sps:$4 sm:$0xff]  }
 0x19c   : > { %v823_v55 = vpack.c.bf16 %v743_v54, %v741_v51  ;;  %v751_v11 = vrot.slane %v13405_v53, 4  ;;  %v11320_v22 = vld [vmem:[#allocation5 + $0x8c] ss:$16 sps:$4 sm:$0xff]   ;;  %v11329_v41 = vld [vmem:[#allocation5 + $0xc4] ss:$16 sps:$4 sm:$0xff]  }
 0x19d   : > { %v748_v1 = vsel %vm738_vm3, %v746_v15, %v747_v49  ;;  %v11332_v42 = vld [vmem:[#allocation5 + $0xcc] ss:$16 sps:$4 sm:$0xff]   ;;  %v11327_v51 = vld [vmem:[#allocation5 + $0xc0] ss:$16 sps:$4 sm:$0xff]   ;;  %v11330_v54 = vld [vmem:[#allocation5 + $0xc8] ss:$16 sps:$4 sm:$0xff]  }
 0x19e   : > { %v828_v28 = vpack.c.bf16 %v748_v1, %v745_v63  ;;  %v12228_v15 = vld [vmem:[%s12934_s30 + $0x68] sm:$0xff]  ;;  %v12230_v1 = vld [vmem:[%s12934_s30 + $0x78] sm:$0xff] }
 0x1a0   : > { %2075 = vmatmul.mubr.bf16.gmra.mrb[20].mxu0 %v846_v6  ;;  %2534 = vmatmul.mubr.bf16.gmra.mrb[20].mxu1 %v846_v6  ;;  %v13576_v6 = vld [vmem:[%s12934_s30 + $0xe8] sm:$0xff] }
 0x1a1   : > { %2084 = vmatprep.mubr.bf16.mxu0 %v852_v10  ;;  %2543 = vmatprep.mubr.bf16.mxu1 %v852_v10  ;;  %v708_v10 = vrot.slane %v13576_v6, 3  ;;  %v627_v24 = vrot.slane %v13576_v6, 2 }
 0x1a3   : > { %v709_v48 = vsel %vm657_vm1, %v707_v5, %v708_v10  ;;  %v628_v29 = vsel %vm576_vm2, %v626_v23, %v627_v24  ;;  %v11306_v5 = vld [vmem:[#allocation5 + $0x48] ss:$16 sps:$4 sm:$0xff]  }
 0x1a4   : > { %v872_v20 = vpack.c.bf16 %v709_v48, %v706_v13  ;;  %v871_v36 = vpack.c.bf16 %v628_v29, %v625_v27  ;;  %v11314_v13 = vld [vmem:[#allocation5 + $0x6c] ss:$16 sps:$4 sm:$0xff]   ;;  %v11309_v48 = vld [vmem:[#allocation5 + $0x60] ss:$16 sps:$4 sm:$0xff]   ;;  %v12224_v29 = vld [vmem:[%s12934_s30 + $0x48] sm:$0xff] }
 0x1a8   : > { %2085 = vmatmul.mubr.bf16.gmra.mrb[24].mxu0 %v851_v8  ;;  %2544 = vmatmul.mubr.bf16.gmra.mrb[24].mxu1 %v851_v8  ;;  %v710_v8 = vrot.slane %v13587_v7, 3 }
 0x1a9   : > { %2094 = vmatprep.mubr.bf16.mxu0 %v857_v9  ;;  %2553 = vmatprep.mubr.bf16.mxu1 %v857_v9  ;;  %v13591_v9 = vld [vmem:[%s12934_s30 + $0xf8] sm:$0xff] }
 0x1aa   : > { %v712_v25 = vrot.slane %v13591_v9, 3  ;;  %v711_v33 = vsel %vm657_vm1, %v708_v10, %v710_v8  ;;  %v631_v39 = vrot.slane %v13591_v9, 2  ;;  %v749_v10 = vrot.slane %v13401_v50, 4 }
 0x1ac   : > { %v713_v35 = vsel %vm657_vm1, %v710_v8, %v712_v25  ;;  %v750_v50 = vsel %vm738_vm3, %v747_v49, %v749_v10  ;;  %v752_v53 = vsel %vm738_vm3, %v749_v10, %v751_v11  ;;  %v11318_v8 = vld [vmem:[#allocation5 + $0x88] ss:$16 sps:$4 sm:$0xff]   ;;  %v12223_v25 = vld [vmem:[%s12934_s30 + $0x40] sm:$0xff]  ;;  %v761_v49 = vrot.slane %v12228_v15, 4 }
 0x1ad   : > { %v877_v31 = vpack.c.bf16 %v713_v35, %v711_v33  ;;  %v833_v23 = vpack.c.bf16 %v752_v53, %v750_v50  ;;  %v753_v27 = vrot.slane %v12223_v25, 4  ;;  %v754_v33 = vrot.slane %v12224_v29, 4  ;;  %v12225_v35 = vld [vmem:[%s12934_s30 + $0x50] sm:$0xff] }
 0x1ae   : > { %v768_v10 = vrot.slane %v13501_v58, 4  ;;  %v770_v11 = vrot.slane %v13505_v0, 4  ;;  %v774_v50 = vrot.slane %v13520_v16, 4  ;;  %v791_v25 = vrot.slane %v13587_v7, 4  ;;  %v11357_v15 = vld [vmem:[#allocation5 + $0x160] ss:$16 sps:$4 sm:$0xff]  }
 0x1b0   : > { %2095 = vmatmul.mubr.bf16.gmra.mrb[28].mxu0 %v856_v40  ;;  %2554 = vmatmul.mubr.bf16.gmra.mrb[28].mxu1 %v856_v40  ;;  %v630_v40 = vsel %vm576_vm2, %v627_v24, %v629_v38  ;;  %v11315_v24 = vld [vmem:[#allocation5 + $0x80] ss:$16 sps:$4 sm:$0xff]  }
 0x1b1   : > { %2104 = vmatprep.mubr.bf16.mxu0 %v862_v17  ;;  %2563 = vmatprep.mubr.bf16.mxu1 %v862_v17  ;;  %v632_v17 = vsel %vm576_vm2, %v629_v38, %v631_v39  ;;  %v11326_v38 = vld [vmem:[#allocation5 + $0xac] ss:$16 sps:$4 sm:$0xff]   ;;  %v11321_v39 = vld [vmem:[#allocation5 + $0xa0] ss:$16 sps:$4 sm:$0xff]  }
 0x1b2   : > { %v876_v21 = vpack.c.bf16 %v632_v17, %v630_v40  ;;  %v11324_v40 = vld [vmem:[#allocation5 + $0xa8] ss:$16 sps:$4 sm:$0xff]   ;;  %v755_v17 = vsel %vm738_vm3, %v753_v27, %v754_v33  ;;  %v793_v27 = vrot.slane %v13591_v9, 4 }
 0x1b4   : > { %v794_v9 = vsel %vm738_vm3, %v791_v25, %v793_v27 }
 0x1b8   : > { %2105 = vmatmul.mubr.bf16.gmra.mrb[32].mxu0 %v861_v60  ;;  %2564 = vmatmul.mubr.bf16.gmra.mrb[32].mxu1 %v861_v60  ;;  %v11302_v60 = vld [vmem:[#allocation5 + $0x2c] ss:$16 sps:$4 sm:$0xff]  }
 0x1b9   : > { %2114 = vmatprep.mubr.bf16.mxu0 %v867_v61  ;;  %2573 = vmatprep.mubr.bf16.mxu1 %v867_v61  ;;  %v11297_v61 = vld [vmem:[#allocation5 + $0x20] ss:$16 sps:$4 sm:$0xff]  }
 0x1c0   : > { %2115 = vmatmul.mubr.bf16.gmra.mrb[36].mxu0 %v866_v18  ;;  %2574 = vmatmul.mubr.bf16.gmra.mrb[36].mxu1 %v866_v18  ;;  %v11312_v18 = vld [vmem:[#allocation5 + $0x68] ss:$16 sps:$4 sm:$0xff]  }
 0x1c1   : > { %2124 = vmatprep.mubr.bf16.mxu0 %v872_v20  ;;  %2583 = vmatprep.mubr.bf16.mxu1 %v872_v20  ;;  %v11317_v20 = vld [vmem:[#allocation5 + $0x84] ss:$16 sps:$4 sm:$0xff]  }
 0x1c8   : > { %2125 = vmatmul.mubr.bf16.gmra.mrb[40].mxu0 %v871_v36  ;;  %2584 = vmatmul.mubr.bf16.gmra.mrb[40].mxu1 %v871_v36  ;;  %v756_v36 = vrot.slane %v12225_v35, 4  ;;  %v11335_v35 = vld [vmem:[#allocation5 + $0xe4] ss:$16 sps:$4 sm:$0xff]  }
 0x1c9   : > { %2134 = vmatprep.mubr.bf16.mxu0 %v877_v31  ;;  %2593 = vmatprep.mubr.bf16.mxu1 %v877_v31  ;;  %v11323_v31 = vld [vmem:[#allocation5 + $0xa4] ss:$16 sps:$4 sm:$0xff]  }
 0x1d0   : > { %2135 = vmatmul.mubr.bf16.gmra.mrb[44].mxu0 %v876_v21  ;;  %2594 = vmatmul.mubr.bf16.gmra.mrb[44].mxu1 %v876_v21  ;;  %v757_v21 = vsel %vm738_vm3, %v754_v33, %v756_v36 }
 0x1d1   : > { %2177 = vmatprep.mubr.bf16.mxu0 %v12518_v46  ;;  %2636 = vmatprep.mubr.bf16.mxu1 %v12518_v46  ;;  %v838_v44 = vpack.c.bf16 %v757_v21, %v755_v17  ;;  %v11339_v17 = vld [vmem:[#allocation5 + $0x100] ss:$16 sps:$4 sm:$0xff]   ;;  %v11342_v21 = vld [vmem:[#allocation5 + $0x108] ss:$16 sps:$4 sm:$0xff]  }
 0x1d8   : > { %2178 = vmatmul.mubr.bf16.vlgmr.msra.gmra.mrb[0].mxu0 %v823_v55  ;;  %2637 = vmatmul.mubr.bf16.vlgmr.msra.gmra.mrb[0].mxu1 %v823_v55  ;;  %v12226_v55 = vld [vmem:[%s12934_s30 + $0x58] sm:$0xff] }
 0x1d9   : > { %2187 = vmatprep.mubr.bf16.mxu0 %v12518_v46  ;;  %2646 = vmatprep.mubr.bf16.mxu1 %v12518_v46 }
 0x1da   : > { %6023 = vmatpush1.bf16.msra.mxu0 %v11291_v56  ;;  %6388 = vmatpush1.bf16.msra.mxu1 %v11294_v57  ;;  %v758_v56 = vrot.slane %v12226_v55, 4  ;;  %v12227_v57 = vld [vmem:[%s12934_s30 + $0x60] sm:$0xff] }
 0x1db   : > { %6024 = vmatprep.subr.bf16.mxu0 %v11299_v59  ;;  %6389 = vmatprep.subr.bf16.mxu1 %v11302_v60  ;;  %v760_v14 = vrot.slane %v12227_v57, 4  ;;  %v11351_v55 = vld [vmem:[#allocation5 + $0x140] ss:$16 sps:$4 sm:$0xff]   ;;  %v11359_v57 = vld [vmem:[#allocation5 + $0x164] ss:$16 sps:$4 sm:$0xff]  }
 0x1dc   : > { %v759_v59 = vsel %vm738_vm3, %v756_v36, %v758_v56  ;;  %v11338_v36 = vld [vmem:[#allocation5 + $0xec] ss:$16 sps:$4 sm:$0xff]   ;;  %v11354_v56 = vld [vmem:[#allocation5 + $0x148] ss:$16 sps:$4 sm:$0xff]  }
 0x1dd   : > { %v762_v60 = vsel %vm738_vm3, %v760_v14, %v761_v49  ;;  %v11362_v14 = vld [vmem:[#allocation5 + $0x16c] ss:$16 sps:$4 sm:$0xff]  }
 0x1de   : > { %6025 = vmatpush1.bf16.msra.mxu0 %v11297_v61  ;;  %6390 = vmatpush1.bf16.msra.mxu1 %v11300_v52  ;;  %v843_v61 = vpack.c.bf16 %v762_v60, %v759_v59  ;;  %v12229_v52 = vld [vmem:[%s12934_s30 + $0x70] sm:$0xff]  ;;  %v11365_v59 = vld [vmem:[#allocation5 + $0x184] ss:$16 sps:$4 sm:$0xff]   ;;  %s420_s30 = sand.u32 1, %s12497_s10  }
 0x1df   : > { %6026 = vmatprep.subr.bf16.mxu0 %v11305_v3  ;;  %6391 = vmatprep.subr.bf16.mxu1 %v11308_v26  ;;  %v763_v63 = vrot.slane %v12229_v52, 4  ;;  %v765_v3 = vrot.slane %v12230_v1, 4  ;;  %v11368_v60 = vld [vmem:[#allocation5 + $0x18c] ss:$16 sps:$4 sm:$0xff]   ;;  %v11366_v52 = vld [vmem:[#allocation5 + $0x188] ss:$16 sps:$4 sm:$0xff]  }
 0x1e0   : > { %2188 = vmatmul.mubr.bf16.gmra.mrb[4].mxu0 %v828_v28  ;;  %2647 = vmatmul.mubr.bf16.gmra.mrb[4].mxu1 %v828_v28  ;;  %v11374_v1 = vld [vmem:[#allocation5 + $0x1ac] ss:$16 sps:$4 sm:$0xff]   ;;  %s9766_s16 = sshll.u32 %s420_s30, 3  ;;  %s9607_s20 = scalar_lea.sflag [#allocation4], %s420_s30 }
 0x1e1   : > { %2197 = vmatprep.mubr.bf16.mxu0 %v12518_v46  ;;  %2656 = vmatprep.mubr.bf16.mxu1 %v12518_v46  ;;  %v764_v26 = vsel %vm738_vm3, %v761_v49, %v763_v63  ;;  %v766_v28 = vsel %vm738_vm3, %v763_v63, %v765_v3  ;;  %v11360_v49 = vld [vmem:[#allocation5 + $0x168] ss:$16 sps:$4 sm:$0xff]   ;;  %v11371_v63 = vld [vmem:[#allocation5 + $0x1a4] ss:$16 sps:$4 sm:$0xff]   ;;  %v11369_v3 = vld [vmem:[#allocation5 + $0x1a0] ss:$16 sps:$4 sm:$0xff]  }
 0x1e2   : > { %6027 = vmatpush1.bf16.msra.mxu0 %v11303_v30  ;;  %6392 = vmatpush1.bf16.msra.mxu1 %v11306_v5  ;;  %v848_v30 = vpack.c.bf16 %v766_v28, %v764_v26  ;;  %v767_v5 = vrot.slane %v13497_v62, 4  ;;  %v775_v62 = vrot.slane %v13524_v19, 4  ;;  %v781_v19 = vrot.slane %v13549_v37, 4  ;;  %v11372_v26 = vld [vmem:[#allocation5 + $0x1a8] ss:$16 sps:$4 sm:$0xff]   ;;  %s422_s26 = scalar_lea.vmem [#allocation14], %s9766_s16 }
 0x1e3   : > { %6028 = vmatprep.subr.bf16.mxu0 %v11311_v12  ;;  %6393 = vmatprep.subr.bf16.mxu1 %v11314_v13  ;;  %v771_v13 = vsel %vm738_vm3, %v768_v10, %v770_v11  ;;  %v11377_v28 = vld [vmem:[#allocation5 + $0x1c4] ss:$16 sps:$4 sm:$0xff]   ;;  %s9620_s11 = sshll.u32 %s422_s26, 4  ;;  %s15512_s11 = int_to_ptr.vmem [resolvable:$true] %s9620_s11 }
 0x1e4   : > { %v769_v12 = vsel %vm738_vm3, %v767_v5, %v768_v10  ;;  %v776_v0 = vsel %vm738_vm3, %v774_v50, %v775_v62  ;;  %v11375_v5 = vld [vmem:[#allocation5 + $0x1c0] ss:$16 sps:$4 sm:$0xff]   ;;  %v11378_v10 = vld [vmem:[#allocation5 + $0x1c8] ss:$16 sps:$4 sm:$0xff]   ;;  %v11392_v50 = vld [vmem:[#allocation5 + $0x20c] ss:$16 sps:$4 sm:$0xff]   ;;  %p12434_p5 = scmp.lt.s32.totalorder %s15512_s11, %s12432_s22 }
 0x1e5   : > { %s12427_s17 = scalar_lea.vmem %s15512_s11, 128 }
 0x1e6   : > { %6029 = vmatpush1.bf16.msra.mxu0 %v11309_v48  ;;  %6394 = vmatpush1.bf16.msra.mxu1 %v11312_v18  ;;  %v853_v48 = vpack.c.bf16 %v771_v13, %v769_v12  ;;  %v772_v18 = vrot.slane %v13516_v47, 4  ;;  %v11386_v12 = vld [vmem:[#allocation5 + $0x1ec] ss:$16 sps:$4 sm:$0xff]   ;;  %v11381_v13 = vld [vmem:[#allocation5 + $0x1e0] ss:$16 sps:$4 sm:$0xff]   ;;  %p12428_p13 = scmp.ne.s32.totalorder %s15512_s11, %s12427_s17  ;;  %p12435_p10 = scmp.lt.s32.totalorder %s12433_s25, %s12427_s17 }
 0x1e7   : > { %6030 = vmatprep.subr.bf16.mxu0 %v11317_v20  ;;  %6395 = vmatprep.subr.bf16.mxu1 %v11320_v22  ;;  %v777_v20 = vrot.slane %v13535_v32, 4  ;;  %v779_v22 = vrot.slane %v13539_v34, 4  ;;  %v786_v32 = vrot.slane %v13568_v2, 4  ;;  %v788_v34 = vrot.slane %v13572_v4, 4 }
 0x1e8   : > { %2198 = vmatmul.mubr.bf16.gmra.mrb[8].mxu0 %v833_v23  ;;  %2657 = vmatmul.mubr.bf16.gmra.mrb[8].mxu1 %v833_v23  ;;  %v773_v58 = vsel %vm738_vm3, %v770_v11, %v772_v18  ;;  %v782_v23 = vrot.slane %v13553_v43, 4  ;;  %v11383_v11 = vld [vmem:[#allocation5 + $0x1e4] ss:$16 sps:$4 sm:$0xff]   ;;  %p12429_p6 = pnand %p12428_p13, %p15769_p1  ;;  %p12436_p0 = por %p12435_p10, %p12434_p5 }
 0x1e9   : > { %2207 = vmatprep.mubr.bf16.mxu0 %v12518_v46  ;;  %2666 = vmatprep.mubr.bf16.mxu1 %v12518_v46  ;;  %v858_v53 = vpack.c.bf16 %v776_v0, %v773_v58  ;;  %v778_v47 = vsel %vm738_vm3, %v775_v62, %v777_v20  ;;  %v780_v16 = vsel %vm738_vm3, %v777_v20, %v779_v22  ;;  %v11389_v18 = vld [vmem:[#allocation5 + $0x204] ss:$16 sps:$4 sm:$0xff]   ;;  %v2759_v62 = vlaneseq  ;;  %v2757_v20 = vld [vmem:[#allocation2] sm:$0xf] }
 0x1ea   : > { %6031 = vmatpush1.bf16.msra.mxu0 %v11315_v24  ;;  %6396 = vmatpush1.bf16.msra.mxu1 %v11318_v8  ;;  %v784_v24 = vrot.slane %v13557_v45, 4  ;;  %v789_v8 = vrot.slane %v13576_v6, 4  ;;  %v863_v29 = vpack.c.bf16 %v780_v16, %v778_v47  ;;  %v783_v37 = vsel %vm738_vm3, %v781_v19, %v782_v23  ;;  %p12430_p9 = pneg %p12429_p6 }
 0x1eb   : > { %6032 = vmatprep.subr.bf16.mxu0 %v11323_v31  ;;  %6397 = vmatprep.subr.bf16.mxu1 %v11326_v38  ;;  %v11333_v31 = vld [vmem:[#allocation5 + $0xe0] ss:$16 sps:$4 sm:$0xff]   ;;  %v11336_v38 = vld [vmem:[#allocation5 + $0xe8] ss:$16 sps:$4 sm:$0xff]   ;;  %v2760_v58 = vshrl.u32 %v2759_v62, 7 }
 0x1ec   : > { %v785_v43 = vsel %vm738_vm3, %v782_v23, %v784_v24  ;;  %v787_v2 = vsel %vm738_vm3, %v784_v24, %v786_v32  ;;  %v790_v4 = vsel %vm738_vm3, %v788_v34, %v789_v8  ;;  %v792_v7 = vsel %vm738_vm3, %v789_v8, %v791_v25  ;;  %p12437_p2 = pnand %p12436_p0, %p12430_p9 }
 0x1ed   : > { %v868_v45 = vpack.c.bf16 %v785_v43, %v783_v37  ;;  %v873_v6 = vpack.c.bf16 %v790_v4, %v787_v2  ;;  %v878_v33 = vpack.c.bf16 %v794_v9, %v792_v7  ;;  %v13682_v0 = vsub.s32 0, %v2760_v58 }
 0x1ee   : > { %6033 = vmatpush1.bf16.msra.mxu0 %v11321_v39  ;;  %6398 = vmatpush1.bf16.msra.mxu1 %v11324_v40  ;;  %v11341_v39 = vld [vmem:[#allocation5 + $0x104] ss:$16 sps:$4 sm:$0xff]   ;;  %v11344_v40 = vld [vmem:[#allocation5 + $0x10c] ss:$16 sps:$4 sm:$0xff]   ;;  %v13686_v22 = vsub.s32 1, %v2760_v58  ;;  %v13688_v47 = vsub.s32 3, %v2760_v58 }
 0x1ef   : > { %6034 = vmatprep.subr.bf16.mxu0 %v11329_v41  ;;  %6399 = vmatprep.subr.bf16.mxu1 %v11332_v42  ;;  %v11350_v41 = vld [vmem:[#allocation5 + $0x12c] ss:$16 sps:$4 sm:$0xff]   ;;  %v11345_v42 = vld [vmem:[#allocation5 + $0x120] ss:$16 sps:$4 sm:$0xff]   ;;  %15620 = vst [vmem:[#allocation25_spill] sm:$0xff] %v13682_v0  ;;  %v13691_v16 = vrot.slane %v2757_v20, %v13682_v0 }
 0x1f0   : > { %2208 = vmatmul.mubr.bf16.gmra.mrb[12].mxu0 %v838_v44  ;;  %2667 = vmatmul.mubr.bf16.gmra.mrb[12].mxu1 %v838_v44  ;;  %v11348_v44 = vld [vmem:[#allocation5 + $0x128] ss:$16 sps:$4 sm:$0xff]   ;;  %15622 = vst [vmem:[#allocation27_spill] sm:$0xff] %v13686_v22  ;;  %15623 = vst [vmem:[#allocation28_spill] sm:$0xff] %v13688_v47  ;;  %v13697_v23 = vrot.slane %v2757_v20, %v13686_v22  ;;  %v13700_v24 = vrot.slane %v2757_v20, %v13688_v47 }
 0x1f1   : > { %2217 = vmatprep.mubr.bf16.mxu0 %v12518_v46  ;;  %2676 = vmatprep.mubr.bf16.mxu1 %v12518_v46 }
 0x1f2   : > { %6035 = vmatpush1.bf16.msra.mxu0 %v11327_v51  ;;  %6400 = vmatpush1.bf16.msra.mxu1 %v11330_v54  ;;  %v11353_v51 = vld [vmem:[#allocation5 + $0x144] ss:$16 sps:$4 sm:$0xff]   ;;  %v11356_v54 = vld [vmem:[#allocation5 + $0x14c] ss:$16 sps:$4 sm:$0xff]  }
 0x1f3   : > { %6036 = vmatprep.subr.bf16.mxu0 %v11335_v35  ;;  %6401 = vmatprep.subr.bf16.mxu1 %v11338_v36 }
 0x1f6   : > { %6037 = vmatpush1.bf16.msra.mxu0 %v11333_v31  ;;  %6402 = vmatpush1.bf16.msra.mxu1 %v11336_v38 }
 0x1f7   : > { %6038 = vmatprep.subr.bf16.mxu0 %v11341_v39  ;;  %6403 = vmatprep.subr.bf16.mxu1 %v11344_v40 }
 0x1f8   : > { %2218 = vmatmul.mubr.bf16.gmra.mrb[16].mxu0 %v843_v61  ;;  %2677 = vmatmul.mubr.bf16.gmra.mrb[16].mxu1 %v843_v61  ;;  %v11363_v61 = vld [vmem:[#allocation5 + $0x180] ss:$16 sps:$4 sm:$0xff]  }
 0x1f9   : > { %2227 = vmatprep.mubr.bf16.mxu0 %v12518_v46  ;;  %2686 = vmatprep.mubr.bf16.mxu1 %v12518_v46 }
 0x1fa   : > { %6039 = vmatpush1.bf16.msra.mxu0 %v11339_v17  ;;  %6404 = vmatpush1.bf16.msra.mxu1 %v11342_v21 }
 0x1fb   : > { %6405 = vmatprep.subr.bf16.mxu1 %v11350_v41 }
 0x1fe   : > { %6406 = vmatpush1.bf16.msra.mxu1 %v11348_v44 }
 0x1ff   : > { %6407 = vmatprep.subr.bf16.mxu1 %v11356_v54 }
 0x200   : > { %2228 = vmatmul.mubr.bf16.gmra.mrb[20].mxu0 %v848_v30  ;;  %2687 = vmatmul.mubr.bf16.gmra.mrb[20].mxu1 %v848_v30  ;;  %v11380_v30 = vld [vmem:[#allocation5 + $0x1cc] ss:$16 sps:$4 sm:$0xff]  }
 0x201   : > { %2237 = vmatprep.mubr.bf16.mxu0 %v12518_v46  ;;  %2696 = vmatprep.mubr.bf16.mxu1 %v12518_v46 }
 0x202   : > { %6408 = vmatpush1.bf16.msra.mxu1 %v11354_v56 }
 0x203   : > { %6409 = vmatprep.subr.bf16.mxu1 %v11362_v14 }
 0x206   : > { %6410 = vmatpush1.bf16.msra.mxu1 %v11360_v49 }
 0x207   : > { %6411 = vmatprep.subr.bf16.mxu1 %v11368_v60 }
 0x208   : > { %2238 = vmatmul.mubr.bf16.gmra.mrb[24].mxu0 %v853_v48  ;;  %2697 = vmatmul.mubr.bf16.gmra.mrb[24].mxu1 %v853_v48  ;;  %v11384_v48 = vld [vmem:[#allocation5 + $0x1e8] ss:$16 sps:$4 sm:$0xff]  }
 0x209   : > { %2247 = vmatprep.mubr.bf16.mxu0 %v12518_v46  ;;  %2706 = vmatprep.mubr.bf16.mxu1 %v12518_v46 }
 0x20a   : > { %6412 = vmatpush1.bf16.msra.mxu1 %v11366_v52 }
 0x20b   : > { %6413 = vmatprep.subr.bf16.mxu1 %v11374_v1 }
 0x20e   : > { %6414 = vmatpush1.bf16.msra.mxu1 %v11372_v26 }
 0x20f   : > { %6415 = vmatprep.subr.bf16.mxu1 %v11380_v30 }
 0x210   : > { %2248 = vmatmul.mubr.bf16.gmra.mrb[28].mxu0 %v858_v53  ;;  %2707 = vmatmul.mubr.bf16.gmra.mrb[28].mxu1 %v858_v53  ;;  %v13684_v53 = vsub.s32 2, %v2760_v58 }
 0x211   : > { %2257 = vmatprep.mubr.bf16.mxu0 %v12518_v46  ;;  %2716 = vmatprep.mubr.bf16.mxu1 %v12518_v46 }
 0x212   : > { %6416 = vmatpush1.bf16.msra.mxu1 %v11378_v10  ;;  %15621 = vst [vmem:[#allocation26_spill] sm:$0xff] %v13684_v53  ;;  %v13694_v19 = vrot.slane %v2757_v20, %v13684_v53 }
 0x213   : > { %6417 = vmatprep.subr.bf16.mxu1 %v11386_v12 }
 0x216   : > { %6418 = vmatpush1.bf16.msra.mxu1 %v11384_v48 }
 0x217   : > { %6460 = vmatprep.subr.bf16.mxu1 %v11392_v50 }
 0x218   : > { %2258 = vmatmul.mubr.bf16.gmra.mrb[32].mxu0 %v863_v29  ;;  %2717 = vmatmul.mubr.bf16.gmra.mrb[32].mxu1 %v863_v29 }
 0x219   : > { %2267 = vmatprep.mubr.bf16.mxu0 %v12518_v46  ;;  %2726 = vmatprep.mubr.bf16.mxu1 %v12518_v46 }
 0x220   : > { %2268 = vmatmul.mubr.bf16.gmra.mrb[36].mxu0 %v868_v45  ;;  %2727 = vmatmul.mubr.bf16.gmra.mrb[36].mxu1 %v868_v45 }
 0x221   : > { %2277 = vmatprep.mubr.bf16.mxu0 %v12518_v46  ;;  %2736 = vmatprep.mubr.bf16.mxu1 %v12518_v46 }
 0x228   : > { %2278 = vmatmul.mubr.bf16.gmra.mrb[40].mxu0 %v873_v6  ;;  %2737 = vmatmul.mubr.bf16.gmra.mrb[40].mxu1 %v873_v6 }
 0x229   : > { %2287 = vmatprep.mubr.bf16.mxu0 %v12518_v46  ;;  %2746 = vmatprep.mubr.bf16.mxu1 %v12518_v46  ;;  %v11347_v46 = vld [vmem:[#allocation5 + $0x124] ss:$16 sps:$4 sm:$0xff]  }
 0x22a   : > { %6040 = vmatprep.subr.bf16.mxu0 %v11347_v46 }
 0x22b   : > { %6041 = vmatpush1.bf16.msra.mxu0 %v11345_v42 }
 0x22c   : > { %6042 = vmatprep.subr.bf16.mxu0 %v11353_v51 }
 0x22f   : > { %6043 = vmatpush1.bf16.msra.mxu0 %v11351_v55 }
 0x230   : > { %2288 = vmatmul.mubr.bf16.gmra.mrb[44].mxu0 %v878_v33  ;;  %2747 = vmatmul.mubr.bf16.gmra.mrb[44].mxu1 %v878_v33 }
 0x231   : > { %6044 = vmatprep.subr.bf16.mxu0 %v11359_v57 }
 0x233   : > { %6045 = vmatpush1.bf16.msra.mxu0 %v11357_v15 }
 0x234   : > { %6046 = vmatprep.subr.bf16.mxu0 %v11365_v59 }
 0x237   : > { %6047 = vmatpush1.bf16.msra.mxu0 %v11363_v61 }
 0x238   : > { %6048 = vmatprep.subr.bf16.mxu0 %v11371_v63 }
 0x23b   : > { %6049 = vmatpush1.bf16.msra.mxu0 %v11369_v3 }
 0x23c   : > { %6050 = vmatprep.subr.bf16.mxu0 %v11377_v28 }
 0x23f   : > { %6051 = vmatpush1.bf16.msra.mxu0 %v11375_v5 }
 0x240   : > { %6052 = vmatprep.subr.bf16.mxu0 %v11383_v11 }
 0x243   : > { %6053 = vmatpush1.bf16.msra.mxu0 %v11381_v13 }
 0x244   : > { %6095 = vmatprep.subr.bf16.mxu0 %v11389_v18 }
 0x2ab   : > { %v2179_v32 = vpop.f32.mrb[0].mxu0  ;;  %v2638_v34 = vpop.f32.mrb[0].mxu1 }
 0x2ac   : > { %v2779_v8 = vadd.f32 %v13691_v16, %v2179_v32  ;;  %v2781_v25 = vadd.f32 %v13694_v19, %v2638_v34  ;;  %v2181_v27 = vpop.f32.mrb[1].mxu0  ;;  %v2640_v29 = vpop.f32.mrb[1].mxu1 }
 0x2ad   : > { %v2780_v37 = vadd.f32 %v13697_v23, %v2181_v27  ;;  %v2782_v43 = vadd.f32 %v13700_v24, %v2640_v29  ;;  %v2183_v45 = vpop.f32.mrb[2].mxu0  ;;  %v2642_v2 = vpop.f32.mrb[2].mxu1 }
 0x2ae   : > { %v2875_v4 = vmax.f32 %v2779_v8, 0.0  ;;  %v2877_v6 = vmax.f32 %v2781_v25, 0.0  ;;  %v2783_v7 = vadd.f32 %v13691_v16, %v2183_v45  ;;  %v2785_v9 = vadd.f32 %v13694_v19, %v2642_v2  ;;  %v2185_v33 = vpop.f32.mrb[3].mxu0  ;;  %v2644_v35 = vpop.f32.mrb[3].mxu1 }
 0x2af   : > { %v2876_v36 = vmax.f32 %v2780_v37, 0.0  ;;  %v2878_v31 = vmax.f32 %v2782_v43, 0.0  ;;  %v2784_v38 = vadd.f32 %v13697_v23, %v2185_v33  ;;  %v2786_v39 = vadd.f32 %v13700_v24, %v2644_v35 }
 0x2b0   : > { %v2971_v40 = vmax.f32 %v2875_v4, %v2877_v6  ;;  %v2879_v17 = vmax.f32 %v2783_v7, 0.0  ;;  %v2881_v21 = vmax.f32 %v2785_v9, 0.0 }
 0x2b1   : > { %v2972_v46 = vmax.f32 %v2876_v36, %v2878_v31  ;;  %v2880_v41 = vmax.f32 %v2784_v38, 0.0  ;;  %v2882_v42 = vmax.f32 %v2786_v39, 0.0 }
 0x2b2   : > { %v2973_v44 = vmax.f32 %v2879_v17, %v2881_v21  ;;  %v3067_v56 = vrot.slane %v2971_v40, 1 }
 0x2b3   : > { %v2974_v51 = vmax.f32 %v2880_v41, %v2882_v42  ;;  %v2189_v54 = vpop.f32.mrb[4].mxu0  ;;  %v2648_v55 = vpop.f32.mrb[4].mxu1  ;;  %v3070_v60 = vrot.slane %v2972_v46, 1 }
 0x2b4   : > { %v3068_v57 = vrot.slane %v2973_v44, 1  ;;  %v2787_v14 = vadd.f32 %v13691_v16, %v2189_v54  ;;  %v2789_v15 = vadd.f32 %v13694_v19, %v2648_v55  ;;  %v2191_v49 = vpop.f32.mrb[5].mxu0  ;;  %v2650_v59 = vpop.f32.mrb[5].mxu1 }
 0x2b5   : > { %v3071_v61 = vrot.slane %v2974_v51, 1  ;;  %v2788_v52 = vadd.f32 %v13697_v23, %v2191_v49  ;;  %v2790_v63 = vadd.f32 %v13700_v24, %v2650_v59  ;;  %v2193_v1 = vpop.f32.mrb[6].mxu0  ;;  %v2652_v3 = vpop.f32.mrb[6].mxu1 }
 0x2b6   : > { %v3069_v26 = vsel %vm495_vm0, %v3067_v56, %v3068_v57  ;;  %v2883_v28 = vmax.f32 %v2787_v14, 0.0  ;;  %v2885_v30 = vmax.f32 %v2789_v15, 0.0  ;;  %v2791_v5 = vadd.f32 %v13691_v16, %v2193_v1  ;;  %v2195_v10 = vpop.f32.mrb[7].mxu0  ;;  %v2654_v11 = vpop.f32.mrb[7].mxu1 }
 0x2b7   : > { %v3195_v12 = vmax.f32 %v2971_v40, %v3069_v26  ;;  %v3072_v13 = vsel %vm495_vm0, %v3070_v60, %v3071_v61  ;;  %v2884_v48 = vmax.f32 %v2788_v52, 0.0  ;;  %v2886_v18 = vmax.f32 %v2790_v63, 0.0 }
 0x2b8   : > { %v13717_v50 = vmax.f32 %v2972_v46, %v3072_v13  ;;  %v2975_v62 = vmax.f32 %v2883_v28, %v2885_v30  ;;  %v2887_v58 = vmax.f32 %v2791_v5, 0.0  ;;  %v2793_v20 = vadd.f32 %v13694_v19, %v2652_v3 }
 0x2b9   : > { %v3259_v32 = vrot.slane %v3195_v12, 1  ;;  %v3291_v34 = vrot.slane %v3195_v12, 2  ;;  %v3323_v8 = vrot.slane %v3195_v12, 3  ;;  %v2976_v25 = vmax.f32 %v2884_v48, %v2886_v18 }
 0x2ba   : > { %v3260_v27 = vrot.slane %v13717_v50, 1  ;;  %v3292_v29 = vrot.slane %v13717_v50, 2  ;;  %v3073_v43 = vrot.slane %v2975_v62, 1  ;;  %v2889_v4 = vmax.f32 %v2793_v20, 0.0 }
 0x2bb   : > { %v3612_v45 = vsel %vm3611_vm4, %v3195_v12, %v3259_v32  ;;  %v3075_v2 = vrot.slane %v2976_v25, 1  ;;  %v2792_v6 = vadd.f32 %v13697_v23, %v2195_v10  ;;  %v2199_v7 = vpop.f32.mrb[8].mxu0  ;;  %v2658_v9 = vpop.f32.mrb[8].mxu1  ;;  %v2794_v48 = vadd.f32 %v13700_v24, %v2654_v11 }
 0x2bc   : > { %v3629_v33 = vsel %vm3628_vm5, %v3612_v45, %v3291_v34  ;;  %v3613_v35 = vsel %vm3611_vm4, %v13717_v50, %v3260_v27  ;;  %v3074_v36 = vsel %vm495_vm0, %v3068_v57, %v3073_v43  ;;  %v3199_v31 = vmax.f32 %v2975_v62, %v3073_v43  ;;  %v2201_v38 = vpop.f32.mrb[9].mxu0  ;;  %v2660_v39 = vpop.f32.mrb[9].mxu1 }
 0x2bd   : > { %v3646_v40 = vsel %vm3645_vm6, %v3629_v33, %v3323_v8  ;;  %v13731_v17 = vsel %vm3628_vm5, %v3613_v35, %v3292_v29  ;;  %v13733_v21 = vmax.f32 %v2973_v44, %v3074_v36  ;;  %v3076_v46 = vsel %vm495_vm0, %v3071_v61, %v3075_v2  ;;  %v2203_v41 = vpop.f32.mrb[10].mxu0  ;;  %v2662_v42 = vpop.f32.mrb[10].mxu1 }
 0x2be   : > { %v3515_v54 = vrot.slane %v3199_v31, 1  ;;  %v3547_v55 = vrot.slane %v3199_v31, 2  ;;  %v3579_v56 = vrot.slane %v3199_v31, 3  ;;  %v13736_v14 = vmax.f32 %v2974_v51, %v3076_v46  ;;  %v2205_v57 = vpop.f32.mrb[11].mxu0  ;;  %v2664_v15 = vpop.f32.mrb[11].mxu1 }
 0x2bf   : > { %v3371_v49 = vrot.slane %v13733_v21, 4  ;;  %v13743_v61 = vmax.f32 %v2976_v25, %v3075_v2  ;;  %v2977_v26 = vmax.f32 %v2887_v58, %v2889_v4  ;;  %v2888_v28 = vmax.f32 %v2792_v6, 0.0 }
 0x2c0   : > { %v3726_v52 = vsel %vm3611_vm4, %v3199_v31, %v3515_v54  ;;  %v2795_v18 = vadd.f32 %v13691_v16, %v2199_v7  ;;  %v2797_v62 = vadd.f32 %v13694_v19, %v2658_v9  ;;  %v2796_v34 = vadd.f32 %v13697_v23, %v2201_v38 }
 0x2c1   : > { %15624 = vst [vmem:[#allocation29_spill] sm:$0xff] %v13743_v61  ;;  %v13748_v51 = vsel %vm738_vm3, %v3646_v40, %v3371_v49  ;;  %v3742_v3 = vsel %vm3628_vm5, %v3726_v52, %v3547_v55  ;;  %v3516_v5 = vrot.slane %v13743_v61, 1  ;;  %v3548_v10 = vrot.slane %v13743_v61, 2 }
 0x2c2   : > { %v13752_v30 = vsel %vm3645_vm6, %v3742_v3, %v3579_v56  ;;  %v3077_v13 = vrot.slane %v2977_v26, 1  ;;  %v2798_v8 = vadd.f32 %v13700_v24, %v2660_v39  ;;  %v2799_v25 = vadd.f32 %v13691_v16, %v2203_v41 }
 0x2c3   : > { %15625 = vst [vmem:[#allocation30_spill] sm:$0xff] %v13752_v30  ;;  %v2209_v20 = vpop.f32.mrb[12].mxu0  ;;  %v2668_v32 = vpop.f32.mrb[12].mxu1  ;;  %v3727_v58 = vsel %vm3611_vm4, %v13743_v61, %v3516_v5  ;;  %v2890_v11 = vmax.f32 %v2794_v48, 0.0  ;;  %v2891_v45 = vmax.f32 %v2795_v18, 0.0  ;;  %v2893_v2 = vmax.f32 %v2797_v62, 0.0 }
 0x2c4   : > { %v2211_v27 = vpop.f32.mrb[13].mxu0  ;;  %v2670_v29 = vpop.f32.mrb[13].mxu1  ;;  %v13766_v43 = vsel %vm3628_vm5, %v3727_v58, %v3548_v10  ;;  %v2892_v7 = vmax.f32 %v2796_v34, 0.0  ;;  %v2894_v9 = vmax.f32 %v2798_v8, 0.0  ;;  %v2895_v33 = vmax.f32 %v2799_v25, 0.0 }
 0x2c5   : > { %15626 = vst [vmem:[#allocation31_spill] sm:$0xff] %v13766_v43  ;;  %v13768_v4 = vpop.f32.mrb[14].mxu0  ;;  %v13770_v6 = vpop.f32.mrb[14].mxu1  ;;  %v2801_v35 = vadd.f32 %v13694_v19, %v2662_v42  ;;  %v2978_v38 = vmax.f32 %v2888_v28, %v2890_v11  ;;  %v2979_v39 = vmax.f32 %v2891_v45, %v2893_v2  ;;  %v2800_v40 = vadd.f32 %v13697_v23, %v2205_v57 }
 0x2c6   : > { %v13773_v36 = vpop.f32.mrb[15].mxu0  ;;  %v13775_v31 = vpop.f32.mrb[15].mxu1  ;;  %v2802_v46 = vadd.f32 %v13700_v24, %v2664_v15  ;;  %v2980_v41 = vmax.f32 %v2892_v7, %v2894_v9  ;;  %v2803_v55 = vadd.f32 %v13691_v16, %v2209_v20  ;;  %v2805_v56 = vadd.f32 %v13694_v19, %v2668_v32 }
 0x2c7   : > { %v2897_v54 = vmax.f32 %v2801_v35, 0.0  ;;  %v3080_v49 = vrot.slane %v2978_v38, 1  ;;  %v3078_v52 = vrot.slane %v2979_v39, 1  ;;  %v2896_v3 = vmax.f32 %v2800_v40, 0.0 }
 0x2c8   : > { %v2898_v42 = vmax.f32 %v2802_v46, 0.0  ;;  %v3081_v5 = vrot.slane %v2980_v41, 1  ;;  %v2899_v48 = vmax.f32 %v2803_v55, 0.0  ;;  %v2901_v18 = vmax.f32 %v2805_v56, 0.0 }
 0x2c9   : > { %v2981_v10 = vmax.f32 %v2895_v33, %v2897_v54  ;;  %v3079_v28 = vsel %vm495_vm0, %v3077_v13, %v3078_v52  ;;  %v2804_v57 = vadd.f32 %v13697_v23, %v2211_v27  ;;  %v2806_v15 = vadd.f32 %v13700_v24, %v2670_v29 }
 0x2ca   : > { %v2982_v62 = vmax.f32 %v2896_v3, %v2898_v42  ;;  %v3201_v32 = vmax.f32 %v2977_v26, %v3079_v28  ;;  %v3082_v34 = vsel %vm495_vm0, %v3080_v49, %v3081_v5  ;;  %v13789_v25 = vmax.f32 %v2899_v48, %v2901_v18 }
 0x2cb   : > { %v13784_v58 = vpop.f32.mrb[16].mxu0  ;;  %v13786_v20 = vpop.f32.mrb[16].mxu1  ;;  %v3083_v8 = vrot.slane %v2981_v10, 1  ;;  %v13795_v13 = vmax.f32 %v2978_v38, %v3082_v34  ;;  %v2900_v27 = vmax.f32 %v2804_v57, 0.0  ;;  %v2902_v7 = vmax.f32 %v2806_v15, 0.0 }
 0x2cc   : > { %v13791_v11 = vpop.f32.mrb[17].mxu0  ;;  %v13793_v45 = vpop.f32.mrb[17].mxu1  ;;  %v3085_v2 = vrot.slane %v2982_v62, 1  ;;  %v3261_v33 = vrot.slane %v3201_v32, 1  ;;  %v3293_v35 = vrot.slane %v3201_v32, 2  ;;  %v3325_v26 = vrot.slane %v3201_v32, 3 }
 0x2cd   : > { %v2223_v29 = vpop.f32.mrb[18].mxu0  ;;  %v13797_v9 = vpop.f32.mrb[18].mxu1  ;;  %v3084_v40 = vsel %vm495_vm0, %v3078_v52, %v3083_v8  ;;  %v3262_v55 = vrot.slane %v13795_v13, 1  ;;  %v3294_v38 = vrot.slane %v13795_v13, 2  ;;  %v3205_v42 = vmax.f32 %v2981_v10, %v3083_v8 }
 0x2ce   : > { %v13800_v46 = vpop.f32.mrb[19].mxu0  ;;  %v13802_v54 = vpop.f32.mrb[19].mxu1  ;;  %v13807_v49 = vmax.f32 %v2979_v39, %v3084_v40  ;;  %v3614_v3 = vsel %vm3611_vm4, %v3201_v32, %v3261_v33  ;;  %v3086_v48 = vsel %vm495_vm0, %v3081_v5, %v3085_v2  ;;  %v13811_v18 = vmax.f32 %v2982_v62, %v3085_v2 }
 0x2cf   : > { %v3631_v52 = vsel %vm3628_vm5, %v3614_v3, %v3293_v35  ;;  %v3615_v28 = vsel %vm3611_vm4, %v13795_v13, %v3262_v55  ;;  %v3517_v62 = vrot.slane %v3205_v42, 1  ;;  %v3549_v32 = vrot.slane %v3205_v42, 2 }
 0x2d0   : > { %15627 = vst [vmem:[#allocation32_spill] sm:$0xff] %v13811_v18  ;;  %v3373_v57 = vrot.slane %v13807_v49, 4  ;;  %v3648_v34 = vsel %vm3645_vm6, %v3631_v52, %v3325_v26  ;;  %v13820_v39 = vsel %vm3628_vm5, %v3615_v28, %v3294_v38  ;;  %v3581_v8 = vrot.slane %v3205_v42, 3 }
 0x2d1   : > { %v13829_v40 = vmax.f32 %v2980_v41, %v3086_v48  ;;  %v3518_v26 = vrot.slane %v13811_v18, 1  ;;  %v3550_v55 = vrot.slane %v13811_v18, 2  ;;  %v3728_v28 = vsel %vm3611_vm4, %v3205_v42, %v3517_v62 }
 0x2d2   : > { %v13825_v2 = vsel %vm738_vm3, %v3648_v34, %v3373_v57  ;;  %v3087_v57 = vrot.slane %v13789_v25, 1  ;;  %v2984_v34 = vmax.f32 %v2900_v27, %v2902_v7  ;;  %v2807_v12 = vadd.f32 %v13691_v16, %v13768_v4 }
 0x2d3   : > { %v2229_v33 = vpop.f32.mrb[20].mxu0  ;;  %v13827_v35 = vpop.f32.mrb[20].mxu1  ;;  %v3744_v5 = vsel %vm3628_vm5, %v3728_v28, %v3549_v32  ;;  %v3729_v10 = vsel %vm3611_vm4, %v13811_v18, %v3518_v26  ;;  %v2809_v32 = vadd.f32 %v13694_v19, %v13770_v6  ;;  %v2808_v28 = vadd.f32 %v13697_v23, %v13773_v36 }
 0x2d4   : > { %v13834_v3 = vpop.f32.mrb[21].mxu0  ;;  %v13836_v52 = vpop.f32.mrb[21].mxu1  ;;  %v13856_v27 = vsel %vm3645_vm6, %v3744_v5, %v3581_v8  ;;  %v13859_v4 = vsel %vm3628_vm5, %v3729_v10, %v3550_v55  ;;  %v3090_v7 = vrot.slane %v2984_v34, 1  ;;  %v2903_v60 = vmax.f32 %v2807_v12, 0.0 }
 0x2d5   : > { %v13842_v41 = vpop.f32.mrb[22].mxu0  ;;  %v13844_v48 = vpop.f32.mrb[22].mxu1  ;;  %15628 = vst [vmem:[#allocation33_spill] sm:$0xff] %v13856_v27  ;;  %15629 = vst [vmem:[#allocation34_spill] sm:$0xff] %v13859_v4  ;;  %v2810_v26 = vadd.f32 %v13700_v24, %v13775_v31  ;;  %v2811_v15 = vadd.f32 %v13691_v16, %v13784_v58  ;;  %v2813_v5 = vadd.f32 %v13694_v19, %v13786_v20  ;;  %v2905_v8 = vmax.f32 %v2809_v32, 0.0 }
 0x2d6   : > { %v13851_v42 = vpop.f32.mrb[23].mxu0  ;;  %v13853_v62 = vpop.f32.mrb[23].mxu1  ;;  %v2812_v10 = vadd.f32 %v13697_v23, %v13791_v11  ;;  %v2814_v12 = vadd.f32 %v13700_v24, %v13793_v45  ;;  %v2815_v6 = vadd.f32 %v13691_v16, %v2223_v29  ;;  %v2904_v55 = vmax.f32 %v2808_v28, 0.0 }
 0x2d7   : > { %v2906_v36 = vmax.f32 %v2810_v26, 0.0  ;;  %v2907_v44 = vmax.f32 %v2811_v15, 0.0  ;;  %v2909_v1 = vmax.f32 %v2813_v5, 0.0  ;;  %v2985_v20 = vmax.f32 %v2903_v60, %v2905_v8 }
 0x2d8   : > { %v2908_v31 = vmax.f32 %v2812_v10, 0.0  ;;  %v2910_v59 = vmax.f32 %v2814_v12, 0.0  ;;  %v2911_v38 = vmax.f32 %v2815_v6, 0.0  ;;  %v2817_v11 = vadd.f32 %v13694_v19, %v13797_v9 }
 0x2d9   : > { %v2986_v56 = vmax.f32 %v2904_v55, %v2906_v36  ;;  %v13884_v45 = vadd.f32 %v13697_v23, %v13800_v46  ;;  %v2987_v32 = vmax.f32 %v2907_v44, %v2909_v1  ;;  %v2818_v26 = vadd.f32 %v13700_v24, %v13802_v54 }
 0x2da   : > { %v2988_v28 = vmax.f32 %v2908_v31, %v2910_v59  ;;  %v13893_v5 = vadd.f32 %v13691_v16, %v2229_v33  ;;  %v3088_v9 = vrot.slane %v2985_v20, 1  ;;  %v2913_v46 = vmax.f32 %v2817_v11, 0.0 }
 0x2db   : > { %v13876_v58 = vpop.f32.mrb[24].mxu0  ;;  %v13878_v63 = vpop.f32.mrb[24].mxu1  ;;  %v3091_v12 = vrot.slane %v2986_v56, 1  ;;  %v2912_v6 = vmax.f32 %v13884_v45, 0.0  ;;  %v3093_v59 = vrot.slane %v2987_v32, 1  ;;  %v2914_v1 = vmax.f32 %v2818_v26, 0.0 }
 0x2dc   : > { %v13886_v29 = vpop.f32.mrb[25].mxu0  ;;  %v13888_v15 = vpop.f32.mrb[25].mxu1  ;;  %v3095_v44 = vrot.slane %v2988_v28, 1  ;;  %v2915_v54 = vmax.f32 %v13893_v5, 0.0  ;;  %v3089_v33 = vsel %vm495_vm0, %v3087_v57, %v3088_v9  ;;  %v13907_v31 = vmax.f32 %v2911_v38, %v2913_v46 }
 0x2dd   : > { %v13895_v60 = vpop.f32.mrb[26].mxu0  ;;  %v13897_v10 = vpop.f32.mrb[26].mxu1  ;;  %v3092_v36 = vsel %vm495_vm0, %v3090_v7, %v3091_v12  ;;  %v2821_v11 = vadd.f32 %v13694_v19, %v13827_v35  ;;  %v13912_v45 = vmax.f32 %v13789_v25, %v3089_v33  ;;  %v3094_v47 = vsel %vm495_vm0, %v3088_v9, %v3093_v59 }
 0x2de   : > { %v13900_v8 = vpop.f32.mrb[27].mxu0  ;;  %v13902_v55 = vpop.f32.mrb[27].mxu1  ;;  %v13914_v37 = vmax.f32 %v2984_v34, %v3092_v36  ;;  %v13917_v22 = vmax.f32 %v2987_v32, %v3093_v59  ;;  %v13919_v26 = vmax.f32 %v2985_v20, %v3094_v47  ;;  %v3096_v57 = vsel %vm495_vm0, %v3091_v12, %v3095_v44 }
 0x2df   : > { %v13922_v5 = vmax.f32 %v2988_v28, %v3095_v44  ;;  %v3263_v7 = vrot.slane %v13912_v45, 1  ;;  %v3295_v35 = vrot.slane %v13912_v45, 2  ;;  %v2917_v53 = vmax.f32 %v2821_v11, 0.0 }
 0x2e0   : > { %15630 = vst [vmem:[#allocation35_spill] sm:$0xff] %v13917_v22  ;;  %v3264_v34 = vrot.slane %v13914_v37, 1  ;;  %v3296_v47 = vrot.slane %v13914_v37, 2  ;;  %v3519_v36 = vrot.slane %v13917_v22, 1  ;;  %v3551_v25 = vrot.slane %v13917_v22, 2 }
 0x2e1   : > { %15631 = vst [vmem:[#allocation36_spill] sm:$0xff] %v13922_v5  ;;  %v3616_v44 = vsel %vm3611_vm4, %v13912_v45, %v3263_v7  ;;  %v13958_v7 = vmax.f32 %v2986_v56, %v3096_v57  ;;  %v3520_v30 = vrot.slane %v13922_v5, 1  ;;  %v3552_v4 = vrot.slane %v13922_v5, 2 }
 0x2e2   : > { %v3617_v33 = vsel %vm3611_vm4, %v13914_v37, %v3264_v34  ;;  %v13952_v9 = vsel %vm3628_vm5, %v3616_v44, %v3295_v35  ;;  %v3730_v27 = vsel %vm3611_vm4, %v13917_v22, %v3519_v36  ;;  %v13974_v57 = vmax.f32 %v2912_v6, %v2914_v1 }
 0x2e3   : > { %v13929_v46 = vpop.f32.mrb[28].mxu0  ;;  %v13931_v32 = vpop.f32.mrb[28].mxu1  ;;  %v13955_v28 = vsel %vm3628_vm5, %v3617_v33, %v3296_v47  ;;  %v13970_v47 = vsel %vm3628_vm5, %v3730_v27, %v3551_v25  ;;  %v3731_v33 = vsel %vm3611_vm4, %v13922_v5, %v3520_v30  ;;  %v3436_v36 = vrot.slane %v13736_v14, 6 }
 0x2e4   : > { %v13937_v12 = vpop.f32.mrb[29].mxu0  ;;  %v13939_v59 = vpop.f32.mrb[29].mxu1  ;;  %15632 = vst [vmem:[#allocation37_spill] sm:$0xff] %v13970_v47  ;;  %v3438_v22 = vrot.slane %v13829_v40, 6  ;;  %v13981_v18 = vsel %vm3628_vm5, %v3731_v33, %v3552_v4  ;;  %v3100_v27 = vrot.slane %v13974_v57, 1  ;;  %v3468_v25 = vrot.slane %v13736_v14, 7 }
 0x2e5   : > { %v13947_v38 = vpop.f32.mrb[30].mxu0  ;;  %v13949_v20 = vpop.f32.mrb[30].mxu1  ;;  %15633 = vst [vmem:[#allocation38_spill] sm:$0xff] %v13981_v18  ;;  %v3470_v35 = vrot.slane %v13829_v40, 7  ;;  %v13986_v56 = vmax.f32 %v2915_v54, %v2917_v53  ;;  %v15634_v6 = vrot.slane %v13717_v50, 3  ;;  %v15635_v1 = vrot.slane %v13795_v13, 3 }
 0x2e6   : > { %v13960_v0 = vpop.f32.mrb[31].mxu0  ;;  %v13962_v34 = vpop.f32.mrb[31].mxu1  ;;  %v2820_v4 = vadd.f32 %v13697_v23, %v13834_v3  ;;  %v15636_v53 = vrot.slane %v13736_v14, 4  ;;  %v15637_v50 = vrot.slane %v13829_v40, 4  ;;  %v2822_v13 = vadd.f32 %v13700_v24, %v13836_v52 }
 0x2e7   : > { %v3647_v30 = vsel %vm3645_vm6, %v13731_v17, %v15634_v6  ;;  %v3649_v11 = vsel %vm3645_vm6, %v13820_v39, %v15635_v1  ;;  %v15638_v39 = vrot.slane %v13733_v21, 5  ;;  %v15641_v47 = vrot.slane %v13807_v49, 5 }
 0x2e8   : > { %v3663_v54 = vsel %vm738_vm3, %v3647_v30, %v15636_v53  ;;  %v3665_v17 = vsel %vm738_vm3, %v3649_v11, %v15637_v50  ;;  %v15639_v30 = vrot.slane %v13736_v14, 5  ;;  %v15640_v11 = vrot.slane %v13829_v40, 5 }
 0x2e9   : > { %v3678_v3 = vsel %vm657_vm1, %v13748_v51, %v15638_v39  ;;  %v2916_v52 = vmax.f32 %v2820_v4, 0.0  ;;  %v2918_v43 = vmax.f32 %v2822_v13, 0.0  ;;  %v3680_v14 = vsel %vm657_vm1, %v13825_v2, %v15641_v47 }
 0x2ea   : > { %v3679_v53 = vsel %vm657_vm1, %v3663_v54, %v15639_v30  ;;  %v3681_v50 = vsel %vm657_vm1, %v3665_v17, %v15640_v11  ;;  %v15642_v4 = vrot.slane %v13986_v56, 1  ;;  %v15643_v17 = vrot.slane %v13907_v31, 1 }
 0x2eb   : > { %v13998_v33 = vpop.f32.mrb[32].mxu0  ;;  %v14000_v44 = vpop.f32.mrb[32].mxu1  ;;  %v3695_v51 = vsel %vm576_vm2, %v3679_v53, %v3436_v36  ;;  %v3697_v39 = vsel %vm576_vm2, %v3681_v50, %v3438_v22  ;;  %v15646_v13 = vrot.slane %v13733_v21, 6  ;;  %v14058_v11 = vmax.f32 %v2916_v52, %v2918_v43  ;;  %v11387_v52 = vld [vmem:[#allocation5 + $0x200] ss:$16 sps:$4 sm:$0xff]  }
 0x2ec   : > { %v14014_v6 = vpop.f32.mrb[33].mxu0  ;;  %v14016_v1 = vpop.f32.mrb[33].mxu1  ;;  %v3099_v30 = vsel %vm495_vm0, %v15643_v17, %v15642_v4  ;;  %v14045_v36 = vsel %vm495_vm0, %v3695_v51, %v3468_v25  ;;  %v14048_v22 = vsel %vm495_vm0, %v3697_v39, %v3470_v35  ;;  %v15647_v50 = vrot.slane %v13807_v49, 6  ;;  %v11390_v4 = vld [vmem:[#allocation5 + $0x208] ss:$16 sps:$4 sm:$0xff]  }
 0x2ed   : > { %v14025_v18 = vpop.f32.mrb[34].mxu0  ;;  %v14027_v5 = vpop.f32.mrb[34].mxu1  ;;  %15644 = vst [vmem:[#allocation39_spill] sm:$0xff] %v14045_v36  ;;  %15645 = vst [vmem:[#allocation40_spill] sm:$0xff] %v14048_v22  ;;  %v3694_v2 = vsel %vm576_vm2, %v3678_v3, %v15646_v13  ;;  %v14054_v47 = vmax.f32 %v13907_v31, %v3099_v30  ;;  %v4063_v53 = vpack.c.bf16 %v14048_v22, %v14045_v36  ;;  %v15648_v51 = vrot.slane %v13733_v21, 7 }
 0x2ee   : > { %v14035_v54 = vpop.f32.mrb[35].mxu0  ;;  %v14037_v40 = vpop.f32.mrb[35].mxu1  ;;  %v3696_v25 = vsel %vm576_vm2, %v3680_v14, %v15647_v50  ;;  %v15650_v39 = vrot.slane %v13807_v49, 7  ;;  %v2823_v31 = vadd.f32 %v13691_v16, %v13842_v41  ;;  %v2825_v43 = vadd.f32 %v13694_v19, %v13844_v48  ;;  %v11395_v30 = vld [vmem:[#allocation5 + $0x224] ss:$16 sps:$4 sm:$0xff]  }
 0x2ef   : > { %v14066_v35 = vsel %vm495_vm0, %v3694_v2, %v15648_v51  ;;  %v3265_v14 = vrot.slane %v14054_v47, 1  ;;  %v3297_v21 = vrot.slane %v14054_v47, 2  ;;  %6054 = vmatprep.mubr.bf16.mxu0 %v4063_v53  ;;  %6419 = vmatprep.mubr.bf16.mxu1 %v4063_v53  ;;  %v15587_v49 = vrot.slane %v14058_v11, 1  ;;  %v11398_v50 = vld [vmem:[#allocation5 + $0x22c] ss:$16 sps:$4 sm:$0xff]  }
 0x2f0   : > { %15649 = vst [vmem:[#allocation41_spill] sm:$0xff] %v14066_v35  ;;  %v14071_v3 = vsel %vm495_vm0, %v3696_v25, %v15650_v39  ;;  %v2919_v41 = vmax.f32 %v2823_v31, 0.0  ;;  %v2921_v2 = vmax.f32 %v2825_v43, 0.0  ;;  %v2824_v48 = vadd.f32 %v13697_v23, %v13851_v42  ;;  %v11393_v43 = vld [vmem:[#allocation5 + $0x220] ss:$16 sps:$4 sm:$0xff]  }
 0x2f1   : > { %15651 = vst [vmem:[#allocation42_spill] sm:$0xff] %v14071_v3  ;;  %v4062_v13 = vpack.c.bf16 %v14071_v3, %v14066_v35  ;;  %v3618_v39 = vsel %vm3611_vm4, %v14054_v47, %v3265_v14  ;;  %v3102_v53 = vsel %vm495_vm0, %v3100_v27, %v15587_v49  ;;  %v2826_v17 = vadd.f32 %v13700_v24, %v13853_v62  ;;  %v11396_v22 = vld [vmem:[#allocation5 + $0x228] ss:$16 sps:$4 sm:$0xff]  }
 0x2f2   : > { %v2827_v31 = vadd.f32 %v13691_v16, %v13876_v58  ;;  %v14103_v35 = vsel %vm3628_vm5, %v3618_v39, %v3297_v21  ;;  %v14106_v14 = vmax.f32 %v13974_v57, %v3102_v53  ;;  %v2993_v27 = vmax.f32 %v2919_v41, %v2921_v2  ;;  %v11401_v57 = vld [vmem:[#allocation5 + $0x244] ss:$16 sps:$4 sm:$0xff]  }
 0x2f3   : > { %v14085_v25 = vpop.f32.mrb[36].mxu0  ;;  %v14087_v51 = vpop.f32.mrb[36].mxu1  ;;  %6055 = vmatmul.mubr.bf16.vlgmr.msra.gmra.mrb[48].mxu0 %v4062_v13  ;;  %6420 = vmatmul.mubr.bf16.vlgmr.msra.gmra.mrb[48].mxu1 %v4062_v13  ;;  %v2920_v49 = vmax.f32 %v2824_v48, 0.0  ;;  %v2922_v58 = vmax.f32 %v2826_v17, 0.0  ;;  %v2828_v21 = vadd.f32 %v13697_v23, %v13886_v29 }
 0x2f4   : > { %v14098_v42 = vpop.f32.mrb[37].mxu0  ;;  %v14100_v3 = vpop.f32.mrb[37].mxu1  ;;  %v2923_v61 = vmax.f32 %v2827_v31, 0.0  ;;  %6096 = vmatpush1.bf16.msra.mxu0 %v11387_v52  ;;  %6461 = vmatpush1.bf16.msra.mxu1 %v11390_v4  ;;  %v3266_v41 = vrot.slane %v14106_v14, 1  ;;  %v3298_v2 = vrot.slane %v14106_v14, 2  ;;  %v3103_v48 = vrot.slane %v2993_v27, 1 }
 0x2f5   : > { %15652 = vst [vmem:[#allocation43_spill] sm:$0xff] %v14100_v3  ;;  %v14108_v62 = vpop.f32.mrb[38].mxu0  ;;  %v14110_v36 = vpop.f32.mrb[38].mxu1  ;;  %v2829_v3 = vadd.f32 %v13694_v19, %v13878_v63  ;;  %6097 = vmatprep.subr.bf16.mxu0 %v11395_v30  ;;  %6462 = vmatprep.subr.bf16.mxu1 %v11398_v50  ;;  %v11404_v63 = vld [vmem:[#allocation5 + $0x24c] ss:$16 sps:$4 sm:$0xff]   ;;  %v2994_v53 = vmax.f32 %v2920_v49, %v2922_v58  ;;  %v2924_v29 = vmax.f32 %v2828_v21, 0.0 }
 0x2f6   : > { %15653 = vst [vmem:[#allocation44_spill] sm:$0xff] %v14108_v62  ;;  %15654 = vst [vmem:[#allocation45_spill] sm:$0xff] %v14110_v36  ;;  %v14116_v39 = vpop.f32.mrb[39].mxu0  ;;  %v14118_v13 = vpop.f32.mrb[39].mxu1  ;;  %v2830_v52 = vadd.f32 %v13700_v24, %v13888_v15  ;;  %v3619_v4 = vsel %vm3611_vm4, %v14106_v14, %v3266_v41  ;;  %v14130_v36 = vmax.f32 %v2993_v27, %v3103_v48  ;;  %v11399_v50 = vld [vmem:[#allocation5 + $0x240] ss:$16 sps:$4 sm:$0xff]  }
 0x2f7   : > { %15655 = vst [vmem:[#allocation46_spill] sm:$0xff] %v14116_v39  ;;  %15656 = vst [vmem:[#allocation47_spill] sm:$0xff] %v14118_v13  ;;  %v2925_v31 = vmax.f32 %v2829_v3, 0.0  ;;  %v15657_v13 = vrot.slane %v13986_v56, 1  ;;  %v14134_v30 = vadd.f32 %v13691_v16, %v13895_v60  ;;  %v11402_v49 = vld [vmem:[#allocation5 + $0x248] ss:$16 sps:$4 sm:$0xff]   ;;  %v14137_v3 = vsel %vm3628_vm5, %v3619_v4, %v3298_v2 }
 0x2f8   : > { %15658 = vst [vmem:[#allocation48_spill] sm:$0xff] %v14130_v36  ;;  %v3105_v58 = vrot.slane %v2994_v53, 1  ;;  %6098 = vmatpush1.bf16.msra.mxu0 %v11393_v43  ;;  %6463 = vmatpush1.bf16.msra.mxu1 %v11396_v22  ;;  %v11410_v27 = vld [vmem:[#allocation5 + $0x26c] ss:$16 sps:$4 sm:$0xff]   ;;  %v3521_v41 = vrot.slane %v14130_v36, 1  ;;  %v3553_v60 = vrot.slane %v14130_v36, 2 }
 0x2f9   : > { %v3104_v39 = vsel %vm495_vm0, %v15657_v13, %v3103_v48  ;;  %v14142_v21 = vmax.f32 %v2923_v61, %v2925_v31  ;;  %v11407_v13 = vld [vmem:[#allocation5 + $0x264] ss:$16 sps:$4 sm:$0xff]   ;;  %v2926_v17 = vmax.f32 %v2830_v52, 0.0  ;;  %6099 = vmatprep.subr.bf16.mxu0 %v11401_v57  ;;  %6464 = vmatprep.subr.bf16.mxu1 %v11404_v63  ;;  %v15660_v22 = vrot.slane %v14058_v11, 1  ;;  %v11405_v4 = vld [vmem:[#allocation5 + $0x260] ss:$16 sps:$4 sm:$0xff]  }
 0x2fa   : > { %v14140_v15 = vmax.f32 %v13986_v56, %v3104_v39  ;;  %v14156_v31 = vmax.f32 %v2994_v53, %v3105_v58  ;;  %v11408_v62 = vld [vmem:[#allocation5 + $0x268] ss:$16 sps:$4 sm:$0xff]   ;;  %v3732_v63 = vsel %vm3611_vm4, %v14130_v36, %v3521_v41  ;;  %v11419_v43 = vld [vmem:[#allocation5 + $0x2a4] ss:$16 sps:$4 sm:$0xff]  }
 0x2fb   : > { %v14147_v2 = vpop.f32.mrb[40].mxu0  ;;  %v14149_v56 = vpop.f32.mrb[40].mxu1  ;;  %v3106_v39 = vsel %vm495_vm0, %v15660_v22, %v3105_v58  ;;  %v14168_v61 = vmax.f32 %v2924_v29, %v2926_v17  ;;  %v14175_v58 = vsel %vm3628_vm5, %v3732_v63, %v3553_v60  ;;  %v2927_v60 = vmax.f32 %v14134_v30, 0.0  ;;  %v11416_v63 = vld [vmem:[#allocation5 + $0x28c] ss:$16 sps:$4 sm:$0xff]  }
 0x2fc   : > { %15659 = vst [vmem:[#allocation49_spill] sm:$0xff] %v14149_v56  ;;  %15661 = vst [vmem:[#allocation50_spill] sm:$0xff] %v14156_v31  ;;  %v14158_v48 = vpop.f32.mrb[41].mxu0  ;;  %v14160_v57 = vpop.f32.mrb[41].mxu1  ;;  %v14165_v52 = vmax.f32 %v14058_v11, %v3106_v39  ;;  %v11413_v56 = vld [vmem:[#allocation5 + $0x284] ss:$16 sps:$4 sm:$0xff]   ;;  %6100 = vmatpush1.bf16.msra.mxu0 %v11399_v50  ;;  %6465 = vmatpush1.bf16.msra.mxu1 %v11402_v49  ;;  %v2833_v50 = vadd.f32 %v13694_v19, %v13897_v10 }
 0x2fd   : > { %15662 = vst [vmem:[#allocation51_spill] sm:$0xff] %v14158_v48  ;;  %15663 = vst [vmem:[#allocation52_spill] sm:$0xff] %v14160_v57  ;;  %v14170_v22 = vpop.f32.mrb[42].mxu0  ;;  %v14172_v53 = vpop.f32.mrb[42].mxu1  ;;  %v3522_v57 = vrot.slane %v14156_v31, 1  ;;  %v3554_v48 = vrot.slane %v14156_v31, 2  ;;  %6101 = vmatprep.subr.bf16.mxu0 %v11407_v13  ;;  %6466 = vmatprep.subr.bf16.mxu1 %v11410_v27  ;;  %v2832_v49 = vadd.f32 %v13697_v23, %v13900_v8 }
 0x2fe   : > { %15664 = vst [vmem:[#allocation53_spill] sm:$0xff] %v14175_v58  ;;  %v14180_v11 = vpop.f32.mrb[43].mxu0  ;;  %v14182_v17 = vpop.f32.mrb[43].mxu1  ;;  %v2834_v29 = vadd.f32 %v13700_v24, %v13902_v55  ;;  %v2835_v30 = vadd.f32 %v13691_v16, %v13929_v46  ;;  %v2837_v13 = vadd.f32 %v13694_v19, %v13931_v32  ;;  %v2836_v27 = vadd.f32 %v13697_v23, %v13937_v12  ;;  %v11414_v10 = vld [vmem:[#allocation5 + $0x288] ss:$16 sps:$4 sm:$0xff]  }
 0x2ff   : > { %v3733_v41 = vsel %vm3611_vm4, %v14156_v31, %v3522_v57  ;;  %v11411_v57 = vld [vmem:[#allocation5 + $0x280] ss:$16 sps:$4 sm:$0xff]   ;;  %v2929_v58 = vmax.f32 %v2833_v50, 0.0  ;;  %v2928_v8 = vmax.f32 %v2832_v49, 0.0  ;;  %v2838_v55 = vadd.f32 %v13700_v24, %v13939_v59 }
 0x300   : > { %v14197_v39 = vsel %vm3628_vm5, %v3733_v41, %v3554_v48  ;;  %v2930_v36 = vmax.f32 %v2834_v29, 0.0  ;;  %6102 = vmatpush1.bf16.msra.mxu0 %v11405_v4  ;;  %6467 = vmatpush1.bf16.msra.mxu1 %v11408_v62  ;;  %v11422_v48 = vld [vmem:[#allocation5 + $0x2ac] ss:$16 sps:$4 sm:$0xff]   ;;  %v2931_v41 = vmax.f32 %v2835_v30, 0.0  ;;  %v2933_v46 = vmax.f32 %v2837_v13, 0.0 }
 0x301   : > { %15665 = vst [vmem:[#allocation54_spill] sm:$0xff] %v14197_v39  ;;  %v2932_v39 = vmax.f32 %v2836_v27, 0.0  ;;  %v2839_v32 = vadd.f32 %v13691_v16, %v13947_v38  ;;  %6103 = vmatprep.subr.bf16.mxu0 %v11413_v56  ;;  %6468 = vmatprep.subr.bf16.mxu1 %v11416_v63  ;;  %v2997_v50 = vmax.f32 %v2927_v60, %v2929_v58  ;;  %v2934_v49 = vmax.f32 %v2838_v55, 0.0  ;;  %v11417_v62 = vld [vmem:[#allocation5 + $0x2a0] ss:$16 sps:$4 sm:$0xff]  }
 0x302   : > { %v14213_v29 = vmax.f32 %v2928_v8, %v2930_v36  ;;  %v2841_v59 = vadd.f32 %v13694_v19, %v13949_v20  ;;  %v11420_v4 = vld [vmem:[#allocation5 + $0x2a8] ss:$16 sps:$4 sm:$0xff]   ;;  %v2999_v38 = vmax.f32 %v2931_v41, %v2933_v46  ;;  %v14223_v63 = vadd.f32 %v13697_v23, %v13960_v0  ;;  %v11425_v58 = vld [vmem:[#allocation5 + $0x2c4] ss:$16 sps:$4 sm:$0xff]  }
 0x303   : > { %v14209_v12 = vpop.f32.mrb[44].mxu0  ;;  %v14211_v31 = vpop.f32.mrb[44].mxu1  ;;  %v2935_v56 = vmax.f32 %v2839_v32, 0.0  ;;  %v14227_v36 = vadd.f32 %v13700_v24, %v13962_v34  ;;  %v3108_v27 = vrot.slane %v2997_v50, 1  ;;  %v3000_v55 = vmax.f32 %v2932_v39, %v2934_v49 }
 0x304   : > { %v14217_v30 = vpop.f32.mrb[45].mxu0  ;;  %v14219_v13 = vpop.f32.mrb[45].mxu1  ;;  %v3111_v8 = vrot.slane %v14213_v29, 1  ;;  %6104 = vmatpush1.bf16.msra.mxu0 %v11411_v57  ;;  %6469 = vmatpush1.bf16.msra.mxu1 %v11414_v10  ;;  %v3113_v46 = vrot.slane %v2999_v38, 1  ;;  %v2936_v34 = vmax.f32 %v14223_v63, 0.0  ;;  %v15672_v39 = vrot.slane %v14142_v21, 1 }
 0x305   : > { %15666 = vst [vmem:[#allocation55_spill] sm:$0xff] %v14217_v30  ;;  %15667 = vst [vmem:[#allocation56_spill] sm:$0xff] %v14219_v13  ;;  %v14229_v60 = vpop.f32.mrb[46].mxu0  ;;  %v14231_v20 = vpop.f32.mrb[46].mxu1  ;;  %v2937_v13 = vmax.f32 %v2841_v59, 0.0  ;;  %v2938_v32 = vmax.f32 %v14227_v36, 0.0  ;;  %6105 = vmatprep.subr.bf16.mxu0 %v11419_v43  ;;  %6470 = vmatprep.subr.bf16.mxu1 %v11422_v48 }
 0x306   : > { %15668 = vst [vmem:[#allocation57_spill] sm:$0xff] %v14229_v60  ;;  %15669 = vst [vmem:[#allocation58_spill] sm:$0xff] %v14231_v20  ;;  %v14234_v41 = vpop.f32.mrb[47].mxu0  ;;  %v14236_v0 = vpop.f32.mrb[47].mxu1  ;;  %v14242_v60 = vadd.f32 %v13691_v16, %v13998_v33  ;;  %v11428_v20 = vld [vmem:[#allocation5 + $0x2cc] ss:$16 sps:$4 sm:$0xff]   ;;  %v3109_v57 = vsel %vm495_vm0, %v15672_v39, %v3108_v27  ;;  %v3114_v43 = vsel %vm495_vm0, %v3108_v27, %v3113_v46 }
 0x307   : > { %15670 = vst [vmem:[#allocation59_spill] sm:$0xff] %v14234_v41  ;;  %15671 = vst [vmem:[#allocation60_spill] sm:$0xff] %v14236_v0  ;;  %v15673_v10 = vrot.slane %v14168_v61, 1  ;;  %v3115_v59 = vrot.slane %v3000_v55, 1  ;;  %v14250_v0 = vmax.f32 %v2935_v56, %v2937_v13  ;;  %v14253_v63 = vmax.f32 %v14142_v21, %v3109_v57  ;;  %v11423_v36 = vld [vmem:[#allocation5 + $0x2c0] ss:$16 sps:$4 sm:$0xff]  }
 0x308   : > { %v14259_v48 = vmax.f32 %v2999_v38, %v3113_v46  ;;  %v14261_v41 = vmax.f32 %v2997_v50, %v3114_v43  ;;  %6106 = vmatpush1.bf16.msra.mxu0 %v11417_v62  ;;  %6471 = vmatpush1.bf16.msra.mxu1 %v11420_v4  ;;  %v11426_v21 = vld [vmem:[#allocation5 + $0x2c8] ss:$16 sps:$4 sm:$0xff]   ;;  %v11431_v56 = vld [vmem:[#allocation5 + $0x2e4] ss:$16 sps:$4 sm:$0xff]   ;;  %v11434_v50 = vld [vmem:[#allocation5 + $0x2ec] ss:$16 sps:$4 sm:$0xff]   ;;  %v2845_v62 = vadd.f32 %v13694_v19, %v14000_v44 }
 0x309   : > { %v3112_v49 = vsel %vm495_vm0, %v15673_v10, %v3111_v8  ;;  %v3116_v39 = vsel %vm495_vm0, %v3111_v8, %v3115_v59  ;;  %v14264_v30 = vmax.f32 %v3000_v55, %v3115_v59  ;;  %v3117_v13 = vrot.slane %v14250_v0, 1  ;;  %6107 = vmatprep.subr.bf16.mxu0 %v11425_v58  ;;  %6472 = vmatprep.subr.bf16.mxu1 %v11428_v20  ;;  %v11429_v20 = vld [vmem:[#allocation5 + $0x2e0] ss:$16 sps:$4 sm:$0xff]  }
 0x30a   : > { %v14256_v33 = vmax.f32 %v14168_v61, %v3112_v49  ;;  %v3267_v61 = vrot.slane %v14253_v63, 1  ;;  %v3299_v57 = vrot.slane %v14253_v63, 2  ;;  %v3523_v49 = vrot.slane %v14259_v48, 1 }
 0x30b   : > { %v3555_v58 = vrot.slane %v14259_v48, 2  ;;  %v14289_v4 = vmax.f32 %v14213_v29, %v3116_v39  ;;  %v3524_v55 = vrot.slane %v14264_v30, 1  ;;  %v14301_v39 = vmax.f32 %v2936_v34, %v2938_v32  ;;  %v11438_v32 = vld [vmem:[#allocation5 + $0x308] ss:$16 sps:$4 sm:$0xff]   ;;  %v11443_v29 = vld [vmem:[#allocation5 + $0x324] ss:$16 sps:$4 sm:$0xff]  }
 0x30c   : > { %v3268_v27 = vrot.slane %v14256_v33, 1  ;;  %v3300_v8 = vrot.slane %v14256_v33, 2  ;;  %v3620_v46 = vsel %vm3611_vm4, %v14253_v63, %v3267_v61  ;;  %6108 = vmatpush1.bf16.msra.mxu0 %v11423_v36  ;;  %6473 = vmatpush1.bf16.msra.mxu1 %v11426_v21  ;;  %v11432_v61 = vld [vmem:[#allocation5 + $0x2e8] ss:$16 sps:$4 sm:$0xff]   ;;  %v3734_v38 = vsel %vm3611_vm4, %v14259_v48, %v3523_v49 }
 0x30d   : > { %v14282_v59 = vsel %vm3628_vm5, %v3620_v46, %v3299_v57  ;;  %v3556_v57 = vrot.slane %v14264_v30, 2  ;;  %6109 = vmatprep.subr.bf16.mxu0 %v11431_v56  ;;  %6474 = vmatprep.subr.bf16.mxu1 %v11434_v50  ;;  %v3735_v21 = vsel %vm3611_vm4, %v14264_v30, %v3524_v55  ;;  %v2939_v49 = vmax.f32 %v14242_v60, 0.0  ;;  %v11435_v50 = vld [vmem:[#allocation5 + $0x300] ss:$16 sps:$4 sm:$0xff]  }
 0x30e   : > { %v3621_v10 = vsel %vm3611_vm4, %v14256_v33, %v3268_v27  ;;  %v11437_v27 = vld [vmem:[#allocation5 + $0x304] ss:$16 sps:$4 sm:$0xff]   ;;  %v3440_v56 = vrot.slane %v13958_v7, 6  ;;  %v3442_v46 = vrot.slane %v14165_v52, 6  ;;  %v3472_v34 = vrot.slane %v13958_v7, 7 }
 0x30f   : > { %v14285_v43 = vsel %vm3628_vm5, %v3621_v10, %v3300_v8  ;;  %v11440_v8 = vld [vmem:[#allocation5 + $0x30c] ss:$16 sps:$4 sm:$0xff]   ;;  %v14297_v10 = vsel %vm3628_vm5, %v3734_v38, %v3555_v58  ;;  %v14310_v38 = vsel %vm3628_vm5, %v3735_v21, %v3556_v57  ;;  %v2941_v55 = vmax.f32 %v2845_v62, 0.0 }
 0x310   : > { %6110 = vmatpush1.bf16.msra.mxu0 %v11429_v20  ;;  %6475 = vmatpush1.bf16.msra.mxu1 %v11432_v61  ;;  %v3474_v60 = vrot.slane %v14165_v52, 7  ;;  %v15674_v44 = vrot.slane %v13914_v37, 3  ;;  %v15675_v57 = vrot.slane %v14106_v14, 3  ;;  %v11446_v58 = vld [vmem:[#allocation5 + $0x32c] ss:$16 sps:$4 sm:$0xff]   ;;  %v15676_v20 = vrot.slane %v13958_v7, 4 }
 0x311   : > { %6111 = vmatprep.subr.bf16.mxu0 %v11437_v27  ;;  %6476 = vmatprep.subr.bf16.mxu1 %v11440_v8  ;;  %v15677_v61 = vrot.slane %v14165_v52, 4  ;;  %v2846_v14 = vadd.f32 %v13700_v24, %v14016_v1  ;;  %v15679_v8 = vrot.slane %v14165_v52, 5  ;;  %v3441_v52 = vrot.slane %v14140_v15, 6 }
 0x312   : > { %v3651_v36 = vsel %vm3645_vm6, %v13955_v28, %v15674_v44  ;;  %v3653_v21 = vsel %vm3645_vm6, %v14137_v3, %v15675_v57  ;;  %v2844_v28 = vadd.f32 %v13697_v23, %v14014_v6  ;;  %v14334_v44 = vmax.f32 %v2939_v49, %v2941_v55  ;;  %v11441_v55 = vld [vmem:[#allocation5 + $0x320] ss:$16 sps:$4 sm:$0xff]  }
 0x313   : > { %v3667_v62 = vsel %vm738_vm3, %v3651_v36, %v15676_v20  ;;  %v3669_v37 = vsel %vm738_vm3, %v3653_v21, %v15677_v61  ;;  %v15678_v3 = vrot.slane %v13958_v7, 5  ;;  %v3439_v57 = vrot.slane %v13919_v26, 6 }
 0x314   : > { %v3685_v36 = vsel %vm657_vm1, %v3669_v37, %v15679_v8  ;;  %v2940_v6 = vmax.f32 %v2844_v28, 0.0  ;;  %v2942_v61 = vmax.f32 %v2846_v14, 0.0  ;;  %6112 = vmatpush1.bf16.msra.mxu0 %v11435_v50  ;;  %6477 = vmatpush1.bf16.msra.mxu1 %v11438_v32  ;;  %v3118_v1 = vrot.slane %v14334_v44, 1  ;;  %v11452_v37 = vld [vmem:[#allocation5 + $0x34c] ss:$16 sps:$4 sm:$0xff]  }
 0x315   : > { %v3683_v27 = vsel %vm657_vm1, %v3667_v62, %v15678_v3  ;;  %v3701_v20 = vsel %vm576_vm2, %v3685_v36, %v3442_v46  ;;  %6113 = vmatprep.subr.bf16.mxu0 %v11443_v29  ;;  %v11444_v62 = vld [vmem:[#allocation5 + $0x328] ss:$16 sps:$4 sm:$0xff]   ;;  %6478 = vmatprep.subr.bf16.mxu1 %v11446_v58  ;;  %v3471_v50 = vrot.slane %v13919_v26, 7  ;;  %v3473_v32 = vrot.slane %v14140_v15, 7  ;;  %v11447_v36 = vld [vmem:[#allocation5 + $0x340] ss:$16 sps:$4 sm:$0xff]  }
 0x316   : > { %v3699_v21 = vsel %vm576_vm2, %v3683_v27, %v3440_v56  ;;  %v14350_v49 = vsel %vm495_vm0, %v3701_v20, %v3474_v60  ;;  %v14355_v56 = vmax.f32 %v2940_v6, %v2942_v61  ;;  %v3119_v60 = vsel %vm495_vm0, %v3117_v13, %v3118_v1  ;;  %v11450_v61 = vld [vmem:[#allocation5 + $0x348] ss:$16 sps:$4 sm:$0xff]  }
 0x317   : > { %v14347_v7 = vsel %vm495_vm0, %v3699_v21, %v3472_v34  ;;  %v11449_v34 = vld [vmem:[#allocation5 + $0x344] ss:$16 sps:$4 sm:$0xff]   ;;  %v15680_v29 = vrot.slane %v13912_v45, 3  ;;  %v15681_v28 = vrot.slane %v14054_v47, 3  ;;  %v2847_v3 = vadd.f32 %v13691_v16, %v14025_v18 }
 0x318   : > { %v4073_v46 = vpack.c.bf16 %v14350_v49, %v14347_v7  ;;  %v14375_v27 = vmax.f32 %v14250_v0, %v3119_v60  ;;  %v3121_v13 = vrot.slane %v14355_v56, 1  ;;  %v15682_v45 = vrot.slane %v13919_v26, 4  ;;  %6114 = vmatpush1.bf16.msra.mxu0 %v11441_v55  ;;  %6479 = vmatpush1.bf16.msra.mxu1 %v11444_v62 }
 0x319   : > { %v3650_v58 = vsel %vm3645_vm6, %v13952_v9, %v15680_v29  ;;  %v3652_v14 = vsel %vm3645_vm6, %v14103_v35, %v15681_v28  ;;  %v15683_v9 = vrot.slane %v14140_v15, 4  ;;  %v15684_v35 = vrot.slane %v13919_v26, 5  ;;  %6115 = vmatprep.subr.bf16.mxu0 %v11449_v34  ;;  %6480 = vmatprep.subr.bf16.mxu1 %v11452_v37  ;;  %v11458_v28 = vld [vmem:[#allocation5 + $0x36c] ss:$16 sps:$4 sm:$0xff]   ;;  %v11453_v37 = vld [vmem:[#allocation5 + $0x360] ss:$16 sps:$4 sm:$0xff]  }
 0x31a   : > { %6064 = vmatprep.mubr.bf16.mxu0 %v4073_v46  ;;  %6429 = vmatprep.mubr.bf16.mxu1 %v4073_v46  ;;  %v3666_v8 = vsel %vm738_vm3, %v3650_v58, %v15682_v45  ;;  %v15685_v0 = vrot.slane %v14140_v15, 5  ;;  %v2943_v20 = vmax.f32 %v2847_v3, 0.0  ;;  %v2849_v6 = vadd.f32 %v13694_v19, %v14027_v5  ;;  %v11455_v46 = vld [vmem:[#allocation5 + $0x364] ss:$16 sps:$4 sm:$0xff]  }
 0x31b   : > { %v3668_v47 = vsel %vm738_vm3, %v3652_v14, %v15683_v9  ;;  %v3682_v18 = vsel %vm657_vm1, %v3666_v8, %v15684_v35  ;;  %v3269_v60 = vrot.slane %v14375_v27, 1  ;;  %v3301_v29 = vrot.slane %v14375_v27, 2 }
 0x31c   : > { %v3684_v21 = vsel %vm657_vm1, %v3668_v47, %v15685_v0  ;;  %v15686_v15 = vrot.slane %v14301_v39, 1  ;;  %v3698_v55 = vsel %vm576_vm2, %v3682_v18, %v3439_v57  ;;  %v2945_v14 = vmax.f32 %v2849_v6, 0.0  ;;  %6116 = vmatpush1.bf16.msra.mxu0 %v11447_v36  ;;  %6481 = vmatpush1.bf16.msra.mxu1 %v11450_v61  ;;  %v11461_v18 = vld [vmem:[#allocation5 + $0x384] ss:$16 sps:$4 sm:$0xff]   ;;  %v11464_v0 = vld [vmem:[#allocation5 + $0x38c] ss:$16 sps:$4 sm:$0xff]  }
 0x31d   : > { %v3700_v62 = vsel %vm576_vm2, %v3684_v21, %v3441_v52  ;;  %v3622_v3 = vsel %vm3611_vm4, %v14375_v27, %v3269_v60  ;;  %v14408_v45 = vsel %vm495_vm0, %v3698_v55, %v3471_v50  ;;  %v2848_v34 = vadd.f32 %v13697_v23, %v14035_v54  ;;  %v11456_v50 = vld [vmem:[#allocation5 + $0x368] ss:$16 sps:$4 sm:$0xff]   ;;  %6117 = vmatprep.subr.bf16.mxu0 %v11455_v46 }
 0x31e   : > { %v3122_v58 = vsel %vm495_vm0, %v15686_v15, %v3121_v13  ;;  %v14411_v8 = vsel %vm495_vm0, %v3700_v62, %v3473_v32  ;;  %v3005_v47 = vmax.f32 %v2943_v20, %v2945_v14  ;;  %v2850_v54 = vadd.f32 %v13700_v24, %v14037_v40  ;;  %6482 = vmatprep.subr.bf16.mxu1 %v11458_v28  ;;  %v15687_v60 = vld [vmem:[#allocation43_spill] sm:$0xff]  ;;  %v15688_v55 = vld [vmem:[#allocation44_spill] sm:$0xff] }
 0x31f   : > { %v14401_v5 = vmax.f32 %v14301_v39, %v3122_v58  ;;  %v14416_v39 = vsel %vm3628_vm5, %v3622_v3, %v3301_v29  ;;  %v4072_v32 = vpack.c.bf16 %v14411_v8, %v14408_v45  ;;  %v2944_v35 = vmax.f32 %v2848_v34, 0.0  ;;  %v11459_v15 = vld [vmem:[#allocation5 + $0x380] ss:$16 sps:$4 sm:$0xff]  }
 0x320   : > { %v2851_v36 = vadd.f32 %v13691_v16, %v14085_v25  ;;  %v2853_v6 = vadd.f32 %v13694_v19, %v14087_v51  ;;  %v2852_v20 = vadd.f32 %v13697_v23, %v14098_v42  ;;  %v3123_v40 = vrot.slane %v3005_v47, 1  ;;  %6118 = vmatpush1.bf16.msra.mxu0 %v11453_v37  ;;  %6483 = vmatpush1.bf16.msra.mxu1 %v11456_v50  ;;  %v11462_v42 = vld [vmem:[#allocation5 + $0x388] ss:$16 sps:$4 sm:$0xff]  }
 0x321   : > { %v3270_v57 = vrot.slane %v14401_v5, 1  ;;  %v3302_v52 = vrot.slane %v14401_v5, 2  ;;  %v3334_v9 = vrot.slane %v14401_v5, 3  ;;  %6065 = vmatmul.mubr.bf16.gmra.mrb[52].mxu0 %v4072_v32  ;;  %6430 = vmatmul.mubr.bf16.gmra.mrb[52].mxu1 %v4072_v32  ;;  %v2946_v46 = vmax.f32 %v2850_v54, 0.0  ;;  %v15689_v37 = vld [vmem:[#allocation45_spill] sm:$0xff] }
 0x322   : > { %v2854_v29 = vadd.f32 %v13700_v24, %v15687_v60  ;;  %v2947_v58 = vmax.f32 %v2851_v36, 0.0  ;;  %v2949_v28 = vmax.f32 %v2853_v6, 0.0  ;;  %v2948_v25 = vmax.f32 %v2852_v20, 0.0  ;;  %6119 = vmatprep.subr.bf16.mxu0 %v11461_v18  ;;  %6484 = vmatprep.subr.bf16.mxu1 %v11464_v0  ;;  %v11465_v6 = vld [vmem:[#allocation5 + $0x3a0] ss:$16 sps:$4 sm:$0xff]  }
 0x323   : > { %v3623_v21 = vsel %vm3611_vm4, %v14401_v5, %v3270_v57  ;;  %v2855_v51 = vadd.f32 %v13691_v16, %v15688_v55  ;;  %v3124_v62 = vsel %vm495_vm0, %v3118_v1, %v3123_v40  ;;  %v14443_v14 = vmax.f32 %v3005_v47, %v3123_v40  ;;  %v11467_v57 = vld [vmem:[#allocation5 + $0x3a4] ss:$16 sps:$4 sm:$0xff]   ;;  %v11468_v40 = vld [vmem:[#allocation5 + $0x3a8] ss:$16 sps:$4 sm:$0xff]   ;;  %v11476_v55 = vld [vmem:[#allocation5 + $0x3cc] ss:$16 sps:$4 sm:$0xff]  }
 0x324   : > { %v14434_v61 = vsel %vm3628_vm5, %v3623_v21, %v3302_v52  ;;  %v3006_v3 = vmax.f32 %v2944_v35, %v2946_v46  ;;  %v2950_v34 = vmax.f32 %v2854_v29, 0.0  ;;  %v11470_v52 = vld [vmem:[#allocation5 + $0x3ac] ss:$16 sps:$4 sm:$0xff]   ;;  %v14446_v32 = vmax.f32 %v14334_v44, %v3124_v62  ;;  %6120 = vmatpush1.bf16.msra.mxu0 %v11459_v15  ;;  %6485 = vmatpush1.bf16.msra.mxu1 %v11462_v42  ;;  %v15690_v42 = vld [vmem:[#allocation46_spill] sm:$0xff]  ;;  %v15694_v0 = vld [vmem:[#allocation52_spill] sm:$0xff] }
 0x325   : > { %v3007_v54 = vmax.f32 %v2947_v58, %v2949_v28  ;;  %v2951_v21 = vmax.f32 %v2855_v51, 0.0  ;;  %v2857_v50 = vadd.f32 %v13694_v19, %v15689_v37  ;;  %v3525_v36 = vrot.slane %v14443_v14, 1  ;;  %6121 = vmatprep.subr.bf16.mxu0 %v11467_v57  ;;  %6486 = vmatprep.subr.bf16.mxu1 %v11470_v52  ;;  %v11473_v28 = vld [vmem:[#allocation5 + $0x3c4] ss:$16 sps:$4 sm:$0xff]   ;;  %v11471_v52 = vld [vmem:[#allocation5 + $0x3c0] ss:$16 sps:$4 sm:$0xff]  }
 0x326   : > { %v3557_v1 = vrot.slane %v14443_v14, 2  ;;  %v3125_v35 = vrot.slane %v3006_v3, 1  ;;  %v14455_v44 = vmax.f32 %v2948_v25, %v2950_v34  ;;  %v2856_v62 = vadd.f32 %v13697_v23, %v15690_v42  ;;  %v11479_v47 = vld [vmem:[#allocation5 + $0x3e4] ss:$16 sps:$4 sm:$0xff]  }
 0x327   : > { %v3127_v20 = vrot.slane %v3007_v54, 1  ;;  %v3736_v46 = vsel %vm3611_vm4, %v14443_v14, %v3525_v36  ;;  %v2953_v58 = vmax.f32 %v2857_v50, 0.0  ;;  %v2859_v42 = vadd.f32 %v13691_v16, %v14147_v2 }
 0x328   : > { %v3126_v60 = vsel %vm495_vm0, %v3121_v13, %v3125_v35  ;;  %v14462_v29 = vmax.f32 %v3006_v3, %v3125_v35  ;;  %v14465_v25 = vsel %vm3628_vm5, %v3736_v46, %v3557_v1  ;;  %v3130_v51 = vrot.slane %v14455_v44, 1  ;;  %6122 = vmatpush1.bf16.msra.mxu0 %v11465_v6  ;;  %6487 = vmatpush1.bf16.msra.mxu1 %v11468_v40  ;;  %v11474_v35 = vld [vmem:[#allocation5 + $0x3c8] ss:$16 sps:$4 sm:$0xff]  }
 0x329   : > { %v14468_v15 = vmax.f32 %v14355_v56, %v3126_v60  ;;  %v3009_v57 = vmax.f32 %v2951_v21, %v2953_v58  ;;  %v2952_v36 = vmax.f32 %v2856_v62, 0.0  ;;  %v15691_v56 = vld [vmem:[#allocation47_spill] sm:$0xff]  ;;  %v15692_v21 = vld [vmem:[#allocation49_spill] sm:$0xff]  ;;  %6123 = vmatprep.subr.bf16.mxu0 %v11473_v28  ;;  %6488 = vmatprep.subr.bf16.mxu1 %v11476_v55  ;;  %v2955_v2 = vmax.f32 %v2859_v42, 0.0 }
 0x32a   : > { %v3526_v13 = vrot.slane %v14462_v29, 1  ;;  %v3558_v3 = vrot.slane %v14462_v29, 2  ;;  %v2858_v1 = vadd.f32 %v13700_v24, %v15691_v56  ;;  %v2861_v58 = vadd.f32 %v13694_v19, %v15692_v21  ;;  %v11482_v62 = vld [vmem:[#allocation5 + $0x3ec] ss:$16 sps:$4 sm:$0xff]   ;;  %v11480_v42 = vld [vmem:[#allocation5 + $0x3e8] ss:$16 sps:$4 sm:$0xff]  }
 0x32b   : > { %v3382_v37 = vrot.slane %v14468_v15, 4  ;;  %v3128_v60 = vrot.slane %v3009_v57, 1  ;;  %v15693_v40 = vld [vmem:[#allocation51_spill] sm:$0xff]  ;;  %v2863_v28 = vadd.f32 %v13691_v16, %v14170_v22  ;;  %v11485_v22 = vld [vmem:[#allocation5 + $0x404] ss:$16 sps:$4 sm:$0xff]   ;;  %v3443_v5 = vrot.slane %v14261_v41, 6 }
 0x32c   : > { %v3737_v46 = vsel %vm3611_vm4, %v14462_v29, %v3526_v13  ;;  %v2954_v6 = vmax.f32 %v2858_v1, 0.0  ;;  %v2860_v56 = vadd.f32 %v13697_v23, %v15693_v40  ;;  %v2862_v13 = vadd.f32 %v13700_v24, %v15694_v0  ;;  %6124 = vmatpush1.bf16.msra.mxu0 %v11471_v52  ;;  %6489 = vmatpush1.bf16.msra.mxu1 %v11474_v35  ;;  %v11477_v1 = vld [vmem:[#allocation5 + $0x3e0] ss:$16 sps:$4 sm:$0xff]   ;;  %v11488_v35 = vld [vmem:[#allocation5 + $0x40c] ss:$16 sps:$4 sm:$0xff]  }
 0x32d   : > { %v14487_v34 = vsel %vm3628_vm5, %v3737_v46, %v3558_v3  ;;  %v3129_v18 = vsel %vm495_vm0, %v3127_v20, %v3128_v60  ;;  %v2957_v26 = vmax.f32 %v2861_v58, 0.0  ;;  %v2959_v40 = vmax.f32 %v2863_v28, 0.0  ;;  %6125 = vmatprep.subr.bf16.mxu0 %v11479_v47  ;;  %6490 = vmatprep.subr.bf16.mxu1 %v11482_v62 }
 0x32e   : > { %v14496_v55 = vmax.f32 %v3007_v54, %v3129_v18  ;;  %v3010_v21 = vmax.f32 %v2952_v36, %v2954_v6  ;;  %v2956_v50 = vmax.f32 %v2860_v56, 0.0  ;;  %v2958_v3 = vmax.f32 %v2862_v13, 0.0 }
 0x32f   : > { %v3011_v46 = vmax.f32 %v2955_v2, %v2957_v26  ;;  %v2865_v0 = vadd.f32 %v13694_v19, %v14172_v53  ;;  %v2864_v20 = vadd.f32 %v13697_v23, %v14180_v11  ;;  %v2866_v47 = vadd.f32 %v13700_v24, %v14182_v17 }
 0x330   : > { %v3271_v54 = vrot.slane %v14496_v55, 1  ;;  %v3303_v18 = vrot.slane %v14496_v55, 2  ;;  %v3335_v52 = vrot.slane %v14496_v55, 3  ;;  %v3131_v36 = vrot.slane %v3010_v21, 1  ;;  %6126 = vmatpush1.bf16.msra.mxu0 %v11477_v1  ;;  %6491 = vmatpush1.bf16.msra.mxu1 %v11480_v42  ;;  %v15696_v42 = vld [vmem:[#allocation55_spill] sm:$0xff] }
 0x331   : > { %v3133_v26 = vrot.slane %v3011_v46, 1  ;;  %v3012_v58 = vmax.f32 %v2956_v50, %v2958_v3  ;;  %v2961_v6 = vmax.f32 %v2865_v0, 0.0  ;;  %v2960_v56 = vmax.f32 %v2864_v20, 0.0  ;;  %6168 = vmatprep.subr.bf16.mxu0 %v11485_v22  ;;  %6533 = vmatprep.subr.bf16.mxu1 %v11488_v35 }
 0x332   : > { %v3624_v53 = vsel %vm3611_vm4, %v14496_v55, %v3271_v54  ;;  %v3132_v11 = vsel %vm495_vm0, %v3130_v51, %v3131_v36  ;;  %v2867_v62 = vadd.f32 %v13691_v16, %v14209_v12  ;;  %v2962_v17 = vmax.f32 %v2866_v47, 0.0 }
 0x333   : > { %v14513_v13 = vsel %vm3628_vm5, %v3624_v53, %v3303_v18  ;;  %v14516_v2 = vmax.f32 %v14455_v44, %v3132_v11  ;;  %v3134_v50 = vsel %vm495_vm0, %v3128_v60, %v3133_v26  ;;  %v14519_v28 = vmax.f32 %v3011_v46, %v3133_v26 }
 0x334   : > { %v14521_v3 = vmax.f32 %v3009_v57, %v3134_v50  ;;  %v3135_v51 = vrot.slane %v3012_v58, 1  ;;  %v3013_v0 = vmax.f32 %v2959_v40, %v2961_v6  ;;  %v2868_v50 = vadd.f32 %v13697_v23, %v15696_v42 }
 0x335   : > { %v3272_v12 = vrot.slane %v14516_v2, 1  ;;  %v3304_v1 = vrot.slane %v14516_v2, 2  ;;  %v3336_v20 = vrot.slane %v14516_v2, 3  ;;  %v3527_v44 = vrot.slane %v14519_v28, 1 }
 0x336   : > { %v3383_v60 = vrot.slane %v14521_v3, 4  ;;  %v3559_v57 = vrot.slane %v14519_v28, 2  ;;  %v3136_v54 = vsel %vm495_vm0, %v3131_v36, %v3135_v51  ;;  %v14536_v18 = vmax.f32 %v3012_v58, %v3135_v51 }
 0x337   : > { %v3625_v40 = vsel %vm3611_vm4, %v14516_v2, %v3272_v12  ;;  %v3738_v22 = vsel %vm3611_vm4, %v14519_v28, %v3527_v44  ;;  %v14544_v6 = vmax.f32 %v3010_v21, %v3136_v54  ;;  %v3137_v53 = vrot.slane %v3013_v0, 1 }
 0x338   : > { %v14539_v35 = vsel %vm3628_vm5, %v3625_v40, %v3304_v1  ;;  %v14542_v26 = vsel %vm3628_vm5, %v3738_v22, %v3559_v57  ;;  %v3528_v11 = vrot.slane %v14536_v18, 1  ;;  %v3560_v47 = vrot.slane %v14536_v18, 2 }
 0x339   : > { %v3014_v12 = vmax.f32 %v2960_v56, %v2962_v17  ;;  %v3384_v36 = vrot.slane %v14544_v6, 4  ;;  %v3416_v58 = vrot.slane %v14544_v6, 5  ;;  %v2963_v51 = vmax.f32 %v2867_v62, 0.0 }
 0x33a   : > { %v2869_v1 = vadd.f32 %v13694_v19, %v14211_v31  ;;  %v3739_v21 = vsel %vm3611_vm4, %v14536_v18, %v3528_v11  ;;  %v3444_v57 = vrot.slane %v14289_v4, 6  ;;  %v3446_v40 = vrot.slane %v14468_v15, 6 }
 0x33b   : > { %v3140_v44 = vrot.slane %v3014_v12, 1  ;;  %v14558_v22 = vsel %vm3628_vm5, %v3739_v21, %v3560_v47  ;;  %v3476_v17 = vrot.slane %v14289_v4, 7  ;;  %v3478_v54 = vrot.slane %v14468_v15, 7  ;;  %v15697_v47 = vld [vmem:[#allocation56_spill] sm:$0xff] }
 0x33c   : > { %v2965_v56 = vmax.f32 %v2869_v1, 0.0  ;;  %v15695_v62 = vrot.slane %v14256_v33, 3  ;;  %v3657_v11 = vsel %vm3645_vm6, %v14434_v61, %v3334_v9  ;;  %v2870_v1 = vadd.f32 %v13700_v24, %v15697_v47 }
 0x33d   : > { %v15698_v46 = vrot.slane %v14289_v4, 4  ;;  %v15699_v9 = vrot.slane %v14289_v4, 5  ;;  %v15700_v42 = vrot.slane %v14468_v15, 5  ;;  %v3475_v15 = vrot.slane %v14261_v41, 7 }
 0x33e   : > { %v3655_v31 = vsel %vm3645_vm6, %v14285_v43, %v15695_v62  ;;  %v14574_v21 = vmax.f32 %v2963_v51, %v2965_v56  ;;  %v3673_v43 = vsel %vm738_vm3, %v3657_v11, %v3382_v37  ;;  %v2964_v51 = vmax.f32 %v2868_v50, 0.0 }
 0x33f   : > { %v3671_v33 = vsel %vm738_vm3, %v3655_v31, %v15698_v46  ;;  %v3689_v62 = vsel %vm657_vm1, %v3673_v43, %v15700_v42  ;;  %v2966_v56 = vmax.f32 %v2870_v1, 0.0  ;;  %v3445_v37 = vrot.slane %v14446_v32, 6 }
 0x340   : > { %v3687_v61 = vsel %vm657_vm1, %v3671_v33, %v15699_v9  ;;  %v3138_v47 = vrot.slane %v14574_v21, 1  ;;  %v3705_v31 = vsel %vm576_vm2, %v3689_v62, %v3446_v40  ;;  %v3477_v40 = vrot.slane %v14446_v32, 7 }
 0x341   : > { %v3703_v46 = vsel %vm576_vm2, %v3687_v61, %v3444_v57  ;;  %v14597_v4 = vsel %vm495_vm0, %v3705_v31, %v3478_v54  ;;  %v14599_v33 = vmax.f32 %v2964_v51, %v2966_v56  ;;  %v15701_v1 = vrot.slane %v14253_v63, 3  ;;  %v15706_v51 = vld [vmem:[#allocation57_spill] sm:$0xff] }
 0x342   : > { %v14594_v11 = vsel %vm495_vm0, %v3703_v46, %v3476_v17  ;;  %v3139_v50 = vsel %vm495_vm0, %v3137_v53, %v3138_v47  ;;  %v15702_v9 = vrot.slane %v14375_v27, 3  ;;  %v15703_v53 = vrot.slane %v14261_v41, 4 }
 0x343   : > { %v4083_v57 = vpack.c.bf16 %v14597_v4, %v14594_v11  ;;  %v3654_v17 = vsel %vm3645_vm6, %v14282_v59, %v15701_v1  ;;  %v3237_v54 = vmax.f32 %v3013_v0, %v3139_v50  ;;  %v3141_v43 = vrot.slane %v14599_v33, 1 }
 0x344   : > { %v3656_v61 = vsel %vm3645_vm6, %v14416_v39, %v15702_v9  ;;  %v3670_v42 = vsel %vm738_vm3, %v3654_v17, %v15703_v53  ;;  %v15704_v62 = vrot.slane %v14446_v32, 4  ;;  %v15705_v59 = vrot.slane %v14261_v41, 5 }
 0x345   : > { %6074 = vmatprep.mubr.bf16.mxu0 %v4083_v57  ;;  %6439 = vmatprep.mubr.bf16.mxu1 %v4083_v57  ;;  %v2871_v27 = vadd.f32 %v13691_v16, %v15706_v51  ;;  %v3448_v56 = vrot.slane %v14544_v6, 6  ;;  %v3273_v39 = vrot.slane %v3237_v54, 1  ;;  %v3305_v46 = vrot.slane %v3237_v54, 2  ;;  %v15710_v51 = vld [vmem:[#allocation60_spill] sm:$0xff] }
 0x346   : > { %v3672_v63 = vsel %vm738_vm3, %v3656_v61, %v15704_v62  ;;  %v3686_v0 = vsel %vm657_vm1, %v3670_v42, %v15705_v59  ;;  %v3337_v31 = vrot.slane %v3237_v54, 3  ;;  %v3142_v50 = vsel %vm495_vm0, %v3140_v44, %v3141_v43  ;;  %v15708_v42 = vld [vmem:[#allocation58_spill] sm:$0xff] }
 0x347   : > { %v3238_v57 = vmax.f32 %v3014_v12, %v3142_v50  ;;  %v15707_v1 = vrot.slane %v14446_v32, 5  ;;  %v3702_v41 = vsel %vm576_vm2, %v3686_v0, %v3443_v5  ;;  %v2967_v9 = vmax.f32 %v2871_v27, 0.0  ;;  %v15709_v0 = vld [vmem:[#allocation59_spill] sm:$0xff] }
 0x348   : > { %v3626_v61 = vsel %vm3611_vm4, %v3237_v54, %v3273_v39  ;;  %v14639_v53 = vsel %vm495_vm0, %v3702_v41, %v3475_v15  ;;  %v2873_v62 = vadd.f32 %v13694_v19, %v15708_v42  ;;  %v2872_v54 = vadd.f32 %v13697_v23, %v15709_v0 }
 0x349   : > { %v3688_v17 = vsel %vm657_vm1, %v3672_v63, %v15707_v1  ;;  %v3643_v44 = vsel %vm3628_vm5, %v3626_v61, %v3305_v46  ;;  %v3274_v12 = vrot.slane %v3238_v57, 1  ;;  %v3306_v59 = vrot.slane %v3238_v57, 2 }
 0x34a   : > { %v3704_v16 = vsel %vm576_vm2, %v3688_v17, %v3445_v37  ;;  %v3338_v32 = vrot.slane %v3238_v57, 3  ;;  %v2969_v5 = vmax.f32 %v2873_v62, 0.0  ;;  %v2874_v37 = vadd.f32 %v13700_v24, %v15710_v51  ;;  %v15713_v62 = vld [vmem:[#allocation31_spill] sm:$0xff] }
 0x34b   : > { %v14645_v63 = vsel %vm495_vm0, %v3704_v16, %v3477_v40  ;;  %v3627_v15 = vsel %vm3611_vm4, %v3238_v57, %v3274_v12  ;;  %v3480_v27 = vrot.slane %v14544_v6, 7  ;;  %v3659_v40 = vsel %vm3645_vm6, %v14539_v35, %v3336_v20  ;;  %v15711_v16 = vld [vmem:[#allocation29_spill] sm:$0xff] }
 0x34c   : > { %v4082_v19 = vpack.c.bf16 %v14645_v63, %v14639_v53  ;;  %v3644_v39 = vsel %vm3628_vm5, %v3627_v15, %v3306_v59  ;;  %v3017_v46 = vmax.f32 %v2967_v9, %v2969_v5  ;;  %v2968_v50 = vmax.f32 %v2872_v54, 0.0  ;;  %v15717_v59 = vld [vmem:[#allocation34_spill] sm:$0xff]  ;;  %v15718_v5 = vld [vmem:[#allocation39_spill] sm:$0xff] }
 0x34d   : > { %v2970_v23 = vmax.f32 %v2874_v37, 0.0  ;;  %v3661_v24 = vsel %vm3645_vm6, %v3644_v39, %v3338_v32  ;;  %v3675_v57 = vsel %vm738_vm3, %v3659_v40, %v3384_v36  ;;  %v3447_v1 = vrot.slane %v14521_v3, 6 }
 0x34e   : > { %6075 = vmatmul.mubr.bf16.gmra.mrb[56].mxu0 %v4082_v19  ;;  %6440 = vmatmul.mubr.bf16.gmra.mrb[56].mxu1 %v4082_v19  ;;  %v3479_v2 = vrot.slane %v14521_v3, 7  ;;  %v3143_v17 = vrot.slane %v3017_v46, 1  ;;  %v3691_v20 = vsel %vm657_vm1, %v3675_v57, %v3416_v58  ;;  %v3658_v35 = vsel %vm3645_vm6, %v14513_v13, %v3335_v52 }
 0x34f   : > { %v3018_v41 = vmax.f32 %v2968_v50, %v2970_v23  ;;  %v3707_v9 = vsel %vm576_vm2, %v3691_v20, %v3448_v56  ;;  %v3660_v61 = vsel %vm3645_vm6, %v3643_v44, %v3337_v31  ;;  %v3674_v36 = vsel %vm738_vm3, %v3658_v35, %v3383_v60  ;;  %v15715_v44 = vld [vmem:[#allocation32_spill] sm:$0xff] }
 0x350   : > { %v15712_v42 = vrot.slane %v15711_v16, 3  ;;  %v3144_v55 = vsel %vm495_vm0, %v3138_v47, %v3143_v17  ;;  %v14687_v58 = vmax.f32 %v3017_v46, %v3143_v17  ;;  %v14690_v13 = vsel %vm495_vm0, %v3707_v9, %v3480_v27 }
 0x351   : > { %v3145_v52 = vrot.slane %v3018_v41, 1  ;;  %v3239_v56 = vmax.f32 %v14574_v21, %v3144_v55  ;;  %v15714_v60 = vrot.slane %v14521_v3, 5  ;;  %v15716_v12 = vrot.slane %v15715_v44, 3 }
 0x352   : > { %v14682_v6 = vsel %vm3645_vm6, %v15713_v62, %v15712_v42  ;;  %v3809_v47 = vrot.slane %v15718_v5, 1  ;;  %v3529_v0 = vrot.slane %v14687_v58, 1  ;;  %v3561_v54 = vrot.slane %v14687_v58, 2 }
 0x353   : > { %v3690_v31 = vsel %vm657_vm1, %v3674_v36, %v15714_v60  ;;  %v14700_v32 = vsel %vm3645_vm6, %v15717_v59, %v15716_v12  ;;  %v3593_v51 = vrot.slane %v14687_v58, 3  ;;  %v3146_v3 = vsel %vm495_vm0, %v3141_v43, %v3145_v52  ;;  %v15719_v60 = vld [vmem:[#allocation40_spill] sm:$0xff]  ;;  %v15720_v12 = vld [vmem:[#allocation41_spill] sm:$0xff] }
 0x354   : > { %v3385_v21 = vrot.slane %v3239_v56, 4  ;;  %v3417_v37 = vrot.slane %v3239_v56, 5  ;;  %v3240_v15 = vmax.f32 %v14599_v33, %v3146_v3  ;;  %v14710_v19 = vmax.f32 %v3018_v41, %v3145_v52 }
 0x355   : > { %v3740_v27 = vsel %vm3611_vm4, %v14687_v58, %v3529_v0  ;;  %v3449_v40 = vrot.slane %v3239_v56, 6  ;;  %v3481_v39 = vrot.slane %v3239_v56, 7  ;;  %v3706_v46 = vsel %vm576_vm2, %v3690_v31, %v3447_v1 }
 0x356   : > { %v14716_v50 = vsel %vm3628_vm5, %v3740_v27, %v3561_v54  ;;  %v3386_v23 = vrot.slane %v3240_v15, 4  ;;  %v3418_v57 = vrot.slane %v3240_v15, 5  ;;  %v3530_v43 = vrot.slane %v14710_v19, 1  ;;  %v15722_v27 = vld [vmem:[#allocation42_spill] sm:$0xff] }
 0x357   : > { %v3562_v17 = vrot.slane %v14710_v19, 2  ;;  %v3594_v33 = vrot.slane %v14710_v19, 3  ;;  %v3450_v41 = vrot.slane %v3240_v15, 6  ;;  %v3482_v20 = vrot.slane %v3240_v15, 7 }
 0x358   : > { %v3741_v35 = vsel %vm3611_vm4, %v14710_v19, %v3530_v43  ;;  %v3677_v9 = vsel %vm738_vm3, %v3661_v24, %v3386_v23  ;;  %v3676_v1 = vsel %vm738_vm3, %v3660_v61, %v3385_v21  ;;  %v14726_v36 = vsel %vm495_vm0, %v3706_v46, %v3479_v2  ;;  %v15721_v21 = vld [vmem:[#allocation30_spill] sm:$0xff]  ;;  %v15723_v46 = vld [vmem:[#allocation33_spill] sm:$0xff]  ;;  %v15724_v23 = vld [vmem:[#allocation36_spill] sm:$0xff] }
 0x359   : > { %v14729_v16 = vsel %vm3628_vm5, %v3741_v35, %v3562_v17  ;;  %v3693_v42 = vsel %vm657_vm1, %v3677_v9, %v3418_v57  ;;  %v3692_v62 = vsel %vm657_vm1, %v3676_v1, %v3417_v37  ;;  %v3810_v55 = vrot.slane %v14682_v6, 1  ;;  %v15729_v35 = vld [vmem:[#allocation54_spill] sm:$0xff] }
 0x35a   : > { %v3709_v52 = vsel %vm576_vm2, %v3693_v42, %v3450_v41  ;;  %v3708_v56 = vsel %vm576_vm2, %v3692_v62, %v3449_v40  ;;  %v3815_v24 = vrot.slane %v15719_v60, 1  ;;  %v3816_v61 = vrot.slane %v14700_v32, 1  ;;  %v15727_v41 = vld [vmem:[#allocation50_spill] sm:$0xff] }
 0x35b   : > { %v14739_v2 = vsel %vm495_vm0, %v3709_v52, %v3482_v20  ;;  %v14742_v31 = vsel %vm495_vm0, %v3708_v56, %v3481_v39  ;;  %v3811_v44 = vsel %vm495_vm0, %v3809_v47, %v3810_v55  ;;  %v3806_v59 = vrot.slane %v15720_v12, 1  ;;  %v15726_v47 = vld [vmem:[#allocation38_spill] sm:$0xff]  ;;  %v15730_v56 = vld [vmem:[#allocation35_spill] sm:$0xff] }
 0x35c   : > { %v4093_v0 = vpack.c.bf16 %v14739_v2, %v14690_v13  ;;  %v4092_v54 = vpack.c.bf16 %v14742_v31, %v14726_v36  ;;  %v3817_v3 = vsel %vm495_vm0, %v3815_v24, %v3816_v61  ;;  %v3807_v37 = vrot.slane %v15721_v21, 1  ;;  %v15732_v61 = vld [vmem:[#allocation37_spill] sm:$0xff] }
 0x35d   : > { %v4065_v15 = vpack.c.bf16 %v3817_v3, %v3811_v44  ;;  %v3812_v40 = vrot.slane %v15722_v27, 1  ;;  %v3813_v39 = vrot.slane %v15723_v46, 1  ;;  %v15725_v57 = vrot.slane %v15724_v23, 3  ;;  %v15733_v3 = vld [vmem:[#allocation48_spill] sm:$0xff] }
 0x35e   : > { %6084 = vmatprep.mubr.bf16.mxu0 %v4093_v0  ;;  %6449 = vmatprep.mubr.bf16.mxu1 %v4093_v0  ;;  %v3808_v17 = vsel %vm495_vm0, %v3806_v59, %v3807_v37  ;;  %v15728_v20 = vrot.slane %v15727_v41, 3  ;;  %v3821_v1 = vrot.slane %v14347_v7, 1  ;;  %v3827_v55 = vrot.slane %v14350_v49, 1 }
 0x35f   : > { %v14758_v43 = vsel %vm3645_vm6, %v15726_v47, %v15725_v57  ;;  %6085 = vmatmul.mubr.bf16.gmra.mrb[60].mxu0 %v4092_v54  ;;  %6450 = vmatmul.mubr.bf16.gmra.mrb[60].mxu1 %v4092_v54  ;;  %v3814_v62 = vsel %vm495_vm0, %v3812_v40, %v3813_v39  ;;  %v15731_v24 = vrot.slane %v15730_v56, 3  ;;  %v15734_v37 = vrot.slane %v15733_v3, 3  ;;  %v15735_v54 = vld [vmem:[#allocation53_spill] sm:$0xff] }
 0x360   : > { %v14765_v9 = vsel %vm3645_vm6, %v15729_v35, %v15728_v20  ;;  %v3822_v42 = vrot.slane %v14758_v43, 1  ;;  %6127 = vmatprep.mubr.bf16.mxu0 %v4065_v15  ;;  %6492 = vmatprep.mubr.bf16.mxu1 %v4065_v15  ;;  %v4064_v59 = vpack.c.bf16 %v3814_v62, %v3808_v17  ;;  %v3818_v39 = vrot.slane %v14408_v45, 1  ;;  %v11483_v56 = vld [vmem:[#allocation5 + $0x400] ss:$16 sps:$4 sm:$0xff]  }
 0x361   : > { %v3828_v52 = vrot.slane %v14765_v9, 1  ;;  %v14776_v44 = vsel %vm3645_vm6, %v15732_v61, %v15731_v24  ;;  %v14783_v40 = vsel %vm3645_vm6, %v15735_v54, %v15734_v37  ;;  %v3824_v47 = vrot.slane %v14411_v8, 1  ;;  %v11486_v24 = vld [vmem:[#allocation5 + $0x408] ss:$16 sps:$4 sm:$0xff]  }
 0x362   : > { %v3823_v0 = vsel %vm495_vm0, %v3821_v1, %v3822_v42  ;;  %v3819_v57 = vrot.slane %v14776_v44, 1  ;;  %v3825_v41 = vrot.slane %v14783_v40, 1  ;;  %v15736_v17 = vrot.slane %v14264_v30, 3 }
 0x363   : > { %v3829_v23 = vsel %vm495_vm0, %v3827_v55, %v3828_v52  ;;  %v15737_v35 = vrot.slane %v14462_v29, 3  ;;  %v3833_v42 = vrot.slane %v14594_v11, 1  ;;  %v3839_v30 = vrot.slane %v14597_v4, 1 }
 0x364   : > { %v4075_v15 = vpack.c.bf16 %v3829_v23, %v3823_v0  ;;  %v14794_v20 = vsel %vm3645_vm6, %v14310_v38, %v15736_v17  ;;  %v3820_v62 = vsel %vm495_vm0, %v3818_v39, %v3819_v57  ;;  %v3826_v55 = vsel %vm495_vm0, %v3824_v47, %v3825_v41  ;;  %v11491_v57 = vld [vmem:[#allocation5 + $0x424] ss:$16 sps:$4 sm:$0xff]  }
 0x365   : > { %v14800_v1 = vsel %vm3645_vm6, %v14487_v34, %v15737_v35  ;;  %v3834_v52 = vrot.slane %v14794_v20, 1  ;;  %v14807_v38 = vpack.c.bf16 %v3826_v55, %v3820_v62  ;;  %v15738_v61 = vrot.slane %v14259_v48, 3  ;;  %v11494_v48 = vld [vmem:[#allocation5 + $0x42c] ss:$16 sps:$4 sm:$0xff]   ;;  %v11492_v62 = vld [vmem:[#allocation5 + $0x428] ss:$16 sps:$4 sm:$0xff]  }
 0x366   : > { %v3840_v29 = vrot.slane %v14800_v1, 1  ;;  %v15739_v0 = vrot.slane %v14443_v14, 3  ;;  %v3830_v54 = vrot.slane %v14639_v53, 1  ;;  %v3836_v23 = vrot.slane %v14645_v63, 1 }
 0x367   : > { %v14814_v34 = vsel %vm3645_vm6, %v14297_v10, %v15738_v61  ;;  %v3835_v37 = vsel %vm495_vm0, %v3833_v42, %v3834_v52  ;;  %v15740_v14 = vrot.slane %v14536_v18, 3  ;;  %v14838_v41 = vsel %vm3645_vm6, %v14729_v16, %v3594_v33  ;;  %6128 = vmatmul.mubr.bf16.vlgmr.msra.gmra.mrb[48].mxu0 %v4064_v59  ;;  %6493 = vmatmul.mubr.bf16.vlgmr.msra.gmra.mrb[48].mxu1 %v4064_v59  ;;  %v11497_v52 = vld [vmem:[#allocation5 + $0x444] ss:$16 sps:$4 sm:$0xff]  }
 0x368   : > { %v14820_v3 = vsel %vm3645_vm6, %v14465_v25, %v15739_v0  ;;  %v3831_v39 = vrot.slane %v14814_v34, 1  ;;  %v3841_v47 = vsel %vm495_vm0, %v3839_v30, %v3840_v29  ;;  %v3845_v42 = vrot.slane %v14690_v13, 1  ;;  %6169 = vmatpush1.bf16.msra.mxu0 %v11483_v56  ;;  %6534 = vmatpush1.bf16.msra.mxu1 %v11486_v24  ;;  %v11500_v30 = vld [vmem:[#allocation5 + $0x44c] ss:$16 sps:$4 sm:$0xff]  }
 0x369   : > { %v3837_v10 = vrot.slane %v14820_v3, 1  ;;  %v14832_v25 = vsel %vm3645_vm6, %v14558_v22, %v15740_v14  ;;  %v14840_v17 = vpack.c.bf16 %v3841_v47, %v3835_v37  ;;  %v11489_v22 = vld [vmem:[#allocation5 + $0x420] ss:$16 sps:$4 sm:$0xff]   ;;  %v3851_v55 = vrot.slane %v14739_v2, 1  ;;  %6137 = vmatprep.mubr.bf16.mxu0 %v4075_v15  ;;  %6502 = vmatprep.mubr.bf16.mxu1 %v4075_v15 }
 0x36a   : > { %v3832_v35 = vsel %vm495_vm0, %v3830_v54, %v3831_v39  ;;  %v3846_v18 = vrot.slane %v14832_v25, 1  ;;  %v3852_v33 = vrot.slane %v14838_v41, 1  ;;  %v15741_v16 = vrot.slane %v14519_v28, 3  ;;  %6170 = vmatprep.subr.bf16.mxu0 %v11491_v57  ;;  %6535 = vmatprep.subr.bf16.mxu1 %v11494_v48  ;;  %v11498_v39 = vld [vmem:[#allocation5 + $0x448] ss:$16 sps:$4 sm:$0xff]  }
 0x36b   : > { %v3838_v19 = vsel %vm495_vm0, %v3836_v23, %v3837_v10  ;;  %v14861_v29 = vsel %vm3645_vm6, %v14716_v50, %v3593_v51  ;;  %v3842_v28 = vrot.slane %v14726_v36, 1  ;;  %v3848_v61 = vrot.slane %v14742_v31, 1  ;;  %v11495_v50 = vld [vmem:[#allocation5 + $0x440] ss:$16 sps:$4 sm:$0xff]   ;;  %v11503_v10 = vld [vmem:[#allocation5 + $0x464] ss:$16 sps:$4 sm:$0xff]  }
 0x36c   : > { %v14852_v59 = vsel %vm3645_vm6, %v14542_v26, %v15741_v16  ;;  %v14854_v56 = vpack.c.bf16 %v3838_v19, %v3832_v35  ;;  %v3847_v24 = vsel %vm495_vm0, %v3845_v42, %v3846_v18  ;;  %v3853_v26 = vsel %vm495_vm0, %v3851_v55, %v3852_v33  ;;  %6171 = vmatpush1.bf16.msra.mxu0 %v11489_v22  ;;  %v11506_v22 = vld [vmem:[#allocation5 + $0x46c] ss:$16 sps:$4 sm:$0xff]  }
 0x36d   : > { %v3843_v15 = vrot.slane %v14852_v59, 1  ;;  %v3849_v0 = vrot.slane %v14861_v29, 1  ;;  %v14868_v37 = vpack.c.bf16 %v3853_v26, %v3847_v24  ;;  %v3873_v58 = vrot.slane %v15718_v5, 2  ;;  %6536 = vmatpush1.bf16.msra.mxu1 %v11492_v62  ;;  %6172 = vmatprep.subr.bf16.mxu0 %v11497_v52  ;;  %v11504_v26 = vld [vmem:[#allocation5 + $0x468] ss:$16 sps:$4 sm:$0xff]  }
 0x36e   : > { %v3874_v54 = vrot.slane %v14682_v6, 2  ;;  %v3879_v51 = vrot.slane %v15719_v60, 2  ;;  %v3880_v48 = vrot.slane %v14700_v32, 2  ;;  %v3870_v47 = vrot.slane %v15720_v12, 2  ;;  %6537 = vmatprep.subr.bf16.mxu1 %v11500_v30 }
 0x36f   : > { %v3844_v23 = vsel %vm495_vm0, %v3842_v28, %v3843_v15  ;;  %v3850_v57 = vsel %vm495_vm0, %v3848_v61, %v3849_v0  ;;  %v3871_v42 = vrot.slane %v15721_v21, 2  ;;  %v3876_v18 = vrot.slane %v15722_v27, 2  ;;  %6138 = vmatmul.mubr.bf16.gmra.mrb[52].mxu0 %v14807_v38  ;;  %6503 = vmatmul.mubr.bf16.gmra.mrb[52].mxu1 %v14807_v38  ;;  %v11501_v28 = vld [vmem:[#allocation5 + $0x460] ss:$16 sps:$4 sm:$0xff]  }
 0x370   : > { %v14877_v14 = vpack.c.bf16 %v3850_v57, %v3844_v23  ;;  %v3875_v35 = vsel %vm576_vm2, %v3873_v58, %v3874_v54  ;;  %v3881_v62 = vsel %vm576_vm2, %v3879_v51, %v3880_v48  ;;  %v3877_v19 = vrot.slane %v15723_v46, 2  ;;  %6173 = vmatpush1.bf16.msra.mxu0 %v11495_v50  ;;  %6147 = vmatprep.mubr.bf16.mxu0 %v14840_v17  ;;  %v11509_v58 = vld [vmem:[#allocation5 + $0x484] ss:$16 sps:$4 sm:$0xff]   ;;  %v11512_v54 = vld [vmem:[#allocation5 + $0x48c] ss:$16 sps:$4 sm:$0xff]  }
 0x371   : > { %v3885_v55 = vrot.slane %v14347_v7, 2  ;;  %v3886_v33 = vrot.slane %v14758_v43, 2  ;;  %v14888_v16 = vpack.c.bf16 %v3881_v62, %v3875_v35  ;;  %v3872_v52 = vsel %vm576_vm2, %v3870_v47, %v3871_v42  ;;  %6538 = vmatpush1.bf16.msra.mxu1 %v11498_v39  ;;  %6512 = vmatprep.mubr.bf16.mxu1 %v14840_v17 }
 0x372   : > { %v3891_v30 = vrot.slane %v14350_v49, 2  ;;  %v3892_v24 = vrot.slane %v14765_v9, 2  ;;  %v3878_v15 = vsel %vm576_vm2, %v3876_v18, %v3877_v19  ;;  %v3882_v0 = vrot.slane %v14408_v45, 2  ;;  %6174 = vmatprep.subr.bf16.mxu0 %v11503_v10  ;;  %6539 = vmatprep.subr.bf16.mxu1 %v11506_v22  ;;  %v11507_v10 = vld [vmem:[#allocation5 + $0x480] ss:$16 sps:$4 sm:$0xff]  }
 0x373   : > { %v3887_v61 = vsel %vm576_vm2, %v3885_v55, %v3886_v33  ;;  %v3883_v38 = vrot.slane %v14776_v44, 2  ;;  %v14899_v51 = vpack.c.bf16 %v3878_v15, %v3872_v52  ;;  %v3888_v39 = vrot.slane %v14411_v8, 2  ;;  %v11510_v22 = vld [vmem:[#allocation5 + $0x488] ss:$16 sps:$4 sm:$0xff]  }
 0x374   : > { %v3893_v50 = vsel %vm576_vm2, %v3891_v30, %v3892_v24  ;;  %v3889_v23 = vrot.slane %v14783_v40, 2  ;;  %v3897_v47 = vrot.slane %v14594_v11, 2  ;;  %v3898_v17 = vrot.slane %v14794_v20, 2  ;;  %6175 = vmatpush1.bf16.msra.mxu0 %v11501_v28 }
 0x375   : > { %v14904_v57 = vpack.c.bf16 %v3893_v50, %v3887_v61  ;;  %v3884_v48 = vsel %vm576_vm2, %v3882_v0, %v3883_v38  ;;  %v3903_v42 = vrot.slane %v14597_v4, 2  ;;  %v3904_v18 = vrot.slane %v14800_v1, 2  ;;  %6540 = vmatpush1.bf16.msra.mxu1 %v11504_v26  ;;  %6176 = vmatprep.subr.bf16.mxu0 %v11509_v58  ;;  %v11515_v26 = vld [vmem:[#allocation5 + $0x4a4] ss:$16 sps:$4 sm:$0xff]   ;;  %v11518_v61 = vld [vmem:[#allocation5 + $0x4ac] ss:$16 sps:$4 sm:$0xff]  }
 0x376   : > { %v3890_v35 = vsel %vm576_vm2, %v3888_v39, %v3889_v23  ;;  %v3894_v62 = vrot.slane %v14639_v53, 2  ;;  %v3899_v55 = vsel %vm576_vm2, %v3897_v47, %v3898_v17  ;;  %v3895_v33 = vrot.slane %v14814_v34, 2  ;;  %6541 = vmatprep.subr.bf16.mxu1 %v11512_v54  ;;  %v11513_v47 = vld [vmem:[#allocation5 + $0x4a0] ss:$16 sps:$4 sm:$0xff]   ;;  %v11516_v17 = vld [vmem:[#allocation5 + $0x4a8] ss:$16 sps:$4 sm:$0xff]  }
 0x377   : > { %v14913_v19 = vpack.c.bf16 %v3890_v35, %v3884_v48  ;;  %v3900_v52 = vrot.slane %v14645_v63, 2  ;;  %v3905_v30 = vsel %vm576_vm2, %v3903_v42, %v3904_v18  ;;  %v3901_v24 = vrot.slane %v14820_v3, 2  ;;  %6148 = vmatmul.mubr.bf16.gmra.mrb[56].mxu0 %v14854_v56  ;;  %6513 = vmatmul.mubr.bf16.gmra.mrb[56].mxu1 %v14854_v56 }
 0x378   : > { %v3909_v15 = vrot.slane %v14690_v13, 2  ;;  %v3910_v28 = vrot.slane %v14832_v25, 2  ;;  %v14922_v0 = vpack.c.bf16 %v3905_v30, %v3899_v55  ;;  %v3896_v38 = vsel %vm576_vm2, %v3894_v62, %v3895_v33  ;;  %6177 = vmatpush1.bf16.msra.mxu0 %v11507_v10  ;;  %6157 = vmatprep.mubr.bf16.mxu0 %v14868_v37  ;;  %v11521_v62 = vld [vmem:[#allocation5 + $0x4c4] ss:$16 sps:$4 sm:$0xff]   ;;  %v11524_v55 = vld [vmem:[#allocation5 + $0x4cc] ss:$16 sps:$4 sm:$0xff]  }
 0x379   : > { %v3915_v50 = vrot.slane %v14739_v2, 2  ;;  %v3916_v39 = vrot.slane %v14838_v41, 2  ;;  %v3902_v58 = vsel %vm576_vm2, %v3900_v52, %v3901_v24  ;;  %v3906_v23 = vrot.slane %v14726_v36, 2  ;;  %6542 = vmatpush1.bf16.msra.mxu1 %v11510_v22  ;;  %6522 = vmatprep.mubr.bf16.mxu1 %v14868_v37 }
 0x37a   : > { %v3911_v54 = vsel %vm576_vm2, %v3909_v15, %v3910_v28  ;;  %v3907_v48 = vrot.slane %v14852_v59, 2  ;;  %v14933_v35 = vpack.c.bf16 %v3902_v58, %v3896_v38  ;;  %v3912_v18 = vrot.slane %v14742_v31, 2  ;;  %6178 = vmatprep.subr.bf16.mxu0 %v11515_v26  ;;  %6543 = vmatprep.subr.bf16.mxu1 %v11518_v61  ;;  %v11519_v28 = vld [vmem:[#allocation5 + $0x4c0] ss:$16 sps:$4 sm:$0xff]   ;;  %v11522_v26 = vld [vmem:[#allocation5 + $0x4c8] ss:$16 sps:$4 sm:$0xff]  }
 0x37b   : > { %v3917_v42 = vsel %vm576_vm2, %v3915_v50, %v3916_v39  ;;  %v3913_v56 = vrot.slane %v14861_v29, 2  ;;  %v3937_v22 = vrot.slane %v15718_v5, 3  ;;  %v3938_v52 = vrot.slane %v14682_v6, 3 }
 0x37c   : > { %v14940_v33 = vpack.c.bf16 %v3917_v42, %v3911_v54  ;;  %v3908_v10 = vsel %vm576_vm2, %v3906_v23, %v3907_v48  ;;  %v3943_v24 = vrot.slane %v15719_v60, 3  ;;  %v3944_v15 = vrot.slane %v14700_v32, 3  ;;  %6179 = vmatpush1.bf16.msra.mxu0 %v11513_v47 }
 0x37d   : > { %v3914_v30 = vsel %vm576_vm2, %v3912_v18, %v3913_v56  ;;  %v3934_v37 = vrot.slane %v15720_v12, 3  ;;  %v3939_v50 = vsel %vm657_vm1, %v3937_v22, %v3938_v52  ;;  %v3935_v39 = vrot.slane %v15721_v21, 3  ;;  %6544 = vmatpush1.bf16.msra.mxu1 %v11516_v17  ;;  %6180 = vmatprep.subr.bf16.mxu0 %v11521_v62  ;;  %v11527_v17 = vld [vmem:[#allocation5 + $0x4e4] ss:$16 sps:$4 sm:$0xff]   ;;  %v11525_v62 = vld [vmem:[#allocation5 + $0x4e0] ss:$16 sps:$4 sm:$0xff]  }
 0x37e   : > { %v14949_v38 = vpack.c.bf16 %v3914_v30, %v3908_v10  ;;  %v3940_v58 = vrot.slane %v15722_v27, 3  ;;  %v3945_v61 = vsel %vm657_vm1, %v3943_v24, %v3944_v15  ;;  %v3941_v54 = vrot.slane %v15723_v46, 3  ;;  %6545 = vmatprep.subr.bf16.mxu1 %v11524_v55  ;;  %v11530_v10 = vld [vmem:[#allocation5 + $0x4ec] ss:$16 sps:$4 sm:$0xff]  }
 0x37f   : > { %v3949_v23 = vrot.slane %v14347_v7, 3  ;;  %v3950_v48 = vrot.slane %v14758_v43, 3  ;;  %v14958_v42 = vpack.c.bf16 %v3945_v61, %v3939_v50  ;;  %v3936_v18 = vsel %vm657_vm1, %v3934_v37, %v3935_v39  ;;  %6158 = vmatmul.mubr.bf16.gmra.mrb[60].mxu0 %v14877_v14  ;;  %6523 = vmatmul.mubr.bf16.gmra.mrb[60].mxu1 %v14877_v14  ;;  %v11528_v39 = vld [vmem:[#allocation5 + $0x4e8] ss:$16 sps:$4 sm:$0xff]  }
 0x380   : > { %v3955_v56 = vrot.slane %v14350_v49, 3  ;;  %v3956_v47 = vrot.slane %v14765_v9, 3  ;;  %v3942_v22 = vsel %vm657_vm1, %v3940_v58, %v3941_v54  ;;  %v3946_v30 = vrot.slane %v14408_v45, 3  ;;  %6181 = vmatpush1.bf16.msra.mxu0 %v11519_v28  ;;  %v11533_v58 = vld [vmem:[#allocation5 + $0x504] ss:$16 sps:$4 sm:$0xff]   ;;  %6200 = vmatprep.mubr.bf16.mxu0 %v14888_v16 }
 0x381   : > { %v3951_v52 = vsel %vm657_vm1, %v3949_v23, %v3950_v48  ;;  %v3947_v24 = vrot.slane %v14776_v44, 3  ;;  %v14969_v55 = vpack.c.bf16 %v3942_v22, %v3936_v18  ;;  %v3952_v37 = vrot.slane %v14411_v8, 3  ;;  %6546 = vmatpush1.bf16.msra.mxu1 %v11522_v26  ;;  %6565 = vmatprep.mubr.bf16.mxu1 %v14888_v16  ;;  %v11536_v48 = vld [vmem:[#allocation5 + $0x50c] ss:$16 sps:$4 sm:$0xff]  }
 0x382   : > { %v3957_v15 = vsel %vm657_vm1, %v3955_v56, %v3956_v47  ;;  %v3953_v50 = vrot.slane %v14783_v40, 3  ;;  %v3961_v23 = vrot.slane %v14594_v11, 3  ;;  %v3962_v14 = vrot.slane %v14794_v20, 3  ;;  %6182 = vmatprep.subr.bf16.mxu0 %v11527_v17  ;;  %6547 = vmatprep.subr.bf16.mxu1 %v11530_v10  ;;  %v11531_v17 = vld [vmem:[#allocation5 + $0x500] ss:$16 sps:$4 sm:$0xff]  }
 0x383   : > { %v14974_v61 = vpack.c.bf16 %v3957_v15, %v3951_v52  ;;  %v3948_v54 = vsel %vm657_vm1, %v3946_v30, %v3947_v24  ;;  %v3967_v28 = vrot.slane %v14597_v4, 3  ;;  %v3968_v26 = vrot.slane %v14800_v1, 3  ;;  %v11534_v10 = vld [vmem:[#allocation5 + $0x508] ss:$16 sps:$4 sm:$0xff]  }
 0x384   : > { %v3954_v18 = vsel %vm657_vm1, %v3952_v37, %v3953_v50  ;;  %v3958_v56 = vrot.slane %v14639_v53, 3  ;;  %v3963_v22 = vsel %vm657_vm1, %v3961_v23, %v3962_v14  ;;  %v3959_v52 = vrot.slane %v14814_v34, 3  ;;  %6183 = vmatpush1.bf16.msra.mxu0 %v11525_v62 }
 0x385   : > { %v14985_v47 = vpack.c.bf16 %v3954_v18, %v3948_v54  ;;  %v3964_v30 = vrot.slane %v14645_v63, 3  ;;  %v3969_v16 = vsel %vm657_vm1, %v3967_v28, %v3968_v26  ;;  %v3965_v24 = vrot.slane %v14820_v3, 3  ;;  %6548 = vmatpush1.bf16.msra.mxu1 %v11528_v39  ;;  %6184 = vmatprep.subr.bf16.mxu0 %v11533_v58  ;;  %v11539_v18 = vld [vmem:[#allocation5 + $0x524] ss:$16 sps:$4 sm:$0xff]   ;;  %v11542_v28 = vld [vmem:[#allocation5 + $0x52c] ss:$16 sps:$4 sm:$0xff]  }
 0x386   : > { %v3973_v15 = vrot.slane %v14690_v13, 3  ;;  %v3974_v37 = vrot.slane %v14832_v25, 3  ;;  %v14994_v50 = vpack.c.bf16 %v3969_v16, %v3963_v22  ;;  %v3960_v54 = vsel %vm657_vm1, %v3958_v56, %v3959_v52  ;;  %6549 = vmatprep.subr.bf16.mxu1 %v11536_v48  ;;  %v11537_v58 = vld [vmem:[#allocation5 + $0x520] ss:$16 sps:$4 sm:$0xff]  }
 0x387   : > { %15742 = vst [vmem:[#allocation43_spill] sm:$0xff] %v14985_v47  ;;  %v3979_v23 = vrot.slane %v14739_v2, 3  ;;  %v3980_v14 = vrot.slane %v14838_v41, 3  ;;  %v3966_v26 = vsel %vm657_vm1, %v3964_v30, %v3965_v24  ;;  %v3970_v62 = vrot.slane %v14726_v36, 3 }
 0x388   : > { %15743 = vst [vmem:[#allocation44_spill] sm:$0xff] %v14994_v50  ;;  %v3975_v47 = vsel %vm657_vm1, %v3973_v15, %v3974_v37  ;;  %v3971_v39 = vrot.slane %v14852_v59, 3  ;;  %v15003_v22 = vpack.c.bf16 %v3966_v26, %v3960_v54  ;;  %v3976_v52 = vrot.slane %v14742_v31, 3  ;;  %6185 = vmatpush1.bf16.msra.mxu0 %v11531_v17  ;;  %v11540_v15 = vld [vmem:[#allocation5 + $0x528] ss:$16 sps:$4 sm:$0xff]  }
 0x389   : > { %v3981_v56 = vsel %vm657_vm1, %v3979_v23, %v3980_v14  ;;  %v3977_v16 = vrot.slane %v14861_v29, 3  ;;  %v4001_v30 = vrot.slane %v15718_v5, 4  ;;  %v4002_v24 = vrot.slane %v14682_v6, 4  ;;  %6550 = vmatpush1.bf16.msra.mxu1 %v11534_v10  ;;  %6186 = vmatprep.subr.bf16.mxu0 %v11539_v18  ;;  %v11548_v26 = vld [vmem:[#allocation5 + $0x54c] ss:$16 sps:$4 sm:$0xff]  }
 0x38a   : > { %v15008_v48 = vpack.c.bf16 %v3981_v56, %v3975_v47  ;;  %v3972_v50 = vsel %vm657_vm1, %v3970_v62, %v3971_v39  ;;  %v4007_v54 = vrot.slane %v15719_v60, 4  ;;  %v4008_v23 = vrot.slane %v14700_v32, 4  ;;  %6551 = vmatprep.subr.bf16.mxu1 %v11542_v28  ;;  %v11545_v47 = vld [vmem:[#allocation5 + $0x544] ss:$16 sps:$4 sm:$0xff]   ;;  %v11543_v39 = vld [vmem:[#allocation5 + $0x540] ss:$16 sps:$4 sm:$0xff]  }
 0x38b   : > { %v3978_v37 = vsel %vm657_vm1, %v3976_v52, %v3977_v16  ;;  %v3998_v14 = vrot.slane %v15720_v12, 4  ;;  %v3999_v5 = vrot.slane %v15721_v21, 4  ;;  %v4004_v6 = vrot.slane %v15722_v27, 4  ;;  %v11546_v60 = vld [vmem:[#allocation5 + $0x548] ss:$16 sps:$4 sm:$0xff]  }
 0x38c   : > { %v15017_v62 = vpack.c.bf16 %v3978_v37, %v3972_v50  ;;  %v4003_v17 = vsel %vm738_vm3, %v4001_v30, %v4002_v24  ;;  %v4009_v10 = vsel %vm738_vm3, %v4007_v54, %v4008_v23  ;;  %v4005_v12 = vrot.slane %v15723_v46, 4  ;;  %6187 = vmatpush1.bf16.msra.mxu0 %v11537_v58  ;;  %v11551_v50 = vld [vmem:[#allocation5 + $0x564] ss:$16 sps:$4 sm:$0xff]   ;;  %v11554_v16 = vld [vmem:[#allocation5 + $0x56c] ss:$16 sps:$4 sm:$0xff]  }
 0x38d   : > { %v15023_v56 = vpack.c.bf16 %v4009_v10, %v4003_v17  ;;  %v4000_v32 = vsel %vm738_vm3, %v3998_v14, %v3999_v5  ;;  %v4013_v18 = vrot.slane %v14347_v7, 4  ;;  %6552 = vmatpush1.bf16.msra.mxu1 %v11540_v15  ;;  %v4014_v21 = vrot.slane %v14758_v43, 4  ;;  %6188 = vmatprep.subr.bf16.mxu0 %v11545_v47  ;;  %v11552_v15 = vld [vmem:[#allocation5 + $0x568] ss:$16 sps:$4 sm:$0xff]  }
 0x38e   : > { %v4019_v27 = vrot.slane %v14350_v49, 4  ;;  %v4020_v28 = vrot.slane %v14765_v9, 4  ;;  %v4010_v52 = vrot.slane %v14408_v45, 4  ;;  %6553 = vmatprep.subr.bf16.mxu1 %v11548_v26  ;;  %v4006_v30 = vsel %vm738_vm3, %v4004_v6, %v4005_v12  ;;  %v11549_v9 = vld [vmem:[#allocation5 + $0x560] ss:$16 sps:$4 sm:$0xff]  }
 0x38f   : > { %v4011_v46 = vrot.slane %v14776_v44, 4  ;;  %v4016_v7 = vrot.slane %v14411_v8, 4  ;;  %v4017_v58 = vrot.slane %v14783_v40, 4  ;;  %v15036_v24 = vpack.c.bf16 %v4006_v30, %v4000_v32  ;;  %v11557_v8 = vld [vmem:[#allocation5 + $0x584] ss:$16 sps:$4 sm:$0xff]  }
 0x390   : > { %v4015_v43 = vsel %vm738_vm3, %v4013_v18, %v4014_v21  ;;  %v4021_v49 = vsel %vm738_vm3, %v4019_v27, %v4020_v28  ;;  %v4025_v44 = vrot.slane %v14594_v11, 4  ;;  %6189 = vmatpush1.bf16.msra.mxu0 %v11543_v39  ;;  %v4026_v23 = vrot.slane %v14794_v20, 4  ;;  %v11560_v26 = vld [vmem:[#allocation5 + $0x58c] ss:$16 sps:$4 sm:$0xff]   ;;  %v11555_v20 = vld [vmem:[#allocation5 + $0x580] ss:$16 sps:$4 sm:$0xff]  }
 0x391   : > { %v15040_v45 = vpack.c.bf16 %v4021_v49, %v4015_v43  ;;  %v4012_v37 = vsel %vm738_vm3, %v4010_v52, %v4011_v46  ;;  %v4018_v54 = vsel %vm738_vm3, %v4016_v7, %v4017_v58  ;;  %6554 = vmatpush1.bf16.msra.mxu1 %v11546_v60  ;;  %v4031_v14 = vrot.slane %v14597_v4, 4  ;;  %6190 = vmatprep.subr.bf16.mxu0 %v11551_v50  ;;  %v11558_v60 = vld [vmem:[#allocation5 + $0x588] ss:$16 sps:$4 sm:$0xff]   ;;  %v11566_v50 = vld [vmem:[#allocation5 + $0x5ac] ss:$16 sps:$4 sm:$0xff]  }
 0x392   : > { %v15045_v40 = vpack.c.bf16 %v4018_v54, %v4012_v37  ;;  %v4032_v47 = vrot.slane %v14800_v1, 4  ;;  %6555 = vmatprep.subr.bf16.mxu1 %v11554_v16  ;;  %v4022_v5 = vrot.slane %v14639_v53, 4  ;;  %v4023_v6 = vrot.slane %v14814_v34, 4  ;;  %v11563_v34 = vld [vmem:[#allocation5 + $0x5a4] ss:$16 sps:$4 sm:$0xff]  }
 0x393   : > { %v4028_v11 = vrot.slane %v14645_v63, 4  ;;  %v4029_v17 = vrot.slane %v14820_v3, 4  ;;  %v4027_v10 = vsel %vm738_vm3, %v4025_v44, %v4026_v23  ;;  %v4037_v53 = vrot.slane %v14690_v13, 4  ;;  %v11561_v30 = vld [vmem:[#allocation5 + $0x5a0] ss:$16 sps:$4 sm:$0xff]  }
 0x394   : > { %v4033_v39 = vsel %vm738_vm3, %v4031_v14, %v4032_v47  ;;  %v4024_v1 = vsel %vm738_vm3, %v4022_v5, %v4023_v6  ;;  %6191 = vmatpush1.bf16.msra.mxu0 %v11549_v9  ;;  %v4038_v3 = vrot.slane %v14832_v25, 4  ;;  %v4043_v12 = vrot.slane %v14739_v2, 4  ;;  %v11570_v7 = vld [vmem:[#allocation5 + $0x5c8] ss:$16 sps:$4 sm:$0xff]   ;;  %v11575_v58 = vld [vmem:[#allocation5 + $0x5e4] ss:$16 sps:$4 sm:$0xff]  }
 0x395   : > { %v15056_v4 = vpack.c.bf16 %v4033_v39, %v4027_v10  ;;  %v4030_v32 = vsel %vm738_vm3, %v4028_v11, %v4029_v17  ;;  %6556 = vmatpush1.bf16.msra.mxu1 %v11552_v15  ;;  %v4044_v18 = vrot.slane %v14838_v41, 4  ;;  %6192 = vmatprep.subr.bf16.mxu0 %v11557_v8  ;;  %v4034_v21 = vrot.slane %v14726_v36, 4  ;;  %v11564_v36 = vld [vmem:[#allocation5 + $0x5a8] ss:$16 sps:$4 sm:$0xff]   ;;  %v11578_v43 = vld [vmem:[#allocation5 + $0x5ec] ss:$16 sps:$4 sm:$0xff]  }
 0x396   : > { %v15061_v63 = vpack.c.bf16 %v4030_v32, %v4024_v1  ;;  %6557 = vmatprep.subr.bf16.mxu1 %v11560_v26  ;;  %v4035_v27 = vrot.slane %v14852_v59, 4  ;;  %v4040_v13 = vrot.slane %v14742_v31, 4  ;;  %v4041_v28 = vrot.slane %v14861_v29, 4  ;;  %v11569_v31 = vld [vmem:[#allocation5 + $0x5c4] ss:$16 sps:$4 sm:$0xff]  }
 0x397   : > { %v4039_v52 = vsel %vm738_vm3, %v4037_v53, %v4038_v3  ;;  %v4045_v16 = vsel %vm738_vm3, %v4043_v12, %v4044_v18  ;;  %v11572_v59 = vld [vmem:[#allocation5 + $0x5cc] ss:$16 sps:$4 sm:$0xff]   ;;  %v11567_v29 = vld [vmem:[#allocation5 + $0x5c0] ss:$16 sps:$4 sm:$0xff]   ;;  %v11576_v9 = vld [vmem:[#allocation5 + $0x5e8] ss:$16 sps:$4 sm:$0xff]  }
 0x398   : > { %v15072_v25 = vpack.c.bf16 %v4045_v16, %v4039_v52  ;;  %v4036_v2 = vsel %vm738_vm3, %v4034_v21, %v4035_v27  ;;  %v4042_v41 = vsel %vm738_vm3, %v4040_v13, %v4041_v28  ;;  %6193 = vmatpush1.bf16.msra.mxu0 %v11555_v20  ;;  %v11573_v49 = vld [vmem:[#allocation5 + $0x5e0] ss:$16 sps:$4 sm:$0xff]   ;;  %v11581_v15 = vld [vmem:[#allocation5 + $0x604] ss:$16 sps:$4 sm:$0xff]   ;;  %v11584_v37 = vld [vmem:[#allocation5 + $0x60c] ss:$16 sps:$4 sm:$0xff]  }
 0x399   : > { %6558 = vmatpush1.bf16.msra.mxu1 %v11558_v60  ;;  %v15076_v46 = vpack.c.bf16 %v4042_v41, %v4036_v2  ;;  %6194 = vmatprep.subr.bf16.mxu0 %v11563_v34  ;;  %v11579_v54 = vld [vmem:[#allocation5 + $0x600] ss:$16 sps:$4 sm:$0xff]   ;;  %v11582_v44 = vld [vmem:[#allocation5 + $0x608] ss:$16 sps:$4 sm:$0xff]   ;;  %v11587_v8 = vld [vmem:[#allocation5 + $0x624] ss:$16 sps:$4 sm:$0xff]  }
 0x39a   : > { %6559 = vmatprep.subr.bf16.mxu1 %v11566_v50  ;;  %v11590_v23 = vld [vmem:[#allocation5 + $0x62c] ss:$16 sps:$4 sm:$0xff]   ;;  %v11585_v14 = vld [vmem:[#allocation5 + $0x620] ss:$16 sps:$4 sm:$0xff]   ;;  %v11588_v47 = vld [vmem:[#allocation5 + $0x628] ss:$16 sps:$4 sm:$0xff]  }
 0x39b   : > { %v11593_v26 = vld [vmem:[#allocation5 + $0x644] ss:$16 sps:$4 sm:$0xff]   ;;  %v11596_v5 = vld [vmem:[#allocation5 + $0x64c] ss:$16 sps:$4 sm:$0xff]   ;;  %v11591_v6 = vld [vmem:[#allocation5 + $0x640] ss:$16 sps:$4 sm:$0xff]  }
 0x39c   : > { %6195 = vmatpush1.bf16.msra.mxu0 %v11561_v30  ;;  %v11594_v11 = vld [vmem:[#allocation5 + $0x648] ss:$16 sps:$4 sm:$0xff]   ;;  %v11599_v17 = vld [vmem:[#allocation5 + $0x664] ss:$16 sps:$4 sm:$0xff]   ;;  %v11608_v20 = vld [vmem:[#allocation5 + $0x68c] ss:$16 sps:$4 sm:$0xff]  }
 0x39d   : > { %6560 = vmatpush1.bf16.msra.mxu1 %v11564_v36  ;;  %6196 = vmatprep.subr.bf16.mxu0 %v11569_v31  ;;  %v11600_v10 = vld [vmem:[#allocation5 + $0x668] ss:$16 sps:$4 sm:$0xff]   ;;  %v11605_v39 = vld [vmem:[#allocation5 + $0x684] ss:$16 sps:$4 sm:$0xff]   ;;  %v11603_v60 = vld [vmem:[#allocation5 + $0x680] ss:$16 sps:$4 sm:$0xff]  }
 0x39e   : > { %6561 = vmatprep.subr.bf16.mxu1 %v11572_v59  ;;  %v11606_v1 = vld [vmem:[#allocation5 + $0x688] ss:$16 sps:$4 sm:$0xff]   ;;  %v11611_v32 = vld [vmem:[#allocation5 + $0x6a4] ss:$16 sps:$4 sm:$0xff]   ;;  %v11620_v3 = vld [vmem:[#allocation5 + $0x6cc] ss:$16 sps:$4 sm:$0xff]  }
 0x39f   : > { %v11612_v53 = vld [vmem:[#allocation5 + $0x6a8] ss:$16 sps:$4 sm:$0xff]   ;;  %v11617_v34 = vld [vmem:[#allocation5 + $0x6c4] ss:$16 sps:$4 sm:$0xff]   ;;  %v11615_v12 = vld [vmem:[#allocation5 + $0x6c0] ss:$16 sps:$4 sm:$0xff]  }
 0x3a0   : > { %6197 = vmatpush1.bf16.msra.mxu0 %v11567_v29  ;;  %v11618_v18 = vld [vmem:[#allocation5 + $0x6c8] ss:$16 sps:$4 sm:$0xff]   ;;  %v11623_v50 = vld [vmem:[#allocation5 + $0x6e4] ss:$16 sps:$4 sm:$0xff]   ;;  %v11632_v13 = vld [vmem:[#allocation5 + $0x70c] ss:$16 sps:$4 sm:$0xff]  }
 0x3a1   : > { %6562 = vmatpush1.bf16.msra.mxu1 %v11570_v7  ;;  %6198 = vmatprep.subr.bf16.mxu0 %v11575_v58  ;;  %v11624_v21 = vld [vmem:[#allocation5 + $0x6e8] ss:$16 sps:$4 sm:$0xff]   ;;  %v11629_v27 = vld [vmem:[#allocation5 + $0x704] ss:$16 sps:$4 sm:$0xff]   ;;  %v11627_v28 = vld [vmem:[#allocation5 + $0x700] ss:$16 sps:$4 sm:$0xff]  }
 0x3a2   : > { %6563 = vmatprep.subr.bf16.mxu1 %v11578_v43  ;;  %v11630_v52 = vld [vmem:[#allocation5 + $0x708] ss:$16 sps:$4 sm:$0xff]   ;;  %v11635_v16 = vld [vmem:[#allocation5 + $0x724] ss:$16 sps:$4 sm:$0xff]   ;;  %v11633_v2 = vld [vmem:[#allocation5 + $0x720] ss:$16 sps:$4 sm:$0xff]  }
 0x3a3   : > { %v11636_v41 = vld [vmem:[#allocation5 + $0x728] ss:$16 sps:$4 sm:$0xff]   ;;  %v11641_v30 = vld [vmem:[#allocation5 + $0x744] ss:$16 sps:$4 sm:$0xff]   ;;  %v11639_v36 = vld [vmem:[#allocation5 + $0x740] ss:$16 sps:$4 sm:$0xff]  }
 0x3a4   : > { %6199 = vmatpush1.bf16.msra.mxu0 %v11573_v49  ;;  %v11642_v31 = vld [vmem:[#allocation5 + $0x748] ss:$16 sps:$4 sm:$0xff]   ;;  %v11647_v59 = vld [vmem:[#allocation5 + $0x764] ss:$16 sps:$4 sm:$0xff]   ;;  %v11650_v29 = vld [vmem:[#allocation5 + $0x76c] ss:$16 sps:$4 sm:$0xff]  }
 0x3a5   : > { %6564 = vmatpush1.bf16.msra.mxu1 %v11576_v9  ;;  %6241 = vmatprep.subr.bf16.mxu0 %v11581_v15  ;;  %v11645_v7 = vld [vmem:[#allocation5 + $0x760] ss:$16 sps:$4 sm:$0xff]   ;;  %v11648_v58 = vld [vmem:[#allocation5 + $0x768] ss:$16 sps:$4 sm:$0xff]   ;;  %v11653_v43 = vld [vmem:[#allocation5 + $0x784] ss:$16 sps:$4 sm:$0xff]  }
 0x3a6   : > { %6606 = vmatprep.subr.bf16.mxu1 %v11584_v37  ;;  %v11656_v49 = vld [vmem:[#allocation5 + $0x78c] ss:$16 sps:$4 sm:$0xff]   ;;  %v11651_v9 = vld [vmem:[#allocation5 + $0x780] ss:$16 sps:$4 sm:$0xff]   ;;  %v11654_v15 = vld [vmem:[#allocation5 + $0x788] ss:$16 sps:$4 sm:$0xff]  }
 0x3a7   : > { %6201 = vmatmul.mubr.bf16.vlgmr.msra.gmra.mrb[48].mxu0 %v14899_v51  ;;  %v11659_v37 = vld [vmem:[#allocation5 + $0x7a4] ss:$16 sps:$4 sm:$0xff]  }
 0x3a8   : > { %6566 = vmatmul.mubr.bf16.vlgmr.msra.gmra.mrb[48].mxu1 %v14899_v51  ;;  %6210 = vmatprep.mubr.bf16.mxu0 %v14904_v57  ;;  %v11602_v51 = vld [vmem:[#allocation5 + $0x66c] ss:$16 sps:$4 sm:$0xff]  }
 0x3a9   : > { %6242 = vmatpush1.bf16.msra.mxu0 %v11579_v54  ;;  %6575 = vmatprep.mubr.bf16.mxu1 %v14904_v57  ;;  %v11597_v57 = vld [vmem:[#allocation5 + $0x660] ss:$16 sps:$4 sm:$0xff]   ;;  %v11662_v54 = vld [vmem:[#allocation5 + $0x7ac] ss:$16 sps:$4 sm:$0xff]  }
 0x3aa   : > { %6607 = vmatpush1.bf16.msra.mxu1 %v11582_v44  ;;  %6243 = vmatprep.subr.bf16.mxu0 %v11587_v8  ;;  %v11657_v44 = vld [vmem:[#allocation5 + $0x7a0] ss:$16 sps:$4 sm:$0xff]   ;;  %v11660_v8 = vld [vmem:[#allocation5 + $0x7a8] ss:$16 sps:$4 sm:$0xff]  }
 0x3ab   : > { %6608 = vmatprep.subr.bf16.mxu1 %v11590_v23  ;;  %v11665_v23 = vld [vmem:[#allocation5 + $0x7c4] ss:$16 sps:$4 sm:$0xff]  }
 0x3ad   : > { %6244 = vmatpush1.bf16.msra.mxu0 %v11585_v14  ;;  %v11668_v14 = vld [vmem:[#allocation5 + $0x7cc] ss:$16 sps:$4 sm:$0xff]  }
 0x3ae   : > { %6609 = vmatpush1.bf16.msra.mxu1 %v11588_v47  ;;  %6245 = vmatprep.subr.bf16.mxu0 %v11593_v26  ;;  %v11663_v47 = vld [vmem:[#allocation5 + $0x7c0] ss:$16 sps:$4 sm:$0xff]   ;;  %v11666_v26 = vld [vmem:[#allocation5 + $0x7c8] ss:$16 sps:$4 sm:$0xff]  }
 0x3af   : > { %6610 = vmatprep.subr.bf16.mxu1 %v11596_v5  ;;  %6211 = vmatmul.mubr.bf16.gmra.mrb[52].mxu0 %v14913_v19  ;;  %v11671_v5 = vld [vmem:[#allocation5 + $0x7e4] ss:$16 sps:$4 sm:$0xff]  }
 0x3b0   : > { %6576 = vmatmul.mubr.bf16.gmra.mrb[52].mxu1 %v14913_v19  ;;  %6220 = vmatprep.mubr.bf16.mxu0 %v14922_v0  ;;  %v11614_v19 = vld [vmem:[#allocation5 + $0x6ac] ss:$16 sps:$4 sm:$0xff]  }
 0x3b1   : > { %6246 = vmatpush1.bf16.msra.mxu0 %v11591_v6  ;;  %6585 = vmatprep.mubr.bf16.mxu1 %v14922_v0  ;;  %v11609_v0 = vld [vmem:[#allocation5 + $0x6a0] ss:$16 sps:$4 sm:$0xff]   ;;  %v11674_v6 = vld [vmem:[#allocation5 + $0x7ec] ss:$16 sps:$4 sm:$0xff]  }
 0x3b2   : > { %6611 = vmatpush1.bf16.msra.mxu1 %v11594_v11  ;;  %6247 = vmatprep.subr.bf16.mxu0 %v11599_v17  ;;  %v11669_v11 = vld [vmem:[#allocation5 + $0x7e0] ss:$16 sps:$4 sm:$0xff]   ;;  %v11672_v17 = vld [vmem:[#allocation5 + $0x7e8] ss:$16 sps:$4 sm:$0xff]  }
 0x3b3   : > { %6612 = vmatprep.subr.bf16.mxu1 %v11602_v51  ;;  %v11677_v51 = vld [vmem:[#allocation5 + $0x804] ss:$16 sps:$4 sm:$0xff]  }
 0x3b5   : > { %6248 = vmatpush1.bf16.msra.mxu0 %v11597_v57  ;;  %v11680_v57 = vld [vmem:[#allocation5 + $0x80c] ss:$16 sps:$4 sm:$0xff]  }
 0x3b6   : > { %6613 = vmatpush1.bf16.msra.mxu1 %v11600_v10  ;;  %6249 = vmatprep.subr.bf16.mxu0 %v11605_v39  ;;  %v11675_v10 = vld [vmem:[#allocation5 + $0x800] ss:$16 sps:$4 sm:$0xff]   ;;  %v11678_v39 = vld [vmem:[#allocation5 + $0x808] ss:$16 sps:$4 sm:$0xff]  }
 0x3b7   : > { %6614 = vmatprep.subr.bf16.mxu1 %v11608_v20  ;;  %6221 = vmatmul.mubr.bf16.gmra.mrb[56].mxu0 %v14933_v35  ;;  %v11683_v20 = vld [vmem:[#allocation5 + $0x824] ss:$16 sps:$4 sm:$0xff]  }
 0x3b8   : > { %6586 = vmatmul.mubr.bf16.gmra.mrb[56].mxu1 %v14933_v35  ;;  %6230 = vmatprep.mubr.bf16.mxu0 %v14940_v33  ;;  %v11626_v35 = vld [vmem:[#allocation5 + $0x6ec] ss:$16 sps:$4 sm:$0xff]  }
 0x3b9   : > { %6250 = vmatpush1.bf16.msra.mxu0 %v11603_v60  ;;  %6595 = vmatprep.mubr.bf16.mxu1 %v14940_v33  ;;  %v11621_v33 = vld [vmem:[#allocation5 + $0x6e0] ss:$16 sps:$4 sm:$0xff]   ;;  %v11686_v60 = vld [vmem:[#allocation5 + $0x82c] ss:$16 sps:$4 sm:$0xff]  }
 0x3ba   : > { %6615 = vmatpush1.bf16.msra.mxu1 %v11606_v1  ;;  %6251 = vmatprep.subr.bf16.mxu0 %v11611_v32  ;;  %v11681_v1 = vld [vmem:[#allocation5 + $0x820] ss:$16 sps:$4 sm:$0xff]   ;;  %v11684_v32 = vld [vmem:[#allocation5 + $0x828] ss:$16 sps:$4 sm:$0xff]  }
 0x3bb   : > { %6616 = vmatprep.subr.bf16.mxu1 %v11614_v19  ;;  %v11689_v19 = vld [vmem:[#allocation5 + $0x844] ss:$16 sps:$4 sm:$0xff]  }
 0x3bd   : > { %6252 = vmatpush1.bf16.msra.mxu0 %v11609_v0  ;;  %v11692_v0 = vld [vmem:[#allocation5 + $0x84c] ss:$16 sps:$4 sm:$0xff]  }
 0x3be   : > { %6617 = vmatpush1.bf16.msra.mxu1 %v11612_v53  ;;  %6253 = vmatprep.subr.bf16.mxu0 %v11617_v34  ;;  %v11687_v53 = vld [vmem:[#allocation5 + $0x840] ss:$16 sps:$4 sm:$0xff]   ;;  %v11690_v34 = vld [vmem:[#allocation5 + $0x848] ss:$16 sps:$4 sm:$0xff]  }
 0x3bf   : > { %6618 = vmatprep.subr.bf16.mxu1 %v11620_v3  ;;  %6231 = vmatmul.mubr.bf16.gmra.mrb[60].mxu0 %v14949_v38  ;;  %v11695_v3 = vld [vmem:[#allocation5 + $0x864] ss:$16 sps:$4 sm:$0xff]  }
 0x3c0   : > { %6596 = vmatmul.mubr.bf16.gmra.mrb[60].mxu1 %v14949_v38  ;;  %6273 = vmatprep.mubr.bf16.mxu0 %v14958_v42  ;;  %v11638_v38 = vld [vmem:[#allocation5 + $0x72c] ss:$16 sps:$4 sm:$0xff]  }
 0x3c1   : > { %6254 = vmatpush1.bf16.msra.mxu0 %v11615_v12  ;;  %6638 = vmatprep.mubr.bf16.mxu1 %v14958_v42  ;;  %v11644_v42 = vld [vmem:[#allocation5 + $0x74c] ss:$16 sps:$4 sm:$0xff]  }
 0x3c2   : > { %6619 = vmatpush1.bf16.msra.mxu1 %v11618_v18  ;;  %6255 = vmatprep.subr.bf16.mxu0 %v11623_v50  ;;  %v15744_v12 = vld [vmem:[#allocation43_spill] sm:$0xff] }
 0x3c3   : > { %6620 = vmatprep.subr.bf16.mxu1 %v11626_v35  ;;  %v11693_v18 = vld [vmem:[#allocation5 + $0x860] ss:$16 sps:$4 sm:$0xff]   ;;  %v11696_v50 = vld [vmem:[#allocation5 + $0x868] ss:$16 sps:$4 sm:$0xff]   ;;  %v11701_v35 = vld [vmem:[#allocation5 + $0x884] ss:$16 sps:$4 sm:$0xff]  }
 0x3c5   : > { %6256 = vmatpush1.bf16.msra.mxu0 %v11621_v33  ;;  %v11704_v33 = vld [vmem:[#allocation5 + $0x88c] ss:$16 sps:$4 sm:$0xff]  }
 0x3c6   : > { %6621 = vmatpush1.bf16.msra.mxu1 %v11624_v21  ;;  %6257 = vmatprep.subr.bf16.mxu0 %v11629_v27  ;;  %v11699_v21 = vld [vmem:[#allocation5 + $0x880] ss:$16 sps:$4 sm:$0xff]   ;;  %v11702_v27 = vld [vmem:[#allocation5 + $0x888] ss:$16 sps:$4 sm:$0xff]  }
 0x3c7   : > { %6622 = vmatprep.subr.bf16.mxu1 %v11632_v13  ;;  %v11707_v13 = vld [vmem:[#allocation5 + $0x8a4] ss:$16 sps:$4 sm:$0xff]  }
 0x3c9   : > { %6258 = vmatpush1.bf16.msra.mxu0 %v11627_v28  ;;  %v11710_v28 = vld [vmem:[#allocation5 + $0x8ac] ss:$16 sps:$4 sm:$0xff]  }
 0x3ca   : > { %6623 = vmatpush1.bf16.msra.mxu1 %v11630_v52  ;;  %6259 = vmatprep.subr.bf16.mxu0 %v11635_v16  ;;  %v11705_v52 = vld [vmem:[#allocation5 + $0x8a0] ss:$16 sps:$4 sm:$0xff]   ;;  %v11708_v16 = vld [vmem:[#allocation5 + $0x8a8] ss:$16 sps:$4 sm:$0xff]  }
 0x3cb   : > { %6624 = vmatprep.subr.bf16.mxu1 %v11638_v38  ;;  %v11713_v38 = vld [vmem:[#allocation5 + $0x8c4] ss:$16 sps:$4 sm:$0xff]  }
 0x3cd   : > { %6260 = vmatpush1.bf16.msra.mxu0 %v11633_v2  ;;  %v11716_v2 = vld [vmem:[#allocation5 + $0x8cc] ss:$16 sps:$4 sm:$0xff]  }
 0x3ce   : > { %6625 = vmatpush1.bf16.msra.mxu1 %v11636_v41  ;;  %6261 = vmatprep.subr.bf16.mxu0 %v11641_v30  ;;  %v11711_v41 = vld [vmem:[#allocation5 + $0x8c0] ss:$16 sps:$4 sm:$0xff]   ;;  %v11714_v30 = vld [vmem:[#allocation5 + $0x8c8] ss:$16 sps:$4 sm:$0xff]  }
 0x3cf   : > { %6626 = vmatprep.subr.bf16.mxu1 %v11644_v42  ;;  %v11719_v42 = vld [vmem:[#allocation5 + $0x8e4] ss:$16 sps:$4 sm:$0xff]  }
 0x3d1   : > { %6262 = vmatpush1.bf16.msra.mxu0 %v11639_v36  ;;  %v11720_v36 = vld [vmem:[#allocation5 + $0x8e8] ss:$16 sps:$4 sm:$0xff]  }
 0x3d2   : > { %6627 = vmatpush1.bf16.msra.mxu1 %v11642_v31  ;;  %6263 = vmatprep.subr.bf16.mxu0 %v11647_v59  ;;  %v11725_v31 = vld [vmem:[#allocation5 + $0x904] ss:$16 sps:$4 sm:$0xff]   ;;  %v11728_v59 = vld [vmem:[#allocation5 + $0x90c] ss:$16 sps:$4 sm:$0xff]  }
 0x3d3   : > { %6628 = vmatprep.subr.bf16.mxu1 %v11650_v29  ;;  %v11723_v29 = vld [vmem:[#allocation5 + $0x900] ss:$16 sps:$4 sm:$0xff]  }
 0x3d5   : > { %6264 = vmatpush1.bf16.msra.mxu0 %v11645_v7  ;;  %v11726_v7 = vld [vmem:[#allocation5 + $0x908] ss:$16 sps:$4 sm:$0xff]  }
 0x3d6   : > { %6629 = vmatpush1.bf16.msra.mxu1 %v11648_v58  ;;  %6265 = vmatprep.subr.bf16.mxu0 %v11653_v43  ;;  %v11731_v58 = vld [vmem:[#allocation5 + $0x924] ss:$16 sps:$4 sm:$0xff]   ;;  %v11729_v43 = vld [vmem:[#allocation5 + $0x920] ss:$16 sps:$4 sm:$0xff]  }
 0x3d7   : > { %6630 = vmatprep.subr.bf16.mxu1 %v11656_v49  ;;  %v11737_v49 = vld [vmem:[#allocation5 + $0x944] ss:$16 sps:$4 sm:$0xff]  }
 0x3d9   : > { %6266 = vmatpush1.bf16.msra.mxu0 %v11651_v9  ;;  %v11740_v9 = vld [vmem:[#allocation5 + $0x94c] ss:$16 sps:$4 sm:$0xff]  }
 0x3da   : > { %6631 = vmatpush1.bf16.msra.mxu1 %v11654_v15  ;;  %6267 = vmatprep.subr.bf16.mxu0 %v11659_v37  ;;  %v11735_v15 = vld [vmem:[#allocation5 + $0x940] ss:$16 sps:$4 sm:$0xff]   ;;  %v11738_v37 = vld [vmem:[#allocation5 + $0x948] ss:$16 sps:$4 sm:$0xff]  }
 0x3db   : > { %6632 = vmatprep.subr.bf16.mxu1 %v11662_v54  ;;  %v11743_v54 = vld [vmem:[#allocation5 + $0x964] ss:$16 sps:$4 sm:$0xff]  }
 0x3dd   : > { %6268 = vmatpush1.bf16.msra.mxu0 %v11657_v44  ;;  %v11746_v44 = vld [vmem:[#allocation5 + $0x96c] ss:$16 sps:$4 sm:$0xff]  }
 0x3de   : > { %6633 = vmatpush1.bf16.msra.mxu1 %v11660_v8  ;;  %6269 = vmatprep.subr.bf16.mxu0 %v11665_v23  ;;  %v11741_v8 = vld [vmem:[#allocation5 + $0x960] ss:$16 sps:$4 sm:$0xff]   ;;  %v11744_v23 = vld [vmem:[#allocation5 + $0x968] ss:$16 sps:$4 sm:$0xff]  }
 0x3df   : > { %6634 = vmatprep.subr.bf16.mxu1 %v11668_v14  ;;  %v11749_v14 = vld [vmem:[#allocation5 + $0x984] ss:$16 sps:$4 sm:$0xff]  }
 0x3e1   : > { %6270 = vmatpush1.bf16.msra.mxu0 %v11663_v47  ;;  %v11752_v47 = vld [vmem:[#allocation5 + $0x98c] ss:$16 sps:$4 sm:$0xff]  }
 0x3e2   : > { %6635 = vmatpush1.bf16.msra.mxu1 %v11666_v26  ;;  %6271 = vmatprep.subr.bf16.mxu0 %v11671_v5  ;;  %v11747_v26 = vld [vmem:[#allocation5 + $0x980] ss:$16 sps:$4 sm:$0xff]   ;;  %v11750_v5 = vld [vmem:[#allocation5 + $0x988] ss:$16 sps:$4 sm:$0xff]  }
 0x3e3   : > { %6636 = vmatprep.subr.bf16.mxu1 %v11674_v6  ;;  %v11755_v6 = vld [vmem:[#allocation5 + $0x9a4] ss:$16 sps:$4 sm:$0xff]  }
 0x3e5   : > { %6272 = vmatpush1.bf16.msra.mxu0 %v11669_v11  ;;  %v11758_v11 = vld [vmem:[#allocation5 + $0x9ac] ss:$16 sps:$4 sm:$0xff]  }
 0x3e6   : > { %6637 = vmatpush1.bf16.msra.mxu1 %v11672_v17  ;;  %6314 = vmatprep.subr.bf16.mxu0 %v11677_v51  ;;  %v11753_v17 = vld [vmem:[#allocation5 + $0x9a0] ss:$16 sps:$4 sm:$0xff]   ;;  %v11756_v51 = vld [vmem:[#allocation5 + $0x9a8] ss:$16 sps:$4 sm:$0xff]  }
 0x3e7   : > { %6679 = vmatprep.subr.bf16.mxu1 %v11680_v57  ;;  %v11761_v57 = vld [vmem:[#allocation5 + $0x9c4] ss:$16 sps:$4 sm:$0xff]  }
 0x3e8   : > { %6274 = vmatmul.mubr.bf16.vlgmr.msra.gmra.mrb[48].mxu0 %v14969_v55 }
 0x3e9   : > { %6639 = vmatmul.mubr.bf16.vlgmr.msra.gmra.mrb[48].mxu1 %v14969_v55  ;;  %6283 = vmatprep.mubr.bf16.mxu0 %v14974_v61  ;;  %v11698_v55 = vld [vmem:[#allocation5 + $0x86c] ss:$16 sps:$4 sm:$0xff]  }
 0x3ea   : > { %6315 = vmatpush1.bf16.msra.mxu0 %v11675_v10  ;;  %6648 = vmatprep.mubr.bf16.mxu1 %v14974_v61  ;;  %v15745_v61 = vld [vmem:[#allocation44_spill] sm:$0xff]  ;;  %v11764_v10 = vld [vmem:[#allocation5 + $0x9cc] ss:$16 sps:$4 sm:$0xff]  }
 0x3eb   : > { %6680 = vmatpush1.bf16.msra.mxu1 %v11678_v39  ;;  %6316 = vmatprep.subr.bf16.mxu0 %v11683_v20  ;;  %v11759_v39 = vld [vmem:[#allocation5 + $0x9c0] ss:$16 sps:$4 sm:$0xff]   ;;  %v11762_v20 = vld [vmem:[#allocation5 + $0x9c8] ss:$16 sps:$4 sm:$0xff]  }
 0x3ec   : > { %6681 = vmatprep.subr.bf16.mxu1 %v11686_v60  ;;  %v11767_v60 = vld [vmem:[#allocation5 + $0x9e4] ss:$16 sps:$4 sm:$0xff]  }
 0x3ee   : > { %6317 = vmatpush1.bf16.msra.mxu0 %v11681_v1  ;;  %v11770_v1 = vld [vmem:[#allocation5 + $0x9ec] ss:$16 sps:$4 sm:$0xff]  }
 0x3ef   : > { %6682 = vmatpush1.bf16.msra.mxu1 %v11684_v32  ;;  %6318 = vmatprep.subr.bf16.mxu0 %v11689_v19  ;;  %v11765_v32 = vld [vmem:[#allocation5 + $0x9e0] ss:$16 sps:$4 sm:$0xff]   ;;  %v11768_v19 = vld [vmem:[#allocation5 + $0x9e8] ss:$16 sps:$4 sm:$0xff]  }
 0x3f0   : > { %6284 = vmatmul.mubr.bf16.gmra.mrb[52].mxu0 %v15744_v12  ;;  %6683 = vmatprep.subr.bf16.mxu1 %v11692_v0  ;;  %v11773_v0 = vld [vmem:[#allocation8 + $0x4] ss:$16 sps:$4 sm:$0xff]  }
 0x3f1   : > { %6649 = vmatmul.mubr.bf16.gmra.mrb[52].mxu1 %v15744_v12  ;;  %6293 = vmatprep.mubr.bf16.mxu0 %v15745_v61  ;;  %v11779_v12 = vld [vmem:[#allocation8 + $0x24] ss:$16 sps:$4 sm:$0xff]  }
 0x3f2   : > { %6319 = vmatpush1.bf16.msra.mxu0 %v11687_v53  ;;  %6658 = vmatprep.mubr.bf16.mxu1 %v15745_v61  ;;  %v11776_v53 = vld [vmem:[#allocation8 + $0xc] ss:$16 sps:$4 sm:$0xff]   ;;  %v11777_v61 = vld [vmem:[#allocation8 + $0x20] ss:$16 sps:$4 sm:$0xff]  }
 0x3f3   : > { %6684 = vmatpush1.bf16.msra.mxu1 %v11690_v34  ;;  %6320 = vmatprep.subr.bf16.mxu0 %v11695_v3  ;;  %v11771_v34 = vld [vmem:[#allocation8] ss:$16 sps:$4 sm:$0xff]   ;;  %v11774_v3 = vld [vmem:[#allocation8 + $0x8] ss:$16 sps:$4 sm:$0xff]  }
 0x3f4   : > { %6685 = vmatprep.subr.bf16.mxu1 %v11698_v55  ;;  %v11782_v55 = vld [vmem:[#allocation8 + $0x2c] ss:$16 sps:$4 sm:$0xff]  }
 0x3f6   : > { %6321 = vmatpush1.bf16.msra.mxu0 %v11693_v18  ;;  %v11780_v18 = vld [vmem:[#allocation8 + $0x28] ss:$16 sps:$4 sm:$0xff]  }
 0x3f7   : > { %6686 = vmatpush1.bf16.msra.mxu1 %v11696_v50  ;;  %6322 = vmatprep.subr.bf16.mxu0 %v11701_v35  ;;  %v11785_v50 = vld [vmem:[#allocation8 + $0x44] ss:$16 sps:$4 sm:$0xff]   ;;  %v11788_v35 = vld [vmem:[#allocation8 + $0x4c] ss:$16 sps:$4 sm:$0xff]  }
 0x3f8   : > { %6294 = vmatmul.mubr.bf16.gmra.mrb[56].mxu0 %v15003_v22  ;;  %6687 = vmatprep.subr.bf16.mxu1 %v11704_v33  ;;  %v11783_v33 = vld [vmem:[#allocation8 + $0x40] ss:$16 sps:$4 sm:$0xff]  }
 0x3f9   : > { %6659 = vmatmul.mubr.bf16.gmra.mrb[56].mxu1 %v15003_v22  ;;  %6303 = vmatprep.mubr.bf16.mxu0 %v15008_v48  ;;  %v11722_v22 = vld [vmem:[#allocation5 + $0x8ec] ss:$16 sps:$4 sm:$0xff]  }
 0x3fa   : > { %6323 = vmatpush1.bf16.msra.mxu0 %v11699_v21  ;;  %6668 = vmatprep.mubr.bf16.mxu1 %v15008_v48  ;;  %v11717_v48 = vld [vmem:[#allocation5 + $0x8e0] ss:$16 sps:$4 sm:$0xff]   ;;  %v11786_v21 = vld [vmem:[#allocation8 + $0x48] ss:$16 sps:$4 sm:$0xff]  }
 0x3fb   : > { %6688 = vmatpush1.bf16.msra.mxu1 %v11702_v27  ;;  %6324 = vmatprep.subr.bf16.mxu0 %v11707_v13  ;;  %v11791_v27 = vld [vmem:[#allocation8 + $0x64] ss:$16 sps:$4 sm:$0xff]   ;;  %v11792_v13 = vld [vmem:[#allocation8 + $0x68] ss:$16 sps:$4 sm:$0xff]  }
 0x3fc   : > { %6689 = vmatprep.subr.bf16.mxu1 %v11710_v28  ;;  %v11797_v28 = vld [vmem:[#allocation8 + $0x84] ss:$16 sps:$4 sm:$0xff]  }
 0x3fe   : > { %6325 = vmatpush1.bf16.msra.mxu0 %v11705_v52  ;;  %v11800_v52 = vld [vmem:[#allocation8 + $0x8c] ss:$16 sps:$4 sm:$0xff]  }
 0x3ff   : > { %6690 = vmatpush1.bf16.msra.mxu1 %v11708_v16  ;;  %6326 = vmatprep.subr.bf16.mxu0 %v11713_v38  ;;  %v11795_v16 = vld [vmem:[#allocation8 + $0x80] ss:$16 sps:$4 sm:$0xff]   ;;  %v11798_v38 = vld [vmem:[#allocation8 + $0x88] ss:$16 sps:$4 sm:$0xff]  }
 0x400   : > { %6304 = vmatmul.mubr.bf16.gmra.mrb[60].mxu0 %v15017_v62  ;;  %6691 = vmatprep.subr.bf16.mxu1 %v11716_v2  ;;  %v11804_v2 = vld [vmem:[#allocation8 + $0xa8] ss:$16 sps:$4 sm:$0xff]  }
 0x401   : > { %6669 = vmatmul.mubr.bf16.gmra.mrb[60].mxu1 %v15017_v62  ;;  %6346 = vmatprep.mubr.bf16.mxu0 %v15023_v56  ;;  %v11734_v62 = vld [vmem:[#allocation5 + $0x92c] ss:$16 sps:$4 sm:$0xff]  }
 0x402   : > { %6327 = vmatpush1.bf16.msra.mxu0 %v11711_v41  ;;  %6711 = vmatprep.mubr.bf16.mxu1 %v15023_v56  ;;  %v11732_v56 = vld [vmem:[#allocation5 + $0x928] ss:$16 sps:$4 sm:$0xff]   ;;  %v11806_v41 = vld [vmem:[#allocation8 + $0xac] ss:$16 sps:$4 sm:$0xff]  }
 0x403   : > { %6692 = vmatpush1.bf16.msra.mxu1 %v11714_v30  ;;  %6328 = vmatprep.subr.bf16.mxu0 %v11719_v42  ;;  %v11809_v30 = vld [vmem:[#allocation8 + $0xc4] ss:$16 sps:$4 sm:$0xff]   ;;  %v11812_v42 = vld [vmem:[#allocation8 + $0xcc] ss:$16 sps:$4 sm:$0xff]  }
 0x404   : > { %6693 = vmatprep.subr.bf16.mxu1 %v11722_v22  ;;  %v11810_v22 = vld [vmem:[#allocation8 + $0xc8] ss:$16 sps:$4 sm:$0xff]  }
 0x406   : > { %6329 = vmatpush1.bf16.msra.mxu0 %v11717_v48  ;;  %v11815_v48 = vld [vmem:[#allocation8 + $0xe4] ss:$16 sps:$4 sm:$0xff]  }
 0x407   : > { %6694 = vmatpush1.bf16.msra.mxu1 %v11720_v36  ;;  %6330 = vmatprep.subr.bf16.mxu0 %v11725_v31  ;;  %v11816_v36 = vld [vmem:[#allocation8 + $0xe8] ss:$16 sps:$4 sm:$0xff]   ;;  %v11821_v31 = vld [vmem:[#allocation8 + $0x104] ss:$16 sps:$4 sm:$0xff]  }
 0x408   : > { %6695 = vmatprep.subr.bf16.mxu1 %v11728_v59  ;;  %v11824_v59 = vld [vmem:[#allocation8 + $0x10c] ss:$16 sps:$4 sm:$0xff]  }
 0x40a   : > { %6331 = vmatpush1.bf16.msra.mxu0 %v11723_v29  ;;  %v11819_v29 = vld [vmem:[#allocation8 + $0x100] ss:$16 sps:$4 sm:$0xff]  }
 0x40b   : > { %6696 = vmatpush1.bf16.msra.mxu1 %v11726_v7  ;;  %6332 = vmatprep.subr.bf16.mxu0 %v11731_v58  ;;  %v11822_v7 = vld [vmem:[#allocation8 + $0x108] ss:$16 sps:$4 sm:$0xff]   ;;  %v11825_v58 = vld [vmem:[#allocation8 + $0x120] ss:$16 sps:$4 sm:$0xff]  }
 0x40c   : > { %6697 = vmatprep.subr.bf16.mxu1 %v11734_v62  ;;  %v11827_v62 = vld [vmem:[#allocation8 + $0x124] ss:$16 sps:$4 sm:$0xff]  }
 0x40e   : > { %6333 = vmatpush1.bf16.msra.mxu0 %v11729_v43  ;;  %v11828_v43 = vld [vmem:[#allocation8 + $0x128] ss:$16 sps:$4 sm:$0xff]  }
 0x40f   : > { %6698 = vmatpush1.bf16.msra.mxu1 %v11732_v56  ;;  %6334 = vmatprep.subr.bf16.mxu0 %v11737_v49  ;;  %v11830_v56 = vld [vmem:[#allocation8 + $0x12c] ss:$16 sps:$4 sm:$0xff]   ;;  %v11833_v49 = vld [vmem:[#allocation8 + $0x144] ss:$16 sps:$4 sm:$0xff]  }
 0x410   : > { %6699 = vmatprep.subr.bf16.mxu1 %v11740_v9  ;;  %v11836_v9 = vld [vmem:[#allocation8 + $0x14c] ss:$16 sps:$4 sm:$0xff]  }
 0x412   : > { %6335 = vmatpush1.bf16.msra.mxu0 %v11735_v15  ;;  %v11831_v15 = vld [vmem:[#allocation8 + $0x140] ss:$16 sps:$4 sm:$0xff]  }
 0x413   : > { %6700 = vmatpush1.bf16.msra.mxu1 %v11738_v37  ;;  %6336 = vmatprep.subr.bf16.mxu0 %v11743_v54  ;;  %v11834_v37 = vld [vmem:[#allocation8 + $0x148] ss:$16 sps:$4 sm:$0xff]   ;;  %v11837_v54 = vld [vmem:[#allocation8 + $0x160] ss:$16 sps:$4 sm:$0xff]  }
 0x414   : > { %6701 = vmatprep.subr.bf16.mxu1 %v11746_v44  ;;  %v11839_v44 = vld [vmem:[#allocation8 + $0x164] ss:$16 sps:$4 sm:$0xff]  }
 0x416   : > { %6337 = vmatpush1.bf16.msra.mxu0 %v11741_v8  ;;  %v11840_v8 = vld [vmem:[#allocation8 + $0x168] ss:$16 sps:$4 sm:$0xff]  }
 0x417   : > { %6702 = vmatpush1.bf16.msra.mxu1 %v11744_v23  ;;  %6338 = vmatprep.subr.bf16.mxu0 %v11749_v14  ;;  %v11842_v23 = vld [vmem:[#allocation8 + $0x16c] ss:$16 sps:$4 sm:$0xff]   ;;  %v11845_v14 = vld [vmem:[#allocation8 + $0x184] ss:$16 sps:$4 sm:$0xff]  }
 0x418   : > { %6703 = vmatprep.subr.bf16.mxu1 %v11752_v47  ;;  %v11848_v47 = vld [vmem:[#allocation8 + $0x18c] ss:$16 sps:$4 sm:$0xff]  }
 0x41a   : > { %6339 = vmatpush1.bf16.msra.mxu0 %v11747_v26  ;;  %v11843_v26 = vld [vmem:[#allocation8 + $0x180] ss:$16 sps:$4 sm:$0xff]  }
 0x41b   : > { %6704 = vmatpush1.bf16.msra.mxu1 %v11750_v5  ;;  %6340 = vmatprep.subr.bf16.mxu0 %v11755_v6  ;;  %v11846_v5 = vld [vmem:[#allocation8 + $0x188] ss:$16 sps:$4 sm:$0xff]   ;;  %v11851_v6 = vld [vmem:[#allocation8 + $0x1a4] ss:$16 sps:$4 sm:$0xff]  }
 0x41c   : > { %6705 = vmatprep.subr.bf16.mxu1 %v11758_v11  ;;  %v11854_v11 = vld [vmem:[#allocation8 + $0x1ac] ss:$16 sps:$4 sm:$0xff]  }
 0x41e   : > { %6341 = vmatpush1.bf16.msra.mxu0 %v11753_v17  ;;  %v11849_v17 = vld [vmem:[#allocation8 + $0x1a0] ss:$16 sps:$4 sm:$0xff]  }
 0x41f   : > { %6706 = vmatpush1.bf16.msra.mxu1 %v11756_v51  ;;  %6342 = vmatprep.subr.bf16.mxu0 %v11761_v57  ;;  %v11852_v51 = vld [vmem:[#allocation8 + $0x1a8] ss:$16 sps:$4 sm:$0xff]   ;;  %v11857_v57 = vld [vmem:[#allocation8 + $0x1c4] ss:$16 sps:$4 sm:$0xff]  }
 0x420   : > { %6707 = vmatprep.subr.bf16.mxu1 %v11764_v10  ;;  %v11860_v10 = vld [vmem:[#allocation8 + $0x1cc] ss:$16 sps:$4 sm:$0xff]  }
 0x422   : > { %6343 = vmatpush1.bf16.msra.mxu0 %v11759_v39  ;;  %v11855_v39 = vld [vmem:[#allocation8 + $0x1c0] ss:$16 sps:$4 sm:$0xff]  }
 0x423   : > { %6708 = vmatpush1.bf16.msra.mxu1 %v11762_v20  ;;  %6344 = vmatprep.subr.bf16.mxu0 %v11767_v60  ;;  %v11858_v20 = vld [vmem:[#allocation8 + $0x1c8] ss:$16 sps:$4 sm:$0xff]   ;;  %v11863_v60 = vld [vmem:[#allocation8 + $0x1e4] ss:$16 sps:$4 sm:$0xff]  }
 0x424   : > { %6709 = vmatprep.subr.bf16.mxu1 %v11770_v1  ;;  %v11866_v1 = vld [vmem:[#allocation8 + $0x1ec] ss:$16 sps:$4 sm:$0xff]  }
 0x426   : > { %6345 = vmatpush1.bf16.msra.mxu0 %v11765_v32  ;;  %v11861_v32 = vld [vmem:[#allocation8 + $0x1e0] ss:$16 sps:$4 sm:$0xff]  }
 0x427   : > { %6710 = vmatpush1.bf16.msra.mxu1 %v11768_v19  ;;  %8915 = vmatprep.subr.bf16.mxu0 %v11773_v0  ;;  %v11864_v19 = vld [vmem:[#allocation8 + $0x1e8] ss:$16 sps:$4 sm:$0xff]   ;;  %v11869_v0 = vld [vmem:[#allocation8 + $0x204] ss:$16 sps:$4 sm:$0xff]  }
 0x428   : > { %9079 = vmatprep.subr.bf16.mxu1 %v11776_v53  ;;  %v11872_v53 = vld [vmem:[#allocation8 + $0x20c] ss:$16 sps:$4 sm:$0xff]  }
 0x429   : > { %6347 = vmatmul.mubr.bf16.vlgmr.msra.gmra.mrb[48].mxu0 %v15036_v24 }
 0x42a   : > { %6712 = vmatmul.mubr.bf16.vlgmr.msra.gmra.mrb[48].mxu1 %v15036_v24  ;;  %6356 = vmatprep.mubr.bf16.mxu0 %v15040_v45  ;;  %v11794_v24 = vld [vmem:[#allocation8 + $0x6c] ss:$16 sps:$4 sm:$0xff]  }
 0x42b   : > { %6721 = vmatprep.mubr.bf16.mxu1 %v15040_v45  ;;  %8916 = vmatpush1.bf16.msra.mxu0 %v11771_v34  ;;  %v11789_v45 = vld [vmem:[#allocation8 + $0x60] ss:$16 sps:$4 sm:$0xff]   ;;  %v6752_v34 = vld [vmem:[#allocation7] sm:$0xf] }
 0x42c   : > { %9080 = vmatpush1.bf16.msra.mxu1 %v11774_v3  ;;  %8917 = vmatprep.subr.bf16.mxu0 %v11779_v12  ;;  %v15746_v3 = vld [vmem:[#allocation25_spill] sm:$0xff] }
 0x42d   : > { %9081 = vmatprep.subr.bf16.mxu1 %v11782_v55  ;;  %v15125_v12 = vrot.slane %v6752_v34, %v15746_v3  ;;  %v15747_v55 = vld [vmem:[#allocation26_spill] sm:$0xff] }
 0x42f   : > { %8918 = vmatpush1.bf16.msra.mxu0 %v11777_v61  ;;  %v15128_v61 = vrot.slane %v6752_v34, %v15747_v55 }
 0x430   : > { %9082 = vmatpush1.bf16.msra.mxu1 %v11780_v18  ;;  %8919 = vmatprep.subr.bf16.mxu0 %v11785_v50  ;;  %v15748_v18 = vld [vmem:[#allocation27_spill] sm:$0xff] }
 0x431   : > { %6357 = vmatmul.mubr.bf16.gmra.mrb[52].mxu0 %v15045_v40  ;;  %9083 = vmatprep.subr.bf16.mxu1 %v11788_v35  ;;  %v15131_v50 = vrot.slane %v6752_v34, %v15748_v18  ;;  %v15749_v35 = vld [vmem:[#allocation28_spill] sm:$0xff] }
 0x432   : > { %6722 = vmatmul.mubr.bf16.gmra.mrb[52].mxu1 %v15045_v40  ;;  %6366 = vmatprep.mubr.bf16.mxu0 %v15056_v4  ;;  %v11801_v40 = vld [vmem:[#allocation8 + $0xa0] ss:$16 sps:$4 sm:$0xff]  }
 0x433   : > { %6731 = vmatprep.mubr.bf16.mxu1 %v15056_v4  ;;  %8920 = vmatpush1.bf16.msra.mxu0 %v11783_v33  ;;  %v11803_v4 = vld [vmem:[#allocation8 + $0xa4] ss:$16 sps:$4 sm:$0xff]   ;;  %v15134_v33 = vrot.slane %v6752_v34, %v15749_v35 }
 0x434   : > { %9084 = vmatpush1.bf16.msra.mxu1 %v11786_v21  ;;  %8921 = vmatprep.subr.bf16.mxu0 %v11791_v27 }
 0x435   : > { %9085 = vmatprep.subr.bf16.mxu1 %v11794_v24 }
 0x437   : > { %8922 = vmatpush1.bf16.msra.mxu0 %v11789_v45 }
 0x438   : > { %9086 = vmatpush1.bf16.msra.mxu1 %v11792_v13  ;;  %8923 = vmatprep.subr.bf16.mxu0 %v11797_v28 }
 0x439   : > { %6367 = vmatmul.mubr.bf16.gmra.mrb[56].mxu0 %v15061_v63  ;;  %9087 = vmatprep.subr.bf16.mxu1 %v11800_v52 }
 0x43a   : > { %6732 = vmatmul.mubr.bf16.gmra.mrb[56].mxu1 %v15061_v63  ;;  %6376 = vmatprep.mubr.bf16.mxu0 %v15072_v25  ;;  %v11807_v63 = vld [vmem:[#allocation8 + $0xc0] ss:$16 sps:$4 sm:$0xff]  }
 0x43b   : > { %6741 = vmatprep.mubr.bf16.mxu1 %v15072_v25  ;;  %8924 = vmatpush1.bf16.msra.mxu0 %v11795_v16  ;;  %v11813_v25 = vld [vmem:[#allocation8 + $0xe0] ss:$16 sps:$4 sm:$0xff]  }
 0x43c   : > { %9088 = vmatpush1.bf16.msra.mxu1 %v11798_v38  ;;  %8925 = vmatprep.subr.bf16.mxu0 %v11803_v4 }
 0x43d   : > { %9089 = vmatprep.subr.bf16.mxu1 %v11806_v41 }
 0x43f   : > { %8926 = vmatpush1.bf16.msra.mxu0 %v11801_v40 }
 0x440   : > { %9090 = vmatpush1.bf16.msra.mxu1 %v11804_v2  ;;  %8927 = vmatprep.subr.bf16.mxu0 %v11809_v30 }
 0x441   : > { %6377 = vmatmul.mubr.bf16.gmra.mrb[60].mxu0 %v15076_v46  ;;  %9091 = vmatprep.subr.bf16.mxu1 %v11812_v42 }
 0x442   : > { %6742 = vmatmul.mubr.bf16.gmra.mrb[60].mxu1 %v15076_v46  ;;  %v11818_v46 = vld [vmem:[#allocation8 + $0xec] ss:$16 sps:$4 sm:$0xff]  }
 0x443   : > { %8928 = vmatpush1.bf16.msra.mxu0 %v11807_v63 }
 0x444   : > { %9092 = vmatpush1.bf16.msra.mxu1 %v11810_v22  ;;  %8929 = vmatprep.subr.bf16.mxu0 %v11815_v48 }
 0x445   : > { %9093 = vmatprep.subr.bf16.mxu1 %v11818_v46 }
 0x447   : > { %8930 = vmatpush1.bf16.msra.mxu0 %v11813_v25 }
 0x448   : > { %9094 = vmatpush1.bf16.msra.mxu1 %v11816_v36  ;;  %8931 = vmatprep.subr.bf16.mxu0 %v11821_v31 }
 0x449   : > { %9095 = vmatprep.subr.bf16.mxu1 %v11824_v59 }
 0x44b   : > { %8932 = vmatpush1.bf16.msra.mxu0 %v11819_v29 }
 0x44c   : > { %9096 = vmatpush1.bf16.msra.mxu1 %v11822_v7  ;;  %8933 = vmatprep.subr.bf16.mxu0 %v11827_v62 }
 0x44d   : > { %9097 = vmatprep.subr.bf16.mxu1 %v11830_v56 }
 0x44f   : > { %8934 = vmatpush1.bf16.msra.mxu0 %v11825_v58 }
 0x450   : > { %9098 = vmatpush1.bf16.msra.mxu1 %v11828_v43  ;;  %8935 = vmatprep.subr.bf16.mxu0 %v11833_v49 }
 0x451   : > { %9099 = vmatprep.subr.bf16.mxu1 %v11836_v9 }
 0x453   : > { %8936 = vmatpush1.bf16.msra.mxu0 %v11831_v15 }
 0x454   : > { %9100 = vmatpush1.bf16.msra.mxu1 %v11834_v37  ;;  %8937 = vmatprep.subr.bf16.mxu0 %v11839_v44 }
 0x455   : > { %9101 = vmatprep.subr.bf16.mxu1 %v11842_v23 }
 0x457   : > { %8938 = vmatpush1.bf16.msra.mxu0 %v11837_v54 }
 0x458   : > { %9102 = vmatpush1.bf16.msra.mxu1 %v11840_v8  ;;  %8939 = vmatprep.subr.bf16.mxu0 %v11845_v14 }
 0x459   : > { %9103 = vmatprep.subr.bf16.mxu1 %v11848_v47 }
 0x45b   : > { %8940 = vmatpush1.bf16.msra.mxu0 %v11843_v26 }
 0x45c   : > { %9104 = vmatpush1.bf16.msra.mxu1 %v11846_v5  ;;  %8941 = vmatprep.subr.bf16.mxu0 %v11851_v6 }
 0x45d   : > { %9105 = vmatprep.subr.bf16.mxu1 %v11854_v11 }
 0x45f   : > { %8942 = vmatpush1.bf16.msra.mxu0 %v11849_v17 }
 0x460   : > { %9106 = vmatpush1.bf16.msra.mxu1 %v11852_v51  ;;  %8943 = vmatprep.subr.bf16.mxu0 %v11857_v57 }
 0x461   : > { %9107 = vmatprep.subr.bf16.mxu1 %v11860_v10 }
 0x463   : > { %8944 = vmatpush1.bf16.msra.mxu0 %v11855_v39 }
 0x464   : > { %9108 = vmatpush1.bf16.msra.mxu1 %v11858_v20  ;;  %8945 = vmatprep.subr.bf16.mxu0 %v11863_v60 }
 0x465   : > { %9109 = vmatprep.subr.bf16.mxu1 %v11866_v1 }
 0x467   : > { %8946 = vmatpush1.bf16.msra.mxu0 %v11861_v32 }
 0x468   : > { %9110 = vmatpush1.bf16.msra.mxu1 %v11864_v19  ;;  %8956 = vmatprep.subr.bf16.mxu0 %v11869_v0 }
 0x469   : > { %9120 = vmatprep.subr.bf16.mxu1 %v11872_v53 }
 0x4fc   : > { %v6348_v21 = vpop.f32.mrb[48].mxu0 }
 0x4fd   : > { %v6774_v27 = vadd.f32 %v15125_v12, %v6348_v21  ;;  %v6713_v24 = vpop.f32.mrb[48].mxu1  ;;  %v6350_v45 = vpop.f32.mrb[49].mxu0 }
 0x4fe   : > { %v6776_v13 = vadd.f32 %v15128_v61, %v6713_v24  ;;  %v6775_v28 = vadd.f32 %v15131_v50, %v6350_v45  ;;  %v6715_v52 = vpop.f32.mrb[49].mxu1  ;;  %v6352_v16 = vpop.f32.mrb[50].mxu0 }
 0x4ff   : > { %v6806_v38 = vmax.f32 %v6774_v27, 0.0  ;;  %v6777_v40 = vadd.f32 %v15134_v33, %v6715_v52  ;;  %v6778_v4 = vadd.f32 %v15125_v12, %v6352_v16  ;;  %v6717_v2 = vpop.f32.mrb[50].mxu1  ;;  %v6354_v41 = vpop.f32.mrb[51].mxu0 }
 0x500   : > { %v6808_v30 = vmax.f32 %v6776_v13, 0.0  ;;  %v6807_v42 = vmax.f32 %v6775_v28, 0.0  ;;  %v6780_v63 = vadd.f32 %v15128_v61, %v6717_v2  ;;  %v6779_v22 = vadd.f32 %v15131_v50, %v6354_v41  ;;  %v6719_v25 = vpop.f32.mrb[51].mxu1 }
 0x501   : > { %v6809_v48 = vmax.f32 %v6777_v40, 0.0  ;;  %v6810_v36 = vmax.f32 %v6778_v4, 0.0  ;;  %v6781_v46 = vadd.f32 %v15134_v33, %v6719_v25 }
 0x502   : > { %v6838_v31 = vmax.f32 %v6806_v38, %v6808_v30  ;;  %v6812_v59 = vmax.f32 %v6780_v63, 0.0  ;;  %v6811_v29 = vmax.f32 %v6779_v22, 0.0 }
 0x503   : > { %v6839_v7 = vmax.f32 %v6807_v42, %v6809_v48  ;;  %v6813_v58 = vmax.f32 %v6781_v46, 0.0 }
 0x504   : > { %v6870_v62 = vrot.slane %v6838_v31, 1  ;;  %v6840_v43 = vmax.f32 %v6810_v36, %v6812_v59  ;;  %v6358_v56 = vpop.f32.mrb[52].mxu0 }
 0x505   : > { %v6871_v49 = vrot.slane %v6839_v7, 1  ;;  %v6841_v9 = vmax.f32 %v6811_v29, %v6813_v58  ;;  %v6723_v15 = vpop.f32.mrb[52].mxu1  ;;  %v6360_v37 = vpop.f32.mrb[53].mxu0  ;;  %v15145_v44 = vadd.f32 %v15125_v12, %v6358_v56 }
 0x506   : > { %v6902_v54 = vmax.f32 %v6838_v31, %v6870_v62  ;;  %v6725_v8 = vpop.f32.mrb[53].mxu1  ;;  %v15147_v23 = vpop.f32.mrb[54].mxu0  ;;  %v6872_v47 = vrot.slane %v6840_v43, 1  ;;  %v15150_v5 = vadd.f32 %v15128_v61, %v6723_v15  ;;  %v15159_v34 = vadd.f32 %v15131_v50, %v6360_v37 }
 0x507   : > { %v6903_v14 = vmax.f32 %v6839_v7, %v6871_v49  ;;  %v6873_v26 = vrot.slane %v6841_v9, 1  ;;  %v15152_v6 = vpop.f32.mrb[54].mxu1  ;;  %v15154_v11 = vpop.f32.mrb[55].mxu0  ;;  %v6814_v24 = vmax.f32 %v15145_v44, 0.0  ;;  %v15165_v45 = vadd.f32 %v15134_v33, %v6725_v8 }
 0x508   : > { %v6934_v17 = vrot.slane %v6902_v54, 2  ;;  %v6966_v51 = vrot.slane %v6902_v54, 4  ;;  %v6998_v57 = vrot.slane %v6902_v54, 6  ;;  %v7030_v10 = vpack.c.bf16 %v6902_v54, %v6902_v54  ;;  %v15156_v39 = vpop.f32.mrb[55].mxu1 }
 0x509   : > { %v6935_v20 = vrot.slane %v6903_v14, 2  ;;  %v6967_v60 = vrot.slane %v6903_v14, 4  ;;  %v6999_v1 = vrot.slane %v6903_v14, 6  ;;  %v7031_v32 = vpack.c.bf16 %v6903_v14, %v6903_v14 }
 0x50a   : > { %v7032_v19 = vpack.c.bf16 %v6934_v17, %v6934_v17  ;;  %v7034_v0 = vpack.c.bf16 %v6966_v51, %v6966_v51  ;;  %v7036_v53 = vpack.c.bf16 %v6998_v57, %v6998_v57  ;;  %v7436_v21 = vunpack.c.l.b16 %v7030_v10 }
 0x50b   : > { %v15161_v27 = vpack.c.bf16 %v6935_v20, %v6935_v20  ;;  %v15167_v13 = vpack.c.bf16 %v6967_v60, %v6967_v60  ;;  %v15169_v28 = vpack.c.bf16 %v6999_v1, %v6999_v1  ;;  %v15171_v52 = vunpack.c.l.b16 %v7031_v32 }
 0x50c   : > { %v6904_v16 = vmax.f32 %v6840_v43, %v6872_v47  ;;  %v6368_v38 = vpop.f32.mrb[56].mxu0  ;;  %v7438_v40 = vunpack.c.l.b16 %v7032_v19  ;;  %v7440_v4 = vunpack.c.l.b16 %v7034_v0  ;;  %v7442_v2 = vunpack.c.l.b16 %v7036_v53 }
 0x50d   : > { %v6905_v41 = vmax.f32 %v6841_v9, %v6873_v26  ;;  %v6733_v30 = vpop.f32.mrb[56].mxu1  ;;  %v15173_v42 = vpop.f32.mrb[57].mxu0 }
 0x50e   : > { %v6936_v63 = vrot.slane %v6904_v16, 2  ;;  %v6968_v22 = vrot.slane %v6904_v16, 4  ;;  %v7000_v25 = vrot.slane %v6904_v16, 6  ;;  %v7038_v48 = vpack.c.bf16 %v6904_v16, %v6904_v16  ;;  %v15175_v36 = vpop.f32.mrb[57].mxu1  ;;  %v15177_v46 = vpop.f32.mrb[58].mxu0 }
 0x50f   : > { %v6937_v31 = vrot.slane %v6905_v41, 2  ;;  %v6969_v59 = vrot.slane %v6905_v41, 4  ;;  %v7001_v29 = vrot.slane %v6905_v41, 6  ;;  %v7039_v7 = vpack.c.bf16 %v6905_v41, %v6905_v41  ;;  %v15179_v58 = vpop.f32.mrb[58].mxu1  ;;  %v15181_v62 = vpop.f32.mrb[59].mxu0 }
 0x510   : > { %v7040_v43 = vpack.c.bf16 %v6936_v63, %v6936_v63  ;;  %v7042_v56 = vpack.c.bf16 %v6968_v22, %v6968_v22  ;;  %v7044_v49 = vpack.c.bf16 %v7000_v25, %v7000_v25  ;;  %v7444_v9 = vunpack.c.l.b16 %v7038_v48  ;;  %v15183_v15 = vpop.f32.mrb[59].mxu1 }
 0x511   : > { %v7041_v37 = vpack.c.bf16 %v6937_v31, %v6937_v31  ;;  %v15185_v54 = vpack.c.bf16 %v6969_v59, %v6969_v59  ;;  %v15187_v44 = vpack.c.bf16 %v7001_v29, %v7001_v29  ;;  %v15189_v8 = vunpack.c.l.b16 %v7039_v7 }
 0x512   : > { %v7446_v14 = vunpack.c.l.b16 %v7040_v43  ;;  %v7448_v47 = vunpack.c.l.b16 %v7042_v56  ;;  %v7450_v26 = vunpack.c.l.b16 %v7044_v49  ;;  %v7500_v17 = vrot.slane %v7444_v9, 7 }
 0x513   : > { %v7447_v20 = vunpack.c.l.b16 %v7041_v37  ;;  %v7449_v53 = vunpack.c.l.b16 %v15185_v54  ;;  %v6816_v63 = vmax.f32 %v15150_v5, 0.0  ;;  %v6815_v59 = vmax.f32 %v15159_v34, 0.0 }
 0x514   : > { %v15195_v60 = vsel %vm7501_vm7, %v7500_v17, %v7436_v21  ;;  %v7535_v1 = vrot.slane %v7446_v14, 7  ;;  %v7563_v32 = vrot.slane %v7448_v47, 7  ;;  %v7591_v19 = vrot.slane %v7450_v26, 7  ;;  %v15197_v0 = vpop.f32.mrb[60].mxu0 }
 0x515   : > { %v15203_v22 = vpop.f32.mrb[60].mxu1  ;;  %v15205_v25 = vpop.f32.mrb[61].mxu0  ;;  %v6842_v5 = vmax.f32 %v6814_v24, %v6816_v63  ;;  %v6817_v43 = vmax.f32 %v15165_v45, 0.0  ;;  %v6786_v56 = vadd.f32 %v15125_v12, %v15147_v23  ;;  %v6787_v34 = vadd.f32 %v15131_v50, %v15154_v11 }
 0x516   : > { %v15208_v21 = vsel %vm7501_vm7, %v7535_v1, %v7438_v40  ;;  %v15211_v48 = vsel %vm7501_vm7, %v7563_v32, %v7440_v4  ;;  %v15214_v31 = vsel %vm7501_vm7, %v7591_v19, %v7442_v2  ;;  %v15217_v29 = vpop.f32.mrb[61].mxu1  ;;  %v15219_v7 = vpop.f32.mrb[62].mxu0  ;;  %v6788_v40 = vadd.f32 %v15128_v61, %v15152_v6 }
 0x517   : > { %15750 = vst [vmem:[#allocation45_spill] sm:$0xff] %v15214_v31  ;;  %v15226_v4 = vpop.f32.mrb[62].mxu1  ;;  %v15228_v49 = vpop.f32.mrb[63].mxu0  ;;  %v6789_v2 = vadd.f32 %v15134_v33, %v15156_v39  ;;  %v6790_v24 = vadd.f32 %v15125_v12, %v6368_v38  ;;  %v6792_v45 = vadd.f32 %v15128_v61, %v6733_v30  ;;  %v6874_v23 = vrot.slane %v6842_v5, 1 }
 0x518   : > { %v15236_v9 = vpop.f32.mrb[63].mxu1  ;;  %v6843_v37 = vmax.f32 %v6815_v59, %v6817_v43  ;;  %v6818_v6 = vmax.f32 %v6786_v56, 0.0  ;;  %v6820_v14 = vmax.f32 %v6788_v40, 0.0  ;;  %v6819_v47 = vmax.f32 %v6787_v34, 0.0 }
 0x519   : > { %v6821_v26 = vmax.f32 %v6789_v2, 0.0  ;;  %v6822_v17 = vmax.f32 %v6790_v24, 0.0  ;;  %v6824_v1 = vmax.f32 %v6792_v45, 0.0  ;;  %v15238_v32 = vrot.slane %v7447_v20, 7 }
 0x51a   : > { %v6906_v11 = vmax.f32 %v6842_v5, %v6874_v23  ;;  %v6875_v19 = vrot.slane %v6843_v37, 1  ;;  %v6844_v63 = vmax.f32 %v6818_v6, %v6820_v14  ;;  %v15242_v38 = vadd.f32 %v15131_v50, %v15173_v42 }
 0x51b   : > { %v6845_v39 = vmax.f32 %v6819_v47, %v6821_v26  ;;  %v6846_v10 = vmax.f32 %v6822_v17, %v6824_v1  ;;  %v15246_v30 = vadd.f32 %v15134_v33, %v15175_v36 }
 0x51c   : > { %v6938_v59 = vrot.slane %v6906_v11, 2  ;;  %v6970_v43 = vrot.slane %v6906_v11, 4  ;;  %v7002_v56 = vrot.slane %v6906_v11, 6  ;;  %v7046_v40 = vpack.c.bf16 %v6906_v11, %v6906_v11 }
 0x51d   : > { %v6907_v34 = vmax.f32 %v6843_v37, %v6875_v19  ;;  %v6876_v20 = vrot.slane %v6844_v63, 1  ;;  %v6877_v2 = vrot.slane %v6845_v39, 1  ;;  %v6878_v5 = vrot.slane %v6846_v10, 1 }
 0x51e   : > { %v7048_v24 = vpack.c.bf16 %v6938_v59, %v6938_v59  ;;  %v7050_v45 = vpack.c.bf16 %v6970_v43, %v6970_v43  ;;  %v7052_v23 = vpack.c.bf16 %v7002_v56, %v7002_v56  ;;  %v7452_v6 = vunpack.c.l.b16 %v7046_v40 }
 0x51f   : > { %v6939_v14 = vrot.slane %v6907_v34, 2  ;;  %v6971_v47 = vrot.slane %v6907_v34, 4  ;;  %v7003_v42 = vrot.slane %v6907_v34, 6  ;;  %v7047_v26 = vpack.c.bf16 %v6907_v34, %v6907_v34 }
 0x520   : > { %v7454_v17 = vunpack.c.l.b16 %v7048_v24  ;;  %v7456_v1 = vunpack.c.l.b16 %v7050_v45  ;;  %v7458_v36 = vunpack.c.l.b16 %v7052_v23  ;;  %v7503_v57 = vrot.slane %v7452_v6, 6 }
 0x521   : > { %v7049_v51 = vpack.c.bf16 %v6939_v14, %v6939_v14  ;;  %v7051_v41 = vpack.c.bf16 %v6971_v47, %v6971_v47  ;;  %v7053_v16 = vpack.c.bf16 %v7003_v42, %v7003_v42  ;;  %v15248_v11 = vunpack.c.l.b16 %v7047_v26 }
 0x522   : > { %v15252_v37 = vrot.slane %v7449_v53, 7  ;;  %v15751_v19 = vunpack.c.l.b16 %v15187_v44  ;;  %v7505_v43 = vsel %vm7504_vm8, %v7503_v57, %v15195_v60  ;;  %v15262_v56 = vadd.f32 %v15125_v12, %v15177_v46 }
 0x523   : > { %v15264_v40 = vrot.slane %v7454_v17, 6  ;;  %v15266_v34 = vrot.slane %v7456_v1, 6  ;;  %v15268_v24 = vrot.slane %v7458_v36, 6  ;;  %v7455_v54 = vunpack.c.l.b16 %v7049_v51 }
 0x524   : > { %v15256_v59 = vrot.slane %v15751_v19, 7  ;;  %v7457_v53 = vunpack.c.l.b16 %v7051_v41  ;;  %v7459_v45 = vunpack.c.l.b16 %v7053_v16  ;;  %v6908_v23 = vmax.f32 %v6844_v63, %v6876_v20 }
 0x525   : > { %15752 = vst [vmem:[#allocation46_spill] sm:$0xff] %v15268_v24  ;;  %v6909_v44 = vmax.f32 %v6845_v39, %v6877_v2  ;;  %v6910_v14 = vmax.f32 %v6846_v10, %v6878_v5  ;;  %v6823_v57 = vmax.f32 %v15242_v38, 0.0  ;;  %v6825_v60 = vmax.f32 %v15246_v30, 0.0 }
 0x526   : > { %v6940_v46 = vrot.slane %v6908_v23, 2  ;;  %v6972_v47 = vrot.slane %v6908_v23, 4  ;;  %v7004_v42 = vrot.slane %v6908_v23, 6  ;;  %v7054_v26 = vpack.c.bf16 %v6908_v23, %v6908_v23 }
 0x527   : > { %v6941_v17 = vrot.slane %v6909_v44, 2  ;;  %v6973_v1 = vrot.slane %v6909_v44, 4  ;;  %v7005_v36 = vrot.slane %v6909_v44, 6  ;;  %v7055_v19 = vpack.c.bf16 %v6909_v44, %v6909_v44 }
 0x528   : > { %v7056_v51 = vpack.c.bf16 %v6940_v46, %v6940_v46  ;;  %v7058_v41 = vpack.c.bf16 %v6972_v47, %v6972_v47  ;;  %v7060_v16 = vpack.c.bf16 %v7004_v42, %v7004_v42  ;;  %v7460_v63 = vunpack.c.l.b16 %v7054_v26 }
 0x529   : > { %v7057_v39 = vpack.c.bf16 %v6941_v17, %v6941_v17  ;;  %v7059_v20 = vpack.c.bf16 %v6973_v1, %v6973_v1  ;;  %v7061_v2 = vpack.c.bf16 %v7005_v36, %v7005_v36  ;;  %v15273_v10 = vunpack.c.l.b16 %v7055_v19 }
 0x52a   : > { %v7462_v38 = vunpack.c.l.b16 %v7056_v51  ;;  %v7464_v30 = vunpack.c.l.b16 %v7058_v41  ;;  %v7466_v5 = vunpack.c.l.b16 %v7060_v16  ;;  %v7506_v6 = vrot.slane %v7460_v63, 5 }
 0x52b   : > { %v15275_v35 = vrot.slane %v7455_v54, 6  ;;  %v15277_v23 = vrot.slane %v7457_v53, 6  ;;  %v15279_v18 = vrot.slane %v7459_v45, 6  ;;  %v7463_v44 = vunpack.c.l.b16 %v7057_v39 }
 0x52c   : > { %v7508_v46 = vsel %vm7507_vm9, %v7506_v6, %v7505_v43  ;;  %v7465_v47 = vunpack.c.l.b16 %v7059_v20  ;;  %v7467_v42 = vunpack.c.l.b16 %v7061_v2  ;;  %v15283_v17 = vrot.slane %v7462_v38, 5 }
 0x52d   : > { %v15285_v1 = vrot.slane %v7464_v30, 5  ;;  %v15287_v36 = vrot.slane %v7466_v5, 5  ;;  %v6942_v19 = vrot.slane %v6910_v14, 2  ;;  %v6974_v54 = vrot.slane %v6910_v14, 4 }
 0x52e   : > { %v7006_v51 = vrot.slane %v6910_v14, 6  ;;  %v7062_v53 = vpack.c.bf16 %v6910_v14, %v6910_v14  ;;  %v6847_v41 = vmax.f32 %v6823_v57, %v6825_v60  ;;  %v6826_v16 = vmax.f32 %v15262_v56, 0.0 }
 0x52f   : > { %15753 = vst [vmem:[#allocation47_spill] sm:$0xff] %v15287_v36  ;;  %v7064_v45 = vpack.c.bf16 %v6942_v19, %v6942_v19  ;;  %v6796_v43 = vadd.f32 %v15128_v61, %v15179_v58  ;;  %v6795_v6 = vadd.f32 %v15131_v50, %v15181_v62  ;;  %v7066_v63 = vpack.c.bf16 %v6974_v54, %v6974_v54 }
 0x530   : > { %v15294_v39 = vpack.c.bf16 %v7006_v51, %v7006_v51  ;;  %v7468_v20 = vunpack.c.l.b16 %v7062_v53  ;;  %v6879_v2 = vrot.slane %v6847_v41, 1  ;;  %v15296_v38 = vrot.slane %v7463_v44, 5 }
 0x531   : > { %v15298_v30 = vrot.slane %v7465_v47, 5  ;;  %v6828_v14 = vmax.f32 %v6796_v43, 0.0  ;;  %v6797_v57 = vadd.f32 %v15134_v33, %v15183_v15  ;;  %v7470_v56 = vunpack.c.l.b16 %v7064_v45 }
 0x532   : > { %v7509_v60 = vrot.slane %v7468_v20, 4  ;;  %v6911_v5 = vmax.f32 %v6847_v41, %v6879_v2  ;;  %v6827_v58 = vmax.f32 %v6795_v6, 0.0  ;;  %v15302_v19 = vrot.slane %v7467_v42, 5 }
 0x533   : > { %v7472_v62 = vunpack.c.l.b16 %v7066_v63  ;;  %v6848_v54 = vmax.f32 %v6826_v16, %v6828_v14  ;;  %v6829_v51 = vmax.f32 %v6797_v57, 0.0  ;;  %v6798_v43 = vadd.f32 %v15125_v12, %v15197_v0 }
 0x534   : > { %v15306_v44 = vsel %vm7510_vm10, %v7509_v60, %v7508_v46  ;;  %v6943_v47 = vrot.slane %v6911_v5, 2  ;;  %v6975_v26 = vrot.slane %v6911_v5, 4  ;;  %v7007_v15 = vrot.slane %v6911_v5, 6 }
 0x535   : > { %v7063_v45 = vpack.c.bf16 %v6911_v5, %v6911_v5  ;;  %v6880_v20 = vrot.slane %v6848_v54, 1  ;;  %v15310_v41 = vrot.slane %v7470_v56, 4  ;;  %v6849_v6 = vmax.f32 %v6827_v58, %v6829_v51 }
 0x536   : > { %v7065_v42 = vpack.c.bf16 %v6943_v47, %v6943_v47  ;;  %v6800_v16 = vadd.f32 %v15128_v61, %v15203_v22  ;;  %v7067_v63 = vpack.c.bf16 %v6975_v26, %v6975_v26  ;;  %v7069_v2 = vpack.c.bf16 %v7007_v15, %v7007_v15 }
 0x537   : > { %v15314_v14 = vunpack.c.l.b16 %v7063_v45  ;;  %v6912_v46 = vmax.f32 %v6848_v54, %v6880_v20  ;;  %v6881_v60 = vrot.slane %v6849_v6, 1  ;;  %v6830_v53 = vmax.f32 %v6798_v43, 0.0 }
 0x538   : > { %v7471_v57 = vunpack.c.l.b16 %v7065_v42  ;;  %v6832_v0 = vmax.f32 %v6800_v16, 0.0  ;;  %v15316_v55 = vrot.slane %v7472_v62, 4  ;;  %v7473_v5 = vunpack.c.l.b16 %v7067_v63 }
 0x539   : > { %v6944_v3 = vrot.slane %v6912_v46, 2  ;;  %v6799_v56 = vadd.f32 %v15131_v50, %v15205_v25  ;;  %v7475_v58 = vunpack.c.l.b16 %v7069_v2  ;;  %v6976_v51 = vrot.slane %v6912_v46, 4 }
 0x53a   : > { %v7008_v47 = vrot.slane %v6912_v46, 6  ;;  %v7070_v22 = vpack.c.bf16 %v6912_v46, %v6912_v46  ;;  %v15321_v15 = vrot.slane %v7471_v57, 4  ;;  %v6913_v45 = vmax.f32 %v6849_v6, %v6881_v60 }
 0x53b   : > { %v7072_v54 = vpack.c.bf16 %v6944_v3, %v6944_v3  ;;  %v7074_v20 = vpack.c.bf16 %v6976_v51, %v6976_v51  ;;  %v6850_v42 = vmax.f32 %v6830_v53, %v6832_v0  ;;  %v15325_v25 = vrot.slane %v7473_v5, 4 }
 0x53c   : > { %v15323_v43 = vpack.c.bf16 %v7008_v47, %v7008_v47  ;;  %v7476_v62 = vunpack.c.l.b16 %v7070_v22  ;;  %v6945_v63 = vrot.slane %v6913_v45, 2  ;;  %v6977_v36 = vrot.slane %v6913_v45, 4 }
 0x53d   : > { %v7478_v16 = vunpack.c.l.b16 %v7072_v54  ;;  %v7009_v24 = vrot.slane %v6913_v45, 6  ;;  %v15327_v2 = vrot.slane %v7475_v58, 4  ;;  %v7480_v46 = vunpack.c.l.b16 %v7074_v20 }
 0x53e   : > { %v7071_v31 = vpack.c.bf16 %v6913_v45, %v6913_v45  ;;  %v7482_v57 = vunpack.c.l.b16 %v15323_v43  ;;  %v7512_v26 = vrot.slane %v7476_v62, 3  ;;  %v7073_v6 = vpack.c.bf16 %v6945_v63, %v6945_v63 }
 0x53f   : > { %v15330_v3 = vrot.slane %v7478_v16, 3  ;;  %v15332_v60 = vpack.c.bf16 %v6977_v36, %v6977_v36  ;;  %v15334_v53 = vpack.c.bf16 %v7009_v24, %v7009_v24  ;;  %v6882_v51 = vrot.slane %v6850_v42, 1 }
 0x540   : > { %v7477_v0 = vunpack.c.l.b16 %v7071_v31  ;;  %v6831_v47 = vmax.f32 %v6799_v56, 0.0  ;;  %v6801_v5 = vadd.f32 %v15134_v33, %v15217_v29  ;;  %v6802_v58 = vadd.f32 %v15125_v12, %v15219_v7 }
 0x541   : > { %v6804_v22 = vadd.f32 %v15128_v61, %v15226_v4  ;;  %v6914_v54 = vmax.f32 %v6850_v42, %v6882_v51  ;;  %v6803_v36 = vadd.f32 %v15131_v50, %v15228_v49  ;;  %v6805_v24 = vadd.f32 %v15134_v33, %v15236_v9 }
 0x542   : > { %v15754_v31 = vrot.slane %v15189_v8, 7  ;;  %v6833_v29 = vmax.f32 %v6801_v5, 0.0  ;;  %v6834_v45 = vmax.f32 %v6802_v58, 0.0  ;;  %v15755_v12 = vrot.slane %v15248_v11, 6 }
 0x543   : > { %v6836_v20 = vmax.f32 %v6804_v22, 0.0  ;;  %v6946_v7 = vrot.slane %v6914_v54, 2  ;;  %v6978_v4 = vrot.slane %v6914_v54, 4  ;;  %v7010_v62 = vrot.slane %v6914_v54, 6 }
 0x544   : > { %v7522_v56 = vsel %vm7501_vm7, %v15754_v31, %v15171_v52  ;;  %v7078_v42 = vpack.c.bf16 %v6914_v54, %v6914_v54  ;;  %v6851_v50 = vmax.f32 %v6831_v47, %v6833_v29  ;;  %v6835_v16 = vmax.f32 %v6803_v36, 0.0 }
 0x545   : > { %v7524_v61 = vsel %vm7504_vm8, %v15755_v12, %v7522_v56  ;;  %v6852_v49 = vmax.f32 %v6834_v45, %v6836_v20  ;;  %v6837_v33 = vmax.f32 %v6805_v24, 0.0  ;;  %v7080_v9 = vpack.c.bf16 %v6946_v7, %v6946_v7 }
 0x546   : > { %v15353_v63 = vpack.c.bf16 %v6978_v4, %v6978_v4  ;;  %v15355_v8 = vpack.c.bf16 %v7010_v62, %v7010_v62  ;;  %v7484_v52 = vunpack.c.l.b16 %v7078_v42  ;;  %v6883_v51 = vrot.slane %v6851_v50, 1 }
 0x547   : > { %v6884_v5 = vrot.slane %v6852_v49, 1  ;;  %v6853_v11 = vmax.f32 %v6835_v16, %v6837_v33  ;;  %v15756_v58 = vrot.slane %v15273_v10, 5  ;;  %v15360_v31 = vrot.slane %v7480_v46, 3 }
 0x548   : > { %v7486_v47 = vunpack.c.l.b16 %v7080_v9  ;;  %v7488_v54 = vunpack.c.l.b16 %v15353_v63  ;;  %v7515_v36 = vrot.slane %v7484_v52, 2  ;;  %v15363_v24 = vmax.f32 %v6851_v50, %v6883_v51  ;;  %v11884_v63 = vld [vmem:[#allocation8 + $0x24c] ss:$16 sps:$4 sm:$0xff]  }
 0x549   : > { %v7526_v22 = vsel %vm7507_vm9, %v15756_v58, %v7524_v61  ;;  %v15365_v56 = vmax.f32 %v6852_v49, %v6884_v5  ;;  %v6885_v29 = vrot.slane %v6853_v11, 1  ;;  %v15757_v45 = vrot.slane %v15314_v14, 4 }
 0x54a   : > { %v7529_v12 = vrot.slane %v7477_v0, 3  ;;  %v7514_v10 = vsel %vm7513_vm11, %v7512_v26, %v15306_v44  ;;  %v7479_v61 = vunpack.c.l.b16 %v7073_v6  ;;  %v15758_v46 = vunpack.c.l.b16 %v15161_v27 }
 0x54b   : > { %v7528_v20 = vsel %vm7510_vm10, %v15757_v45, %v7526_v22  ;;  %v7490_v4 = vunpack.c.l.b16 %v15355_v8  ;;  %v6948_v62 = vrot.slane %v15365_v56, 2  ;;  %v6980_v42 = vrot.slane %v15365_v56, 4 }
 0x54c   : > { %v7550_v7 = vsel %vm7501_vm7, %v15238_v32, %v15758_v46  ;;  %v7086_v14 = vpack.c.bf16 %v15365_v56, %v15365_v56  ;;  %v15381_v50 = vmax.f32 %v6853_v11, %v6885_v29  ;;  %v7079_v44 = vpack.c.bf16 %v15363_v24, %v15363_v24 }
 0x54d   : > { %v7530_v26 = vsel %vm7513_vm11, %v7529_v12, %v7528_v20  ;;  %v7517_v27 = vsel %vm7516_vm12, %v7515_v36, %v7514_v10  ;;  %v6947_v32 = vrot.slane %v15363_v24, 2  ;;  %v7552_v0 = vsel %vm7504_vm8, %v15275_v35, %v7550_v7 }
 0x54e   : > { %v7492_v6 = vunpack.c.l.b16 %v7086_v14  ;;  %v7557_v49 = vrot.slane %v7479_v61, 3  ;;  %v7087_v16 = vpack.c.bf16 %v15381_v50, %v15381_v50  ;;  %v7485_v33 = vunpack.c.l.b16 %v7079_v44 }
 0x54f   : > { %v6949_v9 = vrot.slane %v15381_v50, 2  ;;  %v7554_v52 = vsel %vm7507_vm9, %v15296_v38, %v7552_v0  ;;  %v7081_v5 = vpack.c.bf16 %v6947_v32, %v6947_v32  ;;  %v7088_v58 = vpack.c.bf16 %v6948_v62, %v6948_v62 }
 0x550   : > { %v7518_v51 = vrot.slane %v7492_v6, 1  ;;  %v7556_v11 = vsel %vm7510_vm10, %v15321_v15, %v7554_v52  ;;  %v7493_v22 = vunpack.c.l.b16 %v7087_v16  ;;  %v7531_v36 = vrot.slane %v7485_v33, 2 }
 0x551   : > { %v7089_v29 = vpack.c.bf16 %v6949_v9, %v6949_v9  ;;  %v7558_v35 = vsel %vm7513_vm11, %v7557_v49, %v7556_v11  ;;  %v7487_v20 = vunpack.c.l.b16 %v7081_v5  ;;  %v7494_v12 = vunpack.c.l.b16 %v7088_v58  ;;  %v11875_v5 = vld [vmem:[#allocation8 + $0x224] ss:$16 sps:$4 sm:$0xff]   ;;  %v11878_v11 = vld [vmem:[#allocation8 + $0x22c] ss:$16 sps:$4 sm:$0xff]  }
 0x552   : > { %v7520_v45 = vsel %vm7519_vm13, %v7518_v51, %v7517_v27  ;;  %v7538_v10 = vsel %vm7504_vm8, %v15264_v40, %v15208_v21  ;;  %v7532_v38 = vsel %vm7516_vm12, %v7531_v36, %v7530_v26  ;;  %v7533_v61 = vrot.slane %v7493_v22, 1  ;;  %v11867_v40 = vld [vmem:[#allocation8 + $0x200] ss:$16 sps:$4 sm:$0xff]   ;;  %v11870_v26 = vld [vmem:[#allocation8 + $0x208] ss:$16 sps:$4 sm:$0xff]  }
 0x553   : > { %v7619_v46 = vpack.c.b16 %v7520_v45, %v7520_v45  ;;  %v7495_v7 = vunpack.c.l.b16 %v7089_v29  ;;  %v7559_v15 = vrot.slane %v7487_v20, 2  ;;  %v7540_v62 = vsel %vm7507_vm9, %v15283_v17, %v7538_v10  ;;  %v11873_v45 = vld [vmem:[#allocation8 + $0x220] ss:$16 sps:$4 sm:$0xff]   ;;  %v11876_v20 = vld [vmem:[#allocation8 + $0x228] ss:$16 sps:$4 sm:$0xff]  }
 0x554   : > { %v7545_v14 = vrot.slane %v7486_v47, 2  ;;  %v7547_v44 = vrot.slane %v7494_v12, 1  ;;  %v7534_v6 = vsel %vm7519_vm13, %v7533_v61, %v7532_v38  ;;  %v7542_v32 = vsel %vm7510_vm10, %v15310_v41, %v7540_v62 }
 0x555   : > { %v7561_v27 = vrot.slane %v7495_v7, 1  ;;  %v6979_v0 = vrot.slane %v15363_v24, 4  ;;  %v7620_v21 = vpack.c.b16 %v7534_v6, %v7534_v6  ;;  %v7560_v49 = vsel %vm7516_vm12, %v7559_v15, %v7558_v35 }
 0x556   : > { %v7544_v16 = vsel %vm7513_vm11, %v15330_v3, %v7542_v32  ;;  %v6981_v17 = vrot.slane %v15381_v50, 4  ;;  %v7481_v52 = vunpack.c.l.b16 %v15332_v60  ;;  %v7012_v41 = vrot.slane %v15365_v56, 6  ;;  %v11890_v32 = vld [vmem:[#allocation8 + $0x26c] ss:$16 sps:$4 sm:$0xff]  }
 0x557   : > { %v7562_v47 = vsel %vm7519_vm13, %v7561_v27, %v7560_v49  ;;  %v7546_v33 = vsel %vm7516_vm12, %v7545_v14, %v7544_v16  ;;  %v7083_v9 = vpack.c.bf16 %v6979_v0, %v6979_v0  ;;  %8947 = vmatprep.mubr.bf16.mxu0 %v7620_v21  ;;  %9111 = vmatprep.mubr.bf16.mxu1 %v7620_v21  ;;  %v15759_v36 = vunpack.c.l.b16 %v15167_v13  ;;  %v11882_v14 = vld [vmem:[#allocation8 + $0x248] ss:$16 sps:$4 sm:$0xff]  }
 0x558   : > { %v7622_v51 = vpack.c.b16 %v7562_v47, %v7562_v47  ;;  %v15418_v58 = vsel %vm7519_vm13, %v7547_v44, %v7546_v33  ;;  %v7091_v3 = vpack.c.bf16 %v6981_v17, %v6981_v17  ;;  %8948 = vmatmul.mubr.bf16.vlgmr.msra.gmra.mrb[64].mxu0 %v7619_v46  ;;  %9112 = vmatmul.mubr.bf16.vlgmr.msra.gmra.mrb[64].mxu1 %v7619_v46  ;;  %v7585_v60 = vrot.slane %v7481_v52, 3 }
 0x559   : > { %v7489_v22 = vunpack.c.l.b16 %v7083_v9  ;;  %v7578_v29 = vsel %vm7501_vm7, %v15252_v37, %v15759_v36  ;;  %v7573_v35 = vrot.slane %v7488_v54, 2  ;;  %8957 = vmatpush1.bf16.msra.mxu0 %v11867_v40  ;;  %9121 = vmatpush1.bf16.msra.mxu1 %v11870_v26  ;;  %v7090_v38 = vpack.c.bf16 %v6980_v42, %v6980_v42  ;;  %v11881_v37 = vld [vmem:[#allocation8 + $0x244] ss:$16 sps:$4 sm:$0xff]  }
 0x55a   : > { %v7497_v12 = vunpack.c.l.b16 %v7091_v3  ;;  %v7580_v10 = vsel %vm7504_vm8, %v15277_v23, %v7578_v29  ;;  %v7566_v13 = vsel %vm7504_vm8, %v15266_v34, %v15211_v48  ;;  %8988 = vmatprep.mubr.bf16.mxu0 %v7622_v51  ;;  %9152 = vmatprep.mubr.bf16.mxu1 %v7622_v51  ;;  %v7011_v23 = vrot.slane %v15363_v24, 6  ;;  %v11879_v24 = vld [vmem:[#allocation8 + $0x240] ss:$16 sps:$4 sm:$0xff]   ;;  %v15762_v51 = vld [vmem:[#allocation45_spill] sm:$0xff]  ;;  %v15764_v36 = vld [vmem:[#allocation47_spill] sm:$0xff] }
 0x55b   : > { %v7582_v54 = vsel %vm7507_vm9, %v15298_v30, %v7580_v10  ;;  %v7587_v61 = vrot.slane %v7489_v22, 2  ;;  %v7568_v46 = vsel %vm7507_vm9, %v15285_v1, %v7566_v13  ;;  %8958 = vmatprep.subr.bf16.mxu0 %v11875_v5  ;;  %9122 = vmatprep.subr.bf16.mxu1 %v11878_v11  ;;  %v7496_v48 = vunpack.c.l.b16 %v7090_v38  ;;  %v15763_v5 = vld [vmem:[#allocation46_spill] sm:$0xff] }
 0x55c   : > { %v7584_v42 = vsel %vm7510_vm10, %v15325_v25, %v7582_v54  ;;  %v7589_v7 = vrot.slane %v7497_v12, 1  ;;  %v7570_v34 = vsel %vm7510_vm10, %v15316_v55, %v7568_v46  ;;  %v7013_v62 = vrot.slane %v15381_v50, 6  ;;  %v11887_v55 = vld [vmem:[#allocation8 + $0x264] ss:$16 sps:$4 sm:$0xff]   ;;  %v11896_v11 = vld [vmem:[#allocation8 + $0x28c] ss:$16 sps:$4 sm:$0xff]  }
 0x55d   : > { %v7586_v15 = vsel %vm7513_vm11, %v7585_v60, %v7584_v42  ;;  %v7572_v30 = vsel %vm7513_vm11, %v15360_v31, %v7570_v34  ;;  %v7085_v1 = vpack.c.bf16 %v7011_v23, %v7011_v23  ;;  %8959 = vmatpush1.bf16.msra.mxu0 %v11873_v45  ;;  %9123 = vmatpush1.bf16.msra.mxu1 %v11876_v20  ;;  %v7575_v6 = vrot.slane %v7496_v48, 1  ;;  %v11899_v12 = vld [vmem:[#allocation8 + $0x2a4] ss:$16 sps:$4 sm:$0xff]   ;;  %v11902_v10 = vld [vmem:[#allocation8 + $0x2ac] ss:$16 sps:$4 sm:$0xff]  }
 0x55e   : > { %v7588_v44 = vsel %vm7516_vm12, %v7587_v61, %v7586_v15  ;;  %v7574_v25 = vsel %vm7516_vm12, %v7573_v35, %v7572_v30  ;;  %v7483_v27 = vunpack.c.l.b16 %v15334_v53  ;;  %8960 = vmatprep.subr.bf16.mxu0 %v11881_v37  ;;  %9124 = vmatprep.subr.bf16.mxu1 %v11884_v63  ;;  %v7093_v50 = vpack.c.bf16 %v7013_v62, %v7013_v62  ;;  %v11894_v35 = vld [vmem:[#allocation8 + $0x288] ss:$16 sps:$4 sm:$0xff]   ;;  %v11897_v13 = vld [vmem:[#allocation8 + $0x2a0] ss:$16 sps:$4 sm:$0xff]   ;;  %v11905_v63 = vld [vmem:[#allocation8 + $0x2c4] ss:$16 sps:$4 sm:$0xff]  }
 0x55f   : > { %v15451_v31 = vsel %vm7519_vm13, %v7589_v7, %v7588_v44  ;;  %v7491_v0 = vunpack.c.l.b16 %v7085_v1  ;;  %v15760_v21 = vunpack.c.l.b16 %v15169_v28  ;;  %v15761_v26 = vunpack.c.l.b16 %v15294_v39  ;;  %v11888_v39 = vld [vmem:[#allocation8 + $0x268] ss:$16 sps:$4 sm:$0xff]   ;;  %v11908_v54 = vld [vmem:[#allocation8 + $0x2cc] ss:$16 sps:$4 sm:$0xff]   ;;  %v11903_v61 = vld [vmem:[#allocation8 + $0x2c0] ss:$16 sps:$4 sm:$0xff]  }
 0x560   : > { %v15460_v16 = vsel %vm7519_vm13, %v7575_v6, %v7574_v25  ;;  %v7613_v17 = vrot.slane %v7483_v27, 3  ;;  %v7599_v47 = vrot.slane %v7482_v57, 3  ;;  %v7499_v33 = vunpack.c.l.b16 %v7093_v50  ;;  %v11900_v37 = vld [vmem:[#allocation8 + $0x2a8] ss:$16 sps:$4 sm:$0xff]   ;;  %v11911_v23 = vld [vmem:[#allocation8 + $0x2e4] ss:$16 sps:$4 sm:$0xff]  }
 0x561   : > { %v7606_v40 = vsel %vm7501_vm7, %v15256_v59, %v15760_v21  ;;  %v7597_v49 = vrot.slane %v15761_v26, 4  ;;  %v7615_v9 = vrot.slane %v7491_v0, 2  ;;  %8961 = vmatpush1.bf16.msra.mxu0 %v11879_v24  ;;  %9125 = vmatpush1.bf16.msra.mxu1 %v11882_v14  ;;  %v11885_v59 = vld [vmem:[#allocation8 + $0x260] ss:$16 sps:$4 sm:$0xff]   ;;  %v7594_v43 = vsel %vm7504_vm8, %v15763_v5, %v15762_v51  ;;  %v11906_v46 = vld [vmem:[#allocation8 + $0x2c8] ss:$16 sps:$4 sm:$0xff]  }
 0x562   : > { %v7608_v53 = vsel %vm7504_vm8, %v15279_v18, %v7606_v40  ;;  %v7092_v18 = vpack.c.bf16 %v7012_v41, %v7012_v41  ;;  %v7601_v57 = vrot.slane %v7490_v4, 2  ;;  %8962 = vmatprep.subr.bf16.mxu0 %v11887_v55  ;;  %9126 = vmatprep.subr.bf16.mxu1 %v11890_v32  ;;  %v7617_v22 = vrot.slane %v7499_v33, 1  ;;  %v11891_v4 = vld [vmem:[#allocation8 + $0x280] ss:$16 sps:$4 sm:$0xff]   ;;  %v11914_v42 = vld [vmem:[#allocation8 + $0x2ec] ss:$16 sps:$4 sm:$0xff]  }
 0x563   : > { %v7610_v28 = vsel %vm7507_vm9, %v15302_v19, %v7608_v53  ;;  %v11893_v19 = vld [vmem:[#allocation8 + $0x284] ss:$16 sps:$4 sm:$0xff]   ;;  %v11909_v7 = vld [vmem:[#allocation8 + $0x2e0] ss:$16 sps:$4 sm:$0xff]   ;;  %v11912_v48 = vld [vmem:[#allocation8 + $0x2e8] ss:$16 sps:$4 sm:$0xff]  }
 0x564   : > { %v7612_v52 = vsel %vm7510_vm10, %v15327_v2, %v7610_v28  ;;  %v7596_v2 = vsel %vm7507_vm9, %v15764_v36, %v7594_v43  ;;  %v7498_v41 = vunpack.c.l.b16 %v7092_v18  ;;  %v11917_v34 = vld [vmem:[#allocation8 + $0x304] ss:$16 sps:$4 sm:$0xff]   ;;  %v11920_v15 = vld [vmem:[#allocation8 + $0x30c] ss:$16 sps:$4 sm:$0xff]   ;;  %v11915_v30 = vld [vmem:[#allocation8 + $0x300] ss:$16 sps:$4 sm:$0xff]   ;;  %v7624_v36 = vpack.c.b16 %v15451_v31, %v15451_v31 }
 0x565   : > { %v7614_v3 = vsel %vm7513_vm11, %v7613_v17, %v7612_v52  ;;  %v7598_v29 = vsel %vm7510_vm10, %v7597_v49, %v7596_v2  ;;  %8963 = vmatpush1.bf16.msra.mxu0 %v11885_v59  ;;  %9127 = vmatpush1.bf16.msra.mxu1 %v11888_v39  ;;  %v11918_v62 = vld [vmem:[#allocation8 + $0x308] ss:$16 sps:$4 sm:$0xff]   ;;  %v11923_v1 = vld [vmem:[#allocation8 + $0x324] ss:$16 sps:$4 sm:$0xff]   ;;  %v11926_v24 = vld [vmem:[#allocation8 + $0x32c] ss:$16 sps:$4 sm:$0xff]  }
 0x566   : > { %v7616_v56 = vsel %vm7516_vm12, %v7615_v9, %v7614_v3  ;;  %v7600_v8 = vsel %vm7513_vm11, %v7599_v47, %v7598_v29  ;;  %v7603_v20 = vrot.slane %v7498_v41, 1  ;;  %8964 = vmatprep.subr.bf16.mxu0 %v11893_v19  ;;  %9128 = vmatprep.subr.bf16.mxu1 %v11896_v11  ;;  %v11921_v14 = vld [vmem:[#allocation8 + $0x320] ss:$16 sps:$4 sm:$0xff]   ;;  %v11924_v44 = vld [vmem:[#allocation8 + $0x328] ss:$16 sps:$4 sm:$0xff]   ;;  %v7621_v3 = vpack.c.b16 %v15418_v58, %v15418_v58 }
 0x567   : > { %v15484_v60 = vsel %vm7519_vm13, %v7617_v22, %v7616_v56  ;;  %v7602_v45 = vsel %vm7516_vm12, %v7601_v57, %v7600_v8  ;;  %v11929_v25 = vld [vmem:[#allocation8 + $0x344] ss:$16 sps:$4 sm:$0xff]   ;;  %v11932_v6 = vld [vmem:[#allocation8 + $0x34c] ss:$16 sps:$4 sm:$0xff]   ;;  %v11927_v27 = vld [vmem:[#allocation8 + $0x340] ss:$16 sps:$4 sm:$0xff]  }
 0x568   : > { %v15489_v38 = vsel %vm7519_vm13, %v7603_v20, %v7602_v45  ;;  %v11930_v55 = vld [vmem:[#allocation8 + $0x348] ss:$16 sps:$4 sm:$0xff]   ;;  %v11935_v32 = vld [vmem:[#allocation8 + $0x364] ss:$16 sps:$4 sm:$0xff]   ;;  %v11938_v50 = vld [vmem:[#allocation8 + $0x36c] ss:$16 sps:$4 sm:$0xff]  }
 0x569   : > { %8965 = vmatpush1.bf16.msra.mxu0 %v11891_v4  ;;  %9129 = vmatpush1.bf16.msra.mxu1 %v11894_v35  ;;  %v11933_v0 = vld [vmem:[#allocation8 + $0x360] ss:$16 sps:$4 sm:$0xff]   ;;  %v11936_v21 = vld [vmem:[#allocation8 + $0x368] ss:$16 sps:$4 sm:$0xff]   ;;  %v11941_v40 = vld [vmem:[#allocation8 + $0x384] ss:$16 sps:$4 sm:$0xff]  }
 0x56a   : > { %8966 = vmatprep.subr.bf16.mxu0 %v11899_v12  ;;  %9130 = vmatprep.subr.bf16.mxu1 %v11902_v10  ;;  %v11944_v26 = vld [vmem:[#allocation8 + $0x38c] ss:$16 sps:$4 sm:$0xff]   ;;  %v11939_v49 = vld [vmem:[#allocation8 + $0x380] ss:$16 sps:$4 sm:$0xff]   ;;  %v11942_v53 = vld [vmem:[#allocation8 + $0x388] ss:$16 sps:$4 sm:$0xff]  }
 0x56b   : > { %v11947_v17 = vld [vmem:[#allocation8 + $0x3a4] ss:$16 sps:$4 sm:$0xff]   ;;  %v11950_v47 = vld [vmem:[#allocation8 + $0x3ac] ss:$16 sps:$4 sm:$0xff]   ;;  %v11945_v33 = vld [vmem:[#allocation8 + $0x3a0] ss:$16 sps:$4 sm:$0xff]  }
 0x56c   : > { %v11948_v28 = vld [vmem:[#allocation8 + $0x3a8] ss:$16 sps:$4 sm:$0xff]   ;;  %v11953_v9 = vld [vmem:[#allocation8 + $0x3c4] ss:$16 sps:$4 sm:$0xff]   ;;  %v11956_v59 = vld [vmem:[#allocation8 + $0x3cc] ss:$16 sps:$4 sm:$0xff]  }
 0x56d   : > { %8967 = vmatpush1.bf16.msra.mxu0 %v11897_v13  ;;  %9131 = vmatpush1.bf16.msra.mxu1 %v11900_v37  ;;  %v11951_v39 = vld [vmem:[#allocation8 + $0x3c0] ss:$16 sps:$4 sm:$0xff]   ;;  %v11954_v52 = vld [vmem:[#allocation8 + $0x3c8] ss:$16 sps:$4 sm:$0xff]   ;;  %v11959_v18 = vld [vmem:[#allocation8 + $0x3e4] ss:$16 sps:$4 sm:$0xff]  }
 0x56e   : > { %8968 = vmatprep.subr.bf16.mxu0 %v11905_v63  ;;  %9132 = vmatprep.subr.bf16.mxu1 %v11908_v54  ;;  %v11962_v51 = vld [vmem:[#allocation8 + $0x3ec] ss:$16 sps:$4 sm:$0xff]   ;;  %v11957_v5 = vld [vmem:[#allocation8 + $0x3e0] ss:$16 sps:$4 sm:$0xff]   ;;  %v11960_v43 = vld [vmem:[#allocation8 + $0x3e8] ss:$16 sps:$4 sm:$0xff]  }
 0x56f   : > { %v11965_v57 = vld [vmem:[#allocation8 + $0x404] ss:$16 sps:$4 sm:$0xff]   ;;  %v11968_v19 = vld [vmem:[#allocation8 + $0x40c] ss:$16 sps:$4 sm:$0xff]   ;;  %v11963_v11 = vld [vmem:[#allocation8 + $0x400] ss:$16 sps:$4 sm:$0xff]  }
 0x570   : > { %v11966_v22 = vld [vmem:[#allocation8 + $0x408] ss:$16 sps:$4 sm:$0xff]   ;;  %v11971_v2 = vld [vmem:[#allocation8 + $0x424] ss:$16 sps:$4 sm:$0xff]   ;;  %v11974_v56 = vld [vmem:[#allocation8 + $0x42c] ss:$16 sps:$4 sm:$0xff]  }
 0x571   : > { %8969 = vmatpush1.bf16.msra.mxu0 %v11903_v61  ;;  %9133 = vmatpush1.bf16.msra.mxu1 %v11906_v46  ;;  %v11969_v41 = vld [vmem:[#allocation8 + $0x420] ss:$16 sps:$4 sm:$0xff]   ;;  %v11972_v29 = vld [vmem:[#allocation8 + $0x428] ss:$16 sps:$4 sm:$0xff]   ;;  %v11977_v8 = vld [vmem:[#allocation8 + $0x444] ss:$16 sps:$4 sm:$0xff]  }
 0x572   : > { %8970 = vmatprep.subr.bf16.mxu0 %v11911_v23  ;;  %9134 = vmatprep.subr.bf16.mxu1 %v11914_v42  ;;  %v11980_v58 = vld [vmem:[#allocation8 + $0x44c] ss:$16 sps:$4 sm:$0xff]   ;;  %v11975_v4 = vld [vmem:[#allocation8 + $0x440] ss:$16 sps:$4 sm:$0xff]   ;;  %v11978_v35 = vld [vmem:[#allocation8 + $0x448] ss:$16 sps:$4 sm:$0xff]  }
 0x573   : > { %v11983_v31 = vld [vmem:[#allocation8 + $0x464] ss:$16 sps:$4 sm:$0xff]   ;;  %v11986_v45 = vld [vmem:[#allocation8 + $0x46c] ss:$16 sps:$4 sm:$0xff]   ;;  %v11981_v20 = vld [vmem:[#allocation8 + $0x460] ss:$16 sps:$4 sm:$0xff]  }
 0x574   : > { %v11984_v12 = vld [vmem:[#allocation8 + $0x468] ss:$16 sps:$4 sm:$0xff]   ;;  %v11989_v10 = vld [vmem:[#allocation8 + $0x484] ss:$16 sps:$4 sm:$0xff]   ;;  %v11992_v13 = vld [vmem:[#allocation8 + $0x48c] ss:$16 sps:$4 sm:$0xff]  }
 0x575   : > { %8971 = vmatpush1.bf16.msra.mxu0 %v11909_v7  ;;  %9135 = vmatpush1.bf16.msra.mxu1 %v11912_v48  ;;  %v11987_v37 = vld [vmem:[#allocation8 + $0x480] ss:$16 sps:$4 sm:$0xff]   ;;  %v11990_v63 = vld [vmem:[#allocation8 + $0x488] ss:$16 sps:$4 sm:$0xff]   ;;  %v11995_v54 = vld [vmem:[#allocation8 + $0x4a4] ss:$16 sps:$4 sm:$0xff]  }
 0x576   : > { %8972 = vmatprep.subr.bf16.mxu0 %v11917_v34  ;;  %9136 = vmatprep.subr.bf16.mxu1 %v11920_v15  ;;  %v11998_v61 = vld [vmem:[#allocation8 + $0x4ac] ss:$16 sps:$4 sm:$0xff]   ;;  %v11993_v46 = vld [vmem:[#allocation8 + $0x4a0] ss:$16 sps:$4 sm:$0xff]   ;;  %v11996_v23 = vld [vmem:[#allocation8 + $0x4a8] ss:$16 sps:$4 sm:$0xff]  }
 0x577   : > { %v12001_v42 = vld [vmem:[#allocation8 + $0x4c4] ss:$16 sps:$4 sm:$0xff]   ;;  %v12004_v7 = vld [vmem:[#allocation8 + $0x4cc] ss:$16 sps:$4 sm:$0xff]   ;;  %v11999_v48 = vld [vmem:[#allocation8 + $0x4c0] ss:$16 sps:$4 sm:$0xff]  }
 0x578   : > { %v12002_v34 = vld [vmem:[#allocation8 + $0x4c8] ss:$16 sps:$4 sm:$0xff]   ;;  %v12007_v15 = vld [vmem:[#allocation8 + $0x4e4] ss:$16 sps:$4 sm:$0xff]  }
 0x579   : > { %8973 = vmatpush1.bf16.msra.mxu0 %v11915_v30  ;;  %9137 = vmatpush1.bf16.msra.mxu1 %v11918_v62  ;;  %v12010_v30 = vld [vmem:[#allocation8 + $0x4ec] ss:$16 sps:$4 sm:$0xff]   ;;  %v12005_v62 = vld [vmem:[#allocation8 + $0x4e0] ss:$16 sps:$4 sm:$0xff]  }
 0x57a   : > { %8974 = vmatprep.subr.bf16.mxu0 %v11923_v1  ;;  %9138 = vmatprep.subr.bf16.mxu1 %v11926_v24  ;;  %v12008_v1 = vld [vmem:[#allocation8 + $0x4e8] ss:$16 sps:$4 sm:$0xff]   ;;  %v12013_v24 = vld [vmem:[#allocation8 + $0x504] ss:$16 sps:$4 sm:$0xff]  }
 0x57d   : > { %8975 = vmatpush1.bf16.msra.mxu0 %v11921_v14  ;;  %9139 = vmatpush1.bf16.msra.mxu1 %v11924_v44  ;;  %v12016_v14 = vld [vmem:[#allocation8 + $0x50c] ss:$16 sps:$4 sm:$0xff]   ;;  %v12011_v44 = vld [vmem:[#allocation8 + $0x500] ss:$16 sps:$4 sm:$0xff]  }
 0x57e   : > { %8976 = vmatprep.subr.bf16.mxu0 %v11929_v25  ;;  %9140 = vmatprep.subr.bf16.mxu1 %v11932_v6  ;;  %v12014_v25 = vld [vmem:[#allocation8 + $0x508] ss:$16 sps:$4 sm:$0xff]   ;;  %v12019_v6 = vld [vmem:[#allocation8 + $0x524] ss:$16 sps:$4 sm:$0xff]  }
 0x581   : > { %8977 = vmatpush1.bf16.msra.mxu0 %v11927_v27  ;;  %9141 = vmatpush1.bf16.msra.mxu1 %v11930_v55  ;;  %v12022_v27 = vld [vmem:[#allocation8 + $0x52c] ss:$16 sps:$4 sm:$0xff]   ;;  %v12017_v55 = vld [vmem:[#allocation8 + $0x520] ss:$16 sps:$4 sm:$0xff]  }
 0x582   : > { %8978 = vmatprep.subr.bf16.mxu0 %v11935_v32  ;;  %9142 = vmatprep.subr.bf16.mxu1 %v11938_v50  ;;  %v12020_v32 = vld [vmem:[#allocation8 + $0x528] ss:$16 sps:$4 sm:$0xff]   ;;  %v12025_v50 = vld [vmem:[#allocation8 + $0x544] ss:$16 sps:$4 sm:$0xff]  }
 0x585   : > { %8979 = vmatpush1.bf16.msra.mxu0 %v11933_v0  ;;  %9143 = vmatpush1.bf16.msra.mxu1 %v11936_v21  ;;  %v12028_v0 = vld [vmem:[#allocation8 + $0x54c] ss:$16 sps:$4 sm:$0xff]   ;;  %v12023_v21 = vld [vmem:[#allocation8 + $0x540] ss:$16 sps:$4 sm:$0xff]  }
 0x586   : > { %8980 = vmatprep.subr.bf16.mxu0 %v11941_v40  ;;  %9144 = vmatprep.subr.bf16.mxu1 %v11944_v26  ;;  %v12026_v40 = vld [vmem:[#allocation8 + $0x548] ss:$16 sps:$4 sm:$0xff]   ;;  %v12031_v26 = vld [vmem:[#allocation8 + $0x564] ss:$16 sps:$4 sm:$0xff]  }
 0x589   : > { %8981 = vmatpush1.bf16.msra.mxu0 %v11939_v49  ;;  %9145 = vmatpush1.bf16.msra.mxu1 %v11942_v53  ;;  %v12034_v49 = vld [vmem:[#allocation8 + $0x56c] ss:$16 sps:$4 sm:$0xff]   ;;  %v12029_v53 = vld [vmem:[#allocation8 + $0x560] ss:$16 sps:$4 sm:$0xff]  }
 0x58a   : > { %8982 = vmatprep.subr.bf16.mxu0 %v11947_v17  ;;  %9146 = vmatprep.subr.bf16.mxu1 %v11950_v47  ;;  %v12032_v17 = vld [vmem:[#allocation8 + $0x568] ss:$16 sps:$4 sm:$0xff]   ;;  %v12037_v47 = vld [vmem:[#allocation8 + $0x584] ss:$16 sps:$4 sm:$0xff]  }
 0x58d   : > { %8983 = vmatpush1.bf16.msra.mxu0 %v11945_v33  ;;  %9147 = vmatpush1.bf16.msra.mxu1 %v11948_v28  ;;  %v12040_v33 = vld [vmem:[#allocation8 + $0x58c] ss:$16 sps:$4 sm:$0xff]   ;;  %v12035_v28 = vld [vmem:[#allocation8 + $0x580] ss:$16 sps:$4 sm:$0xff]  }
 0x58e   : > { %8984 = vmatprep.subr.bf16.mxu0 %v11953_v9  ;;  %9148 = vmatprep.subr.bf16.mxu1 %v11956_v59  ;;  %v12038_v9 = vld [vmem:[#allocation8 + $0x588] ss:$16 sps:$4 sm:$0xff]   ;;  %v12043_v59 = vld [vmem:[#allocation8 + $0x5a4] ss:$16 sps:$4 sm:$0xff]  }
 0x591   : > { %8985 = vmatpush1.bf16.msra.mxu0 %v11951_v39  ;;  %9149 = vmatpush1.bf16.msra.mxu1 %v11954_v52  ;;  %v12046_v39 = vld [vmem:[#allocation8 + $0x5ac] ss:$16 sps:$4 sm:$0xff]   ;;  %v12041_v52 = vld [vmem:[#allocation8 + $0x5a0] ss:$16 sps:$4 sm:$0xff]  }
 0x592   : > { %8986 = vmatprep.subr.bf16.mxu0 %v11959_v18  ;;  %9150 = vmatprep.subr.bf16.mxu1 %v11962_v51  ;;  %v12044_v18 = vld [vmem:[#allocation8 + $0x5a8] ss:$16 sps:$4 sm:$0xff]   ;;  %v12049_v51 = vld [vmem:[#allocation8 + $0x5c4] ss:$16 sps:$4 sm:$0xff]  }
 0x595   : > { %8987 = vmatpush1.bf16.msra.mxu0 %v11957_v5  ;;  %9151 = vmatpush1.bf16.msra.mxu1 %v11960_v43  ;;  %v12052_v5 = vld [vmem:[#allocation8 + $0x5cc] ss:$16 sps:$4 sm:$0xff]   ;;  %v12047_v43 = vld [vmem:[#allocation8 + $0x5c0] ss:$16 sps:$4 sm:$0xff]  }
 0x596   : > { %8997 = vmatprep.subr.bf16.mxu0 %v11965_v57  ;;  %9161 = vmatprep.subr.bf16.mxu1 %v11968_v19  ;;  %v12050_v57 = vld [vmem:[#allocation8 + $0x5c8] ss:$16 sps:$4 sm:$0xff]   ;;  %v12055_v19 = vld [vmem:[#allocation8 + $0x5e4] ss:$16 sps:$4 sm:$0xff]  }
 0x598   : > { %8989 = vmatmul.mubr.bf16.vlgmr.msra.gmra.mrb[64].mxu0 %v7621_v3  ;;  %9153 = vmatmul.mubr.bf16.vlgmr.msra.gmra.mrb[64].mxu1 %v7621_v3  ;;  %v12053_v3 = vld [vmem:[#allocation8 + $0x5e0] ss:$16 sps:$4 sm:$0xff]  }
 0x599   : > { %8998 = vmatpush1.bf16.msra.mxu0 %v11963_v11  ;;  %9029 = vmatprep.mubr.bf16.mxu0 %v7624_v36  ;;  %v12058_v11 = vld [vmem:[#allocation8 + $0x5ec] ss:$16 sps:$4 sm:$0xff]  }
 0x59a   : > { %9162 = vmatpush1.bf16.msra.mxu1 %v11966_v22  ;;  %9193 = vmatprep.mubr.bf16.mxu1 %v7624_v36  ;;  %v12056_v22 = vld [vmem:[#allocation8 + $0x5e8] ss:$16 sps:$4 sm:$0xff]   ;;  %v12061_v36 = vld [vmem:[#allocation8 + $0x604] ss:$16 sps:$4 sm:$0xff]  }
 0x59b   : > { %8999 = vmatprep.subr.bf16.mxu0 %v11971_v2  ;;  %9163 = vmatprep.subr.bf16.mxu1 %v11974_v56  ;;  %v12064_v2 = vld [vmem:[#allocation8 + $0x60c] ss:$16 sps:$4 sm:$0xff]   ;;  %v12059_v56 = vld [vmem:[#allocation8 + $0x600] ss:$16 sps:$4 sm:$0xff]  }
 0x59d   : > { %9000 = vmatpush1.bf16.msra.mxu0 %v11969_v41  ;;  %v7623_v41 = vpack.c.b16 %v15460_v16, %v15460_v16  ;;  %v12071_v16 = vld [vmem:[#allocation8 + $0x640] ss:$16 sps:$4 sm:$0xff]  }
 0x59e   : > { %9164 = vmatpush1.bf16.msra.mxu1 %v11972_v29  ;;  %9001 = vmatprep.subr.bf16.mxu0 %v11977_v8  ;;  %v12062_v29 = vld [vmem:[#allocation8 + $0x608] ss:$16 sps:$4 sm:$0xff]   ;;  %v12067_v8 = vld [vmem:[#allocation8 + $0x624] ss:$16 sps:$4 sm:$0xff]  }
 0x59f   : > { %9165 = vmatprep.subr.bf16.mxu1 %v11980_v58  ;;  %v7626_v58 = vpack.c.b16 %v15484_v60, %v15484_v60  ;;  %v12082_v60 = vld [vmem:[#allocation8 + $0x66c] ss:$16 sps:$4 sm:$0xff]  }
 0x5a1   : > { %9002 = vmatpush1.bf16.msra.mxu0 %v11975_v4  ;;  %v12070_v4 = vld [vmem:[#allocation8 + $0x62c] ss:$16 sps:$4 sm:$0xff]  }
 0x5a2   : > { %9166 = vmatpush1.bf16.msra.mxu1 %v11978_v35  ;;  %9003 = vmatprep.subr.bf16.mxu0 %v11983_v31  ;;  %v12065_v35 = vld [vmem:[#allocation8 + $0x620] ss:$16 sps:$4 sm:$0xff]   ;;  %v12068_v31 = vld [vmem:[#allocation8 + $0x628] ss:$16 sps:$4 sm:$0xff]  }
 0x5a3   : > { %9167 = vmatprep.subr.bf16.mxu1 %v11986_v45  ;;  %v12073_v45 = vld [vmem:[#allocation8 + $0x644] ss:$16 sps:$4 sm:$0xff]  }
 0x5a5   : > { %9004 = vmatpush1.bf16.msra.mxu0 %v11981_v20  ;;  %v12076_v20 = vld [vmem:[#allocation8 + $0x64c] ss:$16 sps:$4 sm:$0xff]  }
 0x5a6   : > { %9168 = vmatpush1.bf16.msra.mxu1 %v11984_v12  ;;  %9005 = vmatprep.subr.bf16.mxu0 %v11989_v10  ;;  %v12074_v12 = vld [vmem:[#allocation8 + $0x648] ss:$16 sps:$4 sm:$0xff]   ;;  %v12079_v10 = vld [vmem:[#allocation8 + $0x664] ss:$16 sps:$4 sm:$0xff]  }
 0x5a7   : > { %9169 = vmatprep.subr.bf16.mxu1 %v11992_v13  ;;  %v12077_v13 = vld [vmem:[#allocation8 + $0x660] ss:$16 sps:$4 sm:$0xff]  }
 0x5a9   : > { %9006 = vmatpush1.bf16.msra.mxu0 %v11987_v37  ;;  %v12080_v37 = vld [vmem:[#allocation8 + $0x668] ss:$16 sps:$4 sm:$0xff]  }
 0x5aa   : > { %9170 = vmatpush1.bf16.msra.mxu1 %v11990_v63  ;;  %9007 = vmatprep.subr.bf16.mxu0 %v11995_v54  ;;  %v12085_v63 = vld [vmem:[#allocation8 + $0x684] ss:$16 sps:$4 sm:$0xff]   ;;  %v12088_v54 = vld [vmem:[#allocation8 + $0x68c] ss:$16 sps:$4 sm:$0xff]  }
 0x5ab   : > { %9171 = vmatprep.subr.bf16.mxu1 %v11998_v61  ;;  %v12083_v61 = vld [vmem:[#allocation8 + $0x680] ss:$16 sps:$4 sm:$0xff]  }
 0x5ad   : > { %9008 = vmatpush1.bf16.msra.mxu0 %v11993_v46  ;;  %v12086_v46 = vld [vmem:[#allocation8 + $0x688] ss:$16 sps:$4 sm:$0xff]  }
 0x5ae   : > { %9172 = vmatpush1.bf16.msra.mxu1 %v11996_v23  ;;  %9009 = vmatprep.subr.bf16.mxu0 %v12001_v42  ;;  %v12091_v23 = vld [vmem:[#allocation8 + $0x6a4] ss:$16 sps:$4 sm:$0xff]   ;;  %v12094_v42 = vld [vmem:[#allocation8 + $0x6ac] ss:$16 sps:$4 sm:$0xff]  }
 0x5af   : > { %9173 = vmatprep.subr.bf16.mxu1 %v12004_v7  ;;  %v12089_v7 = vld [vmem:[#allocation8 + $0x6a0] ss:$16 sps:$4 sm:$0xff]  }
 0x5b1   : > { %9010 = vmatpush1.bf16.msra.mxu0 %v11999_v48  ;;  %v12092_v48 = vld [vmem:[#allocation8 + $0x6a8] ss:$16 sps:$4 sm:$0xff]  }
 0x5b2   : > { %9174 = vmatpush1.bf16.msra.mxu1 %v12002_v34  ;;  %9011 = vmatprep.subr.bf16.mxu0 %v12007_v15  ;;  %v12097_v34 = vld [vmem:[#allocation8 + $0x6c4] ss:$16 sps:$4 sm:$0xff]   ;;  %v12100_v15 = vld [vmem:[#allocation8 + $0x6cc] ss:$16 sps:$4 sm:$0xff]  }
 0x5b3   : > { %9175 = vmatprep.subr.bf16.mxu1 %v12010_v30  ;;  %v12095_v30 = vld [vmem:[#allocation8 + $0x6c0] ss:$16 sps:$4 sm:$0xff]  }
 0x5b5   : > { %9012 = vmatpush1.bf16.msra.mxu0 %v12005_v62  ;;  %v12098_v62 = vld [vmem:[#allocation8 + $0x6c8] ss:$16 sps:$4 sm:$0xff]  }
 0x5b6   : > { %9176 = vmatpush1.bf16.msra.mxu1 %v12008_v1  ;;  %9013 = vmatprep.subr.bf16.mxu0 %v12013_v24  ;;  %v12103_v1 = vld [vmem:[#allocation8 + $0x6e4] ss:$16 sps:$4 sm:$0xff]   ;;  %v12106_v24 = vld [vmem:[#allocation8 + $0x6ec] ss:$16 sps:$4 sm:$0xff]  }
 0x5b7   : > { %9177 = vmatprep.subr.bf16.mxu1 %v12016_v14  ;;  %v12101_v14 = vld [vmem:[#allocation8 + $0x6e0] ss:$16 sps:$4 sm:$0xff]  }
 0x5b9   : > { %9014 = vmatpush1.bf16.msra.mxu0 %v12011_v44  ;;  %v12104_v44 = vld [vmem:[#allocation8 + $0x6e8] ss:$16 sps:$4 sm:$0xff]  }
 0x5ba   : > { %9178 = vmatpush1.bf16.msra.mxu1 %v12014_v25  ;;  %9015 = vmatprep.subr.bf16.mxu0 %v12019_v6  ;;  %v12109_v25 = vld [vmem:[#allocation8 + $0x704] ss:$16 sps:$4 sm:$0xff]   ;;  %v12112_v6 = vld [vmem:[#allocation8 + $0x70c] ss:$16 sps:$4 sm:$0xff]  }
 0x5bb   : > { %9179 = vmatprep.subr.bf16.mxu1 %v12022_v27  ;;  %v12107_v27 = vld [vmem:[#allocation8 + $0x700] ss:$16 sps:$4 sm:$0xff]  }
 0x5bd   : > { %9016 = vmatpush1.bf16.msra.mxu0 %v12017_v55  ;;  %v12110_v55 = vld [vmem:[#allocation8 + $0x708] ss:$16 sps:$4 sm:$0xff]  }
 0x5be   : > { %9180 = vmatpush1.bf16.msra.mxu1 %v12020_v32  ;;  %9017 = vmatprep.subr.bf16.mxu0 %v12025_v50  ;;  %v12115_v32 = vld [vmem:[#allocation8 + $0x724] ss:$16 sps:$4 sm:$0xff]   ;;  %v12118_v50 = vld [vmem:[#allocation8 + $0x72c] ss:$16 sps:$4 sm:$0xff]  }
 0x5bf   : > { %9181 = vmatprep.subr.bf16.mxu1 %v12028_v0  ;;  %v12113_v0 = vld [vmem:[#allocation8 + $0x720] ss:$16 sps:$4 sm:$0xff]  }
 0x5c1   : > { %9018 = vmatpush1.bf16.msra.mxu0 %v12023_v21  ;;  %v12116_v21 = vld [vmem:[#allocation8 + $0x728] ss:$16 sps:$4 sm:$0xff]  }
 0x5c2   : > { %9182 = vmatpush1.bf16.msra.mxu1 %v12026_v40  ;;  %9019 = vmatprep.subr.bf16.mxu0 %v12031_v26  ;;  %v12121_v40 = vld [vmem:[#allocation8 + $0x744] ss:$16 sps:$4 sm:$0xff]   ;;  %v12124_v26 = vld [vmem:[#allocation8 + $0x74c] ss:$16 sps:$4 sm:$0xff]  }
 0x5c3   : > { %9183 = vmatprep.subr.bf16.mxu1 %v12034_v49  ;;  %v12119_v49 = vld [vmem:[#allocation8 + $0x740] ss:$16 sps:$4 sm:$0xff]  }
 0x5c5   : > { %9020 = vmatpush1.bf16.msra.mxu0 %v12029_v53  ;;  %v12122_v53 = vld [vmem:[#allocation8 + $0x748] ss:$16 sps:$4 sm:$0xff]  }
 0x5c6   : > { %9184 = vmatpush1.bf16.msra.mxu1 %v12032_v17  ;;  %9021 = vmatprep.subr.bf16.mxu0 %v12037_v47  ;;  %v12127_v17 = vld [vmem:[#allocation8 + $0x764] ss:$16 sps:$4 sm:$0xff]   ;;  %v12130_v47 = vld [vmem:[#allocation8 + $0x76c] ss:$16 sps:$4 sm:$0xff]  }
 0x5c7   : > { %9185 = vmatprep.subr.bf16.mxu1 %v12040_v33  ;;  %v12125_v33 = vld [vmem:[#allocation8 + $0x760] ss:$16 sps:$4 sm:$0xff]  }
 0x5c9   : > { %9022 = vmatpush1.bf16.msra.mxu0 %v12035_v28  ;;  %v12128_v28 = vld [vmem:[#allocation8 + $0x768] ss:$16 sps:$4 sm:$0xff]  }
 0x5ca   : > { %9186 = vmatpush1.bf16.msra.mxu1 %v12038_v9  ;;  %9023 = vmatprep.subr.bf16.mxu0 %v12043_v59  ;;  %v12133_v9 = vld [vmem:[#allocation8 + $0x784] ss:$16 sps:$4 sm:$0xff]   ;;  %v12136_v59 = vld [vmem:[#allocation8 + $0x78c] ss:$16 sps:$4 sm:$0xff]  }
 0x5cb   : > { %9187 = vmatprep.subr.bf16.mxu1 %v12046_v39  ;;  %v12131_v39 = vld [vmem:[#allocation8 + $0x780] ss:$16 sps:$4 sm:$0xff]  }
 0x5cd   : > { %9024 = vmatpush1.bf16.msra.mxu0 %v12041_v52  ;;  %v12134_v52 = vld [vmem:[#allocation8 + $0x788] ss:$16 sps:$4 sm:$0xff]  }
 0x5ce   : > { %9188 = vmatpush1.bf16.msra.mxu1 %v12044_v18  ;;  %9025 = vmatprep.subr.bf16.mxu0 %v12049_v51  ;;  %v12139_v18 = vld [vmem:[#allocation8 + $0x7a4] ss:$16 sps:$4 sm:$0xff]   ;;  %v12142_v51 = vld [vmem:[#allocation8 + $0x7ac] ss:$16 sps:$4 sm:$0xff]  }
 0x5cf   : > { %9189 = vmatprep.subr.bf16.mxu1 %v12052_v5  ;;  %v12137_v5 = vld [vmem:[#allocation8 + $0x7a0] ss:$16 sps:$4 sm:$0xff]  }
 0x5d1   : > { %9026 = vmatpush1.bf16.msra.mxu0 %v12047_v43  ;;  %v12140_v43 = vld [vmem:[#allocation8 + $0x7a8] ss:$16 sps:$4 sm:$0xff]  }
 0x5d2   : > { %9190 = vmatpush1.bf16.msra.mxu1 %v12050_v57  ;;  %9027 = vmatprep.subr.bf16.mxu0 %v12055_v19  ;;  %v12145_v57 = vld [vmem:[#allocation8 + $0x7c4] ss:$16 sps:$4 sm:$0xff]   ;;  %v12148_v19 = vld [vmem:[#allocation8 + $0x7cc] ss:$16 sps:$4 sm:$0xff]  }
 0x5d3   : > { %9191 = vmatprep.subr.bf16.mxu1 %v12058_v11  ;;  %v12143_v11 = vld [vmem:[#allocation8 + $0x7c0] ss:$16 sps:$4 sm:$0xff]  }
 0x5d5   : > { %9028 = vmatpush1.bf16.msra.mxu0 %v12053_v3  ;;  %v12146_v3 = vld [vmem:[#allocation8 + $0x7c8] ss:$16 sps:$4 sm:$0xff]  }
 0x5d6   : > { %9192 = vmatpush1.bf16.msra.mxu1 %v12056_v22  ;;  %9038 = vmatprep.subr.bf16.mxu0 %v12061_v36  ;;  %v12151_v22 = vld [vmem:[#allocation8 + $0x7e4] ss:$16 sps:$4 sm:$0xff]   ;;  %v12154_v36 = vld [vmem:[#allocation8 + $0x7ec] ss:$16 sps:$4 sm:$0xff]  }
 0x5d7   : > { %9202 = vmatprep.subr.bf16.mxu1 %v12064_v2  ;;  %v12149_v2 = vld [vmem:[#allocation8 + $0x7e0] ss:$16 sps:$4 sm:$0xff]  }
 0x5d8   : > { %9030 = vmatmul.mubr.bf16.vlgmr.msra.gmra.mrb[64].mxu0 %v7623_v41 }
 0x5d9   : > { %9194 = vmatmul.mubr.bf16.vlgmr.msra.gmra.mrb[64].mxu1 %v7623_v41  ;;  %9039 = vmatpush1.bf16.msra.mxu0 %v12059_v56  ;;  %v12152_v56 = vld [vmem:[#allocation8 + $0x7e8] ss:$16 sps:$4 sm:$0xff]  }
 0x5da   : > { %9070 = vmatprep.mubr.bf16.mxu0 %v7626_v58  ;;  %9203 = vmatpush1.bf16.msra.mxu1 %v12062_v29  ;;  %v12155_v41 = vld [vmem:[#allocation11 + $0x40] sm:$0xff]  }
 0x5db   : > { %9234 = vmatprep.mubr.bf16.mxu1 %v7626_v58  ;;  %9040 = vmatprep.subr.bf16.mxu0 %v12067_v8  ;;  %v12156_v29 = vld [vmem:[#allocation11 + $0xc0] sm:$0xff]   ;;  %v7625_v58 = vpack.c.b16 %v15489_v38, %v15489_v38  ;;  %v12166_v38 = vld [vmem:[#allocation11 + $0x90] sm:$0xff]  }
 0x5dc   : > { %9204 = vmatprep.subr.bf16.mxu1 %v12070_v4  ;;  %v12157_v8 = vld [vmem:[#allocation11] sm:$0xff]  }
 0x5dd   : > { %9041 = vmatpush1.bf16.msra.mxu0 %v12065_v35  ;;  %v12158_v4 = vld [vmem:[#allocation11 + $0x80] sm:$0xff]   ;;  %v12159_v35 = vld [vmem:[#allocation11 + $0x48] sm:$0xff]  }
 0x5de   : > { %9205 = vmatpush1.bf16.msra.mxu1 %v12068_v31  ;;  %9042 = vmatprep.subr.bf16.mxu0 %v12073_v45  ;;  %v12160_v31 = vld [vmem:[#allocation11 + $0xc8] sm:$0xff]  }
 0x5df   : > { %9206 = vmatprep.subr.bf16.mxu1 %v12076_v20  ;;  %v12161_v45 = vld [vmem:[#allocation11 + $0x8] sm:$0xff]  }
 0x5e0   : > { %v12162_v20 = vld [vmem:[#allocation11 + $0x88] sm:$0xff]  }
 0x5e1   : > { %9043 = vmatpush1.bf16.msra.mxu0 %v12071_v16  ;;  %v12163_v16 = vld [vmem:[#allocation11 + $0x50] sm:$0xff]  }
 0x5e2   : > { %9207 = vmatpush1.bf16.msra.mxu1 %v12074_v12  ;;  %9044 = vmatprep.subr.bf16.mxu0 %v12079_v10  ;;  %v12164_v12 = vld [vmem:[#allocation11 + $0xd0] sm:$0xff]  }
 0x5e3   : > { %9208 = vmatprep.subr.bf16.mxu1 %v12082_v60  ;;  %v12165_v10 = vld [vmem:[#allocation11 + $0x10] sm:$0xff]   ;;  %v12167_v60 = vld [vmem:[#allocation11 + $0x58] sm:$0xff]  }
 0x5e5   : > { %9045 = vmatpush1.bf16.msra.mxu0 %v12077_v13  ;;  %v12168_v13 = vld [vmem:[#allocation11 + $0xd8] sm:$0xff]  }
 0x5e6   : > { %9209 = vmatpush1.bf16.msra.mxu1 %v12080_v37  ;;  %9046 = vmatprep.subr.bf16.mxu0 %v12085_v63  ;;  %v12169_v37 = vld [vmem:[#allocation11 + $0x18] sm:$0xff]  }
 0x5e7   : > { %9210 = vmatprep.subr.bf16.mxu1 %v12088_v54  ;;  %v12170_v63 = vld [vmem:[#allocation11 + $0x98] sm:$0xff]   ;;  %v12171_v54 = vld [vmem:[#allocation11 + $0x60] sm:$0xff]  }
 0x5e9   : > { %9047 = vmatpush1.bf16.msra.mxu0 %v12083_v61  ;;  %v12172_v61 = vld [vmem:[#allocation11 + $0xe0] sm:$0xff]  }
 0x5ea   : > { %9211 = vmatpush1.bf16.msra.mxu1 %v12086_v46  ;;  %9048 = vmatprep.subr.bf16.mxu0 %v12091_v23  ;;  %v12173_v46 = vld [vmem:[#allocation11 + $0x20] sm:$0xff]  }
 0x5eb   : > { %9212 = vmatprep.subr.bf16.mxu1 %v12094_v42  ;;  %v12174_v23 = vld [vmem:[#allocation11 + $0xa0] sm:$0xff]   ;;  %v12175_v42 = vld [vmem:[#allocation11 + $0x68] sm:$0xff]  }
 0x5ed   : > { %9049 = vmatpush1.bf16.msra.mxu0 %v12089_v7  ;;  %v12176_v7 = vld [vmem:[#allocation11 + $0xe8] sm:$0xff]  }
 0x5ee   : > { %9213 = vmatpush1.bf16.msra.mxu1 %v12092_v48  ;;  %9050 = vmatprep.subr.bf16.mxu0 %v12097_v34  ;;  %v12177_v48 = vld [vmem:[#allocation11 + $0x28] sm:$0xff]  }
 0x5ef   : > { %9214 = vmatprep.subr.bf16.mxu1 %v12100_v15  ;;  %v12178_v34 = vld [vmem:[#allocation11 + $0xa8] sm:$0xff]   ;;  %v12179_v15 = vld [vmem:[#allocation11 + $0x70] sm:$0xff]  }
 0x5f1   : > { %9051 = vmatpush1.bf16.msra.mxu0 %v12095_v30  ;;  %v12180_v30 = vld [vmem:[#allocation11 + $0xf0] sm:$0xff]  }
 0x5f2   : > { %9215 = vmatpush1.bf16.msra.mxu1 %v12098_v62  ;;  %9052 = vmatprep.subr.bf16.mxu0 %v12103_v1  ;;  %v12181_v62 = vld [vmem:[#allocation11 + $0x30] sm:$0xff]  }
 0x5f3   : > { %9216 = vmatprep.subr.bf16.mxu1 %v12106_v24  ;;  %v12182_v1 = vld [vmem:[#allocation11 + $0xb0] sm:$0xff]   ;;  %v12183_v24 = vld [vmem:[#allocation11 + $0x78] sm:$0xff]  }
 0x5f5   : > { %9053 = vmatpush1.bf16.msra.mxu0 %v12101_v14  ;;  %v12184_v14 = vld [vmem:[#allocation11 + $0xf8] sm:$0xff]  }
 0x5f6   : > { %9217 = vmatpush1.bf16.msra.mxu1 %v12104_v44  ;;  %9054 = vmatprep.subr.bf16.mxu0 %v12109_v25  ;;  %v12185_v44 = vld [vmem:[#allocation11 + $0x38] sm:$0xff]  }
 0x5f7   : > { %9218 = vmatprep.subr.bf16.mxu1 %v12112_v6  ;;  %v12186_v25 = vld [vmem:[#allocation11 + $0xb8] sm:$0xff]  }
 0x5f8   : > { %v7350_v6 = vld [vmem:[#allocation10] sm:$0xf] }
 0x5f9   : > { %9055 = vmatpush1.bf16.msra.mxu0 %v12107_v27  ;;  %v15765_v27 = vld [vmem:[#allocation25_spill] sm:$0xff] }
 0x5fa   : > { %9219 = vmatpush1.bf16.msra.mxu1 %v12110_v55  ;;  %9056 = vmatprep.subr.bf16.mxu0 %v12115_v32  ;;  %v7355_v55 = vrot.slane %v7350_v6, %v15765_v27  ;;  %v15766_v32 = vld [vmem:[#allocation26_spill] sm:$0xff] }
 0x5fb   : > { %9220 = vmatprep.subr.bf16.mxu1 %v12118_v50  ;;  %v7363_v50 = vrot.slane %v7350_v6, %v15766_v32 }
 0x5fd   : > { %9057 = vmatpush1.bf16.msra.mxu0 %v12113_v0  ;;  %v15767_v0 = vld [vmem:[#allocation27_spill] sm:$0xff] }
 0x5fe   : > { %9221 = vmatpush1.bf16.msra.mxu1 %v12116_v21  ;;  %9058 = vmatprep.subr.bf16.mxu0 %v12121_v40  ;;  %v7359_v21 = vrot.slane %v7350_v6, %v15767_v0  ;;  %v15768_v40 = vld [vmem:[#allocation28_spill] sm:$0xff] }
 0x5ff   : > { %9222 = vmatprep.subr.bf16.mxu1 %v12124_v26  ;;  %v7367_v26 = vrot.slane %v7350_v6, %v15768_v40 }
 0x601   : > { %9059 = vmatpush1.bf16.msra.mxu0 %v12119_v49 }
 0x602   : > { %9223 = vmatpush1.bf16.msra.mxu1 %v12122_v53  ;;  %9060 = vmatprep.subr.bf16.mxu0 %v12127_v17 }
 0x603   : > { %9224 = vmatprep.subr.bf16.mxu1 %v12130_v47 }
 0x605   : > { %9061 = vmatpush1.bf16.msra.mxu0 %v12125_v33 }
 0x606   : > { %9225 = vmatpush1.bf16.msra.mxu1 %v12128_v28  ;;  %9062 = vmatprep.subr.bf16.mxu0 %v12133_v9 }
 0x607   : > { %9226 = vmatprep.subr.bf16.mxu1 %v12136_v59 }
 0x609   : > { %9063 = vmatpush1.bf16.msra.mxu0 %v12131_v39 }
 0x60a   : > { %9227 = vmatpush1.bf16.msra.mxu1 %v12134_v52  ;;  %9064 = vmatprep.subr.bf16.mxu0 %v12139_v18 }
 0x60b   : > { %9228 = vmatprep.subr.bf16.mxu1 %v12142_v51 }
 0x60d   : > { %9065 = vmatpush1.bf16.msra.mxu0 %v12137_v5 }
 0x60e   : > { %9229 = vmatpush1.bf16.msra.mxu1 %v12140_v43  ;;  %9066 = vmatprep.subr.bf16.mxu0 %v12145_v57 }
 0x60f   : > { %9230 = vmatprep.subr.bf16.mxu1 %v12148_v19 }
 0x611   : > { %9067 = vmatpush1.bf16.msra.mxu0 %v12143_v11 }
 0x612   : > { %9231 = vmatpush1.bf16.msra.mxu1 %v12146_v3  ;;  %9068 = vmatprep.subr.bf16.mxu0 %v12151_v22 }
 0x613   : > { %9232 = vmatprep.subr.bf16.mxu1 %v12154_v36 }
 0x615   : > { %9069 = vmatpush1.bf16.msra.mxu0 %v12149_v2 }
 0x616   : > { %9233 = vmatpush1.bf16.msra.mxu1 %v12152_v56  ;;  %10544 = vmatprep.subr.bf16.mxu0 %v12155_v41  ;;  %v10506_v41 = vld [vmem:[#allocation13] ss:$0 sm:$0xff] }
 0x617   : > { %10566 = vmatprep.subr.bf16.mxu1 %v12156_v29 }
 0x618   : > { %9071 = vmatmul.mubr.bf16.vlgmr.msra.gmra.mrb[64].mxu0 %v7625_v58 }
 0x619   : > { %9235 = vmatmul.mubr.bf16.vlgmr.msra.gmra.mrb[64].mxu1 %v7625_v58  ;;  %10545 = vmatpush3.bf16.msra.mxu0 %v12157_v8 }
 0x61a   : > { %10567 = vmatpush3.bf16.msra.mxu1 %v12158_v4  ;;  %10546 = vmatprep.subr.bf16.mxu0 %v12159_v35 }
 0x61b   : > { %10568 = vmatprep.subr.bf16.mxu1 %v12160_v31 }
 0x61d   : > { %10547 = vmatpush3.bf16.msra.mxu0 %v12161_v45 }
 0x61e   : > { %10569 = vmatpush3.bf16.msra.mxu1 %v12162_v20  ;;  %10548 = vmatprep.subr.bf16.mxu0 %v12163_v16 }
 0x61f   : > { %10570 = vmatprep.subr.bf16.mxu1 %v12164_v12 }
 0x621   : > { %10549 = vmatpush3.bf16.msra.mxu0 %v12165_v10 }
 0x622   : > { %10571 = vmatpush3.bf16.msra.mxu1 %v12166_v38  ;;  %10550 = vmatprep.subr.bf16.mxu0 %v12167_v60 }
 0x623   : > { %10572 = vmatprep.subr.bf16.mxu1 %v12168_v13 }
 0x625   : > { %10551 = vmatpush3.bf16.msra.mxu0 %v12169_v37 }
 0x626   : > { %10573 = vmatpush3.bf16.msra.mxu1 %v12170_v63  ;;  %10552 = vmatprep.subr.bf16.mxu0 %v12171_v54 }
 0x627   : > { %10574 = vmatprep.subr.bf16.mxu1 %v12172_v61 }
 0x629   : > { %10553 = vmatpush3.bf16.msra.mxu0 %v12173_v46 }
 0x62a   : > { %10575 = vmatpush3.bf16.msra.mxu1 %v12174_v23  ;;  %10554 = vmatprep.subr.bf16.mxu0 %v12175_v42 }
 0x62b   : > { %10576 = vmatprep.subr.bf16.mxu1 %v12176_v7 }
 0x62d   : > { %10555 = vmatpush3.bf16.msra.mxu0 %v12177_v48 }
 0x62e   : > { %10577 = vmatpush3.bf16.msra.mxu1 %v12178_v34  ;;  %10556 = vmatprep.subr.bf16.mxu0 %v12179_v15 }
 0x62f   : > { %10578 = vmatprep.subr.bf16.mxu1 %v12180_v30 }
 0x631   : > { %10557 = vmatpush3.bf16.msra.mxu0 %v12181_v62 }
 0x632   : > { %10579 = vmatpush3.bf16.msra.mxu1 %v12182_v1  ;;  %10558 = vmatprep.subr.bf16.mxu0 %v12183_v24 }
 0x633   : > { %10580 = vmatprep.subr.bf16.mxu1 %v12184_v14 }
 0x635   : > { %10559 = vmatpush3.bf16.msra.mxu0 %v12185_v44 }
 0x636   : > { %10581 = vmatpush3.bf16.msra.mxu1 %v12186_v25 }
 0x6eb   : > { %v9072_v49 = vpop.f32.mrb[64].mxu0 }
 0x6ec   : > { %v10588_v53 = vadd.f32 %v9072_v49, %v7355_v55  ;;  %v9236_v17 = vpop.f32.mrb[64].mxu1  ;;  %v9074_v47 = vpop.f32.mrb[65].mxu0 }
 0x6ed   : > { %v10590_v33 = vadd.f32 %v9236_v17, %v7363_v50  ;;  %v10589_v28 = vadd.f32 %v9074_v47, %v7359_v21  ;;  %v9238_v9 = vpop.f32.mrb[65].mxu1  ;;  %v9076_v59 = vpop.f32.mrb[66].mxu0 }
 0x6ee   : > { %v9243_v39 = vmax.f32 %v10588_v53, 0.0  ;;  %v10591_v52 = vadd.f32 %v9238_v9, %v7367_v26  ;;  %v9240_v18 = vpop.f32.mrb[66].mxu1  ;;  %v9077_v51 = vpop.f32.mrb[67].mxu0 }
 0x6ef   : > { %v9245_v5 = vmax.f32 %v10590_v33, 0.0  ;;  %v9244_v43 = vmax.f32 %v10589_v28, 0.0  ;;  %v9241_v57 = vpop.f32.mrb[67].mxu1 }
 0x6f0   : > { %v9246_v19 = vmax.f32 %v10591_v52, 0.0  ;;  %v9247_v3 = vpack.c.bf16 %v9243_v39, %v9243_v39 }
 0x6f1   : > { %v9248_v11 = vpack.c.bf16 %v9244_v43, %v9244_v43  ;;  %v9249_v36 = vpack.c.bf16 %v9245_v5, %v9245_v5 }
 0x6f2   : > { %v9250_v22 = vpack.c.bf16 %v9246_v19, %v9246_v19 }
 0x6f3   : > { %9546 = vmatprep.mubr.bf16.mxu0 %v9248_v11 }
 0x6f4   : > { %9586 = vmatprep.mubr.bf16.mxu1 %v9250_v22  ;;  %9547 = vmatmul.mubr.bf16.vlgmr.msra.gmra.mrb[68].mxu0 %v9247_v3 }
 0x6f5   : > { %9587 = vmatmul.mubr.bf16.vlgmr.msra.gmra.mrb[68].mxu1 %v9249_v36 }
 0x7c7   : > { %v10560_v2 = vpop.f32.mrb[68].mxu0 }
 0x7c8   : > { %v10582_v56 = vpop.f32.mrb[68].mxu1  ;;  %v10561_v29 = vpop.f32.mrb[69].mxu0 }
 0x7c9   : > { %v10562_v8 = vadd.f32 %v10561_v29, %v10560_v2  ;;  %v10583_v58 = vpop.f32.mrb[69].mxu1  ;;  %v10563_v4 = vpop.f32.mrb[70].mxu0 }
 0x7ca   : > { %v10584_v35 = vadd.f32 %v10583_v58, %v10582_v56  ;;  %v10585_v31 = vpop.f32.mrb[70].mxu1  ;;  %v10564_v45 = vpop.f32.mrb[71].mxu0 }
 0x7cb   : > { %v9549_v20 = vadd.f32 %v10562_v8, %v10506_v41  ;;  %v10586_v16 = vpop.f32.mrb[71].mxu1 }
 0x7cd   : > { %v9589_v12 = vadd.f32 %v10584_v35, %v9549_v20 }
 0x7cf   : > { %9594 = vmax.xlane.f32.xlu0 %v9589_v12 }
 0x85c   : > { %v9595_v10 = vpop.xlane.xlu0 %9594 }
 0x85d   : > { %v9596_v38 = vsub.f32 %v9589_v12, %v9595_v10 }
 0x85f   : > { %v9597_v60 = vmul.f32 1.442695, %v9596_v38 }
 0x861   : > { %12187 = vpow2.f32 %v9597_v60 }
 0x86b   : > { %v12188_v13 = vpop.eup %12187 }
 0x86c   : > { %9599 = vadd.xlane.f32.xlu0 %v12188_v13 }
 0x8f9   : > { %v9600_v37 = vpop.xlane.xlu0 %9599 }
 0x8fa   : > { %12189 = vlog2.f32 %v9600_v37 }
 0x904   : > { %v12190_v63 = vpop.eup %12189 }
 0x905   : > { %v9602_v54 = vmul.f32 0.6931472, %v12190_v63 }
 0x907   : > { %v9603_v61 = vadd.f32 %v9602_v54, %v9595_v10 }
 0x909   : > { %v9604_v46 = vsub.f32 %v9589_v12, %v9603_v61 }
 0x90b   : > { %9605 = vst [vmem:[%s422_s26] sm:$0xff] %v9604_v46 }
 0x90c   : > { %12440 = shalt.err (!%p12437_p2)
}
 0x90d   : > { %s12441_s15 = scalar_lea.hbm %s15510_s24, 128  ;;  %s12445_s28 = scalar_lea.hbm %s15561_s9, 256 }
 0x90e   : > { %p12442_p3 = scmp.ne.s32.totalorder %s15510_s24, %s12441_s15  ;;  %p12446_p7 = scmp.lt.u32.totalorder %s15510_s24, %s15561_s9 }
 0x90f   : > { %p12447_p8 = scmp.lt.u32.totalorder %s12445_s28, %s12441_s15  ;;  %p12449_p13 = scmp.lt.u32.totalorder %s12441_s15, %s15510_s24 }
 0x910   : > { %p12443_p4 = pnand %p12442_p3, %p15769_p1 }
 0x911   : > { %p12448_p11 = por %p12447_p8, %p12446_p7 }
 0x912   : > { %p12444_p12 = pneg %p12443_p4 }
 0x913   : > { %p12450_p6 = por %p12449_p13, %p12448_p11 }
 0x915   : > { %p12451_p9 = pnand %p12450_p6, %p12444_p12 }
 0x917   : > { %12454 = shalt.err (!%p12451_p9)
}
 0x918   : > { %10964 = dma.vmem_to_hbm [thread:$0]  (%p15769_p1), %s15512_s11, 128, %s15510_s24, %s9607_s20  }
 0x919 PF: > { %s15770_s5 = sld [smem:[#allocation20_spill]]  ;;  %s15771_s30 = sld [smem:[#allocation24_spill]] }
 0x91a   : > { %p11006_p5 = scmp.ge.s32.totalorder %s12505_s12, 2 }
 0x91f   : > { %s9632_s16 = sand.u32 1, %s15770_s5   ;;  %p15772_p10 = scmp.ne.s32.totalorder %s15771_s30, 0 }
 0x920   : > { %s9633_s23 = scalar_lea.sflag [#allocation4], %s9632_s16 }
 0x921   : > { %p10989_p0 = pnand %p11006_p5, %p15772_p10 }
 0x923   : > { %12488 = dma.done.wait (!%p10989_p0), %s9633_s23, 128  }
 0x924   : > { %12490 = vsyncadd (!%p10989_p0), %s9633_s23, 4294967168  ;;  %s15773_s12 = sld [smem:[#allocation22_spill]]  ;;  %s15774_s26 = sld [smem:[#allocation21_spill]] }
 0x925   : > { %s15775_s11 = sld [smem:[#allocation23_spill]]  ;;  %s15776_s30 = smov %s12497_s10 }
 0x92a   : > { %p23_p2 = scmp.ge.s32.totalorder %s15773_s12, 4   ;;  %s15777_s10 = smov %s15774_s26 }
 0x92c   :  { %25 = sbr.rel (!%p23_p2) target bundleno = 10 (0xa), region = 120 }
 0x933   :  { %9638 = vsyncpa [#allocation3], 1 }
 0x934   :  { %9640 = vsyncpa [#allocation3 + $0x1], 1 }
 0x935   :  { %9641 = vsyncpa [#allocation6], 1 }
 0x936   :  { %9642 = vsyncpa [#allocation9], 1 }
 0x937   :  { %9643 = vsyncpa [#allocation12], 1 }
 0x938   :  { %9644 = vsyncpa [#allocation4], 1 }
 0x939   :  { %9646 = vsyncpa [#allocation4 + $0x1], 1 }

</bundles_post_ra>
